<compile_context>
chip_gen: v5e
topology: v5e:2x2
jax: 0.10.0
libtpu: 0.0.40
codegen_flags: <defaults>
</compile_context>

<pallas_src>
import functools

import jax
import jax.numpy as jnp
from jax.experimental import pallas as pl
from jax.experimental.pallas import tpu as pltpu


_NEG = float(jnp.finfo(jnp.float32).min)   # safe pool-pad value: center tap is always real
_VMEM_LIMIT = 64 * 1024 * 1024             # headroom over 16/32 MiB scoped defaults at real sizes


def _compiler_params():
    return pltpu.CompilerParams(
        dimension_semantics=("parallel", "arbitrary"),   # (batch, Cout-tile)
        vmem_limit_bytes=_VMEM_LIMIT)


def _cout_tile(cout):
    """Lane-dense Cout tile (<=512) at real Xception sizes; whole Cout at toy sizes."""
    if cout <= 512:
        return cout
    for t in (512, 256, 128):
        if cout % t == 0:
            return t
    return cout


# ----------------------------------------------------------------------------- kernel helpers
def _depthwise3x3_to_scratch(x, dw_ref, xp_ref, acc_ref, H, W):
    """x (H, W, Cin) f32 -> zero-padded VMEM scratch -> 3x3 depthwise -> acc scratch (bf16).

    Padding is done entirely in VMEM (no HBM jnp.pad glue).
    """
    cin = x.shape[-1]
    xp_ref[...] = jnp.zeros(xp_ref.shape, jnp.float32)
    xp_ref[1:H + 1, 1:W + 1, :] = x
    xp = xp_ref[...]
    acc = jnp.zeros((H, W, cin), jnp.float32)
    # TODO(synk): the dx taps are sublane-misaligned slices; pltpu.roll on the XLU could
    #             shave the relayout cost, kept as plain slices for robustness.
    for dy in range(3):
        for dx in range(3):
            w = dw_ref[dy:dy + 1, dx:dx + 1, :].astype(jnp.float32)       # (1, 1, Cin)
            acc = acc + xp[dy:dy + H, dx:dx + W, :] * w
    acc_ref[...] = acc.reshape(H * W, cin).astype(acc_ref.dtype)          # bf16 MXU operand


# ----------------------------------------------------------------------------- kernels
def _sepconv_bn_kernel(x_ref, dw_ref, pw_ref, b_ref, o_ref, xp_ref, acc_ref,
                       *, relu_in, relu_out, H, W):
    """[ReLU] -> depthwise 3x3 (pad=1) -> pointwise (BN-folded) -> bias -> [ReLU]."""
    jc = pl.program_id(1)

    @pl.when(jc == 0)
    def _prep():                                   # once per batch element, reused per Cout tile
        x = x_ref[0].astype(jnp.float32)
        if relu_in:
            x = jnp.maximum(x, 0.0)
        _depthwise3x3_to_scratch(x, dw_ref, xp_ref, acc_ref, H, W)

    ct = pw_ref.shape[-1]
    y = jnp.dot(acc_ref[...], pw_ref[...], preferred_element_type=jnp.float32)
    y = y + b_ref[...]                             # BN scale folded into pw; bias only
    if relu_out:
        y = jnp.maximum(y, 0.0)
    o_ref[0] = y.reshape(H, W, ct).astype(o_ref.dtype)


def _block1_tail_kernel(t_ref, x_ref, dw_ref, pw_ref, b_ref, wsc_ref, bsc_ref, o_ref,
                        xp_ref, acc_ref, xs_ref, yp_ref, *, H, W):
    """Fused: ReLU(t) -> SepConv -> BN -> MaxPool(3,s2,p1)  +  Conv1x1(s2)(relu(x)) -> BN."""
    jc = pl.program_id(1)
    Ho, Wo = (H + 1) // 2, (W + 1) // 2

    @pl.when(jc == 0)
    def _prep():
        # residual branch: ReLU (inplace in PyTorch) -> depthwise accumulator
        t = jnp.maximum(t_ref[0].astype(jnp.float32), 0.0)
        _depthwise3x3_to_scratch(t, dw_ref, xp_ref, acc_ref, H, W)
        # shortcut branch: relu(x) (x was mutated in place) -> stride-2 subsample in VMEM
        xs = x_ref[:, pl.ds(0, Ho, stride=2), pl.ds(0, Wo, stride=2), :].astype(jnp.float32)
        xs = jnp.maximum(xs, 0.0)
        xs_ref[...] = xs.reshape(Ho * Wo, xs.shape[-1]).astype(xs_ref.dtype)

    ct = pw_ref.shape[-1]
    # residual: pointwise + folded-BN bias at full resolution
    y = jnp.dot(acc_ref[...], pw_ref[...], preferred_element_type=jnp.float32) + b_ref[...]
    # 3x3 / stride-2 / pad-1 max-pool, entirely in VMEM (padded scratch + strided reads)
    yp_ref[...] = jnp.full(yp_ref.shape, _NEG, jnp.float32)
    yp_ref[1:H + 1, 1:W + 1, :] = y.reshape(H, W, ct)
    m = yp_ref[pl.ds(0, Ho, stride=2), pl.ds(0, Wo, stride=2), :]
    for ky in range(3):
        for kx in range(3):
            if ky == 0 and kx == 0:
                continue
            m = jnp.maximum(m, yp_ref[pl.ds(ky, Ho, stride=2), pl.ds(kx, Wo, stride=2), :])
    # shortcut: 1x1 conv (stride handled by the subsample above) + folded-BN bias, then add
    s = jnp.dot(xs_ref[...], wsc_ref[...], preferred_element_type=jnp.float32) + bsc_ref[...]
    o_ref[0] = (m + s.reshape(Ho, Wo, ct)).astype(o_ref.dtype)


def _sepconv_bn_gap_kernel(x_ref, dw_ref, pw_ref, b_ref, o_ref, xp_ref, acc_ref, *, H, W):
    """SepConv -> BN -> ReLU -> global average pool, fused (no HBM round trip for u)."""
    jc = pl.program_id(1)

    @pl.when(jc == 0)
    def _prep():
        _depthwise3x3_to_scratch(x_ref[0].astype(jnp.float32), dw_ref, xp_ref, acc_ref, H, W)

    y = jnp.dot(acc_ref[...], pw_ref[...], preferred_element_type=jnp.float32) + b_ref[...]
    y = jnp.maximum(y, 0.0)
    g = jnp.sum(y, axis=0, keepdims=True) * (1.0 / float(H * W))     # (1, ct)
    o_ref[0] = g.astype(o_ref.dtype)


# ----------------------------------------------------------------------------- wrappers
def sepconv_bn(x, dw, pw, bias, *, relu_in, relu_out):
    N, H, W, Cin = x.shape
    Cout = pw.shape[1]
    ct = _cout_tile(Cout)
    kern = functools.partial(_sepconv_bn_kernel, relu_in=relu_in, relu_out=relu_out, H=H, W=W)
    cost = pl.CostEstimate(flops=2 * N * H * W * Cin * (9 + Cout), transcendentals=0,
                           bytes_accessed=4 * N * H * W * (Cin + Cout) + 2 * Cin * Cout)
    return pl.pallas_call(
        kern,
        out_shape=jax.ShapeDtypeStruct((N, H, W, Cout), x.dtype),
        grid=(N, Cout // ct),
        in_specs=[
            pl.BlockSpec((1, H, W, Cin), lambda n, c: (n, 0, 0, 0)),
            pl.BlockSpec((3, 3, Cin), lambda n, c: (0, 0, 0)),
            pl.BlockSpec((Cin, ct), lambda n, c: (0, c)),
            pl.BlockSpec((1, ct), lambda n, c: (0, c)),
        ],
        out_specs=pl.BlockSpec((1, H, W, ct), lambda n, c: (n, 0, 0, c)),
        scratch_shapes=[pltpu.VMEM((H + 2, W + 2, Cin), jnp.float32),
                        pltpu.VMEM((H * W, Cin), jnp.bfloat16)],
        compiler_params=_compiler_params(),
        cost_estimate=cost,
    )(x, dw, pw, bias)


def block1_fused(t, x, dw, pw, b, wsc, bsc):
    N, H, W, C0 = t.shape
    C1 = pw.shape[1]
    Ho, Wo = (H + 1) // 2, (W + 1) // 2
    ct = _cout_tile(C1)
    kern = functools.partial(_block1_tail_kernel, H=H, W=W)
    cost = pl.CostEstimate(flops=2 * N * C0 * (H * W * (9 + C1) + Ho * Wo * C1),
                           transcendentals=0,
                           bytes_accessed=8 * N * H * W * C0 + 4 * N * Ho * Wo * C1 + 4 * C0 * C1)
    return pl.pallas_call(
        kern,
        out_shape=jax.ShapeDtypeStruct((N, Ho, Wo, C1), t.dtype),
        grid=(N, C1 // ct),
        in_specs=[
            pl.BlockSpec((1, H, W, C0), lambda n, c: (n, 0, 0, 0)),   # t (residual input)
            pl.BlockSpec((1, H, W, C0), lambda n, c: (n, 0, 0, 0)),   # x (shortcut input)
            pl.BlockSpec((3, 3, C0), lambda n, c: (0, 0, 0)),
            pl.BlockSpec((C0, ct), lambda n, c: (0, c)),
            pl.BlockSpec((1, ct), lambda n, c: (0, c)),
            pl.BlockSpec((C0, ct), lambda n, c: (0, c)),
            pl.BlockSpec((1, ct), lambda n, c: (0, c)),
        ],
        out_specs=pl.BlockSpec((1, Ho, Wo, ct), lambda n, c: (n, 0, 0, c)),
        scratch_shapes=[pltpu.VMEM((H + 2, W + 2, C0), jnp.float32),
                        pltpu.VMEM((H * W, C0), jnp.bfloat16),
                        pltpu.VMEM((Ho * Wo, C0), jnp.bfloat16),
                        pltpu.VMEM((H + 2, W + 2, ct), jnp.float32)],
        compiler_params=_compiler_params(),
        cost_estimate=cost,
    )(t, x, dw, pw, b, wsc, bsc)


def sepconv_bn_gap(x, dw, pw, bias):
    N, H, W, Cin = x.shape
    Cout = pw.shape[1]
    ct = _cout_tile(Cout)
    kern = functools.partial(_sepconv_bn_gap_kernel, H=H, W=W)
    cost = pl.CostEstimate(flops=2 * N * H * W * Cin * (9 + Cout), transcendentals=0,
                           bytes_accessed=4 * N * H * W * Cin + 4 * N * Cout + 2 * Cin * Cout)
    return pl.pallas_call(
        kern,
        out_shape=jax.ShapeDtypeStruct((N, 1, Cout), x.dtype),
        grid=(N, Cout // ct),
        in_specs=[
            pl.BlockSpec((1, H, W, Cin), lambda n, c: (n, 0, 0, 0)),
            pl.BlockSpec((3, 3, Cin), lambda n, c: (0, 0, 0)),
            pl.BlockSpec((Cin, ct), lambda n, c: (0, c)),
            pl.BlockSpec((1, ct), lambda n, c: (0, c)),
        ],
        out_specs=pl.BlockSpec((1, 1, ct), lambda n, c: (n, 0, c)),
        scratch_shapes=[pltpu.VMEM((H + 2, W + 2, Cin), jnp.float32),
                        pltpu.VMEM((H * W, Cin), jnp.bfloat16)],
        compiler_params=_compiler_params(),
        cost_estimate=cost,
    )(x, dw, pw, bias)


# ----------------------------------------------------------------------------- model
def exit_flow_forward(x_nchw, p):
    """Forward pass of ExitFlow. Input NCHW (like PyTorch), output (N, C3, 1, 1)."""
    x = jnp.transpose(x_nchw, (0, 2, 3, 1))                   # NCHW -> NHWC

    # block_1_residual, first half (first inplace ReLU folded as relu_in)
    t = sepconv_bn(x, p["dw1"], p["pw1"], p["b1"], relu_in=True, relu_out=False)
    # block_1: second SepConv+BN+MaxPool of the residual fused with the Conv1x1+BN
    # shortcut (which sees relu(x) due to the inplace ReLU) and the residual add.
    r = block1_fused(t, x, p["dw2"], p["pw2"], p["b2"], p["w_sc"], p["b_sc"])

    # block_2
    u = sepconv_bn(r, p["dw3"], p["pw3"], p["b3"], relu_in=False, relu_out=True)
    g = sepconv_bn_gap(u, p["dw4"], p["pw4"], p["b4"])         # (N, 1, C3), GAP fused

    return jnp.transpose(g, (0, 2, 1))[..., None]              # (N, C3, 1, 1) like PyTorch


def init_params(key, c0, c1, c2, c3):
    ks = iter(jax.random.split(key, 24))

    def conv_w(shape, fan_in):
        return jax.random.normal(next(ks), shape, jnp.float32) / jnp.sqrt(float(fan_in))

    def bn(c):
        gamma = 1.0 + 0.1 * jax.random.normal(next(ks), (c,), jnp.float32)
        beta = 0.1 * jax.random.normal(next(ks), (c,), jnp.float32)
        return gamma, beta

    def fold(pw, gamma, beta, eps=1e-5):
        # TODO(synk): folded with freshly-initialized running stats (mean=0, var=1).
        scale = gamma / jnp.sqrt(1.0 + eps)
        pw_folded = (pw * scale[None, :]).astype(jnp.bfloat16)        # bf16 MXU weights
        return pw_folded, beta.reshape(1, -1).astype(jnp.float32)

    p = {}
    p["dw1"] = conv_w((3, 3, c0), 9)
    g, b = bn(c0); p["pw1"], p["b1"] = fold(conv_w((c0, c0), c0), g, b)
    p["dw2"] = conv_w((3, 3, c0), 9)
    g, b = bn(c1); p["pw2"], p["b2"] = fold(conv_w((c0, c1), c0), g, b)
    g, b = bn(c1); p["w_sc"], p["b_sc"] = fold(conv_w((c0, c1), c0), g, b)
    p["dw3"] = conv_w((3, 3, c1), 9)
    g, b = bn(c2); p["pw3"], p["b3"] = fold(conv_w((c1, c2), c1), g, b)
    p["dw4"] = conv_w((3, 3, c2), 9)
    g, b = bn(c3); p["pw4"], p["b4"] = fold(conv_w((c2, c3), c2), g, b)
    return p


if __name__ == "__main__":
    key = jax.random.PRNGKey(0)
    # Small, demo-sized stand-ins for the Xception channel counts (728, 1024, 1536, 2048).
    N, H, W = 2, 16, 16
    C0, C1, C2, C3 = 16, 32, 48, 64

    kx, kp = jax.random.split(key)
    x = jax.random.normal(kx, (N, C0, H, W), jnp.float32)      # NCHW input, as in PyTorch
    params = init_params(kp, C0, C1, C2, C3)

    fwd = jax.jit(exit_flow_forward)
    out = jax.block_until_ready(fwd(x, params))

    assert out.shape == (N, C3, 1, 1), out.shape
    assert bool(jnp.all(jnp.isfinite(out)))
    print("KERNEL_OK")
</pallas_src>

<mosaic_0001>
module attributes {stable_mosaic.version = 11 : i64} {
  func.func @_sepconv_bn_kernel(%arg0: i32, %arg1: i32, %arg2: memref<1x8x8x32xf32, #tpu.memory_space<vmem>>, %arg3: memref<3x3x32xf32, #tpu.memory_space<vmem>>, %arg4: memref<32x48xbf16, #tpu.memory_space<vmem>>, %arg5: memref<1x48xf32, #tpu.memory_space<vmem>>, %arg6: memref<1x8x8x48xf32, #tpu.memory_space<vmem>>, %arg7: memref<10x10x32xf32, #tpu.memory_space<vmem>>, %arg8: memref<64x32xbf16, #tpu.memory_space<vmem>>) attributes {dimension_semantics = [#tpu.dimension_semantics<parallel>, #tpu.dimension_semantics<arbitrary>], iteration_bounds = array<i64: 2, 1>, scalar_prefetch = 0 : i64, scratch_operands = 2 : i64, tpu.core_type = #tpu.core_type<tc>, window_params = [{transform_indices = @transform_0, window_bounds = array<i64: 1, 8, 8, 32>}, {pipeline_mode = #tpu.pipeline_mode<synchronous>, transform_indices = @transform_1, window_bounds = array<i64: 3, 3, 32>}, {transform_indices = @transform_2, window_bounds = array<i64: 32, 48>}, {transform_indices = @transform_3, window_bounds = array<i64: 1, 48>}, {transform_indices = @transform_4, window_bounds = array<i64: 1, 8, 8, 48>}]} {
    %c0_i32 = arith.constant 0 : i32
    %0 = arith.cmpi eq, %arg1, %c0_i32 : i32
    %1 = arith.extui %0 : i1 to i32
    %c0_i32_0 = arith.constant 0 : i32
    %2 = arith.cmpi ne, %1, %c0_i32_0 : i32
    scf.if %2 {
      %c0_11 = arith.constant 0 : index
      %c0_12 = arith.constant 0 : index
      %c0_13 = arith.constant 0 : index
      %c0_14 = arith.constant 0 : index
      %15 = vector.load %arg2[%c0_11, %c0_12, %c0_13, %c0_14] : memref<1x8x8x32xf32, #tpu.memory_space<vmem>>, vector<1x8x8x32xf32>
      %16 = vector.shape_cast %15 : vector<1x8x8x32xf32> to vector<8x8x32xf32>
      %cst_15 = arith.constant 0.000000e+00 : f32
      %17 = vector.broadcast %cst_15 : f32 to vector<10x10x32xf32>
      %c0_16 = arith.constant 0 : index
      %c0_17 = arith.constant 0 : index
      %c0_18 = arith.constant 0 : index
      %18 = vector.load %arg7[%c0_16, %c0_17, %c0_18] : memref<10x10x32xf32, #tpu.memory_space<vmem>>, vector<10x10x32xf32>
      tpu.vector_store %arg7[%c0_16, %c0_17, %c0_18], %17 {strides = array<i32>} : memref<10x10x32xf32, #tpu.memory_space<vmem>>, vector<10x10x32xf32>,
      %c1 = arith.constant 1 : index
      %c1_19 = arith.constant 1 : index
      %c0_20 = arith.constant 0 : index
      %19 = vector.load %arg7[%c1, %c1_19, %c0_20] : memref<10x10x32xf32, #tpu.memory_space<vmem>>, vector<8x8x32xf32>
      tpu.vector_store %arg7[%c1, %c1_19, %c0_20], %16 {strides = array<i32>} : memref<10x10x32xf32, #tpu.memory_space<vmem>>, vector<8x8x32xf32>,
      %c0_21 = arith.constant 0 : index
      %c0_22 = arith.constant 0 : index
      %c0_23 = arith.constant 0 : index
      %20 = vector.load %arg7[%c0_21, %c0_22, %c0_23] : memref<10x10x32xf32, #tpu.memory_space<vmem>>, vector<10x10x32xf32>
      %cst_24 = arith.constant 0.000000e+00 : f32
      %21 = vector.broadcast %cst_24 : f32 to vector<8x8x32xf32>
      %c0_25 = arith.constant 0 : index
      %c0_26 = arith.constant 0 : index
      %c0_27 = arith.constant 0 : index
      %22 = vector.load %arg3[%c0_25, %c0_26, %c0_27] : memref<3x3x32xf32, #tpu.memory_space<vmem>>, vector<1x1x32xf32>
      %23 = vector.extract_strided_slice %20 {offsets = [0, 0, 0], sizes = [8, 8, 32], strides = [1, 1, 1]} : vector<10x10x32xf32> to vector<8x8x32xf32>
      %24 = vector.broadcast %22 : vector<1x1x32xf32> to vector<8x8x32xf32>
      %25 = arith.mulf %23, %24 : vector<8x8x32xf32>
      %26 = arith.addf %21, %25 : vector<8x8x32xf32>
      %c0_28 = arith.constant 0 : index
      %c1_29 = arith.constant 1 : index
      %c0_30 = arith.constant 0 : index
      %27 = vector.load %arg3[%c0_28, %c1_29, %c0_30] : memref<3x3x32xf32, #tpu.memory_space<vmem>>, vector<1x1x32xf32>
      %28 = vector.extract_strided_slice %20 {offsets = [0, 1, 0], sizes = [8, 8, 32], strides = [1, 1, 1]} : vector<10x10x32xf32> to vector<8x8x32xf32>
      %29 = vector.broadcast %27 : vector<1x1x32xf32> to vector<8x8x32xf32>
      %30 = arith.mulf %28, %29 : vector<8x8x32xf32>
      %31 = arith.addf %26, %30 : vector<8x8x32xf32>
      %c0_31 = arith.constant 0 : index
      %c2 = arith.constant 2 : index
      %c0_32 = arith.constant 0 : index
      %32 = vector.load %arg3[%c0_31, %c2, %c0_32] : memref<3x3x32xf32, #tpu.memory_space<vmem>>, vector<1x1x32xf32>
      %33 = vector.extract_strided_slice %20 {offsets = [0, 2, 0], sizes = [8, 8, 32], strides = [1, 1, 1]} : vector<10x10x32xf32> to vector<8x8x32xf32>
      %34 = vector.broadcast %32 : vector<1x1x32xf32> to vector<8x8x32xf32>
      %35 = arith.mulf %33, %34 : vector<8x8x32xf32>
      %36 = arith.addf %31, %35 : vector<8x8x32xf32>
      %c1_33 = arith.constant 1 : index
      %c0_34 = arith.constant 0 : index
      %c0_35 = arith.constant 0 : index
      %37 = vector.load %arg3[%c1_33, %c0_34, %c0_35] : memref<3x3x32xf32, #tpu.memory_space<vmem>>, vector<1x1x32xf32>
      %38 = vector.extract_strided_slice %20 {offsets = [1, 0, 0], sizes = [8, 8, 32], strides = [1, 1, 1]} : vector<10x10x32xf32> to vector<8x8x32xf32>
      %39 = vector.broadcast %37 : vector<1x1x32xf32> to vector<8x8x32xf32>
      %40 = arith.mulf %38, %39 : vector<8x8x32xf32>
      %41 = arith.addf %36, %40 : vector<8x8x32xf32>
      %c1_36 = arith.constant 1 : index
      %c1_37 = arith.constant 1 : index
      %c0_38 = arith.constant 0 : index
      %42 = vector.load %arg3[%c1_36, %c1_37, %c0_38] : memref<3x3x32xf32, #tpu.memory_space<vmem>>, vector<1x1x32xf32>
      %43 = vector.extract_strided_slice %20 {offsets = [1, 1, 0], sizes = [8, 8, 32], strides = [1, 1, 1]} : vector<10x10x32xf32> to vector<8x8x32xf32>
      %44 = vector.broadcast %42 : vector<1x1x32xf32> to vector<8x8x32xf32>
      %45 = arith.mulf %43, %44 : vector<8x8x32xf32>
      %46 = arith.addf %41, %45 : vector<8x8x32xf32>
      %c1_39 = arith.constant 1 : index
      %c2_40 = arith.constant 2 : index
      %c0_41 = arith.constant 0 : index
      %47 = vector.load %arg3[%c1_39, %c2_40, %c0_41] : memref<3x3x32xf32, #tpu.memory_space<vmem>>, vector<1x1x32xf32>
      %48 = vector.extract_strided_slice %20 {offsets = [1, 2, 0], sizes = [8, 8, 32], strides = [1, 1, 1]} : vector<10x10x32xf32> to vector<8x8x32xf32>
      %49 = vector.broadcast %47 : vector<1x1x32xf32> to vector<8x8x32xf32>
      %50 = arith.mulf %48, %49 : vector<8x8x32xf32>
      %51 = arith.addf %46, %50 : vector<8x8x32xf32>
      %c2_42 = arith.constant 2 : index
      %c0_43 = arith.constant 0 : index
      %c0_44 = arith.constant 0 : index
      %52 = vector.load %arg3[%c2_42, %c0_43, %c0_44] : memref<3x3x32xf32, #tpu.memory_space<vmem>>, vector<1x1x32xf32>
      %53 = vector.extract_strided_slice %20 {offsets = [2, 0, 0], sizes = [8, 8, 32], strides = [1, 1, 1]} : vector<10x10x32xf32> to vector<8x8x32xf32>
      %54 = vector.broadcast %52 : vector<1x1x32xf32> to vector<8x8x32xf32>
      %55 = arith.mulf %53, %54 : vector<8x8x32xf32>
      %56 = arith.addf %51, %55 : vector<8x8x32xf32>
      %c2_45 = arith.constant 2 : index
      %c1_46 = arith.constant 1 : index
      %c0_47 = arith.constant 0 : index
      %57 = vector.load %arg3[%c2_45, %c1_46, %c0_47] : memref<3x3x32xf32, #tpu.memory_space<vmem>>, vector<1x1x32xf32>
      %58 = vector.extract_strided_slice %20 {offsets = [2, 1, 0], sizes = [8, 8, 32], strides = [1, 1, 1]} : vector<10x10x32xf32> to vector<8x8x32xf32>
      %59 = vector.broadcast %57 : vector<1x1x32xf32> to vector<8x8x32xf32>
      %60 = arith.mulf %58, %59 : vector<8x8x32xf32>
      %61 = arith.addf %56, %60 : vector<8x8x32xf32>
      %c2_48 = arith.constant 2 : index
      %c2_49 = arith.constant 2 : index
      %c0_50 = arith.constant 0 : index
      %62 = vector.load %arg3[%c2_48, %c2_49, %c0_50] : memref<3x3x32xf32, #tpu.memory_space<vmem>>, vector<1x1x32xf32>
      %63 = vector.extract_strided_slice %20 {offsets = [2, 2, 0], sizes = [8, 8, 32], strides = [1, 1, 1]} : vector<10x10x32xf32> to vector<8x8x32xf32>
      %64 = vector.broadcast %62 : vector<1x1x32xf32> to vector<8x8x32xf32>
      %65 = arith.mulf %63, %64 : vector<8x8x32xf32>
      %66 = arith.addf %61, %65 : vector<8x8x32xf32>
      %67 = vector.shape_cast %66 : vector<8x8x32xf32> to vector<64x32xf32>
      %68 = arith.truncf %67 : vector<64x32xf32> to vector<64x32xbf16>
      %c0_51 = arith.constant 0 : index
      %c0_52 = arith.constant 0 : index
      %69 = vector.load %arg8[%c0_51, %c0_52] : memref<64x32xbf16, #tpu.memory_space<vmem>>, vector<64x32xbf16>
      tpu.vector_store %arg8[%c0_51, %c0_52], %68 {strides = array<i32>} : memref<64x32xbf16, #tpu.memory_space<vmem>>, vector<64x32xbf16>,
    } else {
    }
    %c0 = arith.constant 0 : index
    %c0_1 = arith.constant 0 : index
    %3 = vector.load %arg8[%c0, %c0_1] : memref<64x32xbf16, #tpu.memory_space<vmem>>, vector<64x32xbf16>
    %c0_2 = arith.constant 0 : index
    %c0_3 = arith.constant 0 : index
    %4 = vector.load %arg4[%c0_2, %c0_3] : memref<32x48xbf16, #tpu.memory_space<vmem>>, vector<32x48xbf16>
    %cst = arith.constant dense<0.000000e+00> : vector<64x48xf32>
    %5 = tpu.matmul %3, %4, %cst {dimension_numbers = #tpu.dot_dimension_numbers<[1], [0], [0], [1], [0, 0, 1, 1], [], []>} : vector<64x32xbf16>, vector<32x48xbf16>, vector<64x48xf32> -> vector<64x48xf32>
    %c0_4 = arith.constant 0 : index
    %c0_5 = arith.constant 0 : index
    %6 = vector.load %arg5[%c0_4, %c0_5] : memref<1x48xf32, #tpu.memory_space<vmem>>, vector<1x48xf32>
    %7 = vector.broadcast %6 : vector<1x48xf32> to vector<64x48xf32>
    %8 = arith.addf %5, %7 : vector<64x48xf32>
    %cst_6 = arith.constant 0.000000e+00 : f32
    %9 = vector.broadcast %cst_6 : f32 to vector<64x48xf32>
    %10 = arith.maximumf %8, %9 : vector<64x48xf32>
    %11 = vector.shape_cast %10 : vector<64x48xf32> to vector<8x8x48xf32>
    %c0_7 = arith.constant 0 : index
    %c0_8 = arith.constant 0 : index
    %c0_9 = arith.constant 0 : index
    %c0_10 = arith.constant 0 : index
    %12 = vector.load %arg6[%c0_7, %c0_8, %c0_9, %c0_10] : memref<1x8x8x48xf32, #tpu.memory_space<vmem>>, vector<1x8x8x48xf32>
    %13 = vector.shape_cast %12 : vector<1x8x8x48xf32> to vector<8x8x48xf32>
    %14 = vector.shape_cast %11 : vector<8x8x48xf32> to vector<1x8x8x48xf32>
    tpu.vector_store %arg6[%c0_7, %c0_8, %c0_9, %c0_10], %14 {strides = array<i32>} : memref<1x8x8x48xf32, #tpu.memory_space<vmem>>, vector<1x8x8x48xf32>,
    return
  }
  func.func @transform_0(%arg0: i32, %arg1: i32) -> (i32, i32, i32, i32) {
    %c0_i32 = arith.constant 0 : i32
    %c0_i32_0 = arith.constant 0 : i32
    %c0_i32_1 = arith.constant 0 : i32
    %c0_i32_2 = arith.constant 0 : i32
    return %arg0, %c0_i32, %c0_i32_0, %c0_i32_1 : i32, i32, i32, i32
  }
  func.func @transform_1(%arg0: i32, %arg1: i32) -> (i32, i32, i32) {
    %c0_i32 = arith.constant 0 : i32
    %c0_i32_0 = arith.constant 0 : i32
    %c0_i32_1 = arith.constant 0 : i32
    %c0_i32_2 = arith.constant 0 : i32
    return %c0_i32, %c0_i32_0, %c0_i32_1 : i32, i32, i32
  }
  func.func @transform_2(%arg0: i32, %arg1: i32) -> (i32, i32) {
    %c0_i32 = arith.constant 0 : i32
    %c0_i32_0 = arith.constant 0 : i32
    return %c0_i32, %arg1 : i32, i32
  }
  func.func @transform_3(%arg0: i32, %arg1: i32) -> (i32, i32) {
    %c0_i32 = arith.constant 0 : i32
    %c0_i32_0 = arith.constant 0 : i32
    return %c0_i32, %arg1 : i32, i32
  }
  func.func @transform_4(%arg0: i32, %arg1: i32) -> (i32, i32, i32, i32) {
    %c0_i32 = arith.constant 0 : i32
    %c0_i32_0 = arith.constant 0 : i32
    %c0_i32_1 = arith.constant 0 : i32
    return %arg0, %c0_i32, %c0_i32_0, %arg1 : i32, i32, i32, i32
  }
}

module attributes {stable_mosaic.version = 11 : i64} {
  func.func @_sepconv_bn_kernel(%arg0: i32, %arg1: i32, %arg2: memref<1x16x16x16xf32, #tpu.memory_space<vmem>>, %arg3: memref<3x3x16xf32, #tpu.memory_space<vmem>>, %arg4: memref<16x16xbf16, #tpu.memory_space<vmem>>, %arg5: memref<1x16xf32, #tpu.memory_space<vmem>>, %arg6: memref<1x16x16x16xf32, #tpu.memory_space<vmem>>, %arg7: memref<18x18x16xf32, #tpu.memory_space<vmem>>, %arg8: memref<256x16xbf16, #tpu.memory_space<vmem>>) attributes {dimension_semantics = [#tpu.dimension_semantics<parallel>, #tpu.dimension_semantics<arbitrary>], iteration_bounds = array<i64: 2, 1>, scalar_prefetch = 0 : i64, scratch_operands = 2 : i64, tpu.core_type = #tpu.core_type<tc>, window_params = [{transform_indices = @transform_0, window_bounds = array<i64: 1, 16, 16, 16>}, {pipeline_mode = #tpu.pipeline_mode<synchronous>, transform_indices = @transform_1, window_bounds = array<i64: 3, 3, 16>}, {transform_indices = @transform_2, window_bounds = array<i64: 16, 16>}, {transform_indices = @transform_3, window_bounds = array<i64: 1, 16>}, {transform_indices = @transform_4, window_bounds = array<i64: 1, 16, 16, 16>}]} {
    %c0_i32 = arith.constant 0 : i32
    %0 = arith.cmpi eq, %arg1, %c0_i32 : i32
    %1 = arith.extui %0 : i1 to i32
    %c0_i32_0 = arith.constant 0 : i32
    %2 = arith.cmpi ne, %1, %c0_i32_0 : i32
    scf.if %2 {
      %c0_10 = arith.constant 0 : index
      %c0_11 = arith.constant 0 : index
      %c0_12 = arith.constant 0 : index
      %c0_13 = arith.constant 0 : index
      %13 = vector.load %arg2[%c0_10, %c0_11, %c0_12, %c0_13] : memref<1x16x16x16xf32, #tpu.memory_space<vmem>>, vector<1x16x16x16xf32>
      %14 = vector.shape_cast %13 : vector<1x16x16x16xf32> to vector<16x16x16xf32>
      %cst_14 = arith.constant 0.000000e+00 : f32
      %15 = vector.broadcast %cst_14 : f32 to vector<16x16x16xf32>
      %16 = arith.maximumf %14, %15 : vector<16x16x16xf32>
      %cst_15 = arith.constant 0.000000e+00 : f32
      %17 = vector.broadcast %cst_15 : f32 to vector<18x18x16xf32>
      %c0_16 = arith.constant 0 : index
      %c0_17 = arith.constant 0 : index
      %c0_18 = arith.constant 0 : index
      %18 = vector.load %arg7[%c0_16, %c0_17, %c0_18] : memref<18x18x16xf32, #tpu.memory_space<vmem>>, vector<18x18x16xf32>
      tpu.vector_store %arg7[%c0_16, %c0_17, %c0_18], %17 {strides = array<i32>} : memref<18x18x16xf32, #tpu.memory_space<vmem>>, vector<18x18x16xf32>,
      %c1 = arith.constant 1 : index
      %c1_19 = arith.constant 1 : index
      %c0_20 = arith.constant 0 : index
      %19 = vector.load %arg7[%c1, %c1_19, %c0_20] : memref<18x18x16xf32, #tpu.memory_space<vmem>>, vector<16x16x16xf32>
      tpu.vector_store %arg7[%c1, %c1_19, %c0_20], %16 {strides = array<i32>} : memref<18x18x16xf32, #tpu.memory_space<vmem>>, vector<16x16x16xf32>,
      %c0_21 = arith.constant 0 : index
      %c0_22 = arith.constant 0 : index
      %c0_23 = arith.constant 0 : index
      %20 = vector.load %arg7[%c0_21, %c0_22, %c0_23] : memref<18x18x16xf32, #tpu.memory_space<vmem>>, vector<18x18x16xf32>
      %cst_24 = arith.constant 0.000000e+00 : f32
      %21 = vector.broadcast %cst_24 : f32 to vector<16x16x16xf32>
      %c0_25 = arith.constant 0 : index
      %c0_26 = arith.constant 0 : index
      %c0_27 = arith.constant 0 : index
      %22 = vector.load %arg3[%c0_25, %c0_26, %c0_27] : memref<3x3x16xf32, #tpu.memory_space<vmem>>, vector<1x1x16xf32>
      %23 = vector.extract_strided_slice %20 {offsets = [0, 0, 0], sizes = [16, 16, 16], strides = [1, 1, 1]} : vector<18x18x16xf32> to vector<16x16x16xf32>
      %24 = vector.broadcast %22 : vector<1x1x16xf32> to vector<16x16x16xf32>
      %25 = arith.mulf %23, %24 : vector<16x16x16xf32>
      %26 = arith.addf %21, %25 : vector<16x16x16xf32>
      %c0_28 = arith.constant 0 : index
      %c1_29 = arith.constant 1 : index
      %c0_30 = arith.constant 0 : index
      %27 = vector.load %arg3[%c0_28, %c1_29, %c0_30] : memref<3x3x16xf32, #tpu.memory_space<vmem>>, vector<1x1x16xf32>
      %28 = vector.extract_strided_slice %20 {offsets = [0, 1, 0], sizes = [16, 16, 16], strides = [1, 1, 1]} : vector<18x18x16xf32> to vector<16x16x16xf32>
      %29 = vector.broadcast %27 : vector<1x1x16xf32> to vector<16x16x16xf32>
      %30 = arith.mulf %28, %29 : vector<16x16x16xf32>
      %31 = arith.addf %26, %30 : vector<16x16x16xf32>
      %c0_31 = arith.constant 0 : index
      %c2 = arith.constant 2 : index
      %c0_32 = arith.constant 0 : index
      %32 = vector.load %arg3[%c0_31, %c2, %c0_32] : memref<3x3x16xf32, #tpu.memory_space<vmem>>, vector<1x1x16xf32>
      %33 = vector.extract_strided_slice %20 {offsets = [0, 2, 0], sizes = [16, 16, 16], strides = [1, 1, 1]} : vector<18x18x16xf32> to vector<16x16x16xf32>
      %34 = vector.broadcast %32 : vector<1x1x16xf32> to vector<16x16x16xf32>
      %35 = arith.mulf %33, %34 : vector<16x16x16xf32>
      %36 = arith.addf %31, %35 : vector<16x16x16xf32>
      %c1_33 = arith.constant 1 : index
      %c0_34 = arith.constant 0 : index
      %c0_35 = arith.constant 0 : index
      %37 = vector.load %arg3[%c1_33, %c0_34, %c0_35] : memref<3x3x16xf32, #tpu.memory_space<vmem>>, vector<1x1x16xf32>
      %38 = vector.extract_strided_slice %20 {offsets = [1, 0, 0], sizes = [16, 16, 16], strides = [1, 1, 1]} : vector<18x18x16xf32> to vector<16x16x16xf32>
      %39 = vector.broadcast %37 : vector<1x1x16xf32> to vector<16x16x16xf32>
      %40 = arith.mulf %38, %39 : vector<16x16x16xf32>
      %41 = arith.addf %36, %40 : vector<16x16x16xf32>
      %c1_36 = arith.constant 1 : index
      %c1_37 = arith.constant 1 : index
      %c0_38 = arith.constant 0 : index
      %42 = vector.load %arg3[%c1_36, %c1_37, %c0_38] : memref<3x3x16xf32, #tpu.memory_space<vmem>>, vector<1x1x16xf32>
      %43 = vector.extract_strided_slice %20 {offsets = [1, 1, 0], sizes = [16, 16, 16], strides = [1, 1, 1]} : vector<18x18x16xf32> to vector<16x16x16xf32>
      %44 = vector.broadcast %42 : vector<1x1x16xf32> to vector<16x16x16xf32>
      %45 = arith.mulf %43, %44 : vector<16x16x16xf32>
      %46 = arith.addf %41, %45 : vector<16x16x16xf32>
      %c1_39 = arith.constant 1 : index
      %c2_40 = arith.constant 2 : index
      %c0_41 = arith.constant 0 : index
      %47 = vector.load %arg3[%c1_39, %c2_40, %c0_41] : memref<3x3x16xf32, #tpu.memory_space<vmem>>, vector<1x1x16xf32>
      %48 = vector.extract_strided_slice %20 {offsets = [1, 2, 0], sizes = [16, 16, 16], strides = [1, 1, 1]} : vector<18x18x16xf32> to vector<16x16x16xf32>
      %49 = vector.broadcast %47 : vector<1x1x16xf32> to vector<16x16x16xf32>
      %50 = arith.mulf %48, %49 : vector<16x16x16xf32>
      %51 = arith.addf %46, %50 : vector<16x16x16xf32>
      %c2_42 = arith.constant 2 : index
      %c0_43 = arith.constant 0 : index
      %c0_44 = arith.constant 0 : index
      %52 = vector.load %arg3[%c2_42, %c0_43, %c0_44] : memref<3x3x16xf32, #tpu.memory_space<vmem>>, vector<1x1x16xf32>
      %53 = vector.extract_strided_slice %20 {offsets = [2, 0, 0], sizes = [16, 16, 16], strides = [1, 1, 1]} : vector<18x18x16xf32> to vector<16x16x16xf32>
      %54 = vector.broadcast %52 : vector<1x1x16xf32> to vector<16x16x16xf32>
      %55 = arith.mulf %53, %54 : vector<16x16x16xf32>
      %56 = arith.addf %51, %55 : vector<16x16x16xf32>
      %c2_45 = arith.constant 2 : index
      %c1_46 = arith.constant 1 : index
      %c0_47 = arith.constant 0 : index
      %57 = vector.load %arg3[%c2_45, %c1_46, %c0_47] : memref<3x3x16xf32, #tpu.memory_space<vmem>>, vector<1x1x16xf32>
      %58 = vector.extract_strided_slice %20 {offsets = [2, 1, 0], sizes = [16, 16, 16], strides = [1, 1, 1]} : vector<18x18x16xf32> to vector<16x16x16xf32>
      %59 = vector.broadcast %57 : vector<1x1x16xf32> to vector<16x16x16xf32>
      %60 = arith.mulf %58, %59 : vector<16x16x16xf32>
      %61 = arith.addf %56, %60 : vector<16x16x16xf32>
      %c2_48 = arith.constant 2 : index
      %c2_49 = arith.constant 2 : index
      %c0_50 = arith.constant 0 : index
      %62 = vector.load %arg3[%c2_48, %c2_49, %c0_50] : memref<3x3x16xf32, #tpu.memory_space<vmem>>, vector<1x1x16xf32>
      %63 = vector.extract_strided_slice %20 {offsets = [2, 2, 0], sizes = [16, 16, 16], strides = [1, 1, 1]} : vector<18x18x16xf32> to vector<16x16x16xf32>
      %64 = vector.broadcast %62 : vector<1x1x16xf32> to vector<16x16x16xf32>
      %65 = arith.mulf %63, %64 : vector<16x16x16xf32>
      %66 = arith.addf %61, %65 : vector<16x16x16xf32>
      %67 = vector.shape_cast %66 : vector<16x16x16xf32> to vector<256x16xf32>
      %68 = arith.truncf %67 : vector<256x16xf32> to vector<256x16xbf16>
      %c0_51 = arith.constant 0 : index
      %c0_52 = arith.constant 0 : index
      %69 = vector.load %arg8[%c0_51, %c0_52] : memref<256x16xbf16, #tpu.memory_space<vmem>>, vector<256x16xbf16>
      tpu.vector_store %arg8[%c0_51, %c0_52], %68 {strides = array<i32>} : memref<256x16xbf16, #tpu.memory_space<vmem>>, vector<256x16xbf16>,
    } else {
    }
    %c0 = arith.constant 0 : index
    %c0_1 = arith.constant 0 : index
    %3 = vector.load %arg8[%c0, %c0_1] : memref<256x16xbf16, #tpu.memory_space<vmem>>, vector<256x16xbf16>
    %c0_2 = arith.constant 0 : index
    %c0_3 = arith.constant 0 : index
    %4 = vector.load %arg4[%c0_2, %c0_3] : memref<16x16xbf16, #tpu.memory_space<vmem>>, vector<16x16xbf16>
    %cst = arith.constant dense<0.000000e+00> : vector<256x16xf32>
    %5 = tpu.matmul %3, %4, %cst {dimension_numbers = #tpu.dot_dimension_numbers<[1], [0], [0], [1], [0, 0, 1, 1], [], []>} : vector<256x16xbf16>, vector<16x16xbf16>, vector<256x16xf32> -> vector<256x16xf32>
    %c0_4 = arith.constant 0 : index
    %c0_5 = arith.constant 0 : index
    %6 = vector.load %arg5[%c0_4, %c0_5] : memref<1x16xf32, #tpu.memory_space<vmem>>, vector<1x16xf32>
    %7 = vector.broadcast %6 : vector<1x16xf32> to vector<256x16xf32>
    %8 = arith.addf %5, %7 : vector<256x16xf32>
    %9 = vector.shape_cast %8 : vector<256x16xf32> to vector<16x16x16xf32>
    %c0_6 = arith.constant 0 : index
    %c0_7 = arith.constant 0 : index
    %c0_8 = arith.constant 0 : index
    %c0_9 = arith.constant 0 : index
    %10 = vector.load %arg6[%c0_6, %c0_7, %c0_8, %c0_9] : memref<1x16x16x16xf32, #tpu.memory_space<vmem>>, vector<1x16x16x16xf32>
    %11 = vector.shape_cast %10 : vector<1x16x16x16xf32> to vector<16x16x16xf32>
    %12 = vector.shape_cast %9 : vector<16x16x16xf32> to vector<1x16x16x16xf32>
    tpu.vector_store %arg6[%c0_6, %c0_7, %c0_8, %c0_9], %12 {strides = array<i32>} : memref<1x16x16x16xf32, #tpu.memory_space<vmem>>, vector<1x16x16x16xf32>,
    return
  }
  func.func @transform_0(%arg0: i32, %arg1: i32) -> (i32, i32, i32, i32) {
    %c0_i32 = arith.constant 0 : i32
    %c0_i32_0 = arith.constant 0 : i32
    %c0_i32_1 = arith.constant 0 : i32
    %c0_i32_2 = arith.constant 0 : i32
    return %arg0, %c0_i32, %c0_i32_0, %c0_i32_1 : i32, i32, i32, i32
  }
  func.func @transform_1(%arg0: i32, %arg1: i32) -> (i32, i32, i32) {
    %c0_i32 = arith.constant 0 : i32
    %c0_i32_0 = arith.constant 0 : i32
    %c0_i32_1 = arith.constant 0 : i32
    %c0_i32_2 = arith.constant 0 : i32
    return %c0_i32, %c0_i32_0, %c0_i32_1 : i32, i32, i32
  }
  func.func @transform_2(%arg0: i32, %arg1: i32) -> (i32, i32) {
    %c0_i32 = arith.constant 0 : i32
    %c0_i32_0 = arith.constant 0 : i32
    return %c0_i32, %arg1 : i32, i32
  }
  func.func @transform_3(%arg0: i32, %arg1: i32) -> (i32, i32) {
    %c0_i32 = arith.constant 0 : i32
    %c0_i32_0 = arith.constant 0 : i32
    return %c0_i32, %arg1 : i32, i32
  }
  func.func @transform_4(%arg0: i32, %arg1: i32) -> (i32, i32, i32, i32) {
    %c0_i32 = arith.constant 0 : i32
    %c0_i32_0 = arith.constant 0 : i32
    %c0_i32_1 = arith.constant 0 : i32
    return %arg0, %c0_i32, %c0_i32_0, %arg1 : i32, i32, i32, i32
  }
}

module attributes {stable_mosaic.version = 11 : i64} {
  func.func @_block1_tail_kernel(%arg0: i32, %arg1: i32, %arg2: memref<1x16x16x16xf32, #tpu.memory_space<vmem>>, %arg3: memref<1x16x16x16xf32, #tpu.memory_space<vmem>>, %arg4: memref<3x3x16xf32, #tpu.memory_space<vmem>>, %arg5: memref<16x32xbf16, #tpu.memory_space<vmem>>, %arg6: memref<1x32xf32, #tpu.memory_space<vmem>>, %arg7: memref<16x32xbf16, #tpu.memory_space<vmem>>, %arg8: memref<1x32xf32, #tpu.memory_space<vmem>>, %arg9: memref<1x8x8x32xf32, #tpu.memory_space<vmem>>, %arg10: memref<18x18x16xf32, #tpu.memory_space<vmem>>, %arg11: memref<256x16xbf16, #tpu.memory_space<vmem>>, %arg12: memref<64x16xbf16, #tpu.memory_space<vmem>>, %arg13: memref<18x18x32xf32, #tpu.memory_space<vmem>>) attributes {dimension_semantics = [#tpu.dimension_semantics<parallel>, #tpu.dimension_semantics<arbitrary>], iteration_bounds = array<i64: 2, 1>, scalar_prefetch = 0 : i64, scratch_operands = 4 : i64, tpu.core_type = #tpu.core_type<tc>, window_params = [{transform_indices = @transform_0, window_bounds = array<i64: 1, 16, 16, 16>}, {transform_indices = @transform_1, window_bounds = array<i64: 1, 16, 16, 16>}, {pipeline_mode = #tpu.pipeline_mode<synchronous>, transform_indices = @transform_2, window_bounds = array<i64: 3, 3, 16>}, {transform_indices = @transform_3, window_bounds = array<i64: 16, 32>}, {transform_indices = @transform_4, window_bounds = array<i64: 1, 32>}, {transform_indices = @transform_5, window_bounds = array<i64: 16, 32>}, {transform_indices = @transform_6, window_bounds = array<i64: 1, 32>}, {transform_indices = @transform_7, window_bounds = array<i64: 1, 8, 8, 32>}]} {
    %c0_i32 = arith.constant 0 : i32
    %0 = arith.cmpi eq, %arg1, %c0_i32 : i32
    %1 = arith.extui %0 : i1 to i32
    %c0_i32_0 = arith.constant 0 : i32
    %2 = arith.cmpi ne, %1, %c0_i32_0 : i32
    scf.if %2 {
      %c0_49 = arith.constant 0 : index
      %c0_50 = arith.constant 0 : index
      %c0_51 = arith.constant 0 : index
      %c0_52 = arith.constant 0 : index
      %41 = vector.load %arg2[%c0_49, %c0_50, %c0_51, %c0_52] : memref<1x16x16x16xf32, #tpu.memory_space<vmem>>, vector<1x16x16x16xf32>
      %42 = vector.shape_cast %41 : vector<1x16x16x16xf32> to vector<16x16x16xf32>
      %cst_53 = arith.constant 0.000000e+00 : f32
      %43 = vector.broadcast %cst_53 : f32 to vector<16x16x16xf32>
      %44 = arith.maximumf %42, %43 : vector<16x16x16xf32>
      %cst_54 = arith.constant 0.000000e+00 : f32
      %45 = vector.broadcast %cst_54 : f32 to vector<18x18x16xf32>
      %c0_55 = arith.constant 0 : index
      %c0_56 = arith.constant 0 : index
      %c0_57 = arith.constant 0 : index
      %46 = vector.load %arg10[%c0_55, %c0_56, %c0_57] : memref<18x18x16xf32, #tpu.memory_space<vmem>>, vector<18x18x16xf32>
      tpu.vector_store %arg10[%c0_55, %c0_56, %c0_57], %45 {strides = array<i32>} : memref<18x18x16xf32, #tpu.memory_space<vmem>>, vector<18x18x16xf32>,
      %c1_58 = arith.constant 1 : index
      %c1_59 = arith.constant 1 : index
      %c0_60 = arith.constant 0 : index
      %47 = vector.load %arg10[%c1_58, %c1_59, %c0_60] : memref<18x18x16xf32, #tpu.memory_space<vmem>>, vector<16x16x16xf32>
      tpu.vector_store %arg10[%c1_58, %c1_59, %c0_60], %44 {strides = array<i32>} : memref<18x18x16xf32, #tpu.memory_space<vmem>>, vector<16x16x16xf32>,
      %c0_61 = arith.constant 0 : index
      %c0_62 = arith.constant 0 : index
      %c0_63 = arith.constant 0 : index
      %48 = vector.load %arg10[%c0_61, %c0_62, %c0_63] : memref<18x18x16xf32, #tpu.memory_space<vmem>>, vector<18x18x16xf32>
      %cst_64 = arith.constant 0.000000e+00 : f32
      %49 = vector.broadcast %cst_64 : f32 to vector<16x16x16xf32>
      %c0_65 = arith.constant 0 : index
      %c0_66 = arith.constant 0 : index
      %c0_67 = arith.constant 0 : index
      %50 = vector.load %arg4[%c0_65, %c0_66, %c0_67] : memref<3x3x16xf32, #tpu.memory_space<vmem>>, vector<1x1x16xf32>
      %51 = vector.extract_strided_slice %48 {offsets = [0, 0, 0], sizes = [16, 16, 16], strides = [1, 1, 1]} : vector<18x18x16xf32> to vector<16x16x16xf32>
      %52 = vector.broadcast %50 : vector<1x1x16xf32> to vector<16x16x16xf32>
      %53 = arith.mulf %51, %52 : vector<16x16x16xf32>
      %54 = arith.addf %49, %53 : vector<16x16x16xf32>
      %c0_68 = arith.constant 0 : index
      %c1_69 = arith.constant 1 : index
      %c0_70 = arith.constant 0 : index
      %55 = vector.load %arg4[%c0_68, %c1_69, %c0_70] : memref<3x3x16xf32, #tpu.memory_space<vmem>>, vector<1x1x16xf32>
      %56 = vector.extract_strided_slice %48 {offsets = [0, 1, 0], sizes = [16, 16, 16], strides = [1, 1, 1]} : vector<18x18x16xf32> to vector<16x16x16xf32>
      %57 = vector.broadcast %55 : vector<1x1x16xf32> to vector<16x16x16xf32>
      %58 = arith.mulf %56, %57 : vector<16x16x16xf32>
      %59 = arith.addf %54, %58 : vector<16x16x16xf32>
      %c0_71 = arith.constant 0 : index
      %c2_72 = arith.constant 2 : index
      %c0_73 = arith.constant 0 : index
      %60 = vector.load %arg4[%c0_71, %c2_72, %c0_73] : memref<3x3x16xf32, #tpu.memory_space<vmem>>, vector<1x1x16xf32>
      %61 = vector.extract_strided_slice %48 {offsets = [0, 2, 0], sizes = [16, 16, 16], strides = [1, 1, 1]} : vector<18x18x16xf32> to vector<16x16x16xf32>
      %62 = vector.broadcast %60 : vector<1x1x16xf32> to vector<16x16x16xf32>
      %63 = arith.mulf %61, %62 : vector<16x16x16xf32>
      %64 = arith.addf %59, %63 : vector<16x16x16xf32>
      %c1_74 = arith.constant 1 : index
      %c0_75 = arith.constant 0 : index
      %c0_76 = arith.constant 0 : index
      %65 = vector.load %arg4[%c1_74, %c0_75, %c0_76] : memref<3x3x16xf32, #tpu.memory_space<vmem>>, vector<1x1x16xf32>
      %66 = vector.extract_strided_slice %48 {offsets = [1, 0, 0], sizes = [16, 16, 16], strides = [1, 1, 1]} : vector<18x18x16xf32> to vector<16x16x16xf32>
      %67 = vector.broadcast %65 : vector<1x1x16xf32> to vector<16x16x16xf32>
      %68 = arith.mulf %66, %67 : vector<16x16x16xf32>
      %69 = arith.addf %64, %68 : vector<16x16x16xf32>
      %c1_77 = arith.constant 1 : index
      %c1_78 = arith.constant 1 : index
      %c0_79 = arith.constant 0 : index
      %70 = vector.load %arg4[%c1_77, %c1_78, %c0_79] : memref<3x3x16xf32, #tpu.memory_space<vmem>>, vector<1x1x16xf32>
      %71 = vector.extract_strided_slice %48 {offsets = [1, 1, 0], sizes = [16, 16, 16], strides = [1, 1, 1]} : vector<18x18x16xf32> to vector<16x16x16xf32>
      %72 = vector.broadcast %70 : vector<1x1x16xf32> to vector<16x16x16xf32>
      %73 = arith.mulf %71, %72 : vector<16x16x16xf32>
      %74 = arith.addf %69, %73 : vector<16x16x16xf32>
      %c1_80 = arith.constant 1 : index
      %c2_81 = arith.constant 2 : index
      %c0_82 = arith.constant 0 : index
      %75 = vector.load %arg4[%c1_80, %c2_81, %c0_82] : memref<3x3x16xf32, #tpu.memory_space<vmem>>, vector<1x1x16xf32>
      %76 = vector.extract_strided_slice %48 {offsets = [1, 2, 0], sizes = [16, 16, 16], strides = [1, 1, 1]} : vector<18x18x16xf32> to vector<16x16x16xf32>
      %77 = vector.broadcast %75 : vector<1x1x16xf32> to vector<16x16x16xf32>
      %78 = arith.mulf %76, %77 : vector<16x16x16xf32>
      %79 = arith.addf %74, %78 : vector<16x16x16xf32>
      %c2_83 = arith.constant 2 : index
      %c0_84 = arith.constant 0 : index
      %c0_85 = arith.constant 0 : index
      %80 = vector.load %arg4[%c2_83, %c0_84, %c0_85] : memref<3x3x16xf32, #tpu.memory_space<vmem>>, vector<1x1x16xf32>
      %81 = vector.extract_strided_slice %48 {offsets = [2, 0, 0], sizes = [16, 16, 16], strides = [1, 1, 1]} : vector<18x18x16xf32> to vector<16x16x16xf32>
      %82 = vector.broadcast %80 : vector<1x1x16xf32> to vector<16x16x16xf32>
      %83 = arith.mulf %81, %82 : vector<16x16x16xf32>
      %84 = arith.addf %79, %83 : vector<16x16x16xf32>
      %c2_86 = arith.constant 2 : index
      %c1_87 = arith.constant 1 : index
      %c0_88 = arith.constant 0 : index
      %85 = vector.load %arg4[%c2_86, %c1_87, %c0_88] : memref<3x3x16xf32, #tpu.memory_space<vmem>>, vector<1x1x16xf32>
      %86 = vector.extract_strided_slice %48 {offsets = [2, 1, 0], sizes = [16, 16, 16], strides = [1, 1, 1]} : vector<18x18x16xf32> to vector<16x16x16xf32>
      %87 = vector.broadcast %85 : vector<1x1x16xf32> to vector<16x16x16xf32>
      %88 = arith.mulf %86, %87 : vector<16x16x16xf32>
      %89 = arith.addf %84, %88 : vector<16x16x16xf32>
      %c2_89 = arith.constant 2 : index
      %c2_90 = arith.constant 2 : index
      %c0_91 = arith.constant 0 : index
      %90 = vector.load %arg4[%c2_89, %c2_90, %c0_91] : memref<3x3x16xf32, #tpu.memory_space<vmem>>, vector<1x1x16xf32>
      %91 = vector.extract_strided_slice %48 {offsets = [2, 2, 0], sizes = [16, 16, 16], strides = [1, 1, 1]} : vector<18x18x16xf32> to vector<16x16x16xf32>
      %92 = vector.broadcast %90 : vector<1x1x16xf32> to vector<16x16x16xf32>
      %93 = arith.mulf %91, %92 : vector<16x16x16xf32>
      %94 = arith.addf %89, %93 : vector<16x16x16xf32>
      %95 = vector.shape_cast %94 : vector<16x16x16xf32> to vector<256x16xf32>
      %96 = arith.truncf %95 : vector<256x16xf32> to vector<256x16xbf16>
      %c0_92 = arith.constant 0 : index
      %c0_93 = arith.constant 0 : index
      %97 = vector.load %arg11[%c0_92, %c0_93] : memref<256x16xbf16, #tpu.memory_space<vmem>>, vector<256x16xbf16>
      tpu.vector_store %arg11[%c0_92, %c0_93], %96 {strides = array<i32>} : memref<256x16xbf16, #tpu.memory_space<vmem>>, vector<256x16xbf16>,
      %c0_94 = arith.constant 0 : index
      %c0_95 = arith.constant 0 : index
      %c0_96 = arith.constant 0 : index
      %c0_97 = arith.constant 0 : index
      %98 = tpu.strided_load %arg3[%c0_94, %c0_95, %c0_96, %c0_97] {strides = array<i32: 1, 2, 2, 1>} : memref<1x16x16x16xf32, #tpu.memory_space<vmem>>, vector<1x8x8x16xf32>
      %cst_98 = arith.constant 0.000000e+00 : f32
      %99 = vector.broadcast %cst_98 : f32 to vector<1x8x8x16xf32>
      %100 = arith.maximumf %98, %99 : vector<1x8x8x16xf32>
      %101 = vector.shape_cast %100 : vector<1x8x8x16xf32> to vector<64x16xf32>
      %102 = arith.truncf %101 : vector<64x16xf32> to vector<64x16xbf16>
      %c0_99 = arith.constant 0 : index
      %c0_100 = arith.constant 0 : index
      %103 = vector.load %arg12[%c0_99, %c0_100] : memref<64x16xbf16, #tpu.memory_space<vmem>>, vector<64x16xbf16>
      tpu.vector_store %arg12[%c0_99, %c0_100], %102 {strides = array<i32>} : memref<64x16xbf16, #tpu.memory_space<vmem>>, vector<64x16xbf16>,
    } else {
    }
    %c0 = arith.constant 0 : index
    %c0_1 = arith.constant 0 : index
    %3 = vector.load %arg11[%c0, %c0_1] : memref<256x16xbf16, #tpu.memory_space<vmem>>, vector<256x16xbf16>
    %c0_2 = arith.constant 0 : index
    %c0_3 = arith.constant 0 : index
    %4 = vector.load %arg5[%c0_2, %c0_3] : memref<16x32xbf16, #tpu.memory_space<vmem>>, vector<16x32xbf16>
    %cst = arith.constant dense<0.000000e+00> : vector<256x32xf32>
    %5 = tpu.matmul %3, %4, %cst {dimension_numbers = #tpu.dot_dimension_numbers<[1], [0], [0], [1], [0, 0, 1, 1], [], []>} : vector<256x16xbf16>, vector<16x32xbf16>, vector<256x32xf32> -> vector<256x32xf32>
    %c0_4 = arith.constant 0 : index
    %c0_5 = arith.constant 0 : index
    %6 = vector.load %arg6[%c0_4, %c0_5] : memref<1x32xf32, #tpu.memory_space<vmem>>, vector<1x32xf32>
    %7 = vector.broadcast %6 : vector<1x32xf32> to vector<256x32xf32>
    %8 = arith.addf %5, %7 : vector<256x32xf32>
    %cst_6 = arith.constant -3.40282347E+38 : f32
    %9 = vector.broadcast %cst_6 : f32 to vector<18x18x32xf32>
    %c0_7 = arith.constant 0 : index
    %c0_8 = arith.constant 0 : index
    %c0_9 = arith.constant 0 : index
    %10 = vector.load %arg13[%c0_7, %c0_8, %c0_9] : memref<18x18x32xf32, #tpu.memory_space<vmem>>, vector<18x18x32xf32>
    tpu.vector_store %arg13[%c0_7, %c0_8, %c0_9], %9 {strides = array<i32>} : memref<18x18x32xf32, #tpu.memory_space<vmem>>, vector<18x18x32xf32>,
    %11 = vector.shape_cast %8 : vector<256x32xf32> to vector<16x16x32xf32>
    %c1 = arith.constant 1 : index
    %c1_10 = arith.constant 1 : index
    %c0_11 = arith.constant 0 : index
    %12 = vector.load %arg13[%c1, %c1_10, %c0_11] : memref<18x18x32xf32, #tpu.memory_space<vmem>>, vector<16x16x32xf32>
    tpu.vector_store %arg13[%c1, %c1_10, %c0_11], %11 {strides = array<i32>} : memref<18x18x32xf32, #tpu.memory_space<vmem>>, vector<16x16x32xf32>,
    %c0_12 = arith.constant 0 : index
    %c0_13 = arith.constant 0 : index
    %c0_14 = arith.constant 0 : index
    %13 = tpu.strided_load %arg13[%c0_12, %c0_13, %c0_14] {strides = array<i32: 2, 2, 1>} : memref<18x18x32xf32, #tpu.memory_space<vmem>>, vector<8x8x32xf32>
    %c0_15 = arith.constant 0 : index
    %c1_16 = arith.constant 1 : index
    %c0_17 = arith.constant 0 : index
    %14 = tpu.strided_load %arg13[%c0_15, %c1_16, %c0_17] {strides = array<i32: 2, 2, 1>} : memref<18x18x32xf32, #tpu.memory_space<vmem>>, vector<8x8x32xf32>
    %15 = arith.maximumf %13, %14 : vector<8x8x32xf32>
    %c0_18 = arith.constant 0 : index
    %c2 = arith.constant 2 : index
    %c0_19 = arith.constant 0 : index
    %16 = tpu.strided_load %arg13[%c0_18, %c2, %c0_19] {strides = array<i32: 2, 2, 1>} : memref<18x18x32xf32, #tpu.memory_space<vmem>>, vector<8x8x32xf32>
    %17 = arith.maximumf %15, %16 : vector<8x8x32xf32>
    %c1_20 = arith.constant 1 : index
    %c0_21 = arith.constant 0 : index
    %c0_22 = arith.constant 0 : index
    %18 = tpu.strided_load %arg13[%c1_20, %c0_21, %c0_22] {strides = array<i32: 2, 2, 1>} : memref<18x18x32xf32, #tpu.memory_space<vmem>>, vector<8x8x32xf32>
    %19 = arith.maximumf %17, %18 : vector<8x8x32xf32>
    %c1_23 = arith.constant 1 : index
    %c1_24 = arith.constant 1 : index
    %c0_25 = arith.constant 0 : index
    %20 = tpu.strided_load %arg13[%c1_23, %c1_24, %c0_25] {strides = array<i32: 2, 2, 1>} : memref<18x18x32xf32, #tpu.memory_space<vmem>>, vector<8x8x32xf32>
    %21 = arith.maximumf %19, %20 : vector<8x8x32xf32>
    %c1_26 = arith.constant 1 : index
    %c2_27 = arith.constant 2 : index
    %c0_28 = arith.constant 0 : index
    %22 = tpu.strided_load %arg13[%c1_26, %c2_27, %c0_28] {strides = array<i32: 2, 2, 1>} : memref<18x18x32xf32, #tpu.memory_space<vmem>>, vector<8x8x32xf32>
    %23 = arith.maximumf %21, %22 : vector<8x8x32xf32>
    %c2_29 = arith.constant 2 : index
    %c0_30 = arith.constant 0 : index
    %c0_31 = arith.constant 0 : index
    %24 = tpu.strided_load %arg13[%c2_29, %c0_30, %c0_31] {strides = array<i32: 2, 2, 1>} : memref<18x18x32xf32, #tpu.memory_space<vmem>>, vector<8x8x32xf32>
    %25 = arith.maximumf %23, %24 : vector<8x8x32xf32>
    %c2_32 = arith.constant 2 : index
    %c1_33 = arith.constant 1 : index
    %c0_34 = arith.constant 0 : index
    %26 = tpu.strided_load %arg13[%c2_32, %c1_33, %c0_34] {strides = array<i32: 2, 2, 1>} : memref<18x18x32xf32, #tpu.memory_space<vmem>>, vector<8x8x32xf32>
    %27 = arith.maximumf %25, %26 : vector<8x8x32xf32>
    %c2_35 = arith.constant 2 : index
    %c2_36 = arith.constant 2 : index
    %c0_37 = arith.constant 0 : index
    %28 = tpu.strided_load %arg13[%c2_35, %c2_36, %c0_37] {strides = array<i32: 2, 2, 1>} : memref<18x18x32xf32, #tpu.memory_space<vmem>>, vector<8x8x32xf32>
    %29 = arith.maximumf %27, %28 : vector<8x8x32xf32>
    %c0_38 = arith.constant 0 : index
    %c0_39 = arith.constant 0 : index
    %30 = vector.load %arg12[%c0_38, %c0_39] : memref<64x16xbf16, #tpu.memory_space<vmem>>, vector<64x16xbf16>
    %c0_40 = arith.constant 0 : index
    %c0_41 = arith.constant 0 : index
    %31 = vector.load %arg7[%c0_40, %c0_41] : memref<16x32xbf16, #tpu.memory_space<vmem>>, vector<16x32xbf16>
    %cst_42 = arith.constant dense<0.000000e+00> : vector<64x32xf32>
    %32 = tpu.matmul %30, %31, %cst_42 {dimension_numbers = #tpu.dot_dimension_numbers<[1], [0], [0], [1], [0, 0, 1, 1], [], []>} : vector<64x16xbf16>, vector<16x32xbf16>, vector<64x32xf32> -> vector<64x32xf32>
    %c0_43 = arith.constant 0 : index
    %c0_44 = arith.constant 0 : index
    %33 = vector.load %arg8[%c0_43, %c0_44] : memref<1x32xf32, #tpu.memory_space<vmem>>, vector<1x32xf32>
    %34 = vector.broadcast %33 : vector<1x32xf32> to vector<64x32xf32>
    %35 = arith.addf %32, %34 : vector<64x32xf32>
    %36 = vector.shape_cast %35 : vector<64x32xf32> to vector<8x8x32xf32>
    %37 = arith.addf %29, %36 : vector<8x8x32xf32>
    %c0_45 = arith.constant 0 : index
    %c0_46 = arith.constant 0 : index
    %c0_47 = arith.constant 0 : index
    %c0_48 = arith.constant 0 : index
    %38 = vector.load %arg9[%c0_45, %c0_46, %c0_47, %c0_48] : memref<1x8x8x32xf32, #tpu.memory_space<vmem>>, vector<1x8x8x32xf32>
    %39 = vector.shape_cast %38 : vector<1x8x8x32xf32> to vector<8x8x32xf32>
    %40 = vector.shape_cast %37 : vector<8x8x32xf32> to vector<1x8x8x32xf32>
    tpu.vector_store %arg9[%c0_45, %c0_46, %c0_47, %c0_48], %40 {strides = array<i32>} : memref<1x8x8x32xf32, #tpu.memory_space<vmem>>, vector<1x8x8x32xf32>,
    return
  }
  func.func @transform_0(%arg0: i32, %arg1: i32) -> (i32, i32, i32, i32) {
    %c0_i32 = arith.constant 0 : i32
    %c0_i32_0 = arith.constant 0 : i32
    %c0_i32_1 = arith.constant 0 : i32
    %c0_i32_2 = arith.constant 0 : i32
    return %arg0, %c0_i32, %c0_i32_0, %c0_i32_1 : i32, i32, i32, i32
  }
  func.func @transform_1(%arg0: i32, %arg1: i32) -> (i32, i32, i32, i32) {
    %c0_i32 = arith.constant 0 : i32
    %c0_i32_0 = arith.constant 0 : i32
    %c0_i32_1 = arith.constant 0 : i32
    %c0_i32_2 = arith.constant 0 : i32
    return %arg0, %c0_i32, %c0_i32_0, %c0_i32_1 : i32, i32, i32, i32
  }
  func.func @transform_2(%arg0: i32, %arg1: i32) -> (i32, i32, i32) {
    %c0_i32 = arith.constant 0 : i32
    %c0_i32_0 = arith.constant 0 : i32
    %c0_i32_1 = arith.constant 0 : i32
    %c0_i32_2 = arith.constant 0 : i32
    return %c0_i32, %c0_i32_0, %c0_i32_1 : i32, i32, i32
  }
  func.func @transform_3(%arg0: i32, %arg1: i32) -> (i32, i32) {
    %c0_i32 = arith.constant 0 : i32
    %c0_i32_0 = arith.constant 0 : i32
    return %c0_i32, %arg1 : i32, i32
  }
  func.func @transform_4(%arg0: i32, %arg1: i32) -> (i32, i32) {
    %c0_i32 = arith.constant 0 : i32
    %c0_i32_0 = arith.constant 0 : i32
    return %c0_i32, %arg1 : i32, i32
  }
  func.func @transform_5(%arg0: i32, %arg1: i32) -> (i32, i32) {
    %c0_i32 = arith.constant 0 : i32
    %c0_i32_0 = arith.constant 0 : i32
    return %c0_i32, %arg1 : i32, i32
  }
  func.func @transform_6(%arg0: i32, %arg1: i32) -> (i32, i32) {
    %c0_i32 = arith.constant 0 : i32
    %c0_i32_0 = arith.constant 0 : i32
    return %c0_i32, %arg1 : i32, i32
  }
  func.func @transform_7(%arg0: i32, %arg1: i32) -> (i32, i32, i32, i32) {
    %c0_i32 = arith.constant 0 : i32
    %c0_i32_0 = arith.constant 0 : i32
    %c0_i32_1 = arith.constant 0 : i32
    return %arg0, %c0_i32, %c0_i32_0, %arg1 : i32, i32, i32, i32
  }
}

module attributes {stable_mosaic.version = 11 : i64} {
  func.func @_sepconv_bn_gap_kernel(%arg0: i32, %arg1: i32, %arg2: memref<1x8x8x48xf32, #tpu.memory_space<vmem>>, %arg3: memref<3x3x48xf32, #tpu.memory_space<vmem>>, %arg4: memref<48x64xbf16, #tpu.memory_space<vmem>>, %arg5: memref<1x64xf32, #tpu.memory_space<vmem>>, %arg6: memref<1x1x64xf32, #tpu.memory_space<vmem>>, %arg7: memref<10x10x48xf32, #tpu.memory_space<vmem>>, %arg8: memref<64x48xbf16, #tpu.memory_space<vmem>>) attributes {dimension_semantics = [#tpu.dimension_semantics<parallel>, #tpu.dimension_semantics<arbitrary>], iteration_bounds = array<i64: 2, 1>, scalar_prefetch = 0 : i64, scratch_operands = 2 : i64, tpu.core_type = #tpu.core_type<tc>, window_params = [{transform_indices = @transform_0, window_bounds = array<i64: 1, 8, 8, 48>}, {pipeline_mode = #tpu.pipeline_mode<synchronous>, transform_indices = @transform_1, window_bounds = array<i64: 3, 3, 48>}, {transform_indices = @transform_2, window_bounds = array<i64: 48, 64>}, {transform_indices = @transform_3, window_bounds = array<i64: 1, 64>}, {transform_indices = @transform_4, window_bounds = array<i64: 1, 1, 64>}]} {
    %c0_i32 = arith.constant 0 : i32
    %0 = arith.cmpi eq, %arg1, %c0_i32 : i32
    %1 = arith.extui %0 : i1 to i32
    %c0_i32_0 = arith.constant 0 : i32
    %2 = arith.cmpi ne, %1, %c0_i32_0 : i32
    scf.if %2 {
      %c0_12 = arith.constant 0 : index
      %c0_13 = arith.constant 0 : index
      %c0_14 = arith.constant 0 : index
      %c0_15 = arith.constant 0 : index
      %18 = vector.load %arg2[%c0_12, %c0_13, %c0_14, %c0_15] : memref<1x8x8x48xf32, #tpu.memory_space<vmem>>, vector<1x8x8x48xf32>
      %19 = vector.shape_cast %18 : vector<1x8x8x48xf32> to vector<8x8x48xf32>
      %cst_16 = arith.constant 0.000000e+00 : f32
      %20 = vector.broadcast %cst_16 : f32 to vector<10x10x48xf32>
      %c0_17 = arith.constant 0 : index
      %c0_18 = arith.constant 0 : index
      %c0_19 = arith.constant 0 : index
      %21 = vector.load %arg7[%c0_17, %c0_18, %c0_19] : memref<10x10x48xf32, #tpu.memory_space<vmem>>, vector<10x10x48xf32>
      tpu.vector_store %arg7[%c0_17, %c0_18, %c0_19], %20 {strides = array<i32>} : memref<10x10x48xf32, #tpu.memory_space<vmem>>, vector<10x10x48xf32>,
      %c1 = arith.constant 1 : index
      %c1_20 = arith.constant 1 : index
      %c0_21 = arith.constant 0 : index
      %22 = vector.load %arg7[%c1, %c1_20, %c0_21] : memref<10x10x48xf32, #tpu.memory_space<vmem>>, vector<8x8x48xf32>
      tpu.vector_store %arg7[%c1, %c1_20, %c0_21], %19 {strides = array<i32>} : memref<10x10x48xf32, #tpu.memory_space<vmem>>, vector<8x8x48xf32>,
      %c0_22 = arith.constant 0 : index
      %c0_23 = arith.constant 0 : index
      %c0_24 = arith.constant 0 : index
      %23 = vector.load %arg7[%c0_22, %c0_23, %c0_24] : memref<10x10x48xf32, #tpu.memory_space<vmem>>, vector<10x10x48xf32>
      %cst_25 = arith.constant 0.000000e+00 : f32
      %24 = vector.broadcast %cst_25 : f32 to vector<8x8x48xf32>
      %c0_26 = arith.constant 0 : index
      %c0_27 = arith.constant 0 : index
      %c0_28 = arith.constant 0 : index
      %25 = vector.load %arg3[%c0_26, %c0_27, %c0_28] : memref<3x3x48xf32, #tpu.memory_space<vmem>>, vector<1x1x48xf32>
      %26 = vector.extract_strided_slice %23 {offsets = [0, 0, 0], sizes = [8, 8, 48], strides = [1, 1, 1]} : vector<10x10x48xf32> to vector<8x8x48xf32>
      %27 = vector.broadcast %25 : vector<1x1x48xf32> to vector<8x8x48xf32>
      %28 = arith.mulf %26, %27 : vector<8x8x48xf32>
      %29 = arith.addf %24, %28 : vector<8x8x48xf32>
      %c0_29 = arith.constant 0 : index
      %c1_30 = arith.constant 1 : index
      %c0_31 = arith.constant 0 : index
      %30 = vector.load %arg3[%c0_29, %c1_30, %c0_31] : memref<3x3x48xf32, #tpu.memory_space<vmem>>, vector<1x1x48xf32>
      %31 = vector.extract_strided_slice %23 {offsets = [0, 1, 0], sizes = [8, 8, 48], strides = [1, 1, 1]} : vector<10x10x48xf32> to vector<8x8x48xf32>
      %32 = vector.broadcast %30 : vector<1x1x48xf32> to vector<8x8x48xf32>
      %33 = arith.mulf %31, %32 : vector<8x8x48xf32>
      %34 = arith.addf %29, %33 : vector<8x8x48xf32>
      %c0_32 = arith.constant 0 : index
      %c2 = arith.constant 2 : index
      %c0_33 = arith.constant 0 : index
      %35 = vector.load %arg3[%c0_32, %c2, %c0_33] : memref<3x3x48xf32, #tpu.memory_space<vmem>>, vector<1x1x48xf32>
      %36 = vector.extract_strided_slice %23 {offsets = [0, 2, 0], sizes = [8, 8, 48], strides = [1, 1, 1]} : vector<10x10x48xf32> to vector<8x8x48xf32>
      %37 = vector.broadcast %35 : vector<1x1x48xf32> to vector<8x8x48xf32>
      %38 = arith.mulf %36, %37 : vector<8x8x48xf32>
      %39 = arith.addf %34, %38 : vector<8x8x48xf32>
      %c1_34 = arith.constant 1 : index
      %c0_35 = arith.constant 0 : index
      %c0_36 = arith.constant 0 : index
      %40 = vector.load %arg3[%c1_34, %c0_35, %c0_36] : memref<3x3x48xf32, #tpu.memory_space<vmem>>, vector<1x1x48xf32>
      %41 = vector.extract_strided_slice %23 {offsets = [1, 0, 0], sizes = [8, 8, 48], strides = [1, 1, 1]} : vector<10x10x48xf32> to vector<8x8x48xf32>
      %42 = vector.broadcast %40 : vector<1x1x48xf32> to vector<8x8x48xf32>
      %43 = arith.mulf %41, %42 : vector<8x8x48xf32>
      %44 = arith.addf %39, %43 : vector<8x8x48xf32>
      %c1_37 = arith.constant 1 : index
      %c1_38 = arith.constant 1 : index
      %c0_39 = arith.constant 0 : index
      %45 = vector.load %arg3[%c1_37, %c1_38, %c0_39] : memref<3x3x48xf32, #tpu.memory_space<vmem>>, vector<1x1x48xf32>
      %46 = vector.extract_strided_slice %23 {offsets = [1, 1, 0], sizes = [8, 8, 48], strides = [1, 1, 1]} : vector<10x10x48xf32> to vector<8x8x48xf32>
      %47 = vector.broadcast %45 : vector<1x1x48xf32> to vector<8x8x48xf32>
      %48 = arith.mulf %46, %47 : vector<8x8x48xf32>
      %49 = arith.addf %44, %48 : vector<8x8x48xf32>
      %c1_40 = arith.constant 1 : index
      %c2_41 = arith.constant 2 : index
      %c0_42 = arith.constant 0 : index
      %50 = vector.load %arg3[%c1_40, %c2_41, %c0_42] : memref<3x3x48xf32, #tpu.memory_space<vmem>>, vector<1x1x48xf32>
      %51 = vector.extract_strided_slice %23 {offsets = [1, 2, 0], sizes = [8, 8, 48], strides = [1, 1, 1]} : vector<10x10x48xf32> to vector<8x8x48xf32>
      %52 = vector.broadcast %50 : vector<1x1x48xf32> to vector<8x8x48xf32>
      %53 = arith.mulf %51, %52 : vector<8x8x48xf32>
      %54 = arith.addf %49, %53 : vector<8x8x48xf32>
      %c2_43 = arith.constant 2 : index
      %c0_44 = arith.constant 0 : index
      %c0_45 = arith.constant 0 : index
      %55 = vector.load %arg3[%c2_43, %c0_44, %c0_45] : memref<3x3x48xf32, #tpu.memory_space<vmem>>, vector<1x1x48xf32>
      %56 = vector.extract_strided_slice %23 {offsets = [2, 0, 0], sizes = [8, 8, 48], strides = [1, 1, 1]} : vector<10x10x48xf32> to vector<8x8x48xf32>
      %57 = vector.broadcast %55 : vector<1x1x48xf32> to vector<8x8x48xf32>
      %58 = arith.mulf %56, %57 : vector<8x8x48xf32>
      %59 = arith.addf %54, %58 : vector<8x8x48xf32>
      %c2_46 = arith.constant 2 : index
      %c1_47 = arith.constant 1 : index
      %c0_48 = arith.constant 0 : index
      %60 = vector.load %arg3[%c2_46, %c1_47, %c0_48] : memref<3x3x48xf32, #tpu.memory_space<vmem>>, vector<1x1x48xf32>
      %61 = vector.extract_strided_slice %23 {offsets = [2, 1, 0], sizes = [8, 8, 48], strides = [1, 1, 1]} : vector<10x10x48xf32> to vector<8x8x48xf32>
      %62 = vector.broadcast %60 : vector<1x1x48xf32> to vector<8x8x48xf32>
      %63 = arith.mulf %61, %62 : vector<8x8x48xf32>
      %64 = arith.addf %59, %63 : vector<8x8x48xf32>
      %c2_49 = arith.constant 2 : index
      %c2_50 = arith.constant 2 : index
      %c0_51 = arith.constant 0 : index
      %65 = vector.load %arg3[%c2_49, %c2_50, %c0_51] : memref<3x3x48xf32, #tpu.memory_space<vmem>>, vector<1x1x48xf32>
      %66 = vector.extract_strided_slice %23 {offsets = [2, 2, 0], sizes = [8, 8, 48], strides = [1, 1, 1]} : vector<10x10x48xf32> to vector<8x8x48xf32>
      %67 = vector.broadcast %65 : vector<1x1x48xf32> to vector<8x8x48xf32>
      %68 = arith.mulf %66, %67 : vector<8x8x48xf32>
      %69 = arith.addf %64, %68 : vector<8x8x48xf32>
      %70 = vector.shape_cast %69 : vector<8x8x48xf32> to vector<64x48xf32>
      %71 = arith.truncf %70 : vector<64x48xf32> to vector<64x48xbf16>
      %c0_52 = arith.constant 0 : index
      %c0_53 = arith.constant 0 : index
      %72 = vector.load %arg8[%c0_52, %c0_53] : memref<64x48xbf16, #tpu.memory_space<vmem>>, vector<64x48xbf16>
      tpu.vector_store %arg8[%c0_52, %c0_53], %71 {strides = array<i32>} : memref<64x48xbf16, #tpu.memory_space<vmem>>, vector<64x48xbf16>,
    } else {
    }
    %c0 = arith.constant 0 : index
    %c0_1 = arith.constant 0 : index
    %3 = vector.load %arg8[%c0, %c0_1] : memref<64x48xbf16, #tpu.memory_space<vmem>>, vector<64x48xbf16>
    %c0_2 = arith.constant 0 : index
    %c0_3 = arith.constant 0 : index
    %4 = vector.load %arg4[%c0_2, %c0_3] : memref<48x64xbf16, #tpu.memory_space<vmem>>, vector<48x64xbf16>
    %cst = arith.constant dense<0.000000e+00> : vector<64x64xf32>
    %5 = tpu.matmul %3, %4, %cst {dimension_numbers = #tpu.dot_dimension_numbers<[1], [0], [0], [1], [0, 0, 1, 1], [], []>} : vector<64x48xbf16>, vector<48x64xbf16>, vector<64x64xf32> -> vector<64x64xf32>
    %c0_4 = arith.constant 0 : index
    %c0_5 = arith.constant 0 : index
    %6 = vector.load %arg5[%c0_4, %c0_5] : memref<1x64xf32, #tpu.memory_space<vmem>>, vector<1x64xf32>
    %7 = vector.broadcast %6 : vector<1x64xf32> to vector<64x64xf32>
    %8 = arith.addf %5, %7 : vector<64x64xf32>
    %cst_6 = arith.constant 0.000000e+00 : f32
    %9 = vector.broadcast %cst_6 : f32 to vector<64x64xf32>
    %10 = arith.maximumf %8, %9 : vector<64x64xf32>
    %cst_7 = arith.constant dense<0.000000e+00> : vector<64xf32>
    %11 = vector.multi_reduction <add>, %10, %cst_7 [0] : vector<64x64xf32> to vector<64xf32>
    %12 = vector.shape_cast %11 : vector<64xf32> to vector<1x64xf32>
    %cst_8 = arith.constant 1.562500e-02 : f32
    %13 = vector.broadcast %cst_8 : f32 to vector<1x64xf32>
    %14 = arith.mulf %12, %13 : vector<1x64xf32>
    %c0_9 = arith.constant 0 : index
    %c0_10 = arith.constant 0 : index
    %c0_11 = arith.constant 0 : index
    %15 = vector.load %arg6[%c0_9, %c0_10, %c0_11] : memref<1x1x64xf32, #tpu.memory_space<vmem>>, vector<1x1x64xf32>
    %16 = vector.shape_cast %15 : vector<1x1x64xf32> to vector<1x64xf32>
    %17 = vector.shape_cast %14 : vector<1x64xf32> to vector<1x1x64xf32>
    tpu.vector_store %arg6[%c0_9, %c0_10, %c0_11], %17 {strides = array<i32>} : memref<1x1x64xf32, #tpu.memory_space<vmem>>, vector<1x1x64xf32>,
    return
  }
  func.func @transform_0(%arg0: i32, %arg1: i32) -> (i32, i32, i32, i32) {
    %c0_i32 = arith.constant 0 : i32
    %c0_i32_0 = arith.constant 0 : i32
    %c0_i32_1 = arith.constant 0 : i32
    %c0_i32_2 = arith.constant 0 : i32
    return %arg0, %c0_i32, %c0_i32_0, %c0_i32_1 : i32, i32, i32, i32
  }
  func.func @transform_1(%arg0: i32, %arg1: i32) -> (i32, i32, i32) {
    %c0_i32 = arith.constant 0 : i32
    %c0_i32_0 = arith.constant 0 : i32
    %c0_i32_1 = arith.constant 0 : i32
    %c0_i32_2 = arith.constant 0 : i32
    return %c0_i32, %c0_i32_0, %c0_i32_1 : i32, i32, i32
  }
  func.func @transform_2(%arg0: i32, %arg1: i32) -> (i32, i32) {
    %c0_i32 = arith.constant 0 : i32
    %c0_i32_0 = arith.constant 0 : i32
    return %c0_i32, %arg1 : i32, i32
  }
  func.func @transform_3(%arg0: i32, %arg1: i32) -> (i32, i32) {
    %c0_i32 = arith.constant 0 : i32
    %c0_i32_0 = arith.constant 0 : i32
    return %c0_i32, %arg1 : i32, i32
  }
  func.func @transform_4(%arg0: i32, %arg1: i32) -> (i32, i32, i32) {
    %c0_i32 = arith.constant 0 : i32
    %c0_i32_0 = arith.constant 0 : i32
    return %arg0, %c0_i32, %arg1 : i32, i32, i32
  }
}

</mosaic_0001>

<bundles_post_ra>
// kernel: exit_flow_forward.6
= control target key start
LH: loop header
LB: loop body
LE: loop exit
PB: predicated region body
PF: predicated region fallthrough
CT: control target
= control target key end

     0   :  { %s1190_s15 = smov 0   ;;  %s1192_s16 = smov 0   ;;  %s1654_s0 = inlined_call_operand.vmem [shape: f32[2,8,8,32], index: 0, kind: input, shape index: {}]   ;;  %s1655_s1 = inlined_call_operand.vmem [shape: f32[3,3,32], index: 1, kind: input, shape index: {}]   ;;  %s1656_s2 = inlined_call_operand.vmem [shape: bf16[32,48], index: 2, kind: input, shape index: {}]   ;;  %s1657_s3 = inlined_call_operand.vmem [shape: f32[1,48], index: 3, kind: input, shape index: {}]   ;;  %s1658_s4 = inlined_call_operand.vmem [shape: f32[2,8,8,48], index: 4, kind: output, shape index: {}]  }
   0x1   :  { %s1194_s17 = smov 0  }
   0x2 LB: > { %s26_s18 = sadd.s32 1, %s1158_s16  ;;  %p1050_p0 = scmp.ge.s32.totalorder %s1162_s17, 1  ;;  %s1162_s17 = sphi %s1194_s17, %s14_s17   ;;  %s1158_s16 = sphi %s1192_s16, %s1660_s16   ;;  %s1154_s15 = sphi %s1190_s15, %s1659_s15  }
   0x3   : > { %p28_p1 = scmp.ge.s32.totalorder %s26_s18, 2  ;;  %p193_p2 = scmp.lt.s32.totalorder %s1162_s17, 3 }
   0x5   : > { %s1662_s18 = smov (%p28_p1, %s26_s18), 0  ;;  %p194_p3 = pnand %p1050_p0, %p193_p2 }
   0x6   : > { %p229_p4 = scmp.lt.s32.totalorder (!%p194_p3), %s1154_s15, 1 }
   0x7   : > { %197 = sbr.rel (%p194_p3) target bundleno = 268 (0x10c), region = 36 }
   0xc   : > { %v1098_v0 = vld [vmem:[%s1656_s2 + $0x8] sm:$0xff]  ;;  %vm262_vm0 = vcmask 261120   ;;  %vm264_vm1 = vcmask 254976   ;;  %v1164_v1 = vmov 0.0   ;;  %v1097_v2 = vld [vmem:[%s1656_s2] sm:$0xff]  ;;  %s1664_s15 = smov (!%p229_p4, %s1154_s15), 1 }
   0xd   : > { %263 = vst.msk [vmem:[#allocation2] sm:$0xff] %vm262_vm0, %v1164_v1  ;;  %899 = vmatpush.bf16.msra.mxu0 %v1098_v0  ;;  %1099 = vmatpush.bf16.msra.mxu1 %v1098_v0  ;;  %s1091_s23 = sshll.u32 %s1664_s15, 6  ;;  %v1228_v3 = vld [vmem:[%s1655_s1 + $0x1] ss:$0 sm:$0xff]  ;;  %v1242_v4 = vld [vmem:[%s1655_s1 + $0x2] ss:$0 sm:$0xff] }
   0xe   : > { %265 = vst.msk [vmem:[#allocation2 + $0x8] sm:$0x3] %vm264_vm1, %v1164_v1  ;;  %1100 = vmatpush.bf16.msra.mxu2 %v1098_v0  ;;  %1101 = vmatpush.bf16.msra.mxu3 %v1098_v0  ;;  %s1235_s28 = scalar_lea.vmem %s1654_s0, %s1091_s23  ;;  %v1253_v7 = vld [vmem:[%s1655_s1] ss:$0 sm:$0xff]  ;;  %vm365_vm2 = vcmask 1046528   ;;  %vm440_vm3 = vcmask 1045504  }
   0xf   : > { %266 = vst.msk [vmem:[#allocation2 + $0x10] sm:$0xff] %vm262_vm0, %v1164_v1  ;;  %v254_v5 = vld [vmem:[%s1235_s28] sm:$0xff]  ;;  %v255_v6 = vld [vmem:[%s1235_s28 + $0x8] sm:$0xff]  ;;  %v256_v8 = vld [vmem:[%s1235_s28 + $0x10] sm:$0xff]  ;;  %vm823_vm4 = vcmask 257024   ;;  %vm930_vm5 = vcmask 392192  }
  0x10   : > { %267 = vst.msk [vmem:[#allocation2 + $0x18] sm:$0x3] %vm264_vm1, %v1164_v1  ;;  %v1272_v21 = vld [vmem:[%s1655_s1 + $0x4] ss:$0 sm:$0xff]  ;;  %v1280_v24 = vld [vmem:[%s1655_s1 + $0x5] ss:$0 sm:$0xff] }
  0x11   : > { %268 = vst.msk [vmem:[#allocation2 + $0x20] sm:$0xff] %vm262_vm0, %v1164_v1  ;;  %900 = vmatpush.bf16.msra.mxu0 %v1097_v2  ;;  %1102 = vmatpush.bf16.msra.mxu1 %v1097_v2  ;;  %v1295_v32 = vld [vmem:[%s1655_s1 + $0x6] ss:$0 sm:$0xff]  ;;  %v1309_v41 = vld [vmem:[%s1655_s1 + $0x8] ss:$0 sm:$0xff]  ;;  %v257_v51 = vld [vmem:[%s1235_s28 + $0x18] sm:$0xff] }
  0x12   : > { %269 = vst.msk [vmem:[#allocation2 + $0x28] sm:$0x3] %vm264_vm1, %v1164_v1  ;;  %1103 = vmatpush.bf16.msra.mxu2 %v1097_v2  ;;  %1104 = vmatpush.bf16.msra.mxu3 %v1097_v2  ;;  %v1331_v56 = vld [vmem:[%s1655_s1 + $0x9] ss:$0 sm:$0xff]  ;;  %v258_v61 = vld [vmem:[%s1235_s28 + $0x20] sm:$0xff] }
  0x13   : > { %270 = vst.msk [vmem:[#allocation2 + $0x30] sm:$0xff] %vm262_vm0, %v1164_v1 }
  0x14   : > { %271 = vst.msk [vmem:[#allocation2 + $0x38] sm:$0x3] %vm264_vm1, %v1164_v1  ;;  %v293_v9 = vld [vmem:[#allocation2] sm:$0xff] }
  0x15   : > { %285 = vst.msk [vmem:[#allocation2 + $0x11] sm:$0xff] %vm262_vm0, %v254_v5  ;;  %v294_v10 = vld [vmem:[#allocation2 + $0x8] sm:$0x3]  ;;  %v333_v11 = vmul.f32 %v1228_v3, %v293_v9  ;;  %v408_v12 = vmul.f32 %v1242_v4, %v293_v9  ;;  %v315_v15 = vmul.f32 %v1253_v7, %v293_v9 }
  0x16   : > { %286 = vst.msk [vmem:[#allocation2 + $0x21] sm:$0xff] %vm262_vm0, %v255_v6  ;;  %v334_v13 = vmul.f32 %v1228_v3, %v294_v10  ;;  %v409_v14 = vmul.f32 %v1242_v4, %v294_v10  ;;  %v259_v5 = vld [vmem:[%s1235_s28 + $0x28] sm:$0xff]  ;;  %v260_v6 = vld [vmem:[%s1235_s28 + $0x30] sm:$0xff] }
  0x17   : > { %287 = vst.msk [vmem:[#allocation2 + $0x31] sm:$0xff] %vm262_vm0, %v256_v8  ;;  %v366_v16 = vrot.slane %v333_v11, 1  ;;  %v441_v17 = vrot.slane %v408_v12, 2 }
  0x18   : > { %v367_v18 = vrot.slane %v334_v13, 1  ;;  %v442_v19 = vrot.slane %v409_v14, 2  ;;  %272 = vst.msk [vmem:[#allocation2 + $0x40] sm:$0xff] %vm262_vm0, %v1164_v1  ;;  %v1356_v13 = vld [vmem:[%s1655_s1 + $0xa] ss:$0 sm:$0xff] }
  0x19   : > { %273 = vst.msk [vmem:[#allocation2 + $0x48] sm:$0x3] %vm264_vm1, %v1164_v1 }
  0x1a   : > { %v368_v20 = vsel %vm365_vm2, %v366_v16, %v367_v18  ;;  %v443_v23 = vsel %vm440_vm3, %v441_v17, %v442_v19  ;;  %274 = vst.msk [vmem:[#allocation2 + $0x50] sm:$0xff] %vm262_vm0, %v1164_v1  ;;  %v261_v18 = vld [vmem:[%s1235_s28 + $0x38] sm:$0xff]  ;;  %s1627_s28 = scalar_lea.vmem %s1658_s4, %s1091_s23 }
  0x1b   : > { %v398_v22 = vadd.f32 %v368_v20, %v315_v15  ;;  %275 = vst.msk [vmem:[#allocation2 + $0x58] sm:$0x3] %vm264_vm1, %v1164_v1 }
  0x1c   : > { %v295_v25 = vld [vmem:[#allocation2 + $0x10] sm:$0xff]  ;;  %v296_v26 = vld [vmem:[#allocation2 + $0x18] sm:$0x3]  ;;  %276 = vst.msk [vmem:[#allocation2 + $0x60] sm:$0xff] %vm262_vm0, %v1164_v1 }
  0x1d   : > { %v1286_v27 = vld [vmem:[#allocation2 + $0x20] sm:$0xff]  ;;  %v316_v28 = vmul.f32 %v1253_v7, %v295_v25  ;;  %v335_v29 = vmul.f32 %v1228_v3, %v295_v25  ;;  %v336_v30 = vmul.f32 %v1228_v3, %v296_v26  ;;  %v410_v31 = vmul.f32 %v1242_v4, %v295_v25  ;;  %277 = vst.msk [vmem:[#allocation2 + $0x68] sm:$0x3] %vm264_vm1, %v1164_v1  ;;  %v1313_v42 = vld [vmem:[#allocation2 + $0x28] sm:$0x3] }
  0x1e   : > { %v411_v33 = vmul.f32 %v1242_v4, %v296_v26  ;;  %v473_v34 = vadd.f32 %v443_v23, %v398_v22  ;;  %v484_v35 = vmul.f32 %v1272_v21, %v295_v25  ;;  %v485_v36 = vmul.f32 %v1272_v21, %v1286_v27  ;;  %278 = vst.msk [vmem:[#allocation2 + $0x70] sm:$0xff] %vm262_vm0, %v1164_v1  ;;  %v1350_v8 = vld [vmem:[#allocation2 + $0x30] sm:$0xff]  ;;  %v1359_v14 = vld [vmem:[#allocation2 + $0x38] sm:$0x3] }
  0x1f   : > { %v369_v37 = vrot.slane %v335_v29, 1  ;;  %v370_v38 = vrot.slane %v336_v30, 1  ;;  %v444_v39 = vrot.slane %v410_v31, 2  ;;  %v502_v40 = vmul.f32 %v1280_v24, %v295_v25  ;;  %279 = vst.msk [vmem:[#allocation2 + $0x78] sm:$0x3] %vm264_vm1, %v1164_v1 }
  0x20   : > { %v445_v43 = vrot.slane %v411_v33, 2  ;;  %v492_v44 = vadd.f32 %v484_v35, %v473_v34  ;;  %v503_v45 = vmul.f32 %v1280_v24, %v296_v26  ;;  %v504_v46 = vmul.f32 %v1280_v24, %v1286_v27  ;;  %280 = vst.msk [vmem:[#allocation2 + $0x80] sm:$0xff] %vm262_vm0, %v1164_v1 }
  0x21   : > { %v371_v47 = vsel %vm365_vm2, %v369_v37, %v370_v38  ;;  %v505_v48 = vmul.f32 %v1280_v24, %v1313_v42  ;;  %v534_v49 = vrot.slane %v502_v40, 1  ;;  %v576_v50 = vmul.f32 %v1295_v32, %v295_v25  ;;  %281 = vst.msk [vmem:[#allocation2 + $0x88] sm:$0x3] %vm264_vm1, %v1164_v1 }
  0x22   : > { %v399_v52 = vadd.f32 %v371_v47, %v316_v28  ;;  %v446_v53 = vsel %vm440_vm3, %v444_v39, %v445_v43  ;;  %v535_v54 = vrot.slane %v503_v45, 1  ;;  %v537_v55 = vrot.slane %v504_v46, 1  ;;  %282 = vst.msk [vmem:[#allocation2 + $0x90] sm:$0xff] %vm262_vm0, %v1164_v1 }
  0x23   : > { %v538_v57 = vrot.slane %v505_v48, 1  ;;  %v577_v58 = vmul.f32 %v1295_v32, %v296_v26  ;;  %v578_v59 = vmul.f32 %v1295_v32, %v1286_v27  ;;  %v579_v60 = vmul.f32 %v1295_v32, %v1313_v42  ;;  %283 = vst.msk [vmem:[#allocation2 + $0x98] sm:$0x3] %vm264_vm1, %v1164_v1 }
  0x24   : > { %v474_v62 = vadd.f32 %v446_v53, %v399_v52  ;;  %v536_v63 = vsel %vm365_vm2, %v534_v49, %v535_v54  ;;  %v608_v0 = vrot.slane %v576_v50, 2  ;;  %v651_v2 = vmul.f32 %v1309_v41, %v1286_v27  ;;  %288 = vst.msk [vmem:[#allocation2 + $0x41] sm:$0xff] %vm262_vm0, %v257_v51 }
  0x25   : > { %v539_v9 = vsel %vm365_vm2, %v537_v55, %v538_v57  ;;  %v566_v10 = vadd.f32 %v536_v63, %v492_v44  ;;  %v609_v11 = vrot.slane %v577_v58, 2  ;;  %v611_v12 = vrot.slane %v578_v59, 2  ;;  %289 = vst.msk [vmem:[#allocation2 + $0x51] sm:$0xff] %vm262_vm0, %v258_v61 }
  0x26   : > { %v493_v1 = vadd.f32 %v485_v36, %v474_v62  ;;  %v612_v15 = vrot.slane %v579_v60, 2  ;;  %v652_v16 = vmul.f32 %v1309_v41, %v1350_v8  ;;  %v669_v17 = vmul.f32 %v1331_v56, %v1286_v27  ;;  %290 = vst.msk [vmem:[#allocation2 + $0x61] sm:$0xff] %vm262_vm0, %v259_v5 }
  0x27   : > { %v610_v19 = vsel %vm440_vm3, %v608_v0, %v609_v11  ;;  %v670_v20 = vmul.f32 %v1331_v56, %v1313_v42  ;;  %v671_v22 = vmul.f32 %v1331_v56, %v1350_v8  ;;  %v672_v23 = vmul.f32 %v1331_v56, %v1359_v14  ;;  %291 = vst.msk [vmem:[#allocation2 + $0x71] sm:$0xff] %vm262_vm0, %v260_v6 }
  0x28   : > { %v567_v25 = vadd.f32 %v539_v9, %v493_v1  ;;  %v613_v26 = vsel %vm440_vm3, %v611_v12, %v612_v15  ;;  %v640_v28 = vadd.f32 %v610_v19, %v566_v10  ;;  %v701_v29 = vrot.slane %v669_v17, 1  ;;  %292 = vst.msk [vmem:[#allocation2 + $0x81] sm:$0xff] %vm262_vm0, %v261_v18 }
  0x29   : > { %v702_v30 = vrot.slane %v670_v20, 1  ;;  %v704_v31 = vrot.slane %v671_v22, 1  ;;  %v705_v33 = vrot.slane %v672_v23, 1  ;;  %v743_v34 = vmul.f32 %v1356_v13, %v1286_v27 }
  0x2a   : > { %v641_v35 = vadd.f32 %v613_v26, %v567_v25  ;;  %v659_v36 = vadd.f32 %v651_v2, %v640_v28  ;;  %v744_v37 = vmul.f32 %v1356_v13, %v1313_v42  ;;  %v745_v38 = vmul.f32 %v1356_v13, %v1350_v8 }
  0x2b   : > { %v703_v39 = vsel %vm365_vm2, %v701_v29, %v702_v30  ;;  %v706_v40 = vsel %vm365_vm2, %v704_v31, %v705_v33  ;;  %v746_v43 = vmul.f32 %v1356_v13, %v1359_v14  ;;  %v775_v44 = vrot.slane %v743_v34, 2  ;;  %v1420_v25 = vld [vmem:[#allocation2 + $0x48] sm:$0x3] }
  0x2c   : > { %v660_v45 = vadd.f32 %v652_v16, %v641_v35  ;;  %v733_v46 = vadd.f32 %v703_v39, %v659_v36  ;;  %v776_v47 = vrot.slane %v744_v37, 2  ;;  %v778_v48 = vrot.slane %v745_v38, 2  ;;  %v1412_v16 = vld [vmem:[#allocation2 + $0x40] sm:$0xff] }
  0x2d   : > { %v779_v49 = vrot.slane %v746_v43, 2  ;;  %v317_v50 = vmul.f32 %v1253_v7, %v1286_v27  ;;  %v318_v51 = vmul.f32 %v1253_v7, %v1350_v8  ;;  %v337_v52 = vmul.f32 %v1228_v3, %v1286_v27 }
  0x2e   : > { %v734_v53 = vadd.f32 %v706_v40, %v660_v45  ;;  %v777_v54 = vsel %vm440_vm3, %v775_v44, %v776_v47  ;;  %v338_v55 = vmul.f32 %v1228_v3, %v1313_v42  ;;  %v339_v57 = vmul.f32 %v1228_v3, %v1350_v8 }
  0x2f   : > { %v780_v58 = vsel %vm440_vm3, %v778_v48, %v779_v49  ;;  %v807_v59 = vadd.f32 %v777_v54, %v733_v46  ;;  %v340_v60 = vmul.f32 %v1228_v3, %v1359_v14  ;;  %v372_v61 = vrot.slane %v337_v52, 1 }
  0x30   : > { %v808_v62 = vadd.f32 %v780_v58, %v734_v53  ;;  %v373_v63 = vrot.slane %v338_v55, 1  ;;  %v375_v0 = vrot.slane %v339_v57, 1  ;;  %v412_v2 = vmul.f32 %v1242_v4, %v1286_v27 }
  0x31   : > { %v815_v5 = vpack.c.bf16 %v807_v59, %v807_v59  ;;  %v376_v6 = vrot.slane %v340_v60, 1  ;;  %v413_v9 = vmul.f32 %v1242_v4, %v1313_v42  ;;  %v414_v10 = vmul.f32 %v1242_v4, %v1350_v8  ;;  %v1448_v59 = vld [vmem:[#allocation2 + $0x58] sm:$0x3] }
  0x32   : > { %v816_v11 = vpack.c.bf16 %v808_v62, %v808_v62  ;;  %v374_v12 = vsel %vm365_vm2, %v372_v61, %v373_v63  ;;  %v415_v1 = vmul.f32 %v1242_v4, %v1359_v14  ;;  %v447_v15 = vrot.slane %v412_v2, 2 }
  0x33   : > { %824 = vst.msk [vmem:[#allocation3] sm:$0xf] %vm823_vm4, %v815_v5  ;;  %v377_v27 = vsel %vm365_vm2, %v375_v0, %v376_v6  ;;  %v400_v17 = vadd.f32 %v374_v12, %v317_v50  ;;  %v448_v18 = vrot.slane %v413_v9, 2  ;;  %v450_v19 = vrot.slane %v414_v10, 2 }
  0x34   : > { %825 = vst.msk [vmem:[#allocation3 + $0x4] sm:$0xf] %vm823_vm4, %v816_v11  ;;  %v401_v42 = vadd.f32 %v377_v27, %v318_v51  ;;  %v451_v20 = vrot.slane %v415_v1, 2  ;;  %v486_v22 = vmul.f32 %v1272_v21, %v1350_v8  ;;  %v487_v23 = vmul.f32 %v1272_v21, %v1412_v16 }
  0x35   : > { %v449_v26 = vsel %vm440_vm3, %v447_v15, %v448_v18  ;;  %v506_v28 = vmul.f32 %v1280_v24, %v1350_v8  ;;  %v507_v29 = vmul.f32 %v1280_v24, %v1359_v14  ;;  %v508_v30 = vmul.f32 %v1280_v24, %v1412_v16 }
  0x36   : > { %v452_v31 = vsel %vm440_vm3, %v450_v19, %v451_v20  ;;  %v475_v33 = vadd.f32 %v449_v26, %v400_v17  ;;  %v509_v34 = vmul.f32 %v1280_v24, %v1420_v25  ;;  %v580_v35 = vmul.f32 %v1295_v32, %v1350_v8  ;;  %v1441_v8 = vld [vmem:[#allocation2 + $0x50] sm:$0xff] }
  0x37   : > { %v476_v36 = vadd.f32 %v452_v31, %v401_v42  ;;  %v540_v37 = vrot.slane %v506_v28, 1  ;;  %v541_v38 = vrot.slane %v507_v29, 1  ;;  %v543_v39 = vrot.slane %v508_v30, 1 }
  0x38   : > { %v494_v40 = vadd.f32 %v486_v22, %v475_v33  ;;  %v544_v43 = vrot.slane %v509_v34, 1  ;;  %v581_v44 = vmul.f32 %v1295_v32, %v1359_v14  ;;  %v582_v45 = vmul.f32 %v1295_v32, %v1412_v16 }
  0x39   : > { %v495_v46 = vadd.f32 %v487_v23, %v476_v36  ;;  %v542_v47 = vsel %vm365_vm2, %v540_v37, %v541_v38  ;;  %v583_v48 = vmul.f32 %v1295_v32, %v1420_v25  ;;  %v614_v49 = vrot.slane %v580_v35, 2 }
  0x3a   : > { %v545_v50 = vsel %vm365_vm2, %v543_v39, %v544_v43  ;;  %v568_v51 = vadd.f32 %v542_v47, %v494_v40  ;;  %v615_v52 = vrot.slane %v581_v44, 2  ;;  %v617_v53 = vrot.slane %v582_v45, 2 }
  0x3b   : > { %v1093_v54 = vld [vmem:[#allocation3] sm:$0xff]  ;;  %v569_v55 = vadd.f32 %v545_v50, %v495_v46  ;;  %v618_v14 = vrot.slane %v583_v48, 2  ;;  %v653_v57 = vmul.f32 %v1309_v41, %v1412_v16  ;;  %v654_v58 = vmul.f32 %v1309_v41, %v1441_v8 }
  0x3c   : > { %v616_v60 = vsel %vm440_vm3, %v614_v49, %v615_v52  ;;  %v673_v61 = vmul.f32 %v1331_v56, %v1412_v16  ;;  %v674_v62 = vmul.f32 %v1331_v56, %v1420_v25  ;;  %v675_v63 = vmul.f32 %v1331_v56, %v1441_v8  ;;  %1085 = vmatmul.msk.bf16.vlgmr.msra.gmra.mxu0 %vm262_vm0, %v1093_v54 }
  0x3d   : > { %v619_v0 = vsel %vm440_vm3, %v617_v53, %v618_v14  ;;  %v642_v2 = vadd.f32 %v616_v60, %v568_v51  ;;  %v676_v5 = vmul.f32 %v1331_v56, %v1448_v59  ;;  %v747_v6 = vmul.f32 %v1356_v13, %v1412_v16 }
  0x3e   : > { %v643_v9 = vadd.f32 %v619_v0, %v569_v55  ;;  %v707_v10 = vrot.slane %v673_v61, 1  ;;  %v708_v11 = vrot.slane %v674_v62, 1  ;;  %v710_v12 = vrot.slane %v675_v63, 1  ;;  %v1503_v0 = vld [vmem:[#allocation2 + $0x68] sm:$0x3] }
  0x3f   : > { %v661_v1 = vadd.f32 %v653_v57, %v642_v2  ;;  %v711_v15 = vrot.slane %v676_v5, 1  ;;  %v748_v27 = vmul.f32 %v1356_v13, %v1420_v25  ;;  %v749_v17 = vmul.f32 %v1356_v13, %v1441_v8 }
  0x40   : > { %v662_v18 = vadd.f32 %v654_v58, %v643_v9  ;;  %v709_v19 = vsel %vm365_vm2, %v707_v10, %v708_v11  ;;  %v750_v42 = vmul.f32 %v1356_v13, %v1448_v59  ;;  %v781_v20 = vrot.slane %v747_v6, 2 }
  0x41   : > { %v712_v22 = vsel %vm365_vm2, %v710_v12, %v711_v15  ;;  %v735_v23 = vadd.f32 %v709_v19, %v661_v1  ;;  %v782_v26 = vrot.slane %v748_v27, 2  ;;  %v784_v28 = vrot.slane %v749_v17, 2 }
  0x42   : > { %v736_v29 = vadd.f32 %v712_v22, %v662_v18  ;;  %v785_v30 = vrot.slane %v750_v42, 2  ;;  %v319_v31 = vmul.f32 %v1253_v7, %v1412_v16  ;;  %v320_v33 = vmul.f32 %v1253_v7, %v1441_v8 }
  0x43   : > { %v783_v34 = vsel %vm440_vm3, %v781_v20, %v782_v26  ;;  %v341_v35 = vmul.f32 %v1228_v3, %v1412_v16  ;;  %v342_v36 = vmul.f32 %v1228_v3, %v1420_v25  ;;  %v343_v37 = vmul.f32 %v1228_v3, %v1441_v8 }
  0x44   : > { %v786_v38 = vsel %vm440_vm3, %v784_v28, %v785_v30  ;;  %v809_v39 = vadd.f32 %v783_v34, %v735_v23  ;;  %v344_v40 = vmul.f32 %v1228_v3, %v1448_v59  ;;  %v416_v43 = vmul.f32 %v1242_v4, %v1412_v16  ;;  %v1495_v16 = vld [vmem:[#allocation2 + $0x60] sm:$0xff] }
  0x45   : > { %v810_v44 = vadd.f32 %v786_v38, %v736_v29  ;;  %v378_v45 = vrot.slane %v341_v35, 1  ;;  %v379_v46 = vrot.slane %v342_v36, 1  ;;  %v381_v47 = vrot.slane %v343_v37, 1 }
  0x46   : > { %v817_v48 = vpack.c.bf16 %v809_v39, %v809_v39  ;;  %v382_v49 = vrot.slane %v344_v40, 1  ;;  %v417_v50 = vmul.f32 %v1242_v4, %v1420_v25  ;;  %v418_v51 = vmul.f32 %v1242_v4, %v1441_v8  ;;  %v1531_v39 = vld [vmem:[#allocation2 + $0x78] sm:$0x3] }
  0x47   : > { %v818_v52 = vpack.c.bf16 %v810_v44, %v810_v44  ;;  %v380_v53 = vsel %vm365_vm2, %v378_v45, %v379_v46  ;;  %v419_v54 = vmul.f32 %v1242_v4, %v1448_v59  ;;  %v453_v55 = vrot.slane %v416_v43, 2 }
  0x48   : > { %826 = vst.msk [vmem:[#allocation3 + $0x8] sm:$0xf] %vm823_vm4, %v817_v48  ;;  %v383_v14 = vsel %vm365_vm2, %v381_v47, %v382_v49  ;;  %v402_v57 = vadd.f32 %v380_v53, %v319_v31  ;;  %v454_v58 = vrot.slane %v417_v50, 2  ;;  %v456_v60 = vrot.slane %v418_v51, 2 }
  0x49   : > { %827 = vst.msk [vmem:[#allocation3 + $0xc] sm:$0xf] %vm823_vm4, %v818_v52  ;;  %v403_v25 = vadd.f32 %v383_v14, %v320_v33  ;;  %v457_v61 = vrot.slane %v419_v54, 2  ;;  %v488_v62 = vmul.f32 %v1272_v21, %v1441_v8  ;;  %v489_v63 = vmul.f32 %v1272_v21, %v1495_v16 }
  0x4a   : > { %v455_v2 = vsel %vm440_vm3, %v453_v55, %v454_v58  ;;  %v510_v5 = vmul.f32 %v1280_v24, %v1441_v8  ;;  %v511_v6 = vmul.f32 %v1280_v24, %v1448_v59  ;;  %v512_v9 = vmul.f32 %v1280_v24, %v1495_v16 }
  0x4b   : > { %v458_v10 = vsel %vm440_vm3, %v456_v60, %v457_v61  ;;  %v477_v11 = vadd.f32 %v455_v2, %v402_v57  ;;  %v513_v12 = vmul.f32 %v1280_v24, %v1503_v0  ;;  %v584_v1 = vmul.f32 %v1295_v32, %v1441_v8  ;;  %v1524_v8 = vld [vmem:[#allocation2 + $0x70] sm:$0xff] }
  0x4c   : > { %v478_v15 = vadd.f32 %v458_v10, %v403_v25  ;;  %v546_v27 = vrot.slane %v510_v5, 1  ;;  %v547_v17 = vrot.slane %v511_v6, 1  ;;  %v549_v18 = vrot.slane %v512_v9, 1 }
  0x4d   : > { %v496_v19 = vadd.f32 %v488_v62, %v477_v11  ;;  %v550_v42 = vrot.slane %v513_v12, 1  ;;  %v585_v20 = vmul.f32 %v1295_v32, %v1448_v59  ;;  %v586_v22 = vmul.f32 %v1295_v32, %v1495_v16 }
  0x4e   : > { %v497_v23 = vadd.f32 %v489_v63, %v478_v15  ;;  %v548_v26 = vsel %vm365_vm2, %v546_v27, %v547_v17  ;;  %v587_v28 = vmul.f32 %v1295_v32, %v1503_v0  ;;  %v620_v29 = vrot.slane %v584_v1, 2 }
  0x4f   : > { %v551_v30 = vsel %vm365_vm2, %v549_v18, %v550_v42  ;;  %v570_v31 = vadd.f32 %v548_v26, %v496_v19  ;;  %v621_v33 = vrot.slane %v585_v20, 2  ;;  %v623_v34 = vrot.slane %v586_v22, 2 }
  0x50   : > { %v1094_v35 = vld [vmem:[#allocation3 + $0x8] sm:$0xff]  ;;  %v571_v36 = vadd.f32 %v551_v30, %v497_v23  ;;  %v624_v59 = vrot.slane %v587_v28, 2  ;;  %v655_v37 = vmul.f32 %v1309_v41, %v1495_v16  ;;  %v656_v38 = vmul.f32 %v1309_v41, %v1524_v8  ;;  %v309_v28 = vld [vmem:[#allocation2 + $0x80] sm:$0xff] }
  0x51   : > { %v622_v40 = vsel %vm440_vm3, %v620_v29, %v621_v33  ;;  %v677_v43 = vmul.f32 %v1331_v56, %v1495_v16  ;;  %v678_v44 = vmul.f32 %v1331_v56, %v1503_v0  ;;  %v679_v45 = vmul.f32 %v1331_v56, %v1524_v8  ;;  %1086 = vmatmul.msk.bf16.vlgmr.msra.gmra.mxu1 %vm262_vm0, %v1094_v35  ;;  %v310_v35 = vld [vmem:[#allocation2 + $0x88] sm:$0x3] }
  0x52   : > { %v625_v46 = vsel %vm440_vm3, %v623_v34, %v624_v59  ;;  %v644_v47 = vadd.f32 %v622_v40, %v570_v31  ;;  %v680_v48 = vmul.f32 %v1331_v56, %v1531_v39  ;;  %v751_v49 = vmul.f32 %v1356_v13, %v1495_v16 }
  0x53   : > { %v645_v50 = vadd.f32 %v625_v46, %v571_v36  ;;  %v713_v51 = vrot.slane %v677_v43, 1  ;;  %v714_v52 = vrot.slane %v678_v44, 1  ;;  %v716_v53 = vrot.slane %v679_v45, 1 }
  0x54   : > { %v663_v54 = vadd.f32 %v655_v37, %v644_v47  ;;  %v717_v55 = vrot.slane %v680_v48, 1  ;;  %v752_v14 = vmul.f32 %v1356_v13, %v1503_v0  ;;  %v753_v57 = vmul.f32 %v1356_v13, %v1524_v8 }
  0x55   : > { %v664_v58 = vadd.f32 %v656_v38, %v645_v50  ;;  %v715_v60 = vsel %vm365_vm2, %v713_v51, %v714_v52  ;;  %v754_v25 = vmul.f32 %v1356_v13, %v1531_v39  ;;  %v787_v61 = vrot.slane %v751_v49, 2 }
  0x56   : > { %v718_v62 = vsel %vm365_vm2, %v716_v53, %v717_v55  ;;  %v737_v63 = vadd.f32 %v715_v60, %v663_v54  ;;  %v788_v2 = vrot.slane %v752_v14, 2  ;;  %v790_v5 = vrot.slane %v753_v57, 2  ;;  %v311_v55 = vld [vmem:[#allocation2 + $0x90] sm:$0xff] }
  0x57   : > { %v738_v6 = vadd.f32 %v718_v62, %v664_v58  ;;  %v791_v9 = vrot.slane %v754_v25, 2  ;;  %v321_v10 = vmul.f32 %v1253_v7, %v1495_v16  ;;  %v322_v11 = vmul.f32 %v1253_v7, %v1524_v8 }
  0x58   : > { %v789_v12 = vsel %vm440_vm3, %v787_v61, %v788_v2  ;;  %v345_v1 = vmul.f32 %v1228_v3, %v1495_v16  ;;  %v346_v15 = vmul.f32 %v1228_v3, %v1503_v0  ;;  %v347_v27 = vmul.f32 %v1228_v3, %v1524_v8 }
  0x59   : > { %v792_v17 = vsel %vm440_vm3, %v790_v5, %v791_v9  ;;  %v811_v18 = vadd.f32 %v789_v12, %v737_v63  ;;  %v348_v19 = vmul.f32 %v1228_v3, %v1531_v39  ;;  %v420_v7 = vmul.f32 %v1242_v4, %v1495_v16  ;;  %v312_v63 = vld [vmem:[#allocation2 + $0x98] sm:$0x3] }
  0x5a   : > { %v812_v42 = vadd.f32 %v792_v17, %v738_v6  ;;  %v384_v20 = vrot.slane %v345_v1, 1  ;;  %v385_v22 = vrot.slane %v346_v15, 1  ;;  %v387_v23 = vrot.slane %v347_v27, 1 }
  0x5b   : > { %v819_v26 = vpack.c.bf16 %v811_v18, %v811_v18  ;;  %v388_v29 = vrot.slane %v348_v19, 1  ;;  %v421_v30 = vmul.f32 %v1242_v4, %v1503_v0  ;;  %v422_v31 = vmul.f32 %v1242_v4, %v1524_v8 }
  0x5c   : > { %v820_v33 = vpack.c.bf16 %v812_v42, %v812_v42  ;;  %v386_v34 = vsel %vm365_vm2, %v384_v20, %v385_v22  ;;  %v423_v3 = vmul.f32 %v1242_v4, %v1531_v39  ;;  %v459_v16 = vrot.slane %v420_v7, 2 }
  0x5d   : > { %828 = vst.msk [vmem:[#allocation3 + $0x10] sm:$0xf] %vm823_vm4, %v819_v26  ;;  %v389_v36 = vsel %vm365_vm2, %v387_v23, %v388_v29  ;;  %v404_v59 = vadd.f32 %v386_v34, %v321_v10  ;;  %v460_v37 = vrot.slane %v421_v30, 2  ;;  %v462_v38 = vrot.slane %v422_v31, 2 }
  0x5e   : > { %829 = vst.msk [vmem:[#allocation3 + $0x14] sm:$0xf] %vm823_vm4, %v820_v33  ;;  %v405_v0 = vadd.f32 %v389_v36, %v322_v11  ;;  %v463_v40 = vrot.slane %v423_v3, 2  ;;  %v490_v43 = vmul.f32 %v1272_v21, %v1524_v8  ;;  %v491_v44 = vmul.f32 %v1272_v21, %v309_v28 }
  0x5f   : > { %v461_v4 = vsel %vm440_vm3, %v459_v16, %v460_v37  ;;  %v514_v45 = vmul.f32 %v1280_v24, %v1524_v8  ;;  %v515_v46 = vmul.f32 %v1280_v24, %v1531_v39  ;;  %v516_v47 = vmul.f32 %v1280_v24, %v309_v28 }
  0x60   : > { %v464_v48 = vsel %vm440_vm3, %v462_v38, %v463_v40  ;;  %v479_v49 = vadd.f32 %v461_v4, %v404_v59  ;;  %v517_v50 = vmul.f32 %v1280_v24, %v310_v35  ;;  %v588_v51 = vmul.f32 %v1295_v32, %v1524_v8  ;;  %v1139_v4 = vld [vmem:[%s1657_s3] ss:$0 sm:$0xff] }
  0x61   : > { %v480_v52 = vadd.f32 %v464_v48, %v405_v0  ;;  %v552_v21 = vrot.slane %v514_v45, 1  ;;  %v553_v53 = vrot.slane %v515_v46, 1  ;;  %v555_v54 = vrot.slane %v516_v47, 1 }
  0x62   : > { %v498_v14 = vadd.f32 %v490_v43, %v479_v49  ;;  %v556_v57 = vrot.slane %v517_v50, 1  ;;  %v589_v58 = vmul.f32 %v1295_v32, %v1531_v39  ;;  %v590_v60 = vmul.f32 %v1295_v32, %v309_v28 }
  0x63   : > { %v499_v25 = vadd.f32 %v491_v44, %v480_v52  ;;  %v554_v61 = vsel %vm365_vm2, %v552_v21, %v553_v53  ;;  %v591_v24 = vmul.f32 %v1295_v32, %v310_v35  ;;  %v626_v62 = vrot.slane %v588_v51, 2 }
  0x64   : > { %v557_v8 = vsel %vm365_vm2, %v555_v54, %v556_v57  ;;  %v572_v2 = vadd.f32 %v554_v61, %v498_v14  ;;  %v627_v5 = vrot.slane %v589_v58, 2  ;;  %v629_v6 = vrot.slane %v590_v60, 2 }
  0x65   : > { %v1095_v9 = vld [vmem:[#allocation3 + $0x10] sm:$0xff]  ;;  %v573_v10 = vadd.f32 %v557_v8, %v499_v25  ;;  %v630_v11 = vrot.slane %v591_v24, 2  ;;  %v657_v12 = vmul.f32 %v1309_v41, %v309_v28  ;;  %v658_v39 = vmul.f32 %v1309_v41, %v311_v55 }
  0x66   : > { %v628_v1 = vsel %vm440_vm3, %v626_v62, %v627_v5  ;;  %v681_v15 = vmul.f32 %v1331_v56, %v309_v28  ;;  %v682_v32 = vmul.f32 %v1331_v56, %v310_v35  ;;  %v683_v27 = vmul.f32 %v1331_v56, %v311_v55  ;;  %1087 = vmatmul.msk.bf16.vlgmr.msra.gmra.mxu2 %vm262_vm0, %v1095_v9 }
  0x67   : > { %v631_v17 = vsel %vm440_vm3, %v629_v6, %v630_v11  ;;  %v646_v18 = vadd.f32 %v628_v1, %v572_v2  ;;  %v684_v19 = vmul.f32 %v1331_v56, %v312_v63  ;;  %v755_v7 = vmul.f32 %v1356_v13, %v309_v28 }
  0x68   : > { %v647_v42 = vadd.f32 %v631_v17, %v573_v10  ;;  %v719_v20 = vrot.slane %v681_v15, 1  ;;  %v720_v41 = vrot.slane %v682_v32, 1  ;;  %v722_v22 = vrot.slane %v683_v27, 1 }
  0x69   : > { %v665_v23 = vadd.f32 %v657_v12, %v646_v18  ;;  %v723_v26 = vrot.slane %v684_v19, 1  ;;  %v756_v29 = vmul.f32 %v1356_v13, %v310_v35  ;;  %v757_v30 = vmul.f32 %v1356_v13, %v311_v55 }
  0x6a   : > { %v666_v31 = vadd.f32 %v658_v39, %v647_v42  ;;  %v721_v33 = vsel %vm365_vm2, %v719_v20, %v720_v41  ;;  %v758_v34 = vmul.f32 %v1356_v13, %v312_v63  ;;  %v793_v3 = vrot.slane %v755_v7, 2 }
  0x6b   : > { %v724_v56 = vsel %vm365_vm2, %v722_v22, %v723_v26  ;;  %v739_v16 = vadd.f32 %v721_v33, %v665_v23  ;;  %v794_v28 = vrot.slane %v756_v29, 2  ;;  %v796_v36 = vrot.slane %v757_v30, 2 }
  0x6c   : > { %v740_v59 = vadd.f32 %v724_v56, %v666_v31  ;;  %v797_v37 = vrot.slane %v758_v34, 2 }
  0x6d   : > { %v795_v38 = vsel %vm440_vm3, %v793_v3, %v794_v28 }
  0x6e   : > { %v798_v35 = vsel %vm440_vm3, %v796_v36, %v797_v37  ;;  %v813_v0 = vadd.f32 %v795_v38, %v739_v16 }
  0x6f   : > { %v814_v40 = vadd.f32 %v798_v35, %v740_v59 }
  0x70   : > { %v821_v43 = vpack.c.bf16 %v813_v0, %v813_v0 }
  0x71   : > { %v822_v44 = vpack.c.bf16 %v814_v40, %v814_v40 }
  0x72   : > { %830 = vst.msk [vmem:[#allocation3 + $0x18] sm:$0xf] %vm823_vm4, %v821_v43 }
  0x73   : > { %831 = vst.msk [vmem:[#allocation3 + $0x1c] sm:$0xf] %vm823_vm4, %v822_v44 }
  0x7a   : > { %v1096_v13 = vld [vmem:[#allocation3 + $0x18] sm:$0xff] }
  0x7b   : > { %1088 = vmatmul.msk.bf16.vlgmr.msra.gmra.mxu3 %vm262_vm0, %v1096_v13 }
  0xb9   : > { %v902_v45 = vpop.f32.mrf.mxu0 }
  0xba   : > { %v903_v46 = vadd.f32 %v1139_v4, %v902_v45 }
  0xbc   : > { %v922_v47 = vmax.f32 %v903_v46, 0.0 }
  0xbe   : > { %931 = vst.msk [vmem:[%s1627_s28] sm:$0xff] %vm930_vm5, %v922_v47 }
  0xc1   : > { %v904_v51 = vpop.f32.mrf.mxu0 }
  0xc2   : > { %v905_v21 = vadd.f32 %v1139_v4, %v904_v51 }
  0xc4   : > { %v923_v54 = vmax.f32 %v905_v21, 0.0 }
  0xc6   : > { %932 = vst.msk [vmem:[%s1627_s28 + $0x8] sm:$0xff] %vm930_vm5, %v923_v54 }
  0xce   : > { %v907_v48 = vpop.f32.mrf.mxu1 }
  0xcf   : > { %v908_v49 = vadd.f32 %v1139_v4, %v907_v48 }
  0xd1   : > { %v924_v50 = vmax.f32 %v908_v49, 0.0 }
  0xd3   : > { %933 = vst.msk [vmem:[%s1627_s28 + $0x10] sm:$0xff] %vm930_vm5, %v924_v50 }
  0xd6   : > { %v909_v52 = vpop.f32.mrf.mxu1 }
  0xd7   : > { %v910_v53 = vadd.f32 %v1139_v4, %v909_v52 }
  0xd9   : > { %v925_v55 = vmax.f32 %v910_v53, 0.0 }
  0xdb   : > { %934 = vst.msk [vmem:[%s1627_s28 + $0x18] sm:$0xff] %vm930_vm5, %v925_v55 }
  0xe9   : > { %v912_v14 = vpop.f32.mrf.mxu2 }
  0xea   : > { %v913_v57 = vadd.f32 %v1139_v4, %v912_v14 }
  0xec   : > { %v926_v58 = vmax.f32 %v913_v57, 0.0 }
  0xee   : > { %935 = vst.msk [vmem:[%s1627_s28 + $0x20] sm:$0xff] %vm930_vm5, %v926_v58 }
  0xf1   : > { %v914_v60 = vpop.f32.mrf.mxu2 }
  0xf2   : > { %v915_v25 = vadd.f32 %v1139_v4, %v914_v60 }
  0xf4   : > { %v927_v61 = vmax.f32 %v915_v25, 0.0 }
  0xf6   : > { %936 = vst.msk [vmem:[%s1627_s28 + $0x28] sm:$0xff] %vm930_vm5, %v927_v61 }
  0xfe   : > { %v917_v24 = vpop.f32.mrf.mxu3 }
  0xff   : > { %v918_v62 = vadd.f32 %v1139_v4, %v917_v24 }
 0x101   : > { %v928_v63 = vmax.f32 %v918_v62, 0.0 }
 0x103   : > { %937 = vst.msk [vmem:[%s1627_s28 + $0x30] sm:$0xff] %vm930_vm5, %v928_v63 }
 0x106   : > { %v919_v8 = vpop.f32.mrf.mxu3 }
 0x107   : > { %v920_v2 = vadd.f32 %v1139_v4, %v919_v8 }
 0x109   : > { %v929_v5 = vmax.f32 %v920_v2, 0.0 }
 0x10b   : > { %938 = vst.msk [vmem:[%s1627_s28 + $0x38] sm:$0xff] %vm930_vm5, %v929_v5 }
 0x10c PF: > { %s14_s17 = sadd.s32 1, %s1162_s17   ;;  %s1659_s15 = smov %s1158_s16 }
 0x10d   : > { %p11_p5 = scmp.ge.s32.totalorder %s14_s17, 4   ;;  %s1660_s16 = smov %s1662_s18 }
 0x10f   :  { %13 = sbr.rel (!%p11_p5) target bundleno = 2 (0x2), region = 79 }

// kernel: exit_flow_forward.7
= control target key start
LH: loop header
LB: loop body
LE: loop exit
PB: predicated region body
PF: predicated region fallthrough
CT: control target
= control target key end

     0   :  { %9 = vsyncpa [#allocation5], 0  ;;  %s1811_s0 = inlined_call_operand.vmem [shape: f32[2,8,8,48], index: 0, kind: input, shape index: {}]   ;;  %s1812_s1 = inlined_call_operand.vmem [shape: f32[3,3,48], index: 1, kind: input, shape index: {}]   ;;  %s1813_s2 = inlined_call_operand.vmem [shape: bf16[48,64], index: 2, kind: input, shape index: {}]   ;;  %s1814_s3 = inlined_call_operand.vmem [shape: f32[1,64], index: 3, kind: input, shape index: {}]   ;;  %s1815_s4 = inlined_call_operand.hbm [shape: f32[2,1,64], index: 4, kind: output, shape index: {}]  }
   0x1   :  { %11 = vsyncpa [#allocation5 + $0x1], 0  ;;  %s1297_s15 = smov 0   ;;  %s1299_s16 = smov 0  }
   0x2   :  { %s1301_s17 = smov 0   ;;  %s1303_s18 = smov 0  }
   0x3   :  { %s1305_s19 = smov 0   ;;  %s1307_s20 = smov 0  }
   0x4 LB: > { %s1059_s21 = sadd.s32 4294967295, %s1269_s20   ;;  %s1060_s22 = sadd.s32 4294967294, %s1269_s20   ;;  %s1269_s20 = sphi %s1307_s20, %s17_s20   ;;  %s1265_s19 = sphi %s1305_s19, %s1822_s19   ;;  %s1261_s18 = sphi %s1303_s18, %s1821_s18   ;;  %s1257_s17 = sphi %s1301_s17, %s1820_s17   ;;  %s1253_s16 = sphi %s1299_s16, %s1819_s16   ;;  %s1249_s15 = sphi %s1297_s15, %s1818_s15  }
   0x5   : > { %s29_s23 = sadd.s32 1, %s1265_s19  ;;  %s137_s24 = sadd.s32 1, %s1257_s17 }
   0x6   : > { %p31_p0 = scmp.ge.s32.totalorder %s29_s23, 2  ;;  %p147_p1 = scmp.ne.s32.totalorder %s1257_s17, %s1253_s16 }
   0x7   : > { %p148_p2 = scmp.eq.s32.totalorder %s1059_s21, 1  ;;  %p153_p3 = scmp.ne.s32.totalorder %s1253_s16, %s1249_s15 }
   0x8   : > { %s1824_s23 = smov (%p31_p0, %s29_s23), 0  ;;  %p154_p5 = scmp.eq.s32.totalorder %s1060_s22, 1 }
   0x9   : > { %p1337_p4 = por %p148_p2, %p147_p1  ;;  %s132_s26 = ssub.s32 %s1265_s19, %s1824_s23 }
   0xa   : > { %p1065_p6 = scmp.ge.s32.totalorder %s1269_s20, 1  ;;  %p135_p7 = scmp.eq.s32.totalorder %s132_s26, 0 }
   0xb   : > { %p1344_p8 = por %p154_p5, %p153_p3  ;;  %p196_p9 = scmp.lt.s32.totalorder %s1269_s20, 3 }
   0xc   : > { %s1350_s28 = scalar_select %p135_p7, %s1257_s17, %s137_s24  }
   0xd   : > { %p197_p10 = pnand %p1065_p6, %p196_p9 }
   0xe   : > { %p228_p11 = scmp.lt.s32.totalorder (!%p197_p10), %s1261_s18, 1  ;;  %s226_s26 = sand.u32 (!%p197_p10), 1, %s1253_s16  }
   0xf   : > { %200 = sbr.rel (%p197_p10) target bundleno = 295 (0x127), region = 36  ;;  %s964_s5 = scalar_lea.hbm (!%p197_p10), %s1815_s4, %s1261_s18 }
  0x10   : > { %s227_s6 = scalar_lea.vmem (!%p197_p10), [#allocation4], %s226_s26  ;;  %s955_s9 = scalar_lea.sflag (!%p197_p10), [#allocation5], %s226_s26 }
  0x11   : > { %s1211_s14 = scalar_lea.hbm (!%p197_p10), %s1815_s4, 2 }
  0x14   : > { %v1115_v0 = vld [vmem:[%s1813_s2 + $0x10] sm:$0xff]  ;;  %vm253_vm0 = vcmask 392192   ;;  %v1271_v1 = vmov 0.0   ;;  %vm255_vm1 = vcmask 386048   ;;  %v1114_v2 = vld [vmem:[%s1813_s2 + $0x8] sm:$0xff]  ;;  %s229_s7 = scalar_select %p228_p11, %s1261_s18, 1 }
  0x15   : > { %254 = vst.msk [vmem:[#allocation2] sm:$0xff] %vm253_vm0, %v1271_v1  ;;  %897 = vmatpush.bf16.msra.mxu0 %v1115_v0  ;;  %1116 = vmatpush.bf16.msra.mxu1 %v1115_v0  ;;  %v1371_v3 = vld [vmem:[%s1812_s1 + $0x1] ss:$0 sm:$0xff]  ;;  %v1383_v4 = vld [vmem:[%s1812_s1 + $0x2] ss:$0 sm:$0xff]  ;;  %vm356_vm2 = vcmask 1046528  }
  0x16   : > { %256 = vst.msk [vmem:[#allocation2 + $0x8] sm:$0x3] %vm255_vm1, %v1271_v1  ;;  %1117 = vmatpush.bf16.msra.mxu2 %v1115_v0  ;;  %1118 = vmatpush.bf16.msra.mxu3 %v1115_v0  ;;  %s1108_s8 = sshll.u32 %s229_s7, 6  ;;  %v1113_v5 = vld [vmem:[%s1813_s2] sm:$0xff]  ;;  %vm431_vm3 = vcmask 1045504   ;;  %vm814_vm4 = vcmask 388096  }
  0x17   : > { %257 = vst.msk [vmem:[#allocation2 + $0x10] sm:$0xff] %vm253_vm0, %v1271_v1  ;;  %s1376_s13 = scalar_lea.vmem %s1811_s0, %s1108_s8  ;;  %v1397_v8 = vld [vmem:[%s1812_s1] ss:$0 sm:$0xff]  ;;  %v1416_v22 = vld [vmem:[%s1812_s1 + $0x4] ss:$0 sm:$0xff]  ;;  %vm929_vm5 = vcmask 523264  }
  0x18   : > { %258 = vst.msk [vmem:[#allocation2 + $0x18] sm:$0x3] %vm255_vm1, %v1271_v1  ;;  %v245_v6 = vld [vmem:[%s1376_s13] sm:$0xff]  ;;  %v246_v7 = vld [vmem:[%s1376_s13 + $0x8] sm:$0xff]  ;;  %v247_v9 = vld [vmem:[%s1376_s13 + $0x10] sm:$0xff]  ;;  %s966_s7 = sshll.u32 %s227_s6, 4  ;;  %s967_s7 = int_to_ptr.vmem [resolvable:$true] %s966_s7 }
  0x19   : > { %259 = vst.msk [vmem:[#allocation2 + $0x20] sm:$0xff] %vm253_vm0, %v1271_v1  ;;  %898 = vmatpush.bf16.msra.mxu0 %v1114_v2  ;;  %1119 = vmatpush.bf16.msra.mxu1 %v1114_v2  ;;  %v1424_v25 = vld [vmem:[%s1812_s1 + $0x5] ss:$0 sm:$0xff]  ;;  %v1439_v33 = vld [vmem:[%s1812_s1 + $0x6] ss:$0 sm:$0xff]  ;;  %v248_v52 = vld [vmem:[%s1376_s13 + $0x18] sm:$0xff] }
  0x1a   : > { %260 = vst.msk [vmem:[#allocation2 + $0x28] sm:$0x3] %vm255_vm1, %v1271_v1  ;;  %1120 = vmatpush.bf16.msra.mxu2 %v1114_v2  ;;  %1121 = vmatpush.bf16.msra.mxu3 %v1114_v2  ;;  %v1453_v42 = vld [vmem:[%s1812_s1 + $0x8] ss:$0 sm:$0xff]  ;;  %v1475_v57 = vld [vmem:[%s1812_s1 + $0x9] ss:$0 sm:$0xff] }
  0x1b   : > { %261 = vst.msk [vmem:[#allocation2 + $0x30] sm:$0xff] %vm253_vm0, %v1271_v1  ;;  %v249_v62 = vld [vmem:[%s1376_s13 + $0x20] sm:$0xff]  ;;  %s968_s8 = sshll.u32 %s964_s5, 4  ;;  %vm952_vm6 = vcmask 516096   ;;  %s969_s8 = int_to_ptr.hbm [resolvable:$true] %s968_s8 }
  0x1c   : > { %262 = vst.msk [vmem:[#allocation2 + $0x38] sm:$0x3] %vm255_vm1, %v1271_v1  ;;  %v284_v10 = vld [vmem:[#allocation2] sm:$0xff]  ;;  %s1205_s10 = sshra.s32 %s969_s8, 4  ;;  %s1206_s10 = int_to_ptr.hbm [resolvable:$true] %s1205_s10 }
  0x1d   : > { %276 = vst.msk [vmem:[#allocation2 + $0x11] sm:$0xff] %vm253_vm0, %v245_v6  ;;  %v285_v11 = vld [vmem:[#allocation2 + $0x8] sm:$0x3]  ;;  %v324_v12 = vmul.f32 %v1371_v3, %v284_v10  ;;  %v399_v13 = vmul.f32 %v1383_v4, %v284_v10  ;;  %899 = vmatpush.bf16.msra.mxu0 %v1113_v5  ;;  %1122 = vmatpush.bf16.msra.mxu1 %v1113_v5  ;;  %s1207_s11 = scalar_lea.hbm %s1206_s10, 1  ;;  %p1212_p1 = scmp.lt.s32.totalorder %s1206_s10, %s1815_s4 }
  0x1e   : > { %277 = vst.msk [vmem:[#allocation2 + $0x21] sm:$0xff] %vm253_vm0, %v246_v7  ;;  %v325_v14 = vmul.f32 %v1371_v3, %v285_v11  ;;  %v400_v15 = vmul.f32 %v1383_v4, %v285_v11  ;;  %1123 = vmatpush.bf16.msra.mxu2 %v1113_v5  ;;  %1124 = vmatpush.bf16.msra.mxu3 %v1113_v5  ;;  %v250_v6 = vld [vmem:[%s1376_s13 + $0x28] sm:$0xff]  ;;  %v251_v7 = vld [vmem:[%s1376_s13 + $0x30] sm:$0xff]  ;;  %p1208_p12 = scmp.ne.s32.totalorder %s1206_s10, %s1207_s11  ;;  %p1213_p2 = scmp.lt.s32.totalorder %s1211_s14, %s1207_s11 }
  0x1f   : > { %278 = vst.msk [vmem:[#allocation2 + $0x31] sm:$0xff] %vm253_vm0, %v247_v9  ;;  %v306_v16 = vmul.f32 %v1397_v8, %v284_v10  ;;  %v357_v17 = vrot.slane %v324_v12, 1  ;;  %v432_v18 = vrot.slane %v399_v13, 2 }
  0x20   : > { %v358_v19 = vrot.slane %v325_v14, 1  ;;  %v433_v20 = vrot.slane %v400_v15, 2  ;;  %263 = vst.msk [vmem:[#allocation2 + $0x40] sm:$0xff] %vm253_vm0, %v1271_v1  ;;  %v1500_v14 = vld [vmem:[%s1812_s1 + $0xa] ss:$0 sm:$0xff]  ;;  %p1209_p13 = pnand %p1208_p12, %p1337_p4  ;;  %p1214_p3 = por %p1213_p2, %p1212_p1 }
  0x21   : > { %264 = vst.msk [vmem:[#allocation2 + $0x48] sm:$0x3] %vm255_vm1, %v1271_v1 }
  0x22   : > { %v359_v21 = vsel %vm356_vm2, %v357_v17, %v358_v19  ;;  %v434_v24 = vsel %vm431_vm3, %v432_v18, %v433_v20  ;;  %265 = vst.msk [vmem:[#allocation2 + $0x50] sm:$0xff] %vm253_vm0, %v1271_v1  ;;  %v252_v19 = vld [vmem:[%s1376_s13 + $0x38] sm:$0xff]  ;;  %p1210_p0 = pneg %p1209_p13 }
  0x23   : > { %v389_v23 = vadd.f32 %v359_v21, %v306_v16  ;;  %266 = vst.msk [vmem:[#allocation2 + $0x58] sm:$0x3] %vm255_vm1, %v1271_v1 }
  0x24   : > { %v286_v26 = vld [vmem:[#allocation2 + $0x10] sm:$0xff]  ;;  %v287_v27 = vld [vmem:[#allocation2 + $0x18] sm:$0x3]  ;;  %267 = vst.msk [vmem:[#allocation2 + $0x60] sm:$0xff] %vm253_vm0, %v1271_v1  ;;  %p1215_p5 = pnand %p1214_p3, %p1210_p0 }
  0x25   : > { %v1430_v28 = vld [vmem:[#allocation2 + $0x20] sm:$0xff]  ;;  %v307_v29 = vmul.f32 %v1397_v8, %v286_v26  ;;  %v326_v30 = vmul.f32 %v1371_v3, %v286_v26  ;;  %v327_v31 = vmul.f32 %v1371_v3, %v287_v27  ;;  %v401_v32 = vmul.f32 %v1383_v4, %v286_v26  ;;  %268 = vst.msk [vmem:[#allocation2 + $0x68] sm:$0x3] %vm255_vm1, %v1271_v1  ;;  %v1457_v43 = vld [vmem:[#allocation2 + $0x28] sm:$0x3] }
  0x26   : > { %v402_v34 = vmul.f32 %v1383_v4, %v287_v27  ;;  %v464_v35 = vadd.f32 %v434_v24, %v389_v23  ;;  %v475_v36 = vmul.f32 %v1416_v22, %v286_v26  ;;  %v476_v37 = vmul.f32 %v1416_v22, %v1430_v28  ;;  %269 = vst.msk [vmem:[#allocation2 + $0x70] sm:$0xff] %vm253_vm0, %v1271_v1  ;;  %v1494_v9 = vld [vmem:[#allocation2 + $0x30] sm:$0xff]  ;;  %v1503_v15 = vld [vmem:[#allocation2 + $0x38] sm:$0x3] }
  0x27   : > { %v360_v38 = vrot.slane %v326_v30, 1  ;;  %v361_v39 = vrot.slane %v327_v31, 1  ;;  %v435_v40 = vrot.slane %v401_v32, 2  ;;  %v493_v41 = vmul.f32 %v1424_v25, %v286_v26  ;;  %270 = vst.msk [vmem:[#allocation2 + $0x78] sm:$0x3] %vm255_vm1, %v1271_v1 }
  0x28   : > { %v436_v44 = vrot.slane %v402_v34, 2  ;;  %v483_v45 = vadd.f32 %v475_v36, %v464_v35  ;;  %v494_v46 = vmul.f32 %v1424_v25, %v287_v27  ;;  %v495_v47 = vmul.f32 %v1424_v25, %v1430_v28  ;;  %271 = vst.msk [vmem:[#allocation2 + $0x80] sm:$0xff] %vm253_vm0, %v1271_v1 }
  0x29   : > { %v362_v48 = vsel %vm356_vm2, %v360_v38, %v361_v39  ;;  %v496_v49 = vmul.f32 %v1424_v25, %v1457_v43  ;;  %v525_v50 = vrot.slane %v493_v41, 1  ;;  %v567_v51 = vmul.f32 %v1439_v33, %v286_v26  ;;  %272 = vst.msk [vmem:[#allocation2 + $0x88] sm:$0x3] %vm255_vm1, %v1271_v1 }
  0x2a   : > { %v390_v53 = vadd.f32 %v362_v48, %v307_v29  ;;  %v437_v54 = vsel %vm431_vm3, %v435_v40, %v436_v44  ;;  %v526_v55 = vrot.slane %v494_v46, 1  ;;  %v528_v56 = vrot.slane %v495_v47, 1  ;;  %273 = vst.msk [vmem:[#allocation2 + $0x90] sm:$0xff] %vm253_vm0, %v1271_v1 }
  0x2b   : > { %v529_v58 = vrot.slane %v496_v49, 1  ;;  %v568_v59 = vmul.f32 %v1439_v33, %v287_v27  ;;  %v569_v60 = vmul.f32 %v1439_v33, %v1430_v28  ;;  %v570_v61 = vmul.f32 %v1439_v33, %v1457_v43  ;;  %274 = vst.msk [vmem:[#allocation2 + $0x98] sm:$0x3] %vm255_vm1, %v1271_v1 }
  0x2c   : > { %v465_v63 = vadd.f32 %v437_v54, %v390_v53  ;;  %v527_v0 = vsel %vm356_vm2, %v525_v50, %v526_v55  ;;  %v599_v2 = vrot.slane %v567_v51, 2  ;;  %v642_v5 = vmul.f32 %v1453_v42, %v1430_v28  ;;  %279 = vst.msk [vmem:[#allocation2 + $0x41] sm:$0xff] %vm253_vm0, %v248_v52 }
  0x2d   : > { %v530_v10 = vsel %vm356_vm2, %v528_v56, %v529_v58  ;;  %v557_v11 = vadd.f32 %v527_v0, %v483_v45  ;;  %v600_v12 = vrot.slane %v568_v59, 2  ;;  %v602_v13 = vrot.slane %v569_v60, 2  ;;  %280 = vst.msk [vmem:[#allocation2 + $0x51] sm:$0xff] %vm253_vm0, %v249_v62 }
  0x2e   : > { %v484_v1 = vadd.f32 %v476_v37, %v465_v63  ;;  %v603_v16 = vrot.slane %v570_v61, 2  ;;  %v643_v17 = vmul.f32 %v1453_v42, %v1494_v9  ;;  %v660_v18 = vmul.f32 %v1475_v57, %v1430_v28  ;;  %281 = vst.msk [vmem:[#allocation2 + $0x61] sm:$0xff] %vm253_vm0, %v250_v6 }
  0x2f   : > { %v601_v20 = vsel %vm431_vm3, %v599_v2, %v600_v12  ;;  %v661_v21 = vmul.f32 %v1475_v57, %v1457_v43  ;;  %v662_v23 = vmul.f32 %v1475_v57, %v1494_v9  ;;  %v663_v24 = vmul.f32 %v1475_v57, %v1503_v15  ;;  %282 = vst.msk [vmem:[#allocation2 + $0x71] sm:$0xff] %vm253_vm0, %v251_v7 }
  0x30   : > { %v558_v26 = vadd.f32 %v530_v10, %v484_v1  ;;  %v604_v27 = vsel %vm431_vm3, %v602_v13, %v603_v16  ;;  %v631_v29 = vadd.f32 %v601_v20, %v557_v11  ;;  %v692_v30 = vrot.slane %v660_v18, 1  ;;  %283 = vst.msk [vmem:[#allocation2 + $0x81] sm:$0xff] %vm253_vm0, %v252_v19 }
  0x31   : > { %v693_v31 = vrot.slane %v661_v21, 1  ;;  %v695_v32 = vrot.slane %v662_v23, 1  ;;  %v696_v34 = vrot.slane %v663_v24, 1  ;;  %v734_v35 = vmul.f32 %v1500_v14, %v1430_v28 }
  0x32   : > { %v632_v36 = vadd.f32 %v604_v27, %v558_v26  ;;  %v650_v37 = vadd.f32 %v642_v5, %v631_v29  ;;  %v735_v38 = vmul.f32 %v1500_v14, %v1457_v43  ;;  %v736_v39 = vmul.f32 %v1500_v14, %v1494_v9 }
  0x33   : > { %v694_v40 = vsel %vm356_vm2, %v692_v30, %v693_v31  ;;  %v697_v41 = vsel %vm356_vm2, %v695_v32, %v696_v34  ;;  %v737_v44 = vmul.f32 %v1500_v14, %v1503_v15  ;;  %v766_v45 = vrot.slane %v734_v35, 2  ;;  %v1564_v26 = vld [vmem:[#allocation2 + $0x48] sm:$0x3] }
  0x34   : > { %v651_v46 = vadd.f32 %v643_v17, %v632_v36  ;;  %v724_v47 = vadd.f32 %v694_v40, %v650_v37  ;;  %v767_v48 = vrot.slane %v735_v38, 2  ;;  %v769_v49 = vrot.slane %v736_v39, 2  ;;  %v1556_v17 = vld [vmem:[#allocation2 + $0x40] sm:$0xff] }
  0x35   : > { %v770_v50 = vrot.slane %v737_v44, 2  ;;  %v308_v51 = vmul.f32 %v1397_v8, %v1430_v28  ;;  %v309_v52 = vmul.f32 %v1397_v8, %v1494_v9  ;;  %v328_v53 = vmul.f32 %v1371_v3, %v1430_v28 }
  0x36   : > { %v725_v54 = vadd.f32 %v697_v41, %v651_v46  ;;  %v768_v55 = vsel %vm431_vm3, %v766_v45, %v767_v48  ;;  %v329_v56 = vmul.f32 %v1371_v3, %v1457_v43  ;;  %v330_v58 = vmul.f32 %v1371_v3, %v1494_v9 }
  0x37   : > { %v771_v59 = vsel %vm431_vm3, %v769_v49, %v770_v50  ;;  %v798_v60 = vadd.f32 %v768_v55, %v724_v47  ;;  %v331_v61 = vmul.f32 %v1371_v3, %v1503_v15  ;;  %v363_v62 = vrot.slane %v328_v53, 1 }
  0x38   : > { %v799_v63 = vadd.f32 %v771_v59, %v725_v54  ;;  %v364_v0 = vrot.slane %v329_v56, 1  ;;  %v366_v2 = vrot.slane %v330_v58, 1  ;;  %v403_v5 = vmul.f32 %v1383_v4, %v1430_v28 }
  0x39   : > { %v806_v6 = vpack.c.bf16 %v798_v60, %v798_v60  ;;  %v367_v7 = vrot.slane %v331_v61, 1  ;;  %v404_v10 = vmul.f32 %v1383_v4, %v1457_v43  ;;  %v405_v11 = vmul.f32 %v1383_v4, %v1494_v9  ;;  %v1592_v60 = vld [vmem:[#allocation2 + $0x58] sm:$0x3] }
  0x3a   : > { %v807_v12 = vpack.c.bf16 %v799_v63, %v799_v63  ;;  %v365_v13 = vsel %vm356_vm2, %v363_v62, %v364_v0  ;;  %v406_v1 = vmul.f32 %v1383_v4, %v1503_v15  ;;  %v438_v16 = vrot.slane %v403_v5, 2 }
  0x3b   : > { %815 = vst.msk [vmem:[#allocation3] sm:$0xf] %vm814_vm4, %v806_v6  ;;  %v368_v28 = vsel %vm356_vm2, %v366_v2, %v367_v7  ;;  %v391_v18 = vadd.f32 %v365_v13, %v308_v51  ;;  %v439_v19 = vrot.slane %v404_v10, 2  ;;  %v441_v20 = vrot.slane %v405_v11, 2 }
  0x3c   : > { %816 = vst.msk [vmem:[#allocation3 + $0x4] sm:$0xf] %vm814_vm4, %v807_v12  ;;  %v392_v43 = vadd.f32 %v368_v28, %v309_v52  ;;  %v442_v21 = vrot.slane %v406_v1, 2  ;;  %v477_v23 = vmul.f32 %v1416_v22, %v1494_v9  ;;  %v478_v24 = vmul.f32 %v1416_v22, %v1556_v17 }
  0x3d   : > { %v440_v27 = vsel %vm431_vm3, %v438_v16, %v439_v19  ;;  %v497_v29 = vmul.f32 %v1424_v25, %v1494_v9  ;;  %v498_v30 = vmul.f32 %v1424_v25, %v1503_v15  ;;  %v499_v31 = vmul.f32 %v1424_v25, %v1556_v17 }
  0x3e   : > { %v443_v32 = vsel %vm431_vm3, %v441_v20, %v442_v21  ;;  %v466_v34 = vadd.f32 %v440_v27, %v391_v18  ;;  %v500_v35 = vmul.f32 %v1424_v25, %v1564_v26  ;;  %v571_v36 = vmul.f32 %v1439_v33, %v1494_v9  ;;  %v1585_v9 = vld [vmem:[#allocation2 + $0x50] sm:$0xff] }
  0x3f   : > { %v467_v37 = vadd.f32 %v443_v32, %v392_v43  ;;  %v531_v38 = vrot.slane %v497_v29, 1  ;;  %v532_v39 = vrot.slane %v498_v30, 1  ;;  %v534_v40 = vrot.slane %v499_v31, 1 }
  0x40   : > { %v485_v41 = vadd.f32 %v477_v23, %v466_v34  ;;  %v535_v44 = vrot.slane %v500_v35, 1  ;;  %v572_v45 = vmul.f32 %v1439_v33, %v1503_v15  ;;  %v573_v46 = vmul.f32 %v1439_v33, %v1556_v17 }
  0x41   : > { %v486_v47 = vadd.f32 %v478_v24, %v467_v37  ;;  %v533_v48 = vsel %vm356_vm2, %v531_v38, %v532_v39  ;;  %v574_v49 = vmul.f32 %v1439_v33, %v1564_v26  ;;  %v605_v50 = vrot.slane %v571_v36, 2 }
  0x42   : > { %v536_v51 = vsel %vm356_vm2, %v534_v40, %v535_v44  ;;  %v559_v52 = vadd.f32 %v533_v48, %v485_v41  ;;  %v606_v53 = vrot.slane %v572_v45, 2  ;;  %v608_v54 = vrot.slane %v573_v46, 2 }
  0x43   : > { %v1109_v55 = vld [vmem:[#allocation3] sm:$0xff]  ;;  %v560_v56 = vadd.f32 %v536_v51, %v486_v47  ;;  %v609_v15 = vrot.slane %v574_v49, 2  ;;  %v644_v58 = vmul.f32 %v1453_v42, %v1556_v17  ;;  %v645_v59 = vmul.f32 %v1453_v42, %v1585_v9 }
  0x44   : > { %v607_v61 = vsel %vm431_vm3, %v605_v50, %v606_v53  ;;  %v664_v62 = vmul.f32 %v1475_v57, %v1556_v17  ;;  %v665_v63 = vmul.f32 %v1475_v57, %v1564_v26  ;;  %v666_v0 = vmul.f32 %v1475_v57, %v1585_v9  ;;  %1102 = vmatmul.msk.bf16.vlgmr.msra.gmra.mxu0 %vm253_vm0, %v1109_v55 }
  0x45   : > { %v610_v2 = vsel %vm431_vm3, %v608_v54, %v609_v15  ;;  %v633_v5 = vadd.f32 %v607_v61, %v559_v52  ;;  %v667_v6 = vmul.f32 %v1475_v57, %v1592_v60  ;;  %v738_v7 = vmul.f32 %v1500_v14, %v1556_v17 }
  0x46   : > { %v634_v10 = vadd.f32 %v610_v2, %v560_v56  ;;  %v698_v11 = vrot.slane %v664_v62, 1  ;;  %v699_v12 = vrot.slane %v665_v63, 1  ;;  %v701_v13 = vrot.slane %v666_v0, 1  ;;  %v1647_v2 = vld [vmem:[#allocation2 + $0x68] sm:$0x3] }
  0x47   : > { %v652_v1 = vadd.f32 %v644_v58, %v633_v5  ;;  %v702_v16 = vrot.slane %v667_v6, 1  ;;  %v739_v28 = vmul.f32 %v1500_v14, %v1564_v26  ;;  %v740_v18 = vmul.f32 %v1500_v14, %v1585_v9 }
  0x48   : > { %v653_v19 = vadd.f32 %v645_v59, %v634_v10  ;;  %v700_v20 = vsel %vm356_vm2, %v698_v11, %v699_v12  ;;  %v741_v43 = vmul.f32 %v1500_v14, %v1592_v60  ;;  %v772_v21 = vrot.slane %v738_v7, 2 }
  0x49   : > { %v703_v23 = vsel %vm356_vm2, %v701_v13, %v702_v16  ;;  %v726_v24 = vadd.f32 %v700_v20, %v652_v1  ;;  %v773_v27 = vrot.slane %v739_v28, 2  ;;  %v775_v29 = vrot.slane %v740_v18, 2 }
  0x4a   : > { %v727_v30 = vadd.f32 %v703_v23, %v653_v19  ;;  %v776_v31 = vrot.slane %v741_v43, 2  ;;  %v310_v32 = vmul.f32 %v1397_v8, %v1556_v17  ;;  %v311_v34 = vmul.f32 %v1397_v8, %v1585_v9 }
  0x4b   : > { %v774_v35 = vsel %vm431_vm3, %v772_v21, %v773_v27  ;;  %v332_v36 = vmul.f32 %v1371_v3, %v1556_v17  ;;  %v333_v37 = vmul.f32 %v1371_v3, %v1564_v26  ;;  %v334_v38 = vmul.f32 %v1371_v3, %v1585_v9 }
  0x4c   : > { %v777_v39 = vsel %vm431_vm3, %v775_v29, %v776_v31  ;;  %v800_v40 = vadd.f32 %v774_v35, %v726_v24  ;;  %v335_v41 = vmul.f32 %v1371_v3, %v1592_v60  ;;  %v407_v44 = vmul.f32 %v1383_v4, %v1556_v17  ;;  %v1639_v17 = vld [vmem:[#allocation2 + $0x60] sm:$0xff] }
  0x4d   : > { %v801_v45 = vadd.f32 %v777_v39, %v727_v30  ;;  %v369_v46 = vrot.slane %v332_v36, 1  ;;  %v370_v47 = vrot.slane %v333_v37, 1  ;;  %v372_v48 = vrot.slane %v334_v38, 1 }
  0x4e   : > { %v808_v49 = vpack.c.bf16 %v800_v40, %v800_v40  ;;  %v373_v50 = vrot.slane %v335_v41, 1  ;;  %v408_v51 = vmul.f32 %v1383_v4, %v1564_v26  ;;  %v409_v52 = vmul.f32 %v1383_v4, %v1585_v9  ;;  %v1675_v40 = vld [vmem:[#allocation2 + $0x78] sm:$0x3] }
  0x4f   : > { %v809_v53 = vpack.c.bf16 %v801_v45, %v801_v45  ;;  %v371_v54 = vsel %vm356_vm2, %v369_v46, %v370_v47  ;;  %v410_v55 = vmul.f32 %v1383_v4, %v1592_v60  ;;  %v444_v56 = vrot.slane %v407_v44, 2 }
  0x50   : > { %817 = vst.msk [vmem:[#allocation3 + $0x8] sm:$0xf] %vm814_vm4, %v808_v49  ;;  %v374_v15 = vsel %vm356_vm2, %v372_v48, %v373_v50  ;;  %v393_v58 = vadd.f32 %v371_v54, %v310_v32  ;;  %v445_v59 = vrot.slane %v408_v51, 2  ;;  %v447_v61 = vrot.slane %v409_v52, 2 }
  0x51   : > { %818 = vst.msk [vmem:[#allocation3 + $0xc] sm:$0xf] %vm814_vm4, %v809_v53  ;;  %v394_v26 = vadd.f32 %v374_v15, %v311_v34  ;;  %v448_v62 = vrot.slane %v410_v55, 2  ;;  %v479_v63 = vmul.f32 %v1416_v22, %v1585_v9  ;;  %v480_v0 = vmul.f32 %v1416_v22, %v1639_v17 }
  0x52   : > { %v446_v5 = vsel %vm431_vm3, %v444_v56, %v445_v59  ;;  %v501_v6 = vmul.f32 %v1424_v25, %v1585_v9  ;;  %v502_v7 = vmul.f32 %v1424_v25, %v1592_v60  ;;  %v503_v10 = vmul.f32 %v1424_v25, %v1639_v17 }
  0x53   : > { %v449_v11 = vsel %vm431_vm3, %v447_v61, %v448_v62  ;;  %v468_v12 = vadd.f32 %v446_v5, %v393_v58  ;;  %v504_v13 = vmul.f32 %v1424_v25, %v1647_v2  ;;  %v575_v1 = vmul.f32 %v1439_v33, %v1585_v9  ;;  %v1668_v9 = vld [vmem:[#allocation2 + $0x70] sm:$0xff] }
  0x54   : > { %v469_v16 = vadd.f32 %v449_v11, %v394_v26  ;;  %v537_v28 = vrot.slane %v501_v6, 1  ;;  %v538_v18 = vrot.slane %v502_v7, 1  ;;  %v540_v19 = vrot.slane %v503_v10, 1 }
  0x55   : > { %v487_v20 = vadd.f32 %v479_v63, %v468_v12  ;;  %v541_v43 = vrot.slane %v504_v13, 1  ;;  %v576_v21 = vmul.f32 %v1439_v33, %v1592_v60  ;;  %v577_v23 = vmul.f32 %v1439_v33, %v1639_v17 }
  0x56   : > { %v488_v24 = vadd.f32 %v480_v0, %v469_v16  ;;  %v539_v27 = vsel %vm356_vm2, %v537_v28, %v538_v18  ;;  %v578_v29 = vmul.f32 %v1439_v33, %v1647_v2  ;;  %v611_v30 = vrot.slane %v575_v1, 2 }
  0x57   : > { %v542_v31 = vsel %vm356_vm2, %v540_v19, %v541_v43  ;;  %v561_v32 = vadd.f32 %v539_v27, %v487_v20  ;;  %v612_v34 = vrot.slane %v576_v21, 2  ;;  %v614_v35 = vrot.slane %v577_v23, 2 }
  0x58   : > { %v1110_v36 = vld [vmem:[#allocation3 + $0x8] sm:$0xff]  ;;  %v562_v37 = vadd.f32 %v542_v31, %v488_v24  ;;  %v615_v60 = vrot.slane %v578_v29, 2  ;;  %v646_v38 = vmul.f32 %v1453_v42, %v1639_v17  ;;  %v647_v39 = vmul.f32 %v1453_v42, %v1668_v9  ;;  %v300_v29 = vld [vmem:[#allocation2 + $0x80] sm:$0xff] }
  0x59   : > { %v613_v41 = vsel %vm431_vm3, %v611_v30, %v612_v34  ;;  %v668_v44 = vmul.f32 %v1475_v57, %v1639_v17  ;;  %v669_v45 = vmul.f32 %v1475_v57, %v1647_v2  ;;  %v670_v46 = vmul.f32 %v1475_v57, %v1668_v9  ;;  %1103 = vmatmul.msk.bf16.vlgmr.msra.gmra.mxu1 %vm253_vm0, %v1110_v36  ;;  %v301_v36 = vld [vmem:[#allocation2 + $0x88] sm:$0x3] }
  0x5a   : > { %v616_v47 = vsel %vm431_vm3, %v614_v35, %v615_v60  ;;  %v635_v48 = vadd.f32 %v613_v41, %v561_v32  ;;  %v671_v49 = vmul.f32 %v1475_v57, %v1675_v40  ;;  %v742_v50 = vmul.f32 %v1500_v14, %v1639_v17 }
  0x5b   : > { %v636_v51 = vadd.f32 %v616_v47, %v562_v37  ;;  %v704_v52 = vrot.slane %v668_v44, 1  ;;  %v705_v53 = vrot.slane %v669_v45, 1  ;;  %v707_v54 = vrot.slane %v670_v46, 1 }
  0x5c   : > { %v654_v55 = vadd.f32 %v646_v38, %v635_v48  ;;  %v708_v56 = vrot.slane %v671_v49, 1  ;;  %v743_v15 = vmul.f32 %v1500_v14, %v1647_v2  ;;  %v744_v58 = vmul.f32 %v1500_v14, %v1668_v9 }
  0x5d   : > { %v655_v59 = vadd.f32 %v647_v39, %v636_v51  ;;  %v706_v61 = vsel %vm356_vm2, %v704_v52, %v705_v53  ;;  %v745_v26 = vmul.f32 %v1500_v14, %v1675_v40  ;;  %v778_v62 = vrot.slane %v742_v50, 2 }
  0x5e   : > { %v709_v63 = vsel %vm356_vm2, %v707_v54, %v708_v56  ;;  %v728_v0 = vadd.f32 %v706_v61, %v654_v55  ;;  %v779_v5 = vrot.slane %v743_v15, 2  ;;  %v781_v6 = vrot.slane %v744_v58, 2  ;;  %v302_v56 = vld [vmem:[#allocation2 + $0x90] sm:$0xff] }
  0x5f   : > { %v729_v7 = vadd.f32 %v709_v63, %v655_v59  ;;  %v782_v10 = vrot.slane %v745_v26, 2  ;;  %v312_v11 = vmul.f32 %v1397_v8, %v1639_v17  ;;  %v313_v12 = vmul.f32 %v1397_v8, %v1668_v9 }
  0x60   : > { %v780_v13 = vsel %vm431_vm3, %v778_v62, %v779_v5  ;;  %v336_v1 = vmul.f32 %v1371_v3, %v1639_v17  ;;  %v337_v16 = vmul.f32 %v1371_v3, %v1647_v2  ;;  %v338_v28 = vmul.f32 %v1371_v3, %v1668_v9 }
  0x61   : > { %v783_v18 = vsel %vm431_vm3, %v781_v6, %v782_v10  ;;  %v802_v19 = vadd.f32 %v780_v13, %v728_v0  ;;  %v339_v20 = vmul.f32 %v1371_v3, %v1675_v40  ;;  %v411_v8 = vmul.f32 %v1383_v4, %v1639_v17  ;;  %v303_v0 = vld [vmem:[#allocation2 + $0x98] sm:$0x3] }
  0x62   : > { %v803_v43 = vadd.f32 %v783_v18, %v729_v7  ;;  %v375_v21 = vrot.slane %v336_v1, 1  ;;  %v376_v23 = vrot.slane %v337_v16, 1  ;;  %v378_v24 = vrot.slane %v338_v28, 1 }
  0x63   : > { %v810_v27 = vpack.c.bf16 %v802_v19, %v802_v19  ;;  %v379_v30 = vrot.slane %v339_v20, 1  ;;  %v412_v31 = vmul.f32 %v1383_v4, %v1647_v2  ;;  %v413_v32 = vmul.f32 %v1383_v4, %v1668_v9 }
  0x64   : > { %v811_v34 = vpack.c.bf16 %v803_v43, %v803_v43  ;;  %v377_v35 = vsel %vm356_vm2, %v375_v21, %v376_v23  ;;  %v414_v3 = vmul.f32 %v1383_v4, %v1675_v40  ;;  %v450_v17 = vrot.slane %v411_v8, 2 }
  0x65   : > { %819 = vst.msk [vmem:[#allocation3 + $0x10] sm:$0xf] %vm814_vm4, %v810_v27  ;;  %v380_v37 = vsel %vm356_vm2, %v378_v24, %v379_v30  ;;  %v395_v60 = vadd.f32 %v377_v35, %v312_v11  ;;  %v451_v38 = vrot.slane %v412_v31, 2  ;;  %v453_v39 = vrot.slane %v413_v32, 2 }
  0x66   : > { %820 = vst.msk [vmem:[#allocation3 + $0x14] sm:$0xf] %vm814_vm4, %v811_v34  ;;  %v396_v2 = vadd.f32 %v380_v37, %v313_v12  ;;  %v454_v41 = vrot.slane %v414_v3, 2  ;;  %v481_v44 = vmul.f32 %v1416_v22, %v1668_v9  ;;  %v482_v45 = vmul.f32 %v1416_v22, %v300_v29 }
  0x67   : > { %v452_v4 = vsel %vm431_vm3, %v450_v17, %v451_v38  ;;  %v505_v46 = vmul.f32 %v1424_v25, %v1668_v9  ;;  %v506_v47 = vmul.f32 %v1424_v25, %v1675_v40  ;;  %v507_v48 = vmul.f32 %v1424_v25, %v300_v29 }
  0x68   : > { %v455_v49 = vsel %vm431_vm3, %v453_v39, %v454_v41  ;;  %v470_v50 = vadd.f32 %v452_v4, %v395_v60  ;;  %v508_v51 = vmul.f32 %v1424_v25, %v301_v36  ;;  %v579_v52 = vmul.f32 %v1439_v33, %v1668_v9 }
  0x69   : > { %v471_v53 = vadd.f32 %v455_v49, %v396_v2  ;;  %v543_v22 = vrot.slane %v505_v46, 1  ;;  %v544_v54 = vrot.slane %v506_v47, 1  ;;  %v546_v55 = vrot.slane %v507_v48, 1  ;;  %v1190_v48 = vld [vmem:[%s1814_s3] ss:$0 sm:$0xff] }
  0x6a   : > { %v489_v15 = vadd.f32 %v481_v44, %v470_v50  ;;  %v547_v58 = vrot.slane %v508_v51, 1  ;;  %v580_v59 = vmul.f32 %v1439_v33, %v1675_v40  ;;  %v581_v61 = vmul.f32 %v1439_v33, %v300_v29 }
  0x6b   : > { %v490_v26 = vadd.f32 %v482_v45, %v471_v53  ;;  %v545_v62 = vsel %vm356_vm2, %v543_v22, %v544_v54  ;;  %v582_v25 = vmul.f32 %v1439_v33, %v301_v36  ;;  %v617_v63 = vrot.slane %v579_v52, 2 }
  0x6c   : > { %v548_v9 = vsel %vm356_vm2, %v546_v55, %v547_v58  ;;  %v563_v5 = vadd.f32 %v545_v62, %v489_v15  ;;  %v618_v6 = vrot.slane %v580_v59, 2  ;;  %v620_v7 = vrot.slane %v581_v61, 2 }
  0x6d   : > { %v1111_v10 = vld [vmem:[#allocation3 + $0x10] sm:$0xff]  ;;  %v564_v11 = vadd.f32 %v548_v9, %v490_v26  ;;  %v621_v12 = vrot.slane %v582_v25, 2  ;;  %v648_v13 = vmul.f32 %v1453_v42, %v300_v29  ;;  %v649_v40 = vmul.f32 %v1453_v42, %v302_v56 }
  0x6e   : > { %v619_v1 = vsel %vm431_vm3, %v617_v63, %v618_v6  ;;  %v672_v16 = vmul.f32 %v1475_v57, %v300_v29  ;;  %v673_v33 = vmul.f32 %v1475_v57, %v301_v36  ;;  %v674_v28 = vmul.f32 %v1475_v57, %v302_v56  ;;  %1104 = vmatmul.msk.bf16.vlgmr.msra.gmra.mxu2 %vm253_vm0, %v1111_v10 }
  0x6f   : > { %v622_v18 = vsel %vm431_vm3, %v620_v7, %v621_v12  ;;  %v637_v19 = vadd.f32 %v619_v1, %v563_v5  ;;  %v675_v20 = vmul.f32 %v1475_v57, %v303_v0  ;;  %v746_v8 = vmul.f32 %v1500_v14, %v300_v29 }
  0x70   : > { %v638_v43 = vadd.f32 %v622_v18, %v564_v11  ;;  %v710_v21 = vrot.slane %v672_v16, 1  ;;  %v711_v42 = vrot.slane %v673_v33, 1  ;;  %v713_v23 = vrot.slane %v674_v28, 1 }
  0x71   : > { %v656_v24 = vadd.f32 %v648_v13, %v637_v19  ;;  %v714_v27 = vrot.slane %v675_v20, 1  ;;  %v747_v30 = vmul.f32 %v1500_v14, %v301_v36  ;;  %v748_v31 = vmul.f32 %v1500_v14, %v302_v56 }
  0x72   : > { %v657_v32 = vadd.f32 %v649_v40, %v638_v43  ;;  %v712_v34 = vsel %vm356_vm2, %v710_v21, %v711_v42  ;;  %v749_v35 = vmul.f32 %v1500_v14, %v303_v0  ;;  %v784_v3 = vrot.slane %v746_v8, 2 }
  0x73   : > { %v715_v57 = vsel %vm356_vm2, %v713_v23, %v714_v27  ;;  %v730_v17 = vadd.f32 %v712_v34, %v656_v24  ;;  %v785_v29 = vrot.slane %v747_v30, 2  ;;  %v787_v37 = vrot.slane %v748_v31, 2 }
  0x74   : > { %v731_v60 = vadd.f32 %v715_v57, %v657_v32  ;;  %v788_v38 = vrot.slane %v749_v35, 2 }
  0x75   : > { %v786_v39 = vsel %vm431_vm3, %v784_v3, %v785_v29 }
  0x76   : > { %v789_v2 = vsel %vm431_vm3, %v787_v37, %v788_v38  ;;  %v804_v36 = vadd.f32 %v786_v39, %v730_v17 }
  0x77   : > { %v805_v41 = vadd.f32 %v789_v2, %v731_v60 }
  0x78   : > { %v812_v44 = vpack.c.bf16 %v804_v36, %v804_v36 }
  0x79   : > { %v813_v45 = vpack.c.bf16 %v805_v41, %v805_v41 }
  0x7a   : > { %821 = vst.msk [vmem:[#allocation3 + $0x18] sm:$0xf] %vm814_vm4, %v812_v44 }
  0x7b   : > { %822 = vst.msk [vmem:[#allocation3 + $0x1c] sm:$0xf] %vm814_vm4, %v813_v45 }
  0x82   : > { %v1112_v14 = vld [vmem:[#allocation3 + $0x18] sm:$0xff] }
  0x83   : > { %1105 = vmatmul.msk.bf16.vlgmr.msra.gmra.mxu3 %vm253_vm0, %v1112_v14 }
  0xc1   : > { %v901_v4 = vpop.f32.mrf.mxu0 }
  0xc2   : > { %v902_v50 = vadd.f32 %v1190_v48, %v901_v4 }
  0xc4   : > { %v921_v53 = vmax.f32 %v902_v50, 0.0 }
  0xc6   : > { %v930_v56 = vsel %vm929_vm5, %v921_v53, 0.0 }
  0xc9   : > { %v903_v47 = vpop.f32.mrf.mxu0 }
  0xca   : > { %v904_v49 = vadd.f32 %v1190_v48, %v903_v47 }
  0xcc   : > { %v922_v51 = vmax.f32 %v904_v49, 0.0 }
  0xce   : > { %v931_v55 = vsel %vm929_vm5, %v922_v51, 0.0 }
  0xcf   : > { %v932_v59 = vadd.f32 %v931_v55, %v930_v56 }
  0xd6   : > { %v906_v46 = vpop.f32.mrf.mxu1 }
  0xd7   : > { %v907_v22 = vadd.f32 %v1190_v48, %v906_v46 }
  0xd9   : > { %v923_v15 = vmax.f32 %v907_v22, 0.0 }
  0xdb   : > { %v933_v61 = vsel %vm929_vm5, %v923_v15, 0.0 }
  0xdc   : > { %v934_v25 = vadd.f32 %v933_v61, %v932_v59 }
  0xde   : > { %v908_v54 = vpop.f32.mrf.mxu1 }
  0xdf   : > { %v909_v58 = vadd.f32 %v1190_v48, %v908_v54 }
  0xe1   : > { %v924_v62 = vmax.f32 %v909_v58, 0.0 }
  0xe3   : > { %v935_v9 = vsel %vm929_vm5, %v924_v62, 0.0 }
  0xe4   : > { %v936_v6 = vadd.f32 %v935_v9, %v934_v25 }
  0xf1   : > { %v911_v52 = vpop.f32.mrf.mxu2 }
  0xf2   : > { %v912_v26 = vadd.f32 %v1190_v48, %v911_v52 }
  0xf4   : > { %v925_v0 = vmax.f32 %v912_v26, 0.0 }
  0xf6   : > { %v937_v10 = vsel %vm929_vm5, %v925_v0, 0.0 }
  0xf7   : > { %v938_v13 = vadd.f32 %v937_v10, %v936_v6 }
  0xf9   : > { %v913_v63 = vpop.f32.mrf.mxu2 }
  0xfa   : > { %v914_v5 = vadd.f32 %v1190_v48, %v913_v63 }
  0xfc   : > { %v926_v12 = vmax.f32 %v914_v5, 0.0 }
  0xfe   : > { %v939_v1 = vsel %vm929_vm5, %v926_v12, 0.0 }
  0xff   : > { %v940_v16 = vadd.f32 %v939_v1, %v938_v13 }
 0x106   : > { %v916_v7 = vpop.f32.mrf.mxu3 }
 0x107   : > { %v917_v11 = vadd.f32 %v1190_v48, %v916_v7 }
 0x109   : > { %v927_v40 = vmax.f32 %v917_v11, 0.0 }
 0x10b   : > { %v941_v28 = vsel %vm929_vm5, %v927_v40, 0.0 }
 0x10c   : > { %v942_v19 = vadd.f32 %v941_v28, %v940_v16 }
 0x10e   : > { %v918_v33 = vpop.f32.mrf.mxu3 }
 0x10f   : > { %v919_v18 = vadd.f32 %v1190_v48, %v918_v33 }
 0x111   : > { %v928_v20 = vmax.f32 %v919_v18, 0.0 }
 0x113   : > { %v943_v8 = vsel %vm929_vm5, %v928_v20, 0.0 }
 0x114   : > { %v944_v43 = vadd.f32 %v943_v8, %v942_v19 }
 0x116   : > { %v945_v21 = vrot.slane %v944_v43, 4 }
 0x118   : > { %v946_v42 = vadd.f32 %v945_v21, %v944_v43 }
 0x11a   : > { %v947_v23 = vrot.slane %v946_v42, 2 }
 0x11c   : > { %v948_v24 = vadd.f32 %v947_v23, %v946_v42 }
 0x11e   : > { %v949_v27 = vrot.slane %v948_v24, 1 }
 0x120   : > { %v950_v30 = vadd.f32 %v949_v27, %v948_v24 }
 0x122   : > { %v951_v31 = vmul.f32 0.015625, %v950_v30 }
 0x124   : > { %953 = vst.msk [vmem:[%s227_s6] sm:$0x1] %vm952_vm6, %v951_v31 }
 0x125   : > { %1218 = shalt.err (!%p1215_p5)
}
 0x126   : > { %1125 = dma.vmem_to_hbm [thread:$0]  (%p1337_p4), %s967_s7, 16, %s969_s8, %s955_s9  }
 0x127 PF: > { %p1131_p6 = scmp.ge.s32.totalorder %s1269_s20, 2  ;;  %s980_s13 = sand.u32 1, %s1249_s15  }
 0x128   : > { %s981_s24 = scalar_lea.sflag [#allocation5], %s980_s13 }
 0x129   : > { %p1128_p7 = pnand %p1131_p6, %p1344_p8 }
 0x12b   : > { %p1129_p9 = pneg %p1128_p7 }
 0x12d   : > { %1244 = dma.done.wait (%p1129_p9), %s981_s24, 16  }
 0x12e   : > { %1246 = vsyncadd (%p1129_p9), %s981_s24, 4294967280  ;;  %s17_s20 = sadd.s32 1, %s1269_s20   ;;  %s1818_s15 = smov %s1253_s16 }
 0x12f   : > { %p14_p10 = scmp.ge.s32.totalorder %s17_s20, 4   ;;  %s1819_s16 = smov %s1257_s17 }
 0x130   : > { %s1820_s17 = smov %s1350_s28  ;;  %s1821_s18 = smov %s1265_s19 }
 0x131   : > { %s1822_s19 = smov %s1824_s23  ;;  %16 = sbr.rel (!%p14_p10) target bundleno = 4 (0x4), region = 84 }
 0x136   :  { %986 = vsyncpa [#allocation5], 1 }
 0x137   :  { %988 = vsyncpa [#allocation5 + $0x1], 1 }

// kernel: exit_flow_forward.4
= control target key start
LH: loop header
LB: loop body
LE: loop exit
PB: predicated region body
PF: predicated region fallthrough
CT: control target
= control target key end

     0   :  { %s2849_s15 = smov 0   ;;  %s2851_s16 = smov 0   ;;  %s4298_s0 = inlined_call_operand.vmem [shape: f32[2,16,16,16], index: 0, kind: input, shape index: {}]   ;;  %s4299_s1 = inlined_call_operand.vmem [shape: f32[3,3,16], index: 1, kind: input, shape index: {}]   ;;  %s4300_s2 = inlined_call_operand.vmem [shape: bf16[16,16], index: 2, kind: input, shape index: {}]   ;;  %s4301_s3 = inlined_call_operand.vmem [shape: f32[1,16], index: 3, kind: input, shape index: {}]   ;;  %s4302_s4 = inlined_call_operand.vmem [shape: f32[2,16,16,16], index: 4, kind: output, shape index: {}]  }
   0x1   :  { %s2853_s17 = smov 0  }
   0x2 LB: > { %s26_s18 = sadd.s32 1, %s2817_s16  ;;  %p2585_p0 = scmp.ge.s32.totalorder %s2821_s17, 1  ;;  %s2821_s17 = sphi %s2853_s17, %s14_s17   ;;  %s2817_s16 = sphi %s2851_s16, %s4304_s16   ;;  %s2813_s15 = sphi %s2849_s15, %s4303_s15  }
   0x3   : > { %p28_p1 = scmp.ge.s32.totalorder %s26_s18, 2  ;;  %p193_p2 = scmp.lt.s32.totalorder %s2821_s17, 3 }
   0x5   : > { %s4306_s18 = smov (%p28_p1, %s26_s18), 0  ;;  %p194_p3 = pnand %p2585_p0, %p193_p2 }
   0x6   : > { %p229_p4 = scmp.lt.s32.totalorder (!%p194_p3), %s2813_s15, 1 }
   0x7   : > { %197 = sbr.rel (%p194_p3) target bundleno = 510 (0x1fe), region = 36 }
   0xc   : > { %v2700_v0 = vld [vmem:[%s4300_s2] sm:$0xff]  ;;  %vm318_vm0 = vcmask 130048   ;;  %vm321_vm1 = vcmask 123904   ;;  %v2823_v1 = vmov 0.0   ;;  %s4308_s15 = smov (!%p229_p4, %s2813_s15), 1  ;;  %vm625_vm2 = vcmask 1046528  }
   0xd   : > { %319 = vst.msk [vmem:[#allocation2] sm:$0xff] %vm318_vm0, %v2823_v1  ;;  %2360 = vmatpush.bf16.msra.mxu0 %v2700_v0  ;;  %2701 = vmatpush.bf16.msra.mxu1 %v2700_v0  ;;  %s2682_s21 = sshll.u32 %s4308_s15, 8  ;;  %v2884_v2 = vld [vmem:[%s4299_s1] ss:$0 sm:$0xff]  ;;  %v2889_v3 = vld [vmem:[%s4299_s1 + $0x1] ss:$0 sm:$0xff] }
   0xe   : > { %320 = vst.msk [vmem:[#allocation2 + $0x8] sm:$0xff] %vm318_vm0, %v2823_v1  ;;  %2702 = vmatpush.bf16.msra.mxu2 %v2700_v0  ;;  %2703 = vmatpush.bf16.msra.mxu3 %v2700_v0  ;;  %s2896_s28 = scalar_lea.vmem %s4298_s0, %s2682_s21  ;;  %v2903_v4 = vld [vmem:[%s4299_s1 + $0x2] ss:$0 sm:$0xff]  ;;  %vm868_vm3 = vcmask 1045504   ;;  %v2931_v28 = vld [vmem:[%s4299_s1 + $0x4] ss:$0 sm:$0xff]  ;;  %s4180_s19 = scalar_lea.vmem %s4302_s4, %s2682_s21 }
   0xf   : > { %322 = vst.msk [vmem:[#allocation2 + $0x10] sm:$0x3] %vm321_vm1, %v2823_v1  ;;  %v254_v5 = vld [vmem:[%s2896_s28] sm:$0xff]  ;;  %v255_v6 = vld [vmem:[%s2896_s28 + $0x8] sm:$0xff]  ;;  %v256_v7 = vld [vmem:[%s2896_s28 + $0x10] sm:$0xff]  ;;  %vm2147_vm4 = vcmask 125952  }
  0x10   : > { %323 = vst.msk [vmem:[#allocation2 + $0x18] sm:$0xff] %vm318_vm0, %v2823_v1  ;;  %v257_v8 = vld [vmem:[%s2896_s28 + $0x18] sm:$0xff]  ;;  %v286_v9 = vmax.f32 %v254_v5, 0.0  ;;  %v287_v10 = vmax.f32 %v255_v6, 0.0  ;;  %v288_v11 = vmax.f32 %v256_v7, 0.0 }
  0x11   : > { %324 = vst.msk [vmem:[#allocation2 + $0x20] sm:$0xff] %vm318_vm0, %v2823_v1  ;;  %v289_v13 = vmax.f32 %v257_v8, 0.0  ;;  %v2937_v31 = vld [vmem:[%s4299_s1 + $0x5] ss:$0 sm:$0xff]  ;;  %v2944_v34 = vld [vmem:[%s4299_s1 + $0x6] ss:$0 sm:$0xff] }
  0x12   : > { %325 = vst.msk [vmem:[#allocation2 + $0x28] sm:$0x3] %vm321_vm1, %v2823_v1  ;;  %v2959_v41 = vld [vmem:[%s4299_s1 + $0x8] ss:$0 sm:$0xff]  ;;  %v2976_v48 = vld [vmem:[%s4299_s1 + $0x9] ss:$0 sm:$0xff] }
  0x13   : > { %326 = vst.msk [vmem:[#allocation2 + $0x30] sm:$0xff] %vm318_vm0, %v2823_v1  ;;  %v2999_v59 = vld [vmem:[%s4299_s1 + $0xa] ss:$0 sm:$0xff] }
  0x14   : > { %327 = vst.msk [vmem:[#allocation2 + $0x38] sm:$0xff] %vm318_vm0, %v2823_v1  ;;  %v407_v12 = vld [vmem:[#allocation2] sm:$0xff] }
  0x15   : > { %328 = vst.msk [vmem:[#allocation2 + $0x40] sm:$0x3] %vm321_vm1, %v2823_v1  ;;  %v408_v14 = vld [vmem:[#allocation2 + $0x8] sm:$0xff]  ;;  %v529_v15 = vmul.f32 %v2889_v3, %v407_v12  ;;  %v772_v16 = vmul.f32 %v2903_v4, %v407_v12  ;;  %v463_v18 = vmul.f32 %v2884_v2, %v407_v12 }
  0x16   : > { %375 = vst.msk [vmem:[#allocation2 + $0x19] sm:$0xff] %vm318_vm0, %v286_v9  ;;  %v409_v17 = vld [vmem:[#allocation2 + $0x10] sm:$0x3]  ;;  %v530_v19 = vmul.f32 %v2889_v3, %v408_v14  ;;  %v773_v20 = vmul.f32 %v2903_v4, %v408_v14  ;;  %v464_v25 = vmul.f32 %v2884_v2, %v408_v14 }
  0x17   : > { %376 = vst.msk [vmem:[#allocation2 + $0x21] sm:$0xff] %vm318_vm0, %v287_v10  ;;  %v531_v21 = vmul.f32 %v2889_v3, %v409_v17  ;;  %v626_v22 = vrot.slane %v529_v15, 1  ;;  %v774_v23 = vmul.f32 %v2903_v4, %v409_v17  ;;  %v869_v24 = vrot.slane %v772_v16, 2 }
  0x18   : > { %377 = vst.msk [vmem:[#allocation2 + $0x31] sm:$0xff] %vm318_vm0, %v288_v11  ;;  %v627_v26 = vrot.slane %v530_v19, 1  ;;  %v870_v27 = vrot.slane %v773_v20, 2 }
  0x19   : > { %378 = vst.msk [vmem:[#allocation2 + $0x39] sm:$0xff] %vm318_vm0, %v289_v13  ;;  %v629_v29 = vrot.slane %v531_v21, 1  ;;  %v872_v30 = vrot.slane %v774_v23, 2 }
  0x1a   : > { %v628_v32 = vsel %vm625_vm2, %v626_v22, %v627_v26  ;;  %v871_v33 = vsel %vm868_vm3, %v869_v24, %v870_v27  ;;  %329 = vst.msk [vmem:[#allocation2 + $0x48] sm:$0xff] %vm318_vm0, %v2823_v1 }
  0x1b   : > { %v630_v35 = vsel %vm625_vm2, %v627_v26, %v629_v29  ;;  %v738_v36 = vadd.f32 %v628_v32, %v463_v18  ;;  %v873_v37 = vsel %vm868_vm3, %v870_v27, %v872_v30  ;;  %330 = vst.msk [vmem:[#allocation2 + $0x50] sm:$0xff] %vm318_vm0, %v2823_v1 }
  0x1c   : > { %v739_v38 = vadd.f32 %v630_v35, %v464_v25  ;;  %331 = vst.msk [vmem:[#allocation2 + $0x58] sm:$0x3] %vm321_vm1, %v2823_v1 }
  0x1d   : > { %v2954_v39 = vld [vmem:[#allocation2 + $0x18] sm:$0xff]  ;;  %v981_v40 = vadd.f32 %v871_v33, %v738_v36  ;;  %332 = vst.msk [vmem:[#allocation2 + $0x60] sm:$0xff] %vm318_vm0, %v2823_v1 }
  0x1e   : > { %v2963_v42 = vld [vmem:[#allocation2 + $0x20] sm:$0xff]  ;;  %v2965_v43 = vld [vmem:[#allocation2 + $0x28] sm:$0x3]  ;;  %v982_v44 = vadd.f32 %v873_v37, %v739_v38  ;;  %v1016_v45 = vmul.f32 %v2931_v28, %v2954_v39  ;;  %v1082_v46 = vmul.f32 %v2937_v31, %v2954_v39  ;;  %v1324_v47 = vmul.f32 %v2944_v34, %v2954_v39  ;;  %333 = vst.msk [vmem:[#allocation2 + $0x68] sm:$0xff] %vm318_vm0, %v2823_v1 }
  0x1f   : > { %v2980_v49 = vld [vmem:[#allocation2 + $0x30] sm:$0xff]  ;;  %v1017_v50 = vmul.f32 %v2931_v28, %v2963_v42  ;;  %v1083_v51 = vmul.f32 %v2937_v31, %v2963_v42  ;;  %v1084_v52 = vmul.f32 %v2937_v31, %v2965_v43  ;;  %v1325_v53 = vmul.f32 %v2944_v34, %v2963_v42  ;;  %334 = vst.msk [vmem:[#allocation2 + $0x70] sm:$0x3] %vm321_vm1, %v2823_v1 }
  0x20   : > { %v2992_v54 = vld [vmem:[#allocation2 + $0x38] sm:$0xff]  ;;  %v1048_v55 = vadd.f32 %v1016_v45, %v981_v40  ;;  %v1178_v56 = vrot.slane %v1082_v46, 1  ;;  %v1326_v57 = vmul.f32 %v2944_v34, %v2965_v43  ;;  %v1420_v58 = vrot.slane %v1324_v47, 2  ;;  %335 = vst.msk [vmem:[#allocation2 + $0x78] sm:$0xff] %vm318_vm0, %v2823_v1  ;;  %v3003_v60 = vld [vmem:[#allocation2 + $0x40] sm:$0x3] }
  0x21   : > { %v1049_v61 = vadd.f32 %v1017_v50, %v982_v44  ;;  %v1179_v62 = vrot.slane %v1083_v51, 1  ;;  %v1181_v63 = vrot.slane %v1084_v52, 1  ;;  %v1421_v0 = vrot.slane %v1325_v53, 2  ;;  %336 = vst.msk [vmem:[#allocation2 + $0x80] sm:$0xff] %vm318_vm0, %v2823_v1  ;;  %v260_v50 = vld [vmem:[%s2896_s28 + $0x30] sm:$0xff]  ;;  %v261_v51 = vld [vmem:[%s2896_s28 + $0x38] sm:$0xff] }
  0x22   : > { %v1423_v5 = vrot.slane %v1326_v57, 2  ;;  %v1567_v6 = vmul.f32 %v2959_v41, %v2980_v49  ;;  %v1568_v7 = vmul.f32 %v2959_v41, %v2992_v54  ;;  %v1633_v8 = vmul.f32 %v2976_v48, %v2980_v49  ;;  %337 = vst.msk [vmem:[#allocation2 + $0x88] sm:$0x3] %vm321_vm1, %v2823_v1  ;;  %v262_v52 = vld [vmem:[%s2896_s28 + $0x40] sm:$0xff]  ;;  %v263_v53 = vld [vmem:[%s2896_s28 + $0x48] sm:$0xff] }
  0x23   : > { %v1180_v9 = vsel %vm625_vm2, %v1178_v56, %v1179_v62  ;;  %v1182_v10 = vsel %vm625_vm2, %v1179_v62, %v1181_v63  ;;  %v1422_v11 = vsel %vm868_vm3, %v1420_v58, %v1421_v0  ;;  %v1634_v12 = vmul.f32 %v2976_v48, %v2992_v54  ;;  %338 = vst.msk [vmem:[#allocation2 + $0x90] sm:$0xff] %vm318_vm0, %v2823_v1  ;;  %v264_v56 = vld [vmem:[%s2896_s28 + $0x50] sm:$0xff]  ;;  %v265_v58 = vld [vmem:[%s2896_s28 + $0x58] sm:$0xff] }
  0x24   : > { %v1290_v13 = vadd.f32 %v1180_v9, %v1048_v55  ;;  %v1291_v14 = vadd.f32 %v1182_v10, %v1049_v61  ;;  %v1424_v15 = vsel %vm868_vm3, %v1421_v0, %v1423_v5  ;;  %v1635_v16 = vmul.f32 %v2976_v48, %v3003_v60  ;;  %339 = vst.msk [vmem:[#allocation2 + $0x98] sm:$0xff] %vm318_vm0, %v2823_v1  ;;  %v268_v63 = vld [vmem:[%s2896_s28 + $0x70] sm:$0xff]  ;;  %v269_v5 = vld [vmem:[%s2896_s28 + $0x78] sm:$0xff] }
  0x25   : > { %v1729_v17 = vrot.slane %v1633_v8, 1  ;;  %v1730_v18 = vrot.slane %v1634_v12, 1  ;;  %v1875_v19 = vmul.f32 %v2999_v59, %v2980_v49  ;;  %v1876_v20 = vmul.f32 %v2999_v59, %v2992_v54  ;;  %340 = vst.msk [vmem:[#allocation2 + $0xa0] sm:$0x3] %vm321_vm1, %v2823_v1  ;;  %v271_v8 = vld [vmem:[%s2896_s28 + $0x88] sm:$0xff]  ;;  %v273_v10 = vld [vmem:[%s2896_s28 + $0x98] sm:$0xff] }
  0x26   : > { %v1532_v21 = vadd.f32 %v1422_v11, %v1290_v13  ;;  %v1533_v22 = vadd.f32 %v1424_v15, %v1291_v14  ;;  %v1732_v23 = vrot.slane %v1635_v16, 1  ;;  %v1877_v24 = vmul.f32 %v2999_v59, %v3003_v60  ;;  %341 = vst.msk [vmem:[#allocation2 + $0xa8] sm:$0xff] %vm318_vm0, %v2823_v1  ;;  %v276_v12 = vld [vmem:[%s2896_s28 + $0xb0] sm:$0xff]  ;;  %v277_v13 = vld [vmem:[%s2896_s28 + $0xb8] sm:$0xff]  ;;  %v278_v15 = vld [vmem:[%s2896_s28 + $0xc0] sm:$0xff] }
  0x27   : > { %v1731_v25 = vsel %vm625_vm2, %v1729_v17, %v1730_v18  ;;  %v1971_v26 = vrot.slane %v1875_v19, 2  ;;  %v1972_v27 = vrot.slane %v1876_v20, 2  ;;  %342 = vst.msk [vmem:[#allocation2 + $0xb0] sm:$0xff] %vm318_vm0, %v2823_v1  ;;  %v292_v55 = vmax.f32 %v260_v50, 0.0  ;;  %v279_v16 = vld [vmem:[%s2896_s28 + $0xc8] sm:$0xff]  ;;  %v3130_v17 = vld [vmem:[%s2896_s28 + $0xd0] sm:$0xff] }
  0x28   : > { %v1599_v29 = vadd.f32 %v1567_v6, %v1532_v21  ;;  %v1600_v30 = vadd.f32 %v1568_v7, %v1533_v22  ;;  %v1733_v32 = vsel %vm625_vm2, %v1730_v18, %v1732_v23  ;;  %v1974_v33 = vrot.slane %v1877_v24, 2  ;;  %343 = vst.msk [vmem:[#allocation2 + $0xb8] sm:$0x3] %vm321_vm1, %v2823_v1  ;;  %v270_v7 = vld [vmem:[%s2896_s28 + $0x80] sm:$0xff]  ;;  %v3134_v19 = vld [vmem:[%s2896_s28 + $0xd8] sm:$0xff] }
  0x29   : > { %v1973_v35 = vsel %vm868_vm3, %v1971_v26, %v1972_v27  ;;  %344 = vst.msk [vmem:[#allocation2 + $0xc0] sm:$0xff] %vm318_vm0, %v2823_v1  ;;  %v293_v57 = vmax.f32 %v261_v51, 0.0  ;;  %v294_v61 = vmax.f32 %v262_v52, 0.0  ;;  %v295_v62 = vmax.f32 %v263_v53, 0.0 }
  0x2a   : > { %v1841_v36 = vadd.f32 %v1731_v25, %v1599_v29  ;;  %v1842_v37 = vadd.f32 %v1733_v32, %v1600_v30  ;;  %v1975_v38 = vsel %vm868_vm3, %v1972_v27, %v1974_v33  ;;  %345 = vst.msk [vmem:[#allocation2 + $0xc8] sm:$0xff] %vm318_vm0, %v2823_v1  ;;  %v296_v0 = vmax.f32 %v264_v56, 0.0 }
  0x2b   : > { %346 = vst.msk [vmem:[#allocation2 + $0xd0] sm:$0x3] %vm321_vm1, %v2823_v1  ;;  %v297_v6 = vmax.f32 %v265_v58, 0.0  ;;  %v300_v9 = vmax.f32 %v268_v63, 0.0  ;;  %v301_v11 = vmax.f32 %v269_v5, 0.0  ;;  %v302_v14 = vmax.f32 %v270_v7, 0.0 }
  0x2c   : > { %v2083_v40 = vadd.f32 %v1973_v35, %v1841_v36  ;;  %v2084_v44 = vadd.f32 %v1975_v38, %v1842_v37  ;;  %347 = vst.msk [vmem:[#allocation2 + $0xd8] sm:$0xff] %vm318_vm0, %v2823_v1  ;;  %v303_v18 = vmax.f32 %v271_v8, 0.0  ;;  %v305_v21 = vmax.f32 %v273_v10, 0.0 }
  0x2d   : > { %348 = vst.msk [vmem:[#allocation2 + $0xe0] sm:$0xff] %vm318_vm0, %v2823_v1  ;;  %v308_v22 = vmax.f32 %v276_v12, 0.0  ;;  %v309_v24 = vmax.f32 %v277_v13, 0.0  ;;  %v310_v25 = vmax.f32 %v278_v15, 0.0  ;;  %v311_v26 = vmax.f32 %v279_v16, 0.0 }
  0x2e   : > { %v2115_v45 = vpack.c.bf16 %v2083_v40, %v2083_v40  ;;  %v2116_v46 = vpack.c.bf16 %v2084_v44, %v2084_v44  ;;  %349 = vst.msk [vmem:[#allocation2 + $0xe8] sm:$0x3] %vm321_vm1, %v2823_v1  ;;  %v312_v27 = vmax.f32 %v3130_v17, 0.0  ;;  %v313_v36 = vmax.f32 %v3134_v19, 0.0 }
  0x2f   : > { %350 = vst.msk [vmem:[#allocation2 + $0xf0] sm:$0xff] %vm318_vm0, %v2823_v1 }
  0x30   : > { %2148 = vst.msk [vmem:[#allocation3] sm:$0xf] %vm2147_vm4, %v2115_v45 }
  0x31   : > { %2149 = vst.msk [vmem:[#allocation3 + $0x4] sm:$0xf] %vm2147_vm4, %v2116_v46 }
  0x32   : > { %351 = vst.msk [vmem:[#allocation2 + $0xf8] sm:$0xff] %vm318_vm0, %v2823_v1 }
  0x33   : > { %352 = vst.msk [vmem:[#allocation2 + $0x100] sm:$0x3] %vm321_vm1, %v2823_v1 }
  0x34   : > { %353 = vst.msk [vmem:[#allocation2 + $0x108] sm:$0xff] %vm318_vm0, %v2823_v1 }
  0x35   : > { %354 = vst.msk [vmem:[#allocation2 + $0x110] sm:$0xff] %vm318_vm0, %v2823_v1 }
  0x36   : > { %355 = vst.msk [vmem:[#allocation2 + $0x118] sm:$0x3] %vm321_vm1, %v2823_v1 }
  0x37   : > { %356 = vst.msk [vmem:[#allocation2 + $0x120] sm:$0xff] %vm318_vm0, %v2823_v1 }
  0x38   : > { %v2684_v47 = vld [vmem:[#allocation3] sm:$0xff]  ;;  %357 = vst.msk [vmem:[#allocation2 + $0x128] sm:$0xff] %vm318_vm0, %v2823_v1 }
  0x39   : > { %358 = vst.msk [vmem:[#allocation2 + $0x130] sm:$0x3] %vm321_vm1, %v2823_v1  ;;  %2664 = vmatmul.msk.bf16.vlgmr.msra.gmra.mxu0 %vm318_vm0, %v2684_v47 }
  0x3a   : > { %359 = vst.msk [vmem:[#allocation2 + $0x138] sm:$0xff] %vm318_vm0, %v2823_v1 }
  0x3b   : > { %360 = vst.msk [vmem:[#allocation2 + $0x140] sm:$0xff] %vm318_vm0, %v2823_v1 }
  0x3c   : > { %361 = vst.msk [vmem:[#allocation2 + $0x148] sm:$0x3] %vm321_vm1, %v2823_v1 }
  0x3d   : > { %362 = vst.msk [vmem:[#allocation2 + $0x150] sm:$0xff] %vm318_vm0, %v2823_v1 }
  0x3e   : > { %363 = vst.msk [vmem:[#allocation2 + $0x158] sm:$0xff] %vm318_vm0, %v2823_v1 }
  0x3f   : > { %364 = vst.msk [vmem:[#allocation2 + $0x160] sm:$0x3] %vm321_vm1, %v2823_v1 }
  0x40   : > { %365 = vst.msk [vmem:[#allocation2 + $0x168] sm:$0xff] %vm318_vm0, %v2823_v1 }
  0x41   : > { %366 = vst.msk [vmem:[#allocation2 + $0x170] sm:$0xff] %vm318_vm0, %v2823_v1 }
  0x42   : > { %367 = vst.msk [vmem:[#allocation2 + $0x178] sm:$0x3] %vm321_vm1, %v2823_v1 }
  0x43   : > { %368 = vst.msk [vmem:[#allocation2 + $0x180] sm:$0xff] %vm318_vm0, %v2823_v1 }
  0x44   : > { %369 = vst.msk [vmem:[#allocation2 + $0x188] sm:$0xff] %vm318_vm0, %v2823_v1 }
  0x45   : > { %370 = vst.msk [vmem:[#allocation2 + $0x190] sm:$0x3] %vm321_vm1, %v2823_v1 }
  0x46   : > { %371 = vst.msk [vmem:[#allocation2 + $0x198] sm:$0xff] %vm318_vm0, %v2823_v1 }
  0x47   : > { %372 = vst.msk [vmem:[#allocation2 + $0x1a0] sm:$0xff] %vm318_vm0, %v2823_v1 }
  0x48   : > { %373 = vst.msk [vmem:[#allocation2 + $0x1a8] sm:$0x3] %vm321_vm1, %v2823_v1  ;;  %v272_v1 = vld [vmem:[%s2896_s28 + $0x90] sm:$0xff] }
  0x49   : > { %381 = vst.msk [vmem:[#allocation2 + $0x61] sm:$0xff] %vm318_vm0, %v292_v55  ;;  %v304_v20 = vmax.f32 %v272_v1, 0.0 }
  0x4a   : > { %382 = vst.msk [vmem:[#allocation2 + $0x69] sm:$0xff] %vm318_vm0, %v293_v57 }
  0x4b   : > { %383 = vst.msk [vmem:[#allocation2 + $0x79] sm:$0xff] %vm318_vm0, %v294_v61 }
  0x4c   : > { %384 = vst.msk [vmem:[#allocation2 + $0x81] sm:$0xff] %vm318_vm0, %v295_v62 }
  0x4d   : > { %385 = vst.msk [vmem:[#allocation2 + $0x91] sm:$0xff] %vm318_vm0, %v296_v0 }
  0x4e   : > { %386 = vst.msk [vmem:[#allocation2 + $0x99] sm:$0xff] %vm318_vm0, %v297_v6 }
  0x4f   : > { %389 = vst.msk [vmem:[#allocation2 + $0xc1] sm:$0xff] %vm318_vm0, %v300_v9 }
  0x50   : > { %v419_v23 = vld [vmem:[#allocation2 + $0x60] sm:$0xff]  ;;  %390 = vst.msk [vmem:[#allocation2 + $0xc9] sm:$0xff] %vm318_vm0, %v301_v11 }
  0x51   : > { %v420_v29 = vld [vmem:[#allocation2 + $0x68] sm:$0xff]  ;;  %v421_v30 = vld [vmem:[#allocation2 + $0x70] sm:$0x3]  ;;  %v471_v32 = vmul.f32 %v2884_v2, %v419_v23  ;;  %v541_v33 = vmul.f32 %v2889_v3, %v419_v23  ;;  %v784_v35 = vmul.f32 %v2903_v4, %v419_v23  ;;  %391 = vst.msk [vmem:[#allocation2 + $0xd9] sm:$0xff] %vm318_vm0, %v302_v14 }
  0x52   : > { %v3144_v37 = vld [vmem:[#allocation2 + $0x78] sm:$0xff]  ;;  %v472_v38 = vmul.f32 %v2884_v2, %v420_v29  ;;  %v542_v40 = vmul.f32 %v2889_v3, %v420_v29  ;;  %v543_v44 = vmul.f32 %v2889_v3, %v421_v30  ;;  %v785_v45 = vmul.f32 %v2903_v4, %v420_v29  ;;  %392 = vst.msk [vmem:[#allocation2 + $0xe1] sm:$0xff] %vm318_vm0, %v303_v18 }
  0x53   : > { %v3151_v46 = vld [vmem:[#allocation2 + $0x80] sm:$0xff]  ;;  %v3153_v47 = vld [vmem:[#allocation2 + $0x88] sm:$0x3]  ;;  %v646_v50 = vrot.slane %v541_v33, 1  ;;  %v786_v51 = vmul.f32 %v2903_v4, %v421_v30  ;;  %v889_v52 = vrot.slane %v784_v35, 2  ;;  %v1024_v53 = vmul.f32 %v2931_v28, %v3144_v37  ;;  %393 = vst.msk [vmem:[#allocation2 + $0xf1] sm:$0xff] %vm318_vm0, %v304_v20 }
  0x54   : > { %v647_v55 = vrot.slane %v542_v40, 1  ;;  %v649_v56 = vrot.slane %v543_v44, 1  ;;  %v890_v57 = vrot.slane %v785_v45, 2  ;;  %v1025_v58 = vmul.f32 %v2931_v28, %v3151_v46  ;;  %394 = vst.msk [vmem:[#allocation2 + $0xf9] sm:$0xff] %vm318_vm0, %v305_v21  ;;  %v3169_v5 = vld [vmem:[#allocation2 + $0x90] sm:$0xff] }
  0x55   : > { %v892_v61 = vrot.slane %v786_v51, 2  ;;  %v1094_v62 = vmul.f32 %v2937_v31, %v3144_v37  ;;  %v1095_v63 = vmul.f32 %v2937_v31, %v3151_v46  ;;  %v1096_v0 = vmul.f32 %v2937_v31, %v3153_v47  ;;  %397 = vst.msk [vmem:[#allocation2 + $0x121] sm:$0xff] %vm318_vm0, %v308_v22  ;;  %v3179_v13 = vld [vmem:[#allocation2 + $0x98] sm:$0xff]  ;;  %v3186_v18 = vld [vmem:[#allocation2 + $0xa0] sm:$0x3] }
  0x56   : > { %v648_v6 = vsel %vm625_vm2, %v646_v50, %v647_v55  ;;  %v650_v7 = vsel %vm625_vm2, %v647_v55, %v649_v56  ;;  %v891_v8 = vsel %vm868_vm3, %v889_v52, %v890_v57  ;;  %v1336_v1 = vmul.f32 %v2944_v34, %v3144_v37  ;;  %398 = vst.msk [vmem:[#allocation2 + $0x129] sm:$0xff] %vm318_vm0, %v309_v24  ;;  %v431_v56 = vld [vmem:[#allocation2 + $0xc0] sm:$0xff] }
  0x57   : > { %v746_v9 = vadd.f32 %v648_v6, %v471_v32  ;;  %v747_v10 = vadd.f32 %v650_v7, %v472_v38  ;;  %v893_v11 = vsel %vm868_vm3, %v890_v57, %v892_v61  ;;  %v1198_v12 = vrot.slane %v1094_v62, 1  ;;  %399 = vst.msk [vmem:[#allocation2 + $0x139] sm:$0xff] %vm318_vm0, %v310_v25  ;;  %v432_v62 = vld [vmem:[#allocation2 + $0xc8] sm:$0xff] }
  0x58   : > { %v1199_v14 = vrot.slane %v1095_v63, 1  ;;  %v1201_v15 = vrot.slane %v1096_v0, 1  ;;  %v1337_v16 = vmul.f32 %v2944_v34, %v3151_v46  ;;  %v1338_v17 = vmul.f32 %v2944_v34, %v3153_v47  ;;  %400 = vst.msk [vmem:[#allocation2 + $0x141] sm:$0xff] %vm318_vm0, %v311_v26  ;;  %v433_v63 = vld [vmem:[#allocation2 + $0xd0] sm:$0x3] }
  0x59   : > { %v989_v19 = vadd.f32 %v891_v8, %v746_v9  ;;  %v990_v20 = vadd.f32 %v893_v11, %v747_v10  ;;  %v1440_v21 = vrot.slane %v1336_v1, 2  ;;  %v1575_v22 = vmul.f32 %v2959_v41, %v3169_v5  ;;  %401 = vst.msk [vmem:[#allocation2 + $0x151] sm:$0xff] %vm318_vm0, %v312_v27 }
  0x5a   : > { %v1200_v23 = vsel %vm625_vm2, %v1198_v12, %v1199_v14  ;;  %v1202_v24 = vsel %vm625_vm2, %v1199_v14, %v1201_v15  ;;  %v1441_v25 = vrot.slane %v1337_v16, 2  ;;  %v1443_v29 = vrot.slane %v1338_v17, 2  ;;  %402 = vst.msk [vmem:[#allocation2 + $0x159] sm:$0xff] %vm318_vm0, %v313_v36  ;;  %v3217_v16 = vld [vmem:[#allocation2 + $0xd8] sm:$0xff] }
  0x5b   : > { %v1056_v30 = vadd.f32 %v1024_v53, %v989_v19  ;;  %v1057_v26 = vadd.f32 %v1025_v58, %v990_v20  ;;  %v1576_v32 = vmul.f32 %v2959_v41, %v3179_v13  ;;  %v1645_v33 = vmul.f32 %v2976_v48, %v3169_v5 }
  0x5c   : > { %v1442_v35 = vsel %vm868_vm3, %v1440_v21, %v1441_v25  ;;  %v1444_v27 = vsel %vm868_vm3, %v1441_v25, %v1443_v29  ;;  %v1646_v38 = vmul.f32 %v2976_v48, %v3179_v13  ;;  %v1647_v40 = vmul.f32 %v2976_v48, %v3186_v18 }
  0x5d   : > { %v1298_v44 = vadd.f32 %v1200_v23, %v1056_v30  ;;  %v1299_v36 = vadd.f32 %v1202_v24, %v1057_v26  ;;  %v1749_v45 = vrot.slane %v1645_v33, 1  ;;  %v1887_v50 = vmul.f32 %v2999_v59, %v3169_v5  ;;  %v3224_v33 = vld [vmem:[#allocation2 + $0xe0] sm:$0xff] }
  0x5e   : > { %v1750_v51 = vrot.slane %v1646_v38, 1  ;;  %v1752_v52 = vrot.slane %v1647_v40, 1  ;;  %v1888_v53 = vmul.f32 %v2999_v59, %v3179_v13  ;;  %v1889_v55 = vmul.f32 %v2999_v59, %v3186_v18  ;;  %v3228_v38 = vld [vmem:[#allocation2 + $0xe8] sm:$0x3] }
  0x5f   : > { %v1540_v57 = vadd.f32 %v1442_v35, %v1298_v44  ;;  %v1541_v58 = vadd.f32 %v1444_v27, %v1299_v36  ;;  %v1991_v61 = vrot.slane %v1887_v50, 2  ;;  %v479_v0 = vmul.f32 %v2884_v2, %v431_v56 }
  0x60   : > { %v1751_v6 = vsel %vm625_vm2, %v1749_v45, %v1750_v51  ;;  %v1753_v7 = vsel %vm625_vm2, %v1750_v51, %v1752_v52  ;;  %v1992_v8 = vrot.slane %v1888_v53, 2  ;;  %v1994_v1 = vrot.slane %v1889_v55, 2 }
  0x61   : > { %v1607_v9 = vadd.f32 %v1575_v22, %v1540_v57  ;;  %v1608_v10 = vadd.f32 %v1576_v32, %v1541_v58  ;;  %v480_v11 = vmul.f32 %v2884_v2, %v432_v62  ;;  %v553_v12 = vmul.f32 %v2889_v3, %v431_v56 }
  0x62   : > { %v1993_v14 = vsel %vm868_vm3, %v1991_v61, %v1992_v8  ;;  %v1995_v15 = vsel %vm868_vm3, %v1992_v8, %v1994_v1  ;;  %v554_v17 = vmul.f32 %v2889_v3, %v432_v62  ;;  %v555_v19 = vmul.f32 %v2889_v3, %v433_v63  ;;  %v3239_v61 = vld [vmem:[#allocation2 + $0xf0] sm:$0xff] }
  0x63   : > { %v1849_v20 = vadd.f32 %v1751_v6, %v1607_v9  ;;  %v1850_v21 = vadd.f32 %v1753_v7, %v1608_v10  ;;  %v666_v23 = vrot.slane %v553_v12, 1  ;;  %v796_v22 = vmul.f32 %v2903_v4, %v431_v56  ;;  %v3246_v7 = vld [vmem:[#allocation2 + $0xf8] sm:$0xff] }
  0x64   : > { %v667_v24 = vrot.slane %v554_v17, 1  ;;  %v669_v25 = vrot.slane %v555_v19, 1  ;;  %v797_v29 = vmul.f32 %v2903_v4, %v432_v62  ;;  %v798_v30 = vmul.f32 %v2903_v4, %v433_v63  ;;  %v3254_v17 = vld [vmem:[#allocation2 + $0x100] sm:$0x3] }
  0x65   : > { %v2091_v26 = vadd.f32 %v1993_v14, %v1849_v20  ;;  %v2092_v32 = vadd.f32 %v1995_v15, %v1850_v21  ;;  %v909_v35 = vrot.slane %v796_v22, 2  ;;  %v1032_v27 = vmul.f32 %v2931_v28, %v3217_v16 }
  0x66   : > { %v668_v40 = vsel %vm625_vm2, %v666_v23, %v667_v24  ;;  %v670_v44 = vsel %vm625_vm2, %v667_v24, %v669_v25  ;;  %v910_v36 = vrot.slane %v797_v29, 2  ;;  %v912_v45 = vrot.slane %v798_v30, 2 }
  0x67   : > { %v2123_v50 = vpack.c.bf16 %v2091_v26, %v2091_v26  ;;  %v2124_v51 = vpack.c.bf16 %v2092_v32, %v2092_v32  ;;  %v754_v52 = vadd.f32 %v668_v40, %v479_v0  ;;  %v755_v53 = vadd.f32 %v670_v44, %v480_v11 }
  0x68   : > { %v911_v55 = vsel %vm868_vm3, %v909_v35, %v910_v36  ;;  %v913_v56 = vsel %vm868_vm3, %v910_v36, %v912_v45  ;;  %v1033_v57 = vmul.f32 %v2931_v28, %v3224_v33  ;;  %v1106_v58 = vmul.f32 %v2937_v31, %v3217_v16 }
  0x69   : > { %2156 = vst.msk [vmem:[#allocation3 + $0x20] sm:$0xf] %vm2147_vm4, %v2123_v50  ;;  %v997_v62 = vadd.f32 %v911_v55, %v754_v52  ;;  %v998_v63 = vadd.f32 %v913_v56, %v755_v53  ;;  %v1107_v0 = vmul.f32 %v2937_v31, %v3224_v33  ;;  %v1108_v6 = vmul.f32 %v2937_v31, %v3228_v38  ;;  %v443_v53 = vld [vmem:[#allocation2 + $0x120] sm:$0xff] }
  0x6a   : > { %2157 = vst.msk [vmem:[#allocation3 + $0x24] sm:$0xf] %vm2147_vm4, %v2124_v51  ;;  %v1218_v8 = vrot.slane %v1106_v58, 1  ;;  %v1348_v1 = vmul.f32 %v2944_v34, %v3217_v16  ;;  %v1349_v9 = vmul.f32 %v2944_v34, %v3224_v33  ;;  %v1350_v10 = vmul.f32 %v2944_v34, %v3228_v38 }
  0x6b   : > { %v1064_v11 = vadd.f32 %v1032_v27, %v997_v62  ;;  %v1065_v12 = vadd.f32 %v1033_v57, %v998_v63  ;;  %v1219_v14 = vrot.slane %v1107_v0, 1  ;;  %v1221_v15 = vrot.slane %v1108_v6, 1 }
  0x6c   : > { %v1460_v19 = vrot.slane %v1348_v1, 2  ;;  %v1461_v20 = vrot.slane %v1349_v9, 2  ;;  %v1463_v21 = vrot.slane %v1350_v10, 2  ;;  %v1583_v23 = vmul.f32 %v2959_v41, %v3239_v61  ;;  %v444_v1 = vld [vmem:[#allocation2 + $0x128] sm:$0xff]  ;;  %v445_v9 = vld [vmem:[#allocation2 + $0x130] sm:$0x3] }
  0x6d   : > { %v1220_v22 = vsel %vm625_vm2, %v1218_v8, %v1219_v14  ;;  %v1222_v24 = vsel %vm625_vm2, %v1219_v14, %v1221_v15  ;;  %v1584_v25 = vmul.f32 %v2959_v41, %v3246_v7  ;;  %v1657_v29 = vmul.f32 %v2976_v48, %v3239_v61 }
  0x6e   : > { %v1306_v30 = vadd.f32 %v1220_v22, %v1064_v11  ;;  %v1307_v26 = vadd.f32 %v1222_v24, %v1065_v12  ;;  %v1462_v32 = vsel %vm868_vm3, %v1460_v19, %v1461_v20  ;;  %v1464_v35 = vsel %vm868_vm3, %v1461_v20, %v1463_v21 }
  0x6f   : > { %v1658_v27 = vmul.f32 %v2976_v48, %v3246_v7  ;;  %v1659_v40 = vmul.f32 %v2976_v48, %v3254_v17  ;;  %v1769_v44 = vrot.slane %v1657_v29, 1  ;;  %v1899_v36 = vmul.f32 %v2999_v59, %v3239_v61 }
  0x70   : > { %v1548_v45 = vadd.f32 %v1462_v32, %v1306_v30  ;;  %v1549_v50 = vadd.f32 %v1464_v35, %v1307_v26  ;;  %v1900_v51 = vmul.f32 %v2999_v59, %v3246_v7  ;;  %v1901_v52 = vmul.f32 %v2999_v59, %v3254_v17  ;;  %v3289_v32 = vld [vmem:[#allocation2 + $0x140] sm:$0xff] }
  0x71   : > { %v2688_v55 = vld [vmem:[#allocation3 + $0x20] sm:$0xff]  ;;  %v1770_v56 = vrot.slane %v1658_v27, 1  ;;  %v1772_v57 = vrot.slane %v1659_v40, 1  ;;  %v2011_v58 = vrot.slane %v1899_v36, 2  ;;  %v487_v62 = vmul.f32 %v2884_v2, %v443_v53 }
  0x72   : > { %v1615_v63 = vadd.f32 %v1583_v23, %v1548_v45  ;;  %v1616_v0 = vadd.f32 %v1584_v25, %v1549_v50  ;;  %v2012_v6 = vrot.slane %v1900_v51, 2  ;;  %v2014_v8 = vrot.slane %v1901_v52, 2  ;;  %2668 = vmatmul.msk.bf16.vlgmr.msra.gmra.mxu1 %vm318_vm0, %v2688_v55  ;;  %v3284_v23 = vld [vmem:[#allocation2 + $0x138] sm:$0xff]  ;;  %v3295_v52 = vld [vmem:[#allocation2 + $0x148] sm:$0x3] }
  0x73   : > { %v1771_v10 = vsel %vm625_vm2, %v1769_v44, %v1770_v56  ;;  %v1773_v11 = vsel %vm625_vm2, %v1770_v56, %v1772_v57  ;;  %v488_v12 = vmul.f32 %v2884_v2, %v444_v1  ;;  %v565_v14 = vmul.f32 %v2889_v3, %v443_v53 }
  0x74   : > { %v1857_v15 = vadd.f32 %v1771_v10, %v1615_v63  ;;  %v1858_v19 = vadd.f32 %v1773_v11, %v1616_v0  ;;  %v2013_v20 = vsel %vm868_vm3, %v2011_v58, %v2012_v6  ;;  %v2015_v21 = vsel %vm868_vm3, %v2012_v6, %v2014_v8  ;;  %v3304_v0 = vld [vmem:[#allocation2 + $0x150] sm:$0xff] }
  0x75   : > { %v566_v22 = vmul.f32 %v2889_v3, %v444_v1  ;;  %v567_v24 = vmul.f32 %v2889_v3, %v445_v9  ;;  %v686_v25 = vrot.slane %v565_v14, 1  ;;  %v808_v29 = vmul.f32 %v2903_v4, %v443_v53 }
  0x76   : > { %v2099_v30 = vadd.f32 %v2013_v20, %v1857_v15  ;;  %v2100_v26 = vadd.f32 %v2015_v21, %v1858_v19  ;;  %v809_v35 = vmul.f32 %v2903_v4, %v444_v1  ;;  %v810_v27 = vmul.f32 %v2903_v4, %v445_v9  ;;  %v3315_v19 = vld [vmem:[#allocation2 + $0x158] sm:$0xff] }
  0x77   : > { %v687_v40 = vrot.slane %v566_v22, 1  ;;  %v689_v44 = vrot.slane %v567_v24, 1  ;;  %v929_v36 = vrot.slane %v808_v29, 2  ;;  %v1040_v45 = vmul.f32 %v2931_v28, %v3284_v23 }
  0x78   : > { %v2131_v50 = vpack.c.bf16 %v2099_v30, %v2099_v30  ;;  %v2132_v51 = vpack.c.bf16 %v2100_v26, %v2100_v26  ;;  %v930_v55 = vrot.slane %v809_v35, 2  ;;  %v932_v53 = vrot.slane %v810_v27, 2  ;;  %v3323_v30 = vld [vmem:[#allocation2 + $0x160] sm:$0x3] }
  0x79   : > { %v688_v56 = vsel %vm625_vm2, %v686_v25, %v687_v40  ;;  %v690_v57 = vsel %vm625_vm2, %v687_v40, %v689_v44  ;;  %v1041_v58 = vmul.f32 %v2931_v28, %v3289_v32  ;;  %v1118_v63 = vmul.f32 %v2937_v31, %v3284_v23 }
  0x7a   : > { %2164 = vst.msk [vmem:[#allocation3 + $0x40] sm:$0xf] %vm2147_vm4, %v2131_v50  ;;  %v762_v6 = vadd.f32 %v688_v56, %v487_v62  ;;  %v763_v8 = vadd.f32 %v690_v57, %v488_v12  ;;  %v931_v1 = vsel %vm868_vm3, %v929_v36, %v930_v55  ;;  %v933_v9 = vsel %vm868_vm3, %v930_v55, %v932_v53  ;;  %v258_v57 = vld [vmem:[%s2896_s28 + $0x20] sm:$0xff] }
  0x7b   : > { %2165 = vst.msk [vmem:[#allocation3 + $0x44] sm:$0xf] %vm2147_vm4, %v2132_v51  ;;  %v1119_v10 = vmul.f32 %v2937_v31, %v3289_v32  ;;  %v1120_v11 = vmul.f32 %v2937_v31, %v3295_v52  ;;  %v1238_v14 = vrot.slane %v1118_v63, 1  ;;  %v1360_v15 = vmul.f32 %v2944_v34, %v3284_v23 }
  0x7c   : > { %v1005_v62 = vadd.f32 %v931_v1, %v762_v6  ;;  %v1006_v12 = vadd.f32 %v933_v9, %v763_v8  ;;  %v1361_v20 = vmul.f32 %v2944_v34, %v3289_v32  ;;  %v1362_v21 = vmul.f32 %v2944_v34, %v3295_v52 }
  0x7d   : > { %v1239_v22 = vrot.slane %v1119_v10, 1  ;;  %v1241_v24 = vrot.slane %v1120_v11, 1  ;;  %v1480_v25 = vrot.slane %v1360_v15, 2  ;;  %v1591_v29 = vmul.f32 %v2959_v41, %v3304_v0  ;;  %v259_v15 = vld [vmem:[%s2896_s28 + $0x28] sm:$0xff] }
  0x7e   : > { %v1072_v26 = vadd.f32 %v1040_v45, %v1005_v62  ;;  %v1073_v35 = vadd.f32 %v1041_v58, %v1006_v12  ;;  %v1481_v27 = vrot.slane %v1361_v20, 2  ;;  %v1483_v40 = vrot.slane %v1362_v21, 2 }
  0x7f   : > { %v1240_v44 = vsel %vm625_vm2, %v1238_v14, %v1239_v22  ;;  %v1242_v36 = vsel %vm625_vm2, %v1239_v22, %v1241_v24  ;;  %v1592_v50 = vmul.f32 %v2959_v41, %v3315_v19  ;;  %v1669_v51 = vmul.f32 %v2976_v48, %v3304_v0 }
  0x80   : > { %v1314_v55 = vadd.f32 %v1240_v44, %v1072_v26  ;;  %v1315_v53 = vadd.f32 %v1242_v36, %v1073_v35  ;;  %v1482_v56 = vsel %vm868_vm3, %v1480_v25, %v1481_v27  ;;  %v1484_v45 = vsel %vm868_vm3, %v1481_v27, %v1483_v40 }
  0x81   : > { %v1670_v58 = vmul.f32 %v2976_v48, %v3315_v19  ;;  %v1671_v63 = vmul.f32 %v2976_v48, %v3323_v30  ;;  %v1789_v6 = vrot.slane %v1669_v51, 1  ;;  %v1911_v8 = vmul.f32 %v2999_v59, %v3304_v0 }
  0x82   : > { %v2692_v1 = vld [vmem:[#allocation3 + $0x40] sm:$0xff]  ;;  %v1556_v9 = vadd.f32 %v1482_v56, %v1314_v55  ;;  %v1557_v10 = vadd.f32 %v1484_v45, %v1315_v53  ;;  %v1912_v11 = vmul.f32 %v2999_v59, %v3315_v19  ;;  %v1913_v14 = vmul.f32 %v2999_v59, %v3323_v30 }
  0x83   : > { %v1790_v62 = vrot.slane %v1670_v58, 1  ;;  %v1792_v12 = vrot.slane %v1671_v63, 1  ;;  %v2031_v20 = vrot.slane %v1911_v8, 2  ;;  %v290_v21 = vmax.f32 %v258_v57, 0.0  ;;  %2672 = vmatmul.msk.bf16.vlgmr.msra.gmra.mxu2 %vm318_vm0, %v2692_v1 }
  0x84   : > { %v1623_v22 = vadd.f32 %v1591_v29, %v1556_v9  ;;  %v1624_v24 = vadd.f32 %v1592_v50, %v1557_v10  ;;  %v2032_v25 = vrot.slane %v1912_v11, 2  ;;  %v2034_v26 = vrot.slane %v1913_v14, 2 }
  0x85   : > { %v1791_v35 = vsel %vm625_vm2, %v1789_v6, %v1790_v62  ;;  %v1793_v27 = vsel %vm625_vm2, %v1790_v62, %v1792_v12  ;;  %v291_v40 = vmax.f32 %v259_v15, 0.0  ;;  %379 = vst.msk [vmem:[#allocation2 + $0x49] sm:$0xff] %vm318_vm0, %v290_v21  ;;  %v465_v44 = vmul.f32 %v2884_v2, %v2954_v39 }
  0x86   : > { %v1865_v36 = vadd.f32 %v1791_v35, %v1623_v22  ;;  %v1866_v51 = vadd.f32 %v1793_v27, %v1624_v24  ;;  %v2033_v55 = vsel %vm868_vm3, %v2031_v20, %v2032_v25  ;;  %v2035_v53 = vsel %vm868_vm3, %v2032_v25, %v2034_v26 }
  0x87   : > { %380 = vst.msk [vmem:[#allocation2 + $0x51] sm:$0xff] %vm318_vm0, %v291_v40  ;;  %v466_v29 = vmul.f32 %v2884_v2, %v2963_v42  ;;  %v532_v50 = vmul.f32 %v2889_v3, %v2954_v39  ;;  %v533_v56 = vmul.f32 %v2889_v3, %v2963_v42  ;;  %v534_v45 = vmul.f32 %v2889_v3, %v2965_v43 }
  0x88   : > { %v2107_v57 = vadd.f32 %v2033_v55, %v1865_v36  ;;  %v2108_v58 = vadd.f32 %v2035_v53, %v1866_v51  ;;  %v775_v63 = vmul.f32 %v2903_v4, %v2954_v39  ;;  %v776_v6 = vmul.f32 %v2903_v4, %v2963_v42 }
  0x89   : > { %v631_v8 = vrot.slane %v532_v50, 1  ;;  %v632_v1 = vrot.slane %v533_v56, 1  ;;  %v634_v2 = vrot.slane %v534_v45, 1  ;;  %v777_v9 = vmul.f32 %v2903_v4, %v2965_v43 }
  0x8a   : > { %v2139_v10 = vpack.c.bf16 %v2107_v57, %v2107_v57  ;;  %v2140_v11 = vpack.c.bf16 %v2108_v58, %v2108_v58  ;;  %v874_v14 = vrot.slane %v775_v63, 2  ;;  %v875_v15 = vrot.slane %v776_v6, 2 }
  0x8b   : > { %v633_v3 = vsel %vm625_vm2, %v631_v8, %v632_v1  ;;  %v635_v62 = vsel %vm625_vm2, %v632_v1, %v634_v2  ;;  %v877_v12 = vrot.slane %v777_v9, 2  ;;  %v1018_v39 = vmul.f32 %v2931_v28, %v2980_v49 }
  0x8c   : > { %2172 = vst.msk [vmem:[#allocation3 + $0x60] sm:$0xf] %vm2147_vm4, %v2139_v10  ;;  %v740_v42 = vadd.f32 %v633_v3, %v465_v44  ;;  %v741_v20 = vadd.f32 %v635_v62, %v466_v29  ;;  %v876_v21 = vsel %vm868_vm3, %v874_v14, %v875_v15  ;;  %v1019_v4 = vmul.f32 %v2931_v28, %v2992_v54  ;;  %v3384_v26 = vld [vmem:[#allocation2 + $0x48] sm:$0xff]  ;;  %v266_v3 = vld [vmem:[%s2896_s28 + $0x60] sm:$0xff] }
  0x8d   : > { %2173 = vst.msk [vmem:[#allocation3 + $0x64] sm:$0xf] %vm2147_vm4, %v2140_v11  ;;  %v878_v43 = vsel %vm868_vm3, %v875_v15, %v877_v12  ;;  %v1085_v22 = vmul.f32 %v2937_v31, %v2980_v49  ;;  %v1086_v24 = vmul.f32 %v2937_v31, %v2992_v54  ;;  %v1087_v25 = vmul.f32 %v2937_v31, %v3003_v60 }
  0x8e   : > { %v983_v35 = vadd.f32 %v876_v21, %v740_v42  ;;  %v984_v27 = vadd.f32 %v878_v43, %v741_v20  ;;  %v1327_v28 = vmul.f32 %v2944_v34, %v2980_v49  ;;  %v1328_v40 = vmul.f32 %v2944_v34, %v2992_v54  ;;  %v3390_v44 = vld [vmem:[#allocation2 + $0x50] sm:$0xff]  ;;  %v3394_v29 = vld [vmem:[#allocation2 + $0x58] sm:$0x3]  ;;  %v267_v20 = vld [vmem:[%s2896_s28 + $0x68] sm:$0xff] }
  0x8f   : > { %v1183_v36 = vrot.slane %v1085_v22, 1  ;;  %v1184_v51 = vrot.slane %v1086_v24, 1  ;;  %v1186_v55 = vrot.slane %v1087_v25, 1  ;;  %v1329_v53 = vmul.f32 %v2944_v34, %v3003_v60 }
  0x90   : > { %v1050_v31 = vadd.f32 %v1018_v39, %v983_v35  ;;  %v1051_v50 = vadd.f32 %v1019_v4, %v984_v27  ;;  %v1425_v56 = vrot.slane %v1327_v28, 2  ;;  %v1426_v45 = vrot.slane %v1328_v40, 2 }
  0x91   : > { %v1185_v57 = vsel %vm625_vm2, %v1183_v36, %v1184_v51  ;;  %v1187_v49 = vsel %vm625_vm2, %v1184_v51, %v1186_v55  ;;  %v1428_v54 = vrot.slane %v1329_v53, 2  ;;  %v1569_v58 = vmul.f32 %v2959_v41, %v3384_v26  ;;  %v3427_v51 = vld [vmem:[%s4299_s1] ss:$0 sm:$0xff] }
  0x92   : > { %v1292_v63 = vadd.f32 %v1185_v57, %v1050_v31  ;;  %v1293_v6 = vadd.f32 %v1187_v49, %v1051_v50  ;;  %v1427_v8 = vsel %vm868_vm3, %v1425_v56, %v1426_v45  ;;  %v1570_v34 = vmul.f32 %v2959_v41, %v3390_v44  ;;  %v3436_v31 = vld [vmem:[%s4299_s1 + $0x1] ss:$0 sm:$0xff] }
  0x93   : > { %v1429_v60 = vsel %vm868_vm3, %v1426_v45, %v1428_v54  ;;  %v1636_v1 = vmul.f32 %v2976_v48, %v3384_v26  ;;  %v1637_v2 = vmul.f32 %v2976_v48, %v3390_v44  ;;  %v1638_v9 = vmul.f32 %v2976_v48, %v3394_v29 }
  0x94   : > { %v2696_v10 = vld [vmem:[#allocation3 + $0x60] sm:$0xff]  ;;  %v1534_v11 = vadd.f32 %v1427_v8, %v1292_v63  ;;  %v1535_v14 = vadd.f32 %v1429_v60, %v1293_v6  ;;  %v1878_v15 = vmul.f32 %v2999_v59, %v3384_v26  ;;  %v1879_v41 = vmul.f32 %v2999_v59, %v3390_v44 }
  0x95   : > { %v1734_v62 = vrot.slane %v1636_v1, 1  ;;  %v1735_v12 = vrot.slane %v1637_v2, 1  ;;  %v1737_v39 = vrot.slane %v1638_v9, 1  ;;  %v1880_v42 = vmul.f32 %v2999_v59, %v3394_v29  ;;  %2676 = vmatmul.msk.bf16.vlgmr.msra.gmra.mxu3 %vm318_vm0, %v2696_v10 }
  0x96   : > { %v1601_v48 = vadd.f32 %v1569_v58, %v1534_v11  ;;  %v1602_v21 = vadd.f32 %v1570_v34, %v1535_v14  ;;  %v1976_v4 = vrot.slane %v1878_v15, 2  ;;  %v1977_v43 = vrot.slane %v1879_v41, 2  ;;  %v3448_v58 = vld [vmem:[%s4299_s1 + $0x2] ss:$0 sm:$0xff]  ;;  %v3459_v14 = vld [vmem:[%s4299_s1 + $0x4] ss:$0 sm:$0xff] }
  0x97   : > { %v1736_v22 = vsel %vm625_vm2, %v1734_v62, %v1735_v12  ;;  %v1738_v24 = vsel %vm625_vm2, %v1735_v12, %v1737_v39  ;;  %v1979_v25 = vrot.slane %v1880_v42, 2  ;;  %v298_v35 = vmax.f32 %v266_v3, 0.0  ;;  %v3471_v41 = vld [vmem:[%s4299_s1 + $0x5] ss:$0 sm:$0xff] }
  0x98   : > { %v1843_v27 = vadd.f32 %v1736_v22, %v1601_v48  ;;  %v1844_v28 = vadd.f32 %v1738_v24, %v1602_v21  ;;  %v1978_v40 = vsel %vm868_vm3, %v1976_v4, %v1977_v43  ;;  %v299_v36 = vmax.f32 %v267_v20, 0.0 }
  0x99   : > { %v1980_v59 = vsel %vm868_vm3, %v1977_v43, %v1979_v25  ;;  %387 = vst.msk [vmem:[#allocation2 + $0xa9] sm:$0xff] %vm318_vm0, %v298_v35  ;;  %v473_v55 = vmul.f32 %v3427_v51, %v3144_v37  ;;  %v474_v53 = vmul.f32 %v3427_v51, %v3151_v46  ;;  %v544_v50 = vmul.f32 %v3436_v31, %v3144_v37  ;;  %v3487_v43 = vld [vmem:[%s4299_s1 + $0x6] ss:$0 sm:$0xff] }
  0x9a   : > { %v2085_v56 = vadd.f32 %v1978_v40, %v1843_v27  ;;  %v2086_v45 = vadd.f32 %v1980_v59, %v1844_v28  ;;  %388 = vst.msk [vmem:[#allocation2 + $0xb1] sm:$0xff] %vm318_vm0, %v299_v36  ;;  %v545_v57 = vmul.f32 %v3436_v31, %v3151_v46  ;;  %v546_v49 = vmul.f32 %v3436_v31, %v3153_v47 }
  0x9b   : > { %v651_v54 = vrot.slane %v544_v50, 1  ;;  %v787_v63 = vmul.f32 %v3448_v58, %v3144_v37  ;;  %v788_v6 = vmul.f32 %v3448_v58, %v3151_v46  ;;  %v789_v8 = vmul.f32 %v3448_v58, %v3153_v47 }
  0x9c   : > { %v2117_v34 = vpack.c.bf16 %v2085_v56, %v2085_v56  ;;  %v2118_v60 = vpack.c.bf16 %v2086_v45, %v2086_v45  ;;  %v652_v1 = vrot.slane %v545_v57, 1  ;;  %v654_v2 = vrot.slane %v546_v49, 1 }
  0x9d   : > { %v894_v9 = vrot.slane %v787_v63, 2  ;;  %v895_v10 = vrot.slane %v788_v6, 2  ;;  %v897_v11 = vrot.slane %v789_v8, 2  ;;  %v1026_v37 = vmul.f32 %v3459_v14, %v3169_v5 }
  0x9e   : > { %2150 = vst.msk [vmem:[#allocation3 + $0x8] sm:$0xf] %vm2147_vm4, %v2117_v34  ;;  %v653_v46 = vsel %vm625_vm2, %v651_v54, %v652_v1  ;;  %v655_v47 = vsel %vm625_vm2, %v652_v1, %v654_v2  ;;  %v1027_v15 = vmul.f32 %v3459_v14, %v3179_v13  ;;  %v1097_v3 = vmul.f32 %v3471_v41, %v3169_v5  ;;  %v3513_v54 = vld [vmem:[%s4299_s1 + $0x9] ss:$0 sm:$0xff]  ;;  %v274_v1 = vld [vmem:[%s2896_s28 + $0xa0] sm:$0xff] }
  0x9f   : > { %2151 = vst.msk [vmem:[#allocation3 + $0xc] sm:$0xf] %vm2147_vm4, %v2118_v60  ;;  %v748_v62 = vadd.f32 %v653_v46, %v473_v55  ;;  %v749_v12 = vadd.f32 %v655_v47, %v474_v53  ;;  %v896_v39 = vsel %vm868_vm3, %v894_v9, %v895_v10  ;;  %v898_v42 = vsel %vm868_vm3, %v895_v10, %v897_v11  ;;  %v3500_v55 = vld [vmem:[%s4299_s1 + $0x8] ss:$0 sm:$0xff] }
  0xa0   : > { %v3478_v20 = vld [vmem:[#allocation2 + $0xa8] sm:$0xff]  ;;  %v1098_v48 = vmul.f32 %v3471_v41, %v3179_v13  ;;  %v1099_v21 = vmul.f32 %v3471_v41, %v3186_v18  ;;  %v1203_v4 = vrot.slane %v1097_v3, 1  ;;  %v1339_v22 = vmul.f32 %v3487_v43, %v3169_v5 }
  0xa1   : > { %v3491_v24 = vld [vmem:[#allocation2 + $0xb0] sm:$0xff]  ;;  %v991_v25 = vadd.f32 %v896_v39, %v748_v62  ;;  %v992_v35 = vadd.f32 %v898_v42, %v749_v12  ;;  %v1340_v27 = vmul.f32 %v3487_v43, %v3179_v13  ;;  %v1341_v28 = vmul.f32 %v3487_v43, %v3186_v18  ;;  %v3504_v53 = vld [vmem:[#allocation2 + $0xb8] sm:$0x3]  ;;  %v275_v12 = vld [vmem:[%s2896_s28 + $0xa8] sm:$0xff] }
  0xa2   : > { %v1204_v40 = vrot.slane %v1098_v48, 1  ;;  %v1206_v36 = vrot.slane %v1099_v21, 1  ;;  %v1445_v59 = vrot.slane %v1339_v22, 2  ;;  %v1577_v5 = vmul.f32 %v3500_v55, %v3478_v20 }
  0xa3   : > { %v1058_v50 = vadd.f32 %v1026_v37, %v991_v25  ;;  %v1059_v56 = vadd.f32 %v1027_v15, %v992_v35  ;;  %v1446_v13 = vrot.slane %v1340_v27, 2  ;;  %v1448_v45 = vrot.slane %v1341_v28, 2  ;;  %v3527_v37 = vld [vmem:[%s4299_s1 + $0xa] ss:$0 sm:$0xff] }
  0xa4   : > { %v1205_v18 = vsel %vm625_vm2, %v1203_v4, %v1204_v40  ;;  %v1207_v57 = vsel %vm625_vm2, %v1204_v40, %v1206_v36  ;;  %v1578_v49 = vmul.f32 %v3500_v55, %v3491_v24  ;;  %v1648_v63 = vmul.f32 %v3513_v54, %v3478_v20 }
  0xa5   : > { %v1300_v6 = vadd.f32 %v1205_v18, %v1058_v50  ;;  %v1301_v8 = vadd.f32 %v1207_v57, %v1059_v56  ;;  %v1447_v34 = vsel %vm868_vm3, %v1445_v59, %v1446_v13  ;;  %v1449_v60 = vsel %vm868_vm3, %v1446_v13, %v1448_v45 }
  0xa6   : > { %v2685_v2 = vld [vmem:[#allocation3 + $0x8] sm:$0xff]  ;;  %v1649_v9 = vmul.f32 %v3513_v54, %v3491_v24  ;;  %v1650_v10 = vmul.f32 %v3513_v54, %v3504_v53  ;;  %v1754_v11 = vrot.slane %v1648_v63, 1  ;;  %v1890_v46 = vmul.f32 %v3527_v37, %v3478_v20 }
  0xa7   : > { %v1542_v47 = vadd.f32 %v1447_v34, %v1300_v6  ;;  %v1543_v15 = vadd.f32 %v1449_v60, %v1301_v8  ;;  %v1891_v3 = vmul.f32 %v3527_v37, %v3491_v24  ;;  %v1892_v62 = vmul.f32 %v3527_v37, %v3504_v53  ;;  %2665 = vmatmul.msk.bf16.gmra.mxu0 %vm318_vm0, %v2685_v2 }
  0xa8   : > { %v1755_v39 = vrot.slane %v1649_v9, 1  ;;  %v1757_v42 = vrot.slane %v1650_v10, 1  ;;  %v1996_v48 = vrot.slane %v1890_v46, 2  ;;  %v306_v21 = vmax.f32 %v274_v1, 0.0 }
  0xa9   : > { %v1609_v4 = vadd.f32 %v1577_v5, %v1542_v47  ;;  %v1610_v22 = vadd.f32 %v1578_v49, %v1543_v15  ;;  %v1997_v25 = vrot.slane %v1891_v3, 2  ;;  %v1999_v35 = vrot.slane %v1892_v62, 2 }
  0xaa   : > { %v1756_v27 = vsel %vm625_vm2, %v1754_v11, %v1755_v39  ;;  %v1758_v28 = vsel %vm625_vm2, %v1755_v39, %v1757_v42  ;;  %v307_v40 = vmax.f32 %v275_v12, 0.0  ;;  %395 = vst.msk [vmem:[#allocation2 + $0x109] sm:$0xff] %vm318_vm0, %v306_v21  ;;  %v481_v36 = vmul.f32 %v3427_v51, %v3217_v16 }
  0xab   : > { %v1851_v59 = vadd.f32 %v1756_v27, %v1609_v4  ;;  %v1852_v50 = vadd.f32 %v1758_v28, %v1610_v22  ;;  %v1998_v56 = vsel %vm868_vm3, %v1996_v48, %v1997_v25  ;;  %v2000_v13 = vsel %vm868_vm3, %v1997_v25, %v1999_v35 }
  0xac   : > { %396 = vst.msk [vmem:[#allocation2 + $0x111] sm:$0xff] %vm318_vm0, %v307_v40  ;;  %v482_v5 = vmul.f32 %v3427_v51, %v3224_v33  ;;  %v556_v45 = vmul.f32 %v3436_v31, %v3217_v16  ;;  %v557_v18 = vmul.f32 %v3436_v31, %v3224_v33  ;;  %v558_v57 = vmul.f32 %v3436_v31, %v3228_v38 }
  0xad   : > { %v2093_v49 = vadd.f32 %v1998_v56, %v1851_v59  ;;  %v2094_v63 = vadd.f32 %v2000_v13, %v1852_v50  ;;  %v799_v6 = vmul.f32 %v3448_v58, %v3217_v16  ;;  %v800_v8 = vmul.f32 %v3448_v58, %v3224_v33 }
  0xae   : > { %v671_v34 = vrot.slane %v556_v45, 1  ;;  %v672_v60 = vrot.slane %v557_v18, 1  ;;  %v674_v1 = vrot.slane %v558_v57, 1  ;;  %v801_v2 = vmul.f32 %v3448_v58, %v3228_v38 }
  0xaf   : > { %v2125_v9 = vpack.c.bf16 %v2093_v49, %v2093_v49  ;;  %v2126_v10 = vpack.c.bf16 %v2094_v63, %v2094_v63  ;;  %v914_v11 = vrot.slane %v799_v6, 2  ;;  %v915_v46 = vrot.slane %v800_v8, 2 }
  0xb0   : > { %v673_v47 = vsel %vm625_vm2, %v671_v34, %v672_v60  ;;  %v675_v15 = vsel %vm625_vm2, %v672_v60, %v674_v1  ;;  %v917_v3 = vrot.slane %v801_v2, 2  ;;  %v1034_v16 = vmul.f32 %v3459_v14, %v3239_v61 }
  0xb1   : > { %2158 = vst.msk [vmem:[#allocation3 + $0x28] sm:$0xf] %vm2147_vm4, %v2125_v9  ;;  %v756_v33 = vadd.f32 %v673_v47, %v481_v36  ;;  %v757_v62 = vadd.f32 %v675_v15, %v482_v5  ;;  %v916_v12 = vsel %vm868_vm3, %v914_v11, %v915_v46  ;;  %v1035_v38 = vmul.f32 %v3459_v14, %v3246_v7  ;;  %v3575_v4 = vld [vmem:[#allocation2 + $0x108] sm:$0xff]  ;;  %v282_v15 = vld [vmem:[%s2896_s28 + $0xe0] sm:$0xff] }
  0xb2   : > { %2159 = vst.msk [vmem:[#allocation3 + $0x2c] sm:$0xf] %vm2147_vm4, %v2126_v10  ;;  %v918_v39 = vsel %vm868_vm3, %v915_v46, %v917_v3  ;;  %v1109_v42 = vmul.f32 %v3471_v41, %v3239_v61  ;;  %v1110_v48 = vmul.f32 %v3471_v41, %v3246_v7  ;;  %v1111_v21 = vmul.f32 %v3471_v41, %v3254_v17 }
  0xb3   : > { %v999_v22 = vadd.f32 %v916_v12, %v756_v33  ;;  %v1000_v25 = vadd.f32 %v918_v39, %v757_v62  ;;  %v1351_v35 = vmul.f32 %v3487_v43, %v3239_v61  ;;  %v1352_v27 = vmul.f32 %v3487_v43, %v3246_v7  ;;  %v3581_v28 = vld [vmem:[#allocation2 + $0x110] sm:$0xff]  ;;  %v3585_v56 = vld [vmem:[#allocation2 + $0x118] sm:$0x3]  ;;  %v283_v12 = vld [vmem:[%s2896_s28 + $0xe8] sm:$0xff] }
  0xb4   : > { %v1223_v40 = vrot.slane %v1109_v42, 1  ;;  %v1224_v36 = vrot.slane %v1110_v48, 1  ;;  %v1226_v59 = vrot.slane %v1111_v21, 1  ;;  %v1353_v50 = vmul.f32 %v3487_v43, %v3254_v17 }
  0xb5   : > { %v1066_v13 = vadd.f32 %v1034_v16, %v999_v22  ;;  %v1067_v5 = vadd.f32 %v1035_v38, %v1000_v25  ;;  %v1465_v45 = vrot.slane %v1351_v35, 2  ;;  %v1466_v18 = vrot.slane %v1352_v27, 2 }
  0xb6   : > { %v1225_v57 = vsel %vm625_vm2, %v1223_v40, %v1224_v36  ;;  %v1227_v61 = vsel %vm625_vm2, %v1224_v36, %v1226_v59  ;;  %v1468_v7 = vrot.slane %v1353_v50, 2  ;;  %v1585_v49 = vmul.f32 %v3500_v55, %v3575_v4 }
  0xb7   : > { %v1308_v63 = vadd.f32 %v1225_v57, %v1066_v13  ;;  %v1309_v6 = vadd.f32 %v1227_v61, %v1067_v5  ;;  %v1467_v8 = vsel %vm868_vm3, %v1465_v45, %v1466_v18  ;;  %v1586_v17 = vmul.f32 %v3500_v55, %v3581_v28 }
  0xb8   : > { %v1469_v34 = vsel %vm868_vm3, %v1466_v18, %v1468_v7  ;;  %v1660_v60 = vmul.f32 %v3513_v54, %v3575_v4  ;;  %v1661_v1 = vmul.f32 %v3513_v54, %v3581_v28  ;;  %v1662_v2 = vmul.f32 %v3513_v54, %v3585_v56 }
  0xb9   : > { %v2689_v9 = vld [vmem:[#allocation3 + $0x28] sm:$0xff]  ;;  %v1550_v10 = vadd.f32 %v1467_v8, %v1308_v63  ;;  %v1551_v11 = vadd.f32 %v1469_v34, %v1309_v6  ;;  %v1902_v46 = vmul.f32 %v3527_v37, %v3575_v4  ;;  %v1903_v47 = vmul.f32 %v3527_v37, %v3581_v28 }
  0xba   : > { %v1774_v3 = vrot.slane %v1660_v60, 1  ;;  %v1775_v16 = vrot.slane %v1661_v1, 1  ;;  %v1777_v33 = vrot.slane %v1662_v2, 1  ;;  %v1904_v62 = vmul.f32 %v3527_v37, %v3585_v56  ;;  %2669 = vmatmul.msk.bf16.gmra.mxu1 %vm318_vm0, %v2689_v9 }
  0xbb   : > { %v1617_v38 = vadd.f32 %v1585_v49, %v1550_v10  ;;  %v1618_v39 = vadd.f32 %v1586_v17, %v1551_v11  ;;  %v2016_v42 = vrot.slane %v1902_v46, 2  ;;  %v2017_v48 = vrot.slane %v1903_v47, 2 }
  0xbc   : > { %v1776_v21 = vsel %vm625_vm2, %v1774_v3, %v1775_v16  ;;  %v1778_v22 = vsel %vm625_vm2, %v1775_v16, %v1777_v33  ;;  %v2019_v25 = vrot.slane %v1904_v62, 2  ;;  %v314_v35 = vmax.f32 %v282_v15, 0.0 }
  0xbd   : > { %v1859_v27 = vadd.f32 %v1776_v21, %v1617_v38  ;;  %v1860_v40 = vadd.f32 %v1778_v22, %v1618_v39  ;;  %v2018_v36 = vsel %vm868_vm3, %v2016_v42, %v2017_v48  ;;  %v315_v59 = vmax.f32 %v283_v12, 0.0 }
  0xbe   : > { %v2020_v50 = vsel %vm868_vm3, %v2017_v48, %v2019_v25  ;;  %403 = vst.msk [vmem:[#allocation2 + $0x169] sm:$0xff] %vm318_vm0, %v314_v35  ;;  %v489_v13 = vmul.f32 %v3427_v51, %v3284_v23  ;;  %v490_v5 = vmul.f32 %v3427_v51, %v3289_v32  ;;  %v568_v45 = vmul.f32 %v3436_v31, %v3284_v23 }
  0xbf   : > { %v2101_v18 = vadd.f32 %v2018_v36, %v1859_v27  ;;  %v2102_v57 = vadd.f32 %v2020_v50, %v1860_v40  ;;  %404 = vst.msk [vmem:[#allocation2 + $0x171] sm:$0xff] %vm318_vm0, %v315_v59  ;;  %v569_v61 = vmul.f32 %v3436_v31, %v3289_v32  ;;  %v570_v7 = vmul.f32 %v3436_v31, %v3295_v52 }
  0xc0   : > { %v691_v49 = vrot.slane %v568_v45, 1  ;;  %v811_v63 = vmul.f32 %v3448_v58, %v3284_v23  ;;  %v812_v6 = vmul.f32 %v3448_v58, %v3289_v32  ;;  %v813_v8 = vmul.f32 %v3448_v58, %v3295_v52 }
  0xc1   : > { %v2133_v17 = vpack.c.bf16 %v2101_v18, %v2101_v18  ;;  %v2134_v34 = vpack.c.bf16 %v2102_v57, %v2102_v57  ;;  %v692_v60 = vrot.slane %v569_v61, 1  ;;  %v694_v1 = vrot.slane %v570_v7, 1 }
  0xc2   : > { %v934_v2 = vrot.slane %v811_v63, 2  ;;  %v935_v9 = vrot.slane %v812_v6, 2  ;;  %v937_v10 = vrot.slane %v813_v8, 2  ;;  %v1042_v11 = vmul.f32 %v3459_v14, %v3304_v0 }
  0xc3   : > { %2166 = vst.msk [vmem:[#allocation3 + $0x48] sm:$0xf] %vm2147_vm4, %v2133_v17  ;;  %v693_v23 = vsel %vm625_vm2, %v691_v49, %v692_v60  ;;  %v695_v46 = vsel %vm625_vm2, %v692_v60, %v694_v1  ;;  %v1043_v32 = vmul.f32 %v3459_v14, %v3315_v19  ;;  %v1121_v52 = vmul.f32 %v3471_v41, %v3304_v0 }
  0xc4   : > { %2167 = vst.msk [vmem:[#allocation3 + $0x4c] sm:$0xf] %vm2147_vm4, %v2134_v34  ;;  %v764_v47 = vadd.f32 %v693_v23, %v489_v13  ;;  %v765_v15 = vadd.f32 %v695_v46, %v490_v5  ;;  %v936_v3 = vsel %vm868_vm3, %v934_v2, %v935_v9  ;;  %v938_v16 = vsel %vm868_vm3, %v935_v9, %v937_v10  ;;  %v2748_v46 = vld [vmem:[#allocation2 + $0x30] sm:$0xff] }
  0xc5   : > { %v3644_v33 = vld [vmem:[#allocation2 + $0x168] sm:$0xff]  ;;  %v1122_v62 = vmul.f32 %v3471_v41, %v3315_v19  ;;  %v1123_v12 = vmul.f32 %v3471_v41, %v3323_v30  ;;  %v1243_v38 = vrot.slane %v1121_v52, 1  ;;  %v1363_v39 = vmul.f32 %v3487_v43, %v3304_v0 }
  0xc6   : > { %v3652_v42 = vld [vmem:[#allocation2 + $0x170] sm:$0xff]  ;;  %v1007_v48 = vadd.f32 %v936_v3, %v764_v47  ;;  %v1008_v21 = vadd.f32 %v938_v16, %v765_v15  ;;  %v1364_v22 = vmul.f32 %v3487_v43, %v3315_v19  ;;  %v1365_v25 = vmul.f32 %v3487_v43, %v3323_v30  ;;  %v3660_v59 = vld [vmem:[#allocation2 + $0x178] sm:$0x3] }
  0xc7   : > { %v1244_v35 = vrot.slane %v1122_v62, 1  ;;  %v1246_v27 = vrot.slane %v1123_v12, 1  ;;  %v1485_v40 = vrot.slane %v1363_v39, 2  ;;  %v1593_v36 = vmul.f32 %v3500_v55, %v3644_v33  ;;  %v2749_v12 = vld [vmem:[#allocation2 + $0x38] sm:$0xff] }
  0xc8   : > { %v1074_v50 = vadd.f32 %v1042_v11, %v1007_v48  ;;  %v1075_v0 = vadd.f32 %v1043_v32, %v1008_v21  ;;  %v1486_v13 = vrot.slane %v1364_v22, 2  ;;  %v1488_v5 = vrot.slane %v1365_v25, 2 }
  0xc9   : > { %v1245_v45 = vsel %vm625_vm2, %v1243_v38, %v1244_v35  ;;  %v1247_v18 = vsel %vm625_vm2, %v1244_v35, %v1246_v27  ;;  %v1594_v19 = vmul.f32 %v3500_v55, %v3652_v42  ;;  %v1672_v30 = vmul.f32 %v3513_v54, %v3644_v33  ;;  %v2750_v27 = vld [vmem:[#allocation2 + $0x40] sm:$0x3] }
  0xca   : > { %v1316_v57 = vadd.f32 %v1245_v45, %v1074_v50  ;;  %v1317_v61 = vadd.f32 %v1247_v18, %v1075_v0  ;;  %v1487_v7 = vsel %vm868_vm3, %v1485_v40, %v1486_v13  ;;  %v1489_v49 = vsel %vm868_vm3, %v1486_v13, %v1488_v5 }
  0xcb   : > { %v2693_v63 = vld [vmem:[#allocation3 + $0x48] sm:$0xff]  ;;  %v1673_v6 = vmul.f32 %v3513_v54, %v3652_v42  ;;  %v1674_v8 = vmul.f32 %v3513_v54, %v3660_v59  ;;  %v1794_v17 = vrot.slane %v1672_v30, 1  ;;  %v1914_v34 = vmul.f32 %v3527_v37, %v3644_v33 }
  0xcc   : > { %v1558_v60 = vadd.f32 %v1487_v7, %v1316_v57  ;;  %v1559_v1 = vadd.f32 %v1489_v49, %v1317_v61  ;;  %v1915_v2 = vmul.f32 %v3527_v37, %v3652_v42  ;;  %v1916_v9 = vmul.f32 %v3527_v37, %v3660_v59  ;;  %2673 = vmatmul.msk.bf16.gmra.mxu2 %vm318_vm0, %v2693_v63 }
  0xcd   : > { %v1795_v10 = vrot.slane %v1673_v6, 1  ;;  %v1797_v11 = vrot.slane %v1674_v8, 1  ;;  %v2036_v23 = vrot.slane %v1914_v34, 2  ;;  %v467_v32 = vmul.f32 %v2748_v46, %v3427_v51 }
  0xce   : > { %v1625_v52 = vadd.f32 %v1593_v36, %v1558_v60  ;;  %v1626_v47 = vadd.f32 %v1594_v19, %v1559_v1  ;;  %v2037_v15 = vrot.slane %v1915_v2, 2  ;;  %v2039_v3 = vrot.slane %v1916_v9, 2 }
  0xcf   : > { %v1796_v16 = vsel %vm625_vm2, %v1794_v17, %v1795_v10  ;;  %v1798_v62 = vsel %vm625_vm2, %v1795_v10, %v1797_v11  ;;  %v468_v38 = vmul.f32 %v2749_v12, %v3427_v51  ;;  %v535_v39 = vmul.f32 %v2748_v46, %v3436_v31 }
  0xd0   : > { %v1867_v48 = vadd.f32 %v1796_v16, %v1625_v52  ;;  %v1868_v21 = vadd.f32 %v1798_v62, %v1626_v47  ;;  %v2038_v22 = vsel %vm868_vm3, %v2036_v23, %v2037_v15  ;;  %v2040_v25 = vsel %vm868_vm3, %v2037_v15, %v2039_v3 }
  0xd1   : > { %v536_v35 = vmul.f32 %v2749_v12, %v3436_v31  ;;  %v537_v40 = vmul.f32 %v2750_v27, %v3436_v31  ;;  %v636_v36 = vrot.slane %v535_v39, 1  ;;  %v778_v50 = vmul.f32 %v2748_v46, %v3448_v58 }
  0xd2   : > { %v2109_v0 = vadd.f32 %v2038_v22, %v1867_v48  ;;  %v2110_v13 = vadd.f32 %v2040_v25, %v1868_v21  ;;  %v779_v5 = vmul.f32 %v2749_v12, %v3448_v58  ;;  %v780_v45 = vmul.f32 %v2750_v27, %v3448_v58  ;;  %v3715_v12 = vld [vmem:[#allocation2 + $0x60] sm:$0xff] }
  0xd3   : > { %v637_v18 = vrot.slane %v536_v35, 1  ;;  %v639_v19 = vrot.slane %v537_v40, 1  ;;  %v879_v30 = vrot.slane %v778_v50, 2  ;;  %v1020_v57 = vmul.f32 %v3459_v14, %v3384_v26 }
  0xd4   : > { %v2141_v61 = vpack.c.bf16 %v2109_v0, %v2109_v0  ;;  %v2142_v7 = vpack.c.bf16 %v2110_v13, %v2110_v13  ;;  %v880_v49 = vrot.slane %v779_v5, 2  ;;  %v882_v63 = vrot.slane %v780_v45, 2  ;;  %v3731_v13 = vld [vmem:[#allocation2 + $0x70] sm:$0x3] }
  0xd5   : > { %v638_v6 = vsel %vm625_vm2, %v636_v36, %v637_v18  ;;  %v640_v8 = vsel %vm625_vm2, %v637_v18, %v639_v19  ;;  %v1021_v17 = vmul.f32 %v3459_v14, %v3390_v44  ;;  %v1088_v34 = vmul.f32 %v3471_v41, %v3384_v26 }
  0xd6   : > { %2174 = vst.msk [vmem:[#allocation3 + $0x68] sm:$0xf] %vm2147_vm4, %v2141_v61  ;;  %v742_v60 = vadd.f32 %v638_v6, %v467_v32  ;;  %v743_v1 = vadd.f32 %v640_v8, %v468_v38  ;;  %v881_v2 = vsel %vm868_vm3, %v879_v30, %v880_v49  ;;  %v883_v9 = vsel %vm868_vm3, %v880_v49, %v882_v63  ;;  %v2754_v8 = vld [vmem:[#allocation2 + $0x90] sm:$0xff] }
  0xd7   : > { %2175 = vst.msk [vmem:[#allocation3 + $0x6c] sm:$0xf] %vm2147_vm4, %v2142_v7  ;;  %v1089_v10 = vmul.f32 %v3471_v41, %v3390_v44  ;;  %v1090_v11 = vmul.f32 %v3471_v41, %v3394_v29  ;;  %v1188_v23 = vrot.slane %v1088_v34, 1  ;;  %v1330_v46 = vmul.f32 %v3487_v43, %v3384_v26 }
  0xd8   : > { %v985_v52 = vadd.f32 %v881_v2, %v742_v60  ;;  %v986_v47 = vadd.f32 %v883_v9, %v743_v1  ;;  %v1331_v32 = vmul.f32 %v3487_v43, %v3390_v44  ;;  %v1332_v15 = vmul.f32 %v3487_v43, %v3394_v29  ;;  %v3721_v44 = vld [vmem:[#allocation2 + $0x68] sm:$0xff] }
  0xd9   : > { %v1189_v3 = vrot.slane %v1089_v10, 1  ;;  %v1191_v16 = vrot.slane %v1090_v11, 1  ;;  %v1430_v62 = vrot.slane %v1330_v46, 2  ;;  %v1571_v38 = vmul.f32 %v3715_v12, %v3500_v55  ;;  %v2755_v11 = vld [vmem:[#allocation2 + $0x98] sm:$0xff] }
  0xda   : > { %v1052_v39 = vadd.f32 %v1020_v57, %v985_v52  ;;  %v1053_v48 = vadd.f32 %v1021_v17, %v986_v47  ;;  %v1431_v21 = vrot.slane %v1331_v32, 2  ;;  %v1433_v26 = vrot.slane %v1332_v15, 2 }
  0xdb   : > { %v1190_v22 = vsel %vm625_vm2, %v1188_v23, %v1189_v3  ;;  %v1192_v25 = vsel %vm625_vm2, %v1189_v3, %v1191_v16  ;;  %v1572_v29 = vmul.f32 %v3721_v44, %v3500_v55  ;;  %v1639_v35 = vmul.f32 %v3715_v12, %v3513_v54  ;;  %v2756_v16 = vld [vmem:[#allocation2 + $0xa0] sm:$0x3] }
  0xdc   : > { %v1294_v27 = vadd.f32 %v1190_v22, %v1052_v39  ;;  %v1295_v40 = vadd.f32 %v1192_v25, %v1053_v48  ;;  %v1432_v36 = vsel %vm868_vm3, %v1430_v62, %v1431_v21  ;;  %v1434_v50 = vsel %vm868_vm3, %v1431_v21, %v1433_v26 }
  0xdd   : > { %v1640_v0 = vmul.f32 %v3721_v44, %v3513_v54  ;;  %v1641_v5 = vmul.f32 %v3731_v13, %v3513_v54  ;;  %v1739_v45 = vrot.slane %v1639_v35, 1  ;;  %v1881_v18 = vmul.f32 %v3715_v12, %v3527_v37 }
  0xde   : > { %v2697_v19 = vld [vmem:[#allocation3 + $0x68] sm:$0xff]  ;;  %v1536_v30 = vadd.f32 %v1432_v36, %v1294_v27  ;;  %v1537_v57 = vadd.f32 %v1434_v50, %v1295_v40  ;;  %v1882_v61 = vmul.f32 %v3721_v44, %v3527_v37  ;;  %v1883_v7 = vmul.f32 %v3731_v13, %v3527_v37 }
  0xdf   : > { %v1740_v49 = vrot.slane %v1640_v0, 1  ;;  %v1742_v63 = vrot.slane %v1641_v5, 1  ;;  %v1981_v6 = vrot.slane %v1881_v18, 2  ;;  %v475_v17 = vmul.f32 %v2754_v8, %v3427_v51  ;;  %2677 = vmatmul.msk.bf16.gmra.mxu3 %vm318_vm0, %v2697_v19 }
  0xe0   : > { %v1603_v34 = vadd.f32 %v1571_v38, %v1536_v30  ;;  %v1604_v60 = vadd.f32 %v1572_v29, %v1537_v57  ;;  %v1982_v1 = vrot.slane %v1882_v61, 2  ;;  %v1984_v2 = vrot.slane %v1883_v7, 2 }
  0xe1   : > { %v1741_v9 = vsel %vm625_vm2, %v1739_v45, %v1740_v49  ;;  %v1743_v10 = vsel %vm625_vm2, %v1740_v49, %v1742_v63  ;;  %v476_v23 = vmul.f32 %v2755_v11, %v3427_v51  ;;  %v547_v46 = vmul.f32 %v2754_v8, %v3436_v31 }
  0xe2   : > { %v1845_v52 = vadd.f32 %v1741_v9, %v1603_v34  ;;  %v1846_v47 = vadd.f32 %v1743_v10, %v1604_v60  ;;  %v1983_v32 = vsel %vm868_vm3, %v1981_v6, %v1982_v1  ;;  %v1985_v15 = vsel %vm868_vm3, %v1982_v1, %v1984_v2 }
  0xe3   : > { %v548_v3 = vmul.f32 %v2755_v11, %v3436_v31  ;;  %v549_v62 = vmul.f32 %v2756_v16, %v3436_v31  ;;  %v656_v38 = vrot.slane %v547_v46, 1  ;;  %v790_v39 = vmul.f32 %v2754_v8, %v3448_v58 }
  0xe4   : > { %v2087_v48 = vadd.f32 %v1983_v32, %v1845_v52  ;;  %v2088_v21 = vadd.f32 %v1985_v15, %v1846_v47  ;;  %v791_v26 = vmul.f32 %v2755_v11, %v3448_v58  ;;  %v792_v22 = vmul.f32 %v2756_v16, %v3448_v58  ;;  %v3776_v11 = vld [vmem:[#allocation2 + $0xc0] sm:$0xff] }
  0xe5   : > { %v657_v25 = vrot.slane %v548_v3, 1  ;;  %v659_v29 = vrot.slane %v549_v62, 1  ;;  %v899_v35 = vrot.slane %v790_v39, 2  ;;  %v1028_v27 = vmul.f32 %v3459_v14, %v3478_v20 }
  0xe6   : > { %v2119_v40 = vpack.c.bf16 %v2087_v48, %v2087_v48  ;;  %v2120_v36 = vpack.c.bf16 %v2088_v21, %v2088_v21  ;;  %v900_v50 = vrot.slane %v791_v26, 2  ;;  %v902_v0 = vrot.slane %v792_v22, 2  ;;  %v3792_v21 = vld [vmem:[#allocation2 + $0xd0] sm:$0x3] }
  0xe7   : > { %v658_v5 = vsel %vm625_vm2, %v656_v38, %v657_v25  ;;  %v660_v45 = vsel %vm625_vm2, %v657_v25, %v659_v29  ;;  %v1029_v18 = vmul.f32 %v3459_v14, %v3491_v24  ;;  %v1100_v19 = vmul.f32 %v3471_v41, %v3478_v20 }
  0xe8   : > { %2152 = vst.msk [vmem:[#allocation3 + $0x10] sm:$0xf] %vm2147_vm4, %v2119_v40  ;;  %v750_v30 = vadd.f32 %v658_v5, %v475_v17  ;;  %v751_v57 = vadd.f32 %v660_v45, %v476_v23  ;;  %v901_v61 = vsel %vm868_vm3, %v899_v35, %v900_v50  ;;  %v903_v7 = vsel %vm868_vm3, %v900_v50, %v902_v0  ;;  %v2760_v45 = vld [vmem:[#allocation2 + $0xf0] sm:$0xff] }
  0xe9   : > { %2153 = vst.msk [vmem:[#allocation3 + $0x14] sm:$0xf] %vm2147_vm4, %v2120_v36  ;;  %v1101_v49 = vmul.f32 %v3471_v41, %v3491_v24  ;;  %v1102_v63 = vmul.f32 %v3471_v41, %v3504_v53  ;;  %v1208_v6 = vrot.slane %v1100_v19, 1  ;;  %v1342_v8 = vmul.f32 %v3487_v43, %v3478_v20 }
  0xea   : > { %v993_v34 = vadd.f32 %v901_v61, %v750_v30  ;;  %v994_v60 = vadd.f32 %v903_v7, %v751_v57  ;;  %v1343_v17 = vmul.f32 %v3487_v43, %v3491_v24  ;;  %v1344_v1 = vmul.f32 %v3487_v43, %v3504_v53  ;;  %v3782_v24 = vld [vmem:[#allocation2 + $0xc8] sm:$0xff] }
  0xeb   : > { %v1209_v2 = vrot.slane %v1101_v49, 1  ;;  %v1211_v9 = vrot.slane %v1102_v63, 1  ;;  %v1450_v10 = vrot.slane %v1342_v8, 2  ;;  %v1579_v23 = vmul.f32 %v3776_v11, %v3500_v55  ;;  %v2761_v63 = vld [vmem:[#allocation2 + $0xf8] sm:$0xff] }
  0xec   : > { %v1060_v46 = vadd.f32 %v1028_v27, %v993_v34  ;;  %v1061_v52 = vadd.f32 %v1029_v18, %v994_v60  ;;  %v1451_v47 = vrot.slane %v1343_v17, 2  ;;  %v1453_v20 = vrot.slane %v1344_v1, 2 }
  0xed   : > { %v1210_v32 = vsel %vm625_vm2, %v1208_v6, %v1209_v2  ;;  %v1212_v15 = vsel %vm625_vm2, %v1209_v2, %v1211_v9  ;;  %v1580_v53 = vmul.f32 %v3782_v24, %v3500_v55  ;;  %v1651_v3 = vmul.f32 %v3776_v11, %v3513_v54  ;;  %v2762_v9 = vld [vmem:[#allocation2 + $0x100] sm:$0x3] }
  0xee   : > { %v1302_v16 = vadd.f32 %v1210_v32, %v1060_v46  ;;  %v1303_v62 = vadd.f32 %v1212_v15, %v1061_v52  ;;  %v1452_v38 = vsel %vm868_vm3, %v1450_v10, %v1451_v47  ;;  %v1454_v39 = vsel %vm868_vm3, %v1451_v47, %v1453_v20 }
  0xef   : > { %v1652_v48 = vmul.f32 %v3782_v24, %v3513_v54  ;;  %v1653_v26 = vmul.f32 %v3792_v21, %v3513_v54  ;;  %v1759_v22 = vrot.slane %v1651_v3, 1  ;;  %v1893_v25 = vmul.f32 %v3776_v11, %v3527_v37 }
  0xf0   : > { %v2686_v29 = vld [vmem:[#allocation3 + $0x10] sm:$0xff]  ;;  %v1544_v35 = vadd.f32 %v1452_v38, %v1302_v16  ;;  %v1545_v27 = vadd.f32 %v1454_v39, %v1303_v62  ;;  %v1894_v40 = vmul.f32 %v3782_v24, %v3527_v37  ;;  %v1895_v36 = vmul.f32 %v3792_v21, %v3527_v37 }
  0xf1   : > { %v1760_v50 = vrot.slane %v1652_v48, 1  ;;  %v1762_v0 = vrot.slane %v1653_v26, 1  ;;  %v2001_v5 = vrot.slane %v1893_v25, 2  ;;  %v483_v18 = vmul.f32 %v2760_v45, %v3427_v51  ;;  %2666 = vmatmul.msk.bf16.gmra.mxu0 %vm318_vm0, %v2686_v29 }
  0xf2   : > { %v1611_v19 = vadd.f32 %v1579_v23, %v1544_v35  ;;  %v1612_v30 = vadd.f32 %v1580_v53, %v1545_v27  ;;  %v2002_v57 = vrot.slane %v1894_v40, 2  ;;  %v2004_v61 = vrot.slane %v1895_v36, 2 }
  0xf3   : > { %v1761_v7 = vsel %vm625_vm2, %v1759_v22, %v1760_v50  ;;  %v1763_v49 = vsel %vm625_vm2, %v1760_v50, %v1762_v0  ;;  %v484_v6 = vmul.f32 %v2761_v63, %v3427_v51  ;;  %v559_v8 = vmul.f32 %v2760_v45, %v3436_v31 }
  0xf4   : > { %v1853_v34 = vadd.f32 %v1761_v7, %v1611_v19  ;;  %v1854_v60 = vadd.f32 %v1763_v49, %v1612_v30  ;;  %v2003_v17 = vsel %vm868_vm3, %v2001_v5, %v2002_v57  ;;  %v2005_v1 = vsel %vm868_vm3, %v2002_v57, %v2004_v61 }
  0xf5   : > { %v560_v2 = vmul.f32 %v2761_v63, %v3436_v31  ;;  %v561_v10 = vmul.f32 %v2762_v9, %v3436_v31  ;;  %v676_v23 = vrot.slane %v559_v8, 1  ;;  %v802_v46 = vmul.f32 %v2760_v45, %v3448_v58 }
  0xf6   : > { %v2095_v52 = vadd.f32 %v2003_v17, %v1853_v34  ;;  %v2096_v47 = vadd.f32 %v2005_v1, %v1854_v60  ;;  %v803_v20 = vmul.f32 %v2761_v63, %v3448_v58  ;;  %v804_v32 = vmul.f32 %v2762_v9, %v3448_v58  ;;  %v3837_v63 = vld [vmem:[#allocation2 + $0x120] sm:$0xff]  ;;  %v3843_v1 = vld [vmem:[#allocation2 + $0x128] sm:$0xff] }
  0xf7   : > { %v677_v15 = vrot.slane %v560_v2, 1  ;;  %v679_v53 = vrot.slane %v561_v10, 1  ;;  %v919_v3 = vrot.slane %v802_v46, 2  ;;  %v1036_v16 = vmul.f32 %v3459_v14, %v3575_v4 }
  0xf8   : > { %v2127_v62 = vpack.c.bf16 %v2095_v52, %v2095_v52  ;;  %v2128_v38 = vpack.c.bf16 %v2096_v47, %v2096_v47  ;;  %v920_v39 = vrot.slane %v803_v20, 2  ;;  %v922_v48 = vrot.slane %v804_v32, 2  ;;  %v284_v52 = vld [vmem:[%s2896_s28 + $0xf0] sm:$0xff] }
  0xf9   : > { %v678_v26 = vsel %vm625_vm2, %v676_v23, %v677_v15  ;;  %v680_v22 = vsel %vm625_vm2, %v677_v15, %v679_v53  ;;  %v1037_v25 = vmul.f32 %v3459_v14, %v3581_v28  ;;  %v1112_v29 = vmul.f32 %v3471_v41, %v3575_v4  ;;  %v3854_v20 = vld [vmem:[#allocation2 + $0x130] sm:$0x3] }
  0xfa   : > { %2160 = vst.msk [vmem:[#allocation3 + $0x30] sm:$0xf] %vm2147_vm4, %v2127_v62  ;;  %v758_v35 = vadd.f32 %v678_v26, %v483_v18  ;;  %v759_v27 = vadd.f32 %v680_v22, %v484_v6  ;;  %v921_v40 = vsel %vm868_vm3, %v919_v3, %v920_v39  ;;  %v923_v36 = vsel %vm868_vm3, %v920_v39, %v922_v48  ;;  %v285_v48 = vld [vmem:[%s2896_s28 + $0xf8] sm:$0xff] }
  0xfb   : > { %2161 = vst.msk [vmem:[#allocation3 + $0x34] sm:$0xf] %vm2147_vm4, %v2128_v38  ;;  %v1113_v50 = vmul.f32 %v3471_v41, %v3581_v28  ;;  %v1114_v0 = vmul.f32 %v3471_v41, %v3585_v56  ;;  %v1228_v5 = vrot.slane %v1112_v29, 1  ;;  %v1354_v45 = vmul.f32 %v3487_v43, %v3575_v4 }
  0xfc   : > { %v1001_v19 = vadd.f32 %v921_v40, %v758_v35  ;;  %v1002_v30 = vadd.f32 %v923_v36, %v759_v27  ;;  %v1355_v18 = vmul.f32 %v3487_v43, %v3581_v28  ;;  %v1356_v57 = vmul.f32 %v3487_v43, %v3585_v56 }
  0xfd   : > { %v1229_v61 = vrot.slane %v1113_v50, 1  ;;  %v1231_v7 = vrot.slane %v1114_v0, 1  ;;  %v1470_v49 = vrot.slane %v1354_v45, 2  ;;  %v1587_v6 = vmul.f32 %v3837_v63, %v3500_v55  ;;  %v2766_v45 = vld [vmem:[#allocation2 + $0x150] sm:$0xff] }
  0xfe   : > { %v1068_v8 = vadd.f32 %v1036_v16, %v1001_v19  ;;  %v1069_v34 = vadd.f32 %v1037_v25, %v1002_v30  ;;  %v1471_v4 = vrot.slane %v1355_v18, 2  ;;  %v1473_v60 = vrot.slane %v1356_v57, 2 }
  0xff   : > { %v1230_v17 = vsel %vm625_vm2, %v1228_v5, %v1229_v61  ;;  %v1232_v28 = vsel %vm625_vm2, %v1229_v61, %v1231_v7  ;;  %v1588_v56 = vmul.f32 %v3843_v1, %v3500_v55  ;;  %v1663_v2 = vmul.f32 %v3837_v63, %v3513_v54  ;;  %v2767_v7 = vld [vmem:[#allocation2 + $0x158] sm:$0xff] }
 0x100   : > { %v1310_v9 = vadd.f32 %v1230_v17, %v1068_v8  ;;  %v1311_v10 = vadd.f32 %v1232_v28, %v1069_v34  ;;  %v1472_v23 = vsel %vm868_vm3, %v1470_v49, %v1471_v4  ;;  %v1474_v46 = vsel %vm868_vm3, %v1471_v4, %v1473_v60  ;;  %v2768_v34 = vld [vmem:[#allocation2 + $0x160] sm:$0x3] }
 0x101   : > { %v1664_v47 = vmul.f32 %v3843_v1, %v3513_v54  ;;  %v1665_v32 = vmul.f32 %v3854_v20, %v3513_v54  ;;  %v1779_v15 = vrot.slane %v1663_v2, 1  ;;  %v1905_v53 = vmul.f32 %v3837_v63, %v3527_v37 }
 0x102   : > { %v2690_v3 = vld [vmem:[#allocation3 + $0x30] sm:$0xff]  ;;  %v1552_v16 = vadd.f32 %v1472_v23, %v1310_v9  ;;  %v1553_v62 = vadd.f32 %v1474_v46, %v1311_v10  ;;  %v1906_v38 = vmul.f32 %v3843_v1, %v3527_v37  ;;  %v1907_v39 = vmul.f32 %v3854_v20, %v3527_v37 }
 0x103   : > { %v1780_v26 = vrot.slane %v1664_v47, 1  ;;  %v1782_v22 = vrot.slane %v1665_v32, 1  ;;  %v2021_v25 = vrot.slane %v1905_v53, 2  ;;  %v316_v29 = vmax.f32 %v284_v52, 0.0  ;;  %2670 = vmatmul.msk.bf16.gmra.mxu1 %vm318_vm0, %v2690_v3 }
 0x104   : > { %v1619_v35 = vadd.f32 %v1587_v6, %v1552_v16  ;;  %v1620_v27 = vadd.f32 %v1588_v56, %v1553_v62  ;;  %v2022_v40 = vrot.slane %v1906_v38, 2  ;;  %v2024_v36 = vrot.slane %v1907_v39, 2 }
 0x105   : > { %v1781_v50 = vsel %vm625_vm2, %v1779_v15, %v1780_v26  ;;  %v1783_v0 = vsel %vm625_vm2, %v1780_v26, %v1782_v22  ;;  %v317_v5 = vmax.f32 %v285_v48, 0.0  ;;  %405 = vst.msk [vmem:[#allocation2 + $0x181] sm:$0xff] %vm318_vm0, %v316_v29  ;;  %v491_v19 = vmul.f32 %v2766_v45, %v3427_v51 }
 0x106   : > { %v1861_v30 = vadd.f32 %v1781_v50, %v1619_v35  ;;  %v1862_v18 = vadd.f32 %v1783_v0, %v1620_v27  ;;  %v2023_v57 = vsel %vm868_vm3, %v2021_v25, %v2022_v40  ;;  %v2025_v61 = vsel %vm868_vm3, %v2022_v40, %v2024_v36 }
 0x107   : > { %406 = vst.msk [vmem:[#allocation2 + $0x189] sm:$0xff] %vm318_vm0, %v317_v5  ;;  %v492_v49 = vmul.f32 %v2767_v7, %v3427_v51  ;;  %v571_v6 = vmul.f32 %v2766_v45, %v3436_v31  ;;  %v572_v8 = vmul.f32 %v2767_v7, %v3436_v31  ;;  %v573_v4 = vmul.f32 %v2768_v34, %v3436_v31 }
 0x108   : > { %v2103_v60 = vadd.f32 %v2023_v57, %v1861_v30  ;;  %v2104_v17 = vadd.f32 %v2025_v61, %v1862_v18  ;;  %v814_v28 = vmul.f32 %v2766_v45, %v3448_v58  ;;  %v815_v56 = vmul.f32 %v2767_v7, %v3448_v58 }
 0x109   : > { %v696_v2 = vrot.slane %v571_v6, 1  ;;  %v697_v9 = vrot.slane %v572_v8, 1  ;;  %v699_v10 = vrot.slane %v573_v4, 1  ;;  %v816_v23 = vmul.f32 %v2768_v34, %v3448_v58 }
 0x10a   : > { %v2135_v46 = vpack.c.bf16 %v2103_v60, %v2103_v60  ;;  %v2136_v51 = vpack.c.bf16 %v2104_v17, %v2104_v17  ;;  %v939_v52 = vrot.slane %v814_v28, 2  ;;  %v940_v47 = vrot.slane %v815_v56, 2 }
 0x10b   : > { %v698_v32 = vsel %vm625_vm2, %v696_v2, %v697_v9  ;;  %v700_v15 = vsel %vm625_vm2, %v697_v9, %v699_v10  ;;  %v942_v31 = vrot.slane %v816_v23, 2  ;;  %v1044_v53 = vmul.f32 %v3459_v14, %v3644_v33 }
 0x10c   : > { %2168 = vst.msk [vmem:[#allocation3 + $0x50] sm:$0xf] %vm2147_vm4, %v2135_v46  ;;  %v766_v3 = vadd.f32 %v698_v32, %v491_v19  ;;  %v767_v16 = vadd.f32 %v700_v15, %v492_v49  ;;  %v941_v62 = vsel %vm868_vm3, %v939_v52, %v940_v47  ;;  %v1045_v58 = vmul.f32 %v3459_v14, %v3652_v42  ;;  %v3896_v22 = vld [vmem:[#allocation2 + $0x180] sm:$0xff] }
 0x10d   : > { %2169 = vst.msk [vmem:[#allocation3 + $0x54] sm:$0xf] %vm2147_vm4, %v2136_v51  ;;  %v943_v38 = vsel %vm868_vm3, %v940_v47, %v942_v31  ;;  %v1124_v39 = vmul.f32 %v3471_v41, %v3644_v33  ;;  %v1125_v48 = vmul.f32 %v3471_v41, %v3652_v42  ;;  %v1126_v26 = vmul.f32 %v3471_v41, %v3660_v59  ;;  %v3934_v15 = vld [vmem:[%s4299_s1] ss:$0 sm:$0xff]  ;;  %v2770_v31 = vld [vmem:[#allocation2 + $0x48] sm:$0xff] }
 0x10e   : > { %v1009_v25 = vadd.f32 %v941_v62, %v766_v3  ;;  %v1010_v29 = vadd.f32 %v943_v38, %v767_v16  ;;  %v1366_v14 = vmul.f32 %v3487_v43, %v3644_v33  ;;  %v1367_v35 = vmul.f32 %v3487_v43, %v3652_v42  ;;  %v3902_v27 = vld [vmem:[#allocation2 + $0x188] sm:$0xff]  ;;  %v3906_v5 = vld [vmem:[#allocation2 + $0x190] sm:$0x3] }
 0x10f   : > { %v1248_v40 = vrot.slane %v1124_v39, 1  ;;  %v1249_v36 = vrot.slane %v1125_v48, 1  ;;  %v1251_v50 = vrot.slane %v1126_v26, 1  ;;  %v1368_v0 = vmul.f32 %v3487_v43, %v3660_v59  ;;  %v2771_v62 = vld [vmem:[#allocation2 + $0x50] sm:$0xff]  ;;  %v3943_v39 = vld [vmem:[%s4299_s1 + $0x1] ss:$0 sm:$0xff] }
 0x110   : > { %v1076_v41 = vadd.f32 %v1044_v53, %v1009_v25  ;;  %v1077_v45 = vadd.f32 %v1045_v58, %v1010_v29  ;;  %v1490_v19 = vrot.slane %v1366_v14, 2  ;;  %v1491_v30 = vrot.slane %v1367_v35, 2  ;;  %v2773_v25 = vld [vmem:[#allocation2 + $0x58] sm:$0x3] }
 0x111   : > { %v1250_v18 = vsel %vm625_vm2, %v1248_v40, %v1249_v36  ;;  %v1252_v33 = vsel %vm625_vm2, %v1249_v36, %v1251_v50  ;;  %v1493_v57 = vrot.slane %v1368_v0, 2  ;;  %v1595_v42 = vmul.f32 %v3500_v55, %v3896_v22  ;;  %v3951_v40 = vld [vmem:[%s4299_s1 + $0x2] ss:$0 sm:$0xff] }
 0x112   : > { %v1318_v61 = vadd.f32 %v1250_v18, %v1076_v41  ;;  %v1319_v7 = vadd.f32 %v1252_v33, %v1077_v45  ;;  %v1492_v49 = vsel %vm868_vm3, %v1490_v19, %v1491_v30  ;;  %v1596_v43 = vmul.f32 %v3500_v55, %v3902_v27 }
 0x113   : > { %v1494_v59 = vsel %vm868_vm3, %v1491_v30, %v1493_v57  ;;  %v1675_v6 = vmul.f32 %v3513_v54, %v3896_v22  ;;  %v1676_v8 = vmul.f32 %v3513_v54, %v3902_v27  ;;  %v1677_v34 = vmul.f32 %v3513_v54, %v3906_v5 }
 0x114   : > { %v2694_v4 = vld [vmem:[#allocation3 + $0x50] sm:$0xff]  ;;  %v1560_v60 = vadd.f32 %v1492_v49, %v1318_v61  ;;  %v1561_v17 = vadd.f32 %v1494_v59, %v1319_v7  ;;  %v1917_v28 = vmul.f32 %v3527_v37, %v3896_v22  ;;  %v1918_v55 = vmul.f32 %v3527_v37, %v3902_v27 }
 0x115   : > { %v1799_v56 = vrot.slane %v1675_v6, 1  ;;  %v1800_v2 = vrot.slane %v1676_v8, 1  ;;  %v1802_v9 = vrot.slane %v1677_v34, 1  ;;  %v1919_v10 = vmul.f32 %v3527_v37, %v3906_v5  ;;  %2674 = vmatmul.msk.bf16.gmra.mxu2 %vm318_vm0, %v2694_v4  ;;  %v3961_v49 = vld [vmem:[%s4299_s1 + $0x4] ss:$0 sm:$0xff] }
 0x116   : > { %v1627_v23 = vadd.f32 %v1595_v42, %v1560_v60  ;;  %v1628_v46 = vadd.f32 %v1596_v43, %v1561_v17  ;;  %v2041_v54 = vrot.slane %v1917_v28, 2  ;;  %v2042_v51 = vrot.slane %v1918_v55, 2  ;;  %v3974_v60 = vld [vmem:[%s4299_s1 + $0x5] ss:$0 sm:$0xff] }
 0x117   : > { %v1801_v52 = vsel %vm625_vm2, %v1799_v56, %v1800_v2  ;;  %v1803_v47 = vsel %vm625_vm2, %v1800_v2, %v1802_v9  ;;  %v2044_v32 = vrot.slane %v1919_v10, 2  ;;  %v469_v53 = vmul.f32 %v2770_v31, %v3934_v15  ;;  %v3985_v9 = vld [vmem:[%s4299_s1 + $0x6] ss:$0 sm:$0xff] }
 0x118   : > { %v1869_v37 = vadd.f32 %v1801_v52, %v1627_v23  ;;  %v1870_v3 = vadd.f32 %v1803_v47, %v1628_v46  ;;  %v2043_v16 = vsel %vm868_vm3, %v2041_v54, %v2042_v51  ;;  %v470_v58 = vmul.f32 %v2771_v62, %v3934_v15 }
 0x119   : > { %v2045_v38 = vsel %vm868_vm3, %v2042_v51, %v2044_v32  ;;  %v538_v48 = vmul.f32 %v3943_v39, %v2770_v31  ;;  %v539_v26 = vmul.f32 %v3943_v39, %v2771_v62  ;;  %v540_v29 = vmul.f32 %v2773_v25, %v3943_v39 }
 0x11a   : > { %v2111_v14 = vadd.f32 %v2043_v16, %v1869_v37  ;;  %v2112_v35 = vadd.f32 %v2045_v38, %v1870_v3  ;;  %v781_v36 = vmul.f32 %v3951_v40, %v2770_v31  ;;  %v782_v50 = vmul.f32 %v3951_v40, %v2771_v62 }
 0x11b   : > { %v641_v0 = vrot.slane %v538_v48, 1  ;;  %v642_v41 = vrot.slane %v539_v26, 1  ;;  %v644_v45 = vrot.slane %v540_v29, 1  ;;  %v783_v19 = vmul.f32 %v3951_v40, %v2773_v25  ;;  %v2780_v48 = vld [vmem:[#allocation2 + $0x80] sm:$0xff]  ;;  %v4007_v29 = vld [vmem:[%s4299_s1 + $0x9] ss:$0 sm:$0xff] }
 0x11c   : > { %v2143_v30 = vpack.c.bf16 %v2111_v14, %v2111_v14  ;;  %v2144_v18 = vpack.c.bf16 %v2112_v35, %v2112_v35  ;;  %v884_v33 = vrot.slane %v781_v36, 2  ;;  %v885_v57 = vrot.slane %v782_v50, 2  ;;  %v2782_v36 = vld [vmem:[#allocation2 + $0x88] sm:$0x3] }
 0x11d   : > { %v643_v42 = vsel %vm625_vm2, %v641_v0, %v642_v41  ;;  %v645_v61 = vsel %vm625_vm2, %v642_v41, %v644_v45  ;;  %v887_v7 = vrot.slane %v783_v19, 2  ;;  %v1022_v43 = vmul.f32 %v3961_v49, %v3715_v12  ;;  %v4015_v19 = vld [vmem:[%s4299_s1 + $0xa] ss:$0 sm:$0xff] }
 0x11e   : > { %2176 = vst.msk [vmem:[#allocation3 + $0x70] sm:$0xf] %vm2147_vm4, %v2143_v30  ;;  %v744_v59 = vadd.f32 %v643_v42, %v469_v53  ;;  %v745_v6 = vadd.f32 %v645_v61, %v470_v58  ;;  %v886_v8 = vsel %vm868_vm3, %v884_v33, %v885_v57  ;;  %v1023_v34 = vmul.f32 %v3961_v49, %v3721_v44 }
 0x11f   : > { %2177 = vst.msk [vmem:[#allocation3 + $0x74] sm:$0xf] %vm2147_vm4, %v2144_v18  ;;  %v888_v4 = vsel %vm868_vm3, %v885_v57, %v887_v7  ;;  %v1091_v17 = vmul.f32 %v3974_v60, %v3715_v12  ;;  %v1092_v28 = vmul.f32 %v3974_v60, %v3721_v44  ;;  %v1093_v55 = vmul.f32 %v3974_v60, %v3731_v13 }
 0x120   : > { %v987_v56 = vadd.f32 %v886_v8, %v744_v59  ;;  %v988_v2 = vadd.f32 %v888_v4, %v745_v6  ;;  %v1333_v10 = vmul.f32 %v3985_v9, %v3715_v12  ;;  %v1334_v23 = vmul.f32 %v3985_v9, %v3721_v44  ;;  %v3998_v12 = vld [vmem:[%s4299_s1 + $0x8] ss:$0 sm:$0xff]  ;;  %v2779_v44 = vld [vmem:[#allocation2 + $0x78] sm:$0xff] }
 0x121   : > { %v1193_v46 = vrot.slane %v1091_v17, 1  ;;  %v1194_v54 = vrot.slane %v1092_v28, 1  ;;  %v1196_v51 = vrot.slane %v1093_v55, 1  ;;  %v1335_v52 = vmul.f32 %v3985_v9, %v3731_v13  ;;  %v2784_v17 = vld [vmem:[#allocation2 + $0xa8] sm:$0xff] }
 0x122   : > { %v1054_v47 = vadd.f32 %v1022_v43, %v987_v56  ;;  %v1055_v32 = vadd.f32 %v1023_v34, %v988_v2  ;;  %v1435_v31 = vrot.slane %v1333_v10, 2  ;;  %v1436_v53 = vrot.slane %v1334_v23, 2  ;;  %v2785_v10 = vld [vmem:[#allocation2 + $0xb0] sm:$0xff] }
 0x123   : > { %v1195_v37 = vsel %vm625_vm2, %v1193_v46, %v1194_v54  ;;  %v1197_v3 = vsel %vm625_vm2, %v1194_v54, %v1196_v51  ;;  %v1438_v16 = vrot.slane %v1335_v52, 2  ;;  %v1573_v62 = vmul.f32 %v2779_v44, %v3998_v12  ;;  %v2786_v52 = vld [vmem:[#allocation2 + $0xb8] sm:$0x3] }
 0x124   : > { %v1296_v58 = vadd.f32 %v1195_v37, %v1054_v47  ;;  %v1297_v38 = vadd.f32 %v1197_v3, %v1055_v32  ;;  %v1437_v13 = vsel %vm868_vm3, %v1435_v31, %v1436_v53  ;;  %v1574_v26 = vmul.f32 %v2780_v48, %v3998_v12 }
 0x125   : > { %v1439_v25 = vsel %vm868_vm3, %v1436_v53, %v1438_v16  ;;  %v1642_v14 = vmul.f32 %v4007_v29, %v2779_v44  ;;  %v1643_v35 = vmul.f32 %v4007_v29, %v2780_v48  ;;  %v1644_v50 = vmul.f32 %v2782_v36, %v4007_v29 }
 0x126   : > { %v2698_v0 = vld [vmem:[#allocation3 + $0x70] sm:$0xff]  ;;  %v1538_v41 = vadd.f32 %v1437_v13, %v1296_v58  ;;  %v1539_v45 = vadd.f32 %v1439_v25, %v1297_v38  ;;  %v1884_v30 = vmul.f32 %v4015_v19, %v2779_v44  ;;  %v1885_v18 = vmul.f32 %v4015_v19, %v2780_v48 }
 0x127   : > { %v1744_v33 = vrot.slane %v1642_v14, 1  ;;  %v1745_v57 = vrot.slane %v1643_v35, 1  ;;  %v1747_v42 = vrot.slane %v1644_v50, 1  ;;  %v1886_v61 = vmul.f32 %v4015_v19, %v2782_v36  ;;  %2678 = vmatmul.msk.bf16.gmra.mxu3 %vm318_vm0, %v2698_v0 }
 0x128   : > { %v1605_v7 = vadd.f32 %v1573_v62, %v1538_v41  ;;  %v1606_v43 = vadd.f32 %v1574_v26, %v1539_v45  ;;  %v1986_v59 = vrot.slane %v1884_v30, 2  ;;  %v1987_v6 = vrot.slane %v1885_v18, 2 }
 0x129   : > { %v1746_v8 = vsel %vm625_vm2, %v1744_v33, %v1745_v57  ;;  %v1748_v34 = vsel %vm625_vm2, %v1745_v57, %v1747_v42  ;;  %v1989_v4 = vrot.slane %v1886_v61, 2  ;;  %v477_v28 = vmul.f32 %v2784_v17, %v3934_v15 }
 0x12a   : > { %v1847_v55 = vadd.f32 %v1746_v8, %v1605_v7  ;;  %v1848_v56 = vadd.f32 %v1748_v34, %v1606_v43  ;;  %v1988_v2 = vsel %vm868_vm3, %v1986_v59, %v1987_v6  ;;  %v478_v23 = vmul.f32 %v2785_v10, %v3934_v15 }
 0x12b   : > { %v1990_v46 = vsel %vm868_vm3, %v1987_v6, %v1989_v4  ;;  %v550_v54 = vmul.f32 %v2784_v17, %v3943_v39  ;;  %v551_v51 = vmul.f32 %v2785_v10, %v3943_v39  ;;  %v552_v47 = vmul.f32 %v2786_v52, %v3943_v39 }
 0x12c   : > { %v2089_v32 = vadd.f32 %v1988_v2, %v1847_v55  ;;  %v2090_v31 = vadd.f32 %v1990_v46, %v1848_v56  ;;  %v793_v53 = vmul.f32 %v2784_v17, %v3951_v40  ;;  %v794_v37 = vmul.f32 %v2785_v10, %v3951_v40  ;;  %v2787_v10 = vld [vmem:[#allocation2 + $0xd8] sm:$0xff] }
 0x12d   : > { %v661_v3 = vrot.slane %v550_v54, 1  ;;  %v662_v16 = vrot.slane %v551_v51, 1  ;;  %v664_v44 = vrot.slane %v552_v47, 1  ;;  %v795_v62 = vmul.f32 %v2786_v52, %v3951_v40  ;;  %v2788_v54 = vld [vmem:[#allocation2 + $0xe0] sm:$0xff] }
 0x12e   : > { %v2121_v58 = vpack.c.bf16 %v2089_v32, %v2089_v32  ;;  %v2122_v38 = vpack.c.bf16 %v2090_v31, %v2090_v31  ;;  %v904_v13 = vrot.slane %v793_v53, 2  ;;  %v905_v48 = vrot.slane %v794_v37, 2  ;;  %v2789_v32 = vld [vmem:[#allocation2 + $0xe8] sm:$0x3] }
 0x12f   : > { %v663_v26 = vsel %vm625_vm2, %v661_v3, %v662_v16  ;;  %v665_v25 = vsel %vm625_vm2, %v662_v16, %v664_v44  ;;  %v907_v14 = vrot.slane %v795_v62, 2  ;;  %v1030_v35 = vmul.f32 %v3961_v49, %v3776_v11 }
 0x130   : > { %2154 = vst.msk [vmem:[#allocation3 + $0x18] sm:$0xf] %vm2147_vm4, %v2121_v58  ;;  %v752_v36 = vadd.f32 %v663_v26, %v477_v28  ;;  %v753_v50 = vadd.f32 %v665_v25, %v478_v23  ;;  %v906_v0 = vsel %vm868_vm3, %v904_v13, %v905_v48  ;;  %v1031_v41 = vmul.f32 %v3961_v49, %v3782_v24 }
 0x131   : > { %2155 = vst.msk [vmem:[#allocation3 + $0x1c] sm:$0xf] %vm2147_vm4, %v2122_v38  ;;  %v908_v45 = vsel %vm868_vm3, %v905_v48, %v907_v14  ;;  %v1103_v30 = vmul.f32 %v3974_v60, %v3776_v11  ;;  %v1104_v18 = vmul.f32 %v3974_v60, %v3782_v24  ;;  %v1105_v33 = vmul.f32 %v3974_v60, %v3792_v21 }
 0x132   : > { %v995_v57 = vadd.f32 %v906_v0, %v752_v36  ;;  %v996_v42 = vadd.f32 %v908_v45, %v753_v50  ;;  %v1345_v61 = vmul.f32 %v3985_v9, %v3776_v11  ;;  %v1346_v7 = vmul.f32 %v3985_v9, %v3782_v24  ;;  %v2790_v0 = vld [vmem:[#allocation2 + $0x108] sm:$0xff] }
 0x133   : > { %v1213_v43 = vrot.slane %v1103_v30, 1  ;;  %v1214_v59 = vrot.slane %v1104_v18, 1  ;;  %v1216_v6 = vrot.slane %v1105_v33, 1  ;;  %v1347_v8 = vmul.f32 %v3985_v9, %v3792_v21  ;;  %v2791_v33 = vld [vmem:[#allocation2 + $0x110] sm:$0xff] }
 0x134   : > { %v1062_v34 = vadd.f32 %v1030_v35, %v995_v57  ;;  %v1063_v4 = vadd.f32 %v1031_v41, %v996_v42  ;;  %v1455_v17 = vrot.slane %v1345_v61, 2  ;;  %v1456_v28 = vrot.slane %v1346_v7, 2 }
 0x135   : > { %v1215_v55 = vsel %vm625_vm2, %v1213_v43, %v1214_v59  ;;  %v1217_v56 = vsel %vm625_vm2, %v1214_v59, %v1216_v6  ;;  %v1458_v2 = vrot.slane %v1347_v8, 2  ;;  %v1581_v11 = vmul.f32 %v2787_v10, %v3998_v12  ;;  %v2792_v43 = vld [vmem:[#allocation2 + $0x118] sm:$0x3] }
 0x136   : > { %v1304_v23 = vadd.f32 %v1215_v55, %v1062_v34  ;;  %v1305_v24 = vadd.f32 %v1217_v56, %v1063_v4  ;;  %v1457_v46 = vsel %vm868_vm3, %v1455_v17, %v1456_v28  ;;  %v1582_v51 = vmul.f32 %v2788_v54, %v3998_v12 }
 0x137   : > { %v1459_v21 = vsel %vm868_vm3, %v1456_v28, %v1458_v2  ;;  %v1654_v52 = vmul.f32 %v2787_v10, %v4007_v29  ;;  %v1655_v47 = vmul.f32 %v2788_v54, %v4007_v29  ;;  %v1656_v31 = vmul.f32 %v2789_v32, %v4007_v29 }
 0x138   : > { %v2687_v53 = vld [vmem:[#allocation3 + $0x18] sm:$0xff]  ;;  %v1546_v37 = vadd.f32 %v1457_v46, %v1304_v23  ;;  %v1547_v3 = vadd.f32 %v1459_v21, %v1305_v24  ;;  %v1896_v16 = vmul.f32 %v2787_v10, %v4015_v19  ;;  %v1897_v44 = vmul.f32 %v2788_v54, %v4015_v19 }
 0x139   : > { %v1764_v62 = vrot.slane %v1654_v52, 1  ;;  %v1765_v58 = vrot.slane %v1655_v47, 1  ;;  %v1767_v38 = vrot.slane %v1656_v31, 1  ;;  %v1898_v13 = vmul.f32 %v2789_v32, %v4015_v19  ;;  %2667 = vmatmul.msk.bf16.gmra.mxu0 %vm318_vm0, %v2687_v53 }
 0x13a   : > { %v1613_v48 = vadd.f32 %v1581_v11, %v1546_v37  ;;  %v1614_v26 = vadd.f32 %v1582_v51, %v1547_v3  ;;  %v2006_v25 = vrot.slane %v1896_v16, 2  ;;  %v2007_v14 = vrot.slane %v1897_v44, 2 }
 0x13b   : > { %v1766_v35 = vsel %vm625_vm2, %v1764_v62, %v1765_v58  ;;  %v1768_v36 = vsel %vm625_vm2, %v1765_v58, %v1767_v38  ;;  %v2009_v50 = vrot.slane %v1898_v13, 2  ;;  %v485_v41 = vmul.f32 %v2790_v0, %v3934_v15 }
 0x13c   : > { %v1855_v45 = vadd.f32 %v1766_v35, %v1613_v48  ;;  %v1856_v30 = vadd.f32 %v1768_v36, %v1614_v26  ;;  %v2008_v18 = vsel %vm868_vm3, %v2006_v25, %v2007_v14  ;;  %v486_v57 = vmul.f32 %v2791_v33, %v3934_v15 }
 0x13d   : > { %v2010_v42 = vsel %vm868_vm3, %v2007_v14, %v2009_v50  ;;  %v562_v61 = vmul.f32 %v2790_v0, %v3943_v39  ;;  %v563_v7 = vmul.f32 %v2791_v33, %v3943_v39  ;;  %v564_v59 = vmul.f32 %v2792_v43, %v3943_v39 }
 0x13e   : > { %v2097_v6 = vadd.f32 %v2008_v18, %v1855_v45  ;;  %v2098_v8 = vadd.f32 %v2010_v42, %v1856_v30  ;;  %v805_v34 = vmul.f32 %v2790_v0, %v3951_v40  ;;  %v806_v4 = vmul.f32 %v2791_v33, %v3951_v40  ;;  %v2793_v45 = vld [vmem:[#allocation2 + $0x138] sm:$0xff]  ;;  %v2794_v33 = vld [vmem:[#allocation2 + $0x140] sm:$0xff] }
 0x13f   : > { %v681_v17 = vrot.slane %v562_v61, 1  ;;  %v682_v28 = vrot.slane %v563_v7, 1  ;;  %v684_v55 = vrot.slane %v564_v59, 1  ;;  %v807_v56 = vmul.f32 %v2792_v43, %v3951_v40  ;;  %v2795_v7 = vld [vmem:[#allocation2 + $0x148] sm:$0x3] }
 0x140   : > { %v2129_v2 = vpack.c.bf16 %v2097_v6, %v2097_v6  ;;  %v2130_v10 = vpack.c.bf16 %v2098_v8, %v2098_v8  ;;  %v924_v11 = vrot.slane %v805_v34, 2  ;;  %v925_v23 = vrot.slane %v806_v4, 2 }
 0x141   : > { %v683_v24 = vsel %vm625_vm2, %v681_v17, %v682_v28  ;;  %v685_v46 = vsel %vm625_vm2, %v682_v28, %v684_v55  ;;  %v927_v54 = vrot.slane %v807_v56, 2  ;;  %v1038_v51 = vmul.f32 %v3961_v49, %v3837_v63 }
 0x142   : > { %2162 = vst.msk [vmem:[#allocation3 + $0x38] sm:$0xf] %vm2147_vm4, %v2129_v2  ;;  %v760_v21 = vadd.f32 %v683_v24, %v485_v41  ;;  %v761_v52 = vadd.f32 %v685_v46, %v486_v57  ;;  %v926_v47 = vsel %vm868_vm3, %v924_v11, %v925_v23  ;;  %v1039_v32 = vmul.f32 %v3961_v49, %v3843_v1 }
 0x143   : > { %2163 = vst.msk [vmem:[#allocation3 + $0x3c] sm:$0xf] %vm2147_vm4, %v2130_v10  ;;  %v928_v31 = vsel %vm868_vm3, %v925_v23, %v927_v54  ;;  %v1115_v53 = vmul.f32 %v3974_v60, %v3837_v63  ;;  %v1116_v37 = vmul.f32 %v3974_v60, %v3843_v1  ;;  %v1117_v3 = vmul.f32 %v3974_v60, %v3854_v20 }
 0x144   : > { %v1003_v16 = vadd.f32 %v926_v47, %v760_v21  ;;  %v1004_v44 = vadd.f32 %v928_v31, %v761_v52  ;;  %v1357_v62 = vmul.f32 %v3985_v9, %v3837_v63  ;;  %v1358_v58 = vmul.f32 %v3985_v9, %v3843_v1  ;;  %v2797_v31 = vld [vmem:[#allocation2 + $0x170] sm:$0xff] }
 0x145   : > { %v1233_v38 = vrot.slane %v1115_v53, 1  ;;  %v1234_v13 = vrot.slane %v1116_v37, 1  ;;  %v1236_v48 = vrot.slane %v1117_v3, 1  ;;  %v1359_v26 = vmul.f32 %v3985_v9, %v3854_v20 }
 0x146   : > { %v1070_v25 = vadd.f32 %v1038_v51, %v1003_v16  ;;  %v1071_v14 = vadd.f32 %v1039_v32, %v1004_v44  ;;  %v1475_v35 = vrot.slane %v1357_v62, 2  ;;  %v1476_v36 = vrot.slane %v1358_v58, 2  ;;  %v2796_v51 = vld [vmem:[#allocation2 + $0x168] sm:$0xff]  ;;  %v2798_v44 = vld [vmem:[#allocation2 + $0x178] sm:$0x3] }
 0x147   : > { %v1235_v50 = vsel %vm625_vm2, %v1233_v38, %v1234_v13  ;;  %v1237_v0 = vsel %vm625_vm2, %v1234_v13, %v1236_v48  ;;  %v1478_v41 = vrot.slane %v1359_v26, 2  ;;  %v1589_v63 = vmul.f32 %v2793_v45, %v3998_v12  ;;  %v4126_v26 = vpop.f32.mrf.mxu0 }
 0x148   : > { %v1312_v30 = vadd.f32 %v1235_v50, %v1070_v25  ;;  %v1313_v1 = vadd.f32 %v1237_v0, %v1071_v14  ;;  %v1477_v18 = vsel %vm868_vm3, %v1475_v35, %v1476_v36  ;;  %v1590_v57 = vmul.f32 %v2794_v33, %v3998_v12  ;;  %v4128_v25 = vpop.f32.mrf.mxu1  ;;  %v4131_v50 = vpop.f32.mrf.mxu2 }
 0x149   : > { %v1479_v20 = vsel %vm868_vm3, %v1476_v36, %v1478_v41  ;;  %v1666_v42 = vmul.f32 %v2793_v45, %v4007_v29  ;;  %v1667_v61 = vmul.f32 %v2794_v33, %v4007_v29  ;;  %v1668_v43 = vmul.f32 %v2795_v7, %v4007_v29  ;;  %v4133_v0 = vpop.f32.mrf.mxu3 }
 0x14a   : > { %v2691_v59 = vld [vmem:[#allocation3 + $0x38] sm:$0xff]  ;;  %v1554_v6 = vadd.f32 %v1477_v18, %v1312_v30  ;;  %v1555_v8 = vadd.f32 %v1479_v20, %v1313_v1  ;;  %v1908_v34 = vmul.f32 %v2793_v45, %v4015_v19  ;;  %v1909_v4 = vmul.f32 %v2794_v33, %v4015_v19 }
 0x14b   : > { %v1784_v17 = vrot.slane %v1666_v42, 1  ;;  %v1785_v28 = vrot.slane %v1667_v61, 1  ;;  %v1787_v55 = vrot.slane %v1668_v43, 1  ;;  %v1910_v56 = vmul.f32 %v2795_v7, %v4015_v19  ;;  %2671 = vmatmul.msk.bf16.gmra.mxu1 %vm318_vm0, %v2691_v59 }
 0x14c   : > { %v1621_v2 = vadd.f32 %v1589_v63, %v1554_v6  ;;  %v1622_v10 = vadd.f32 %v1590_v57, %v1555_v8  ;;  %v2026_v11 = vrot.slane %v1908_v34, 2  ;;  %v2027_v23 = vrot.slane %v1909_v4, 2  ;;  %v458_v6 = vld [vmem:[#allocation2 + $0x198] sm:$0xff] }
 0x14d   : > { %v1786_v24 = vsel %vm625_vm2, %v1784_v17, %v1785_v28  ;;  %v1788_v46 = vsel %vm625_vm2, %v1785_v28, %v1787_v55  ;;  %v2029_v54 = vrot.slane %v1910_v56, 2  ;;  %v493_v21 = vmul.f32 %v2796_v51, %v3934_v15  ;;  %v459_v17 = vld [vmem:[#allocation2 + $0x1a0] sm:$0xff] }
 0x14e   : > { %v1863_v52 = vadd.f32 %v1786_v24, %v1621_v2  ;;  %v1864_v47 = vadd.f32 %v1788_v46, %v1622_v10  ;;  %v2028_v32 = vsel %vm868_vm3, %v2026_v11, %v2027_v23  ;;  %v494_v53 = vmul.f32 %v2797_v31, %v3934_v15  ;;  %v460_v10 = vld [vmem:[#allocation2 + $0x1a8] sm:$0x3] }
 0x14f   : > { %v2030_v37 = vsel %vm868_vm3, %v2027_v23, %v2029_v54  ;;  %v574_v3 = vmul.f32 %v2796_v51, %v3943_v39  ;;  %v575_v16 = vmul.f32 %v2797_v31, %v3943_v39  ;;  %v576_v62 = vmul.f32 %v2798_v44, %v3943_v39  ;;  %v2364_v46 = vpop.f32.mrf.mxu0 }
 0x150   : > { %v2105_v58 = vadd.f32 %v2028_v32, %v1863_v52  ;;  %v2106_v38 = vadd.f32 %v2030_v37, %v1864_v47  ;;  %v817_v13 = vmul.f32 %v2796_v51, %v3951_v40  ;;  %v818_v48 = vmul.f32 %v2797_v31, %v3951_v40  ;;  %v2384_v54 = vpop.f32.mrf.mxu1  ;;  %v2404_v52 = vpop.f32.mrf.mxu2 }
 0x151   : > { %v701_v15 = vrot.slane %v574_v3, 1  ;;  %v702_v14 = vrot.slane %v575_v16, 1  ;;  %v704_v35 = vrot.slane %v576_v62, 1  ;;  %v819_v36 = vmul.f32 %v2798_v44, %v3951_v40  ;;  %v2424_v47 = vpop.f32.mrf.mxu3  ;;  %v4169_v44 = vld [vmem:[%s4301_s3] ss:$0 sm:$0xff] }
 0x152   : > { %v2137_v39 = vpack.c.bf16 %v2105_v58, %v2105_v58  ;;  %v2138_v41 = vpack.c.bf16 %v2106_v38, %v2106_v38  ;;  %v944_v45 = vrot.slane %v817_v13, 2  ;;  %v945_v63 = vrot.slane %v818_v48, 2 }
 0x153   : > { %v703_v30 = vsel %vm625_vm2, %v701_v15, %v702_v14  ;;  %v705_v1 = vsel %vm625_vm2, %v702_v14, %v704_v35  ;;  %v947_v18 = vrot.slane %v819_v36, 2  ;;  %v1046_v33 = vmul.f32 %v3961_v49, %v3896_v22 }
 0x154   : > { %2170 = vst.msk [vmem:[#allocation3 + $0x58] sm:$0xf] %vm2147_vm4, %v2137_v39  ;;  %v768_v57 = vadd.f32 %v703_v30, %v493_v21  ;;  %v769_v40 = vadd.f32 %v705_v1, %v494_v53  ;;  %v946_v20 = vsel %vm868_vm3, %v944_v45, %v945_v63  ;;  %v1047_v42 = vmul.f32 %v3961_v49, %v3902_v27 }
 0x155   : > { %2171 = vst.msk [vmem:[#allocation3 + $0x5c] sm:$0xf] %vm2147_vm4, %v2138_v41  ;;  %v948_v61 = vsel %vm868_vm3, %v945_v63, %v947_v18  ;;  %v1127_v7 = vmul.f32 %v3974_v60, %v3896_v22  ;;  %v1128_v43 = vmul.f32 %v3974_v60, %v3902_v27  ;;  %v1129_v59 = vmul.f32 %v3974_v60, %v3906_v5 }
 0x156   : > { %v1011_v8 = vadd.f32 %v946_v20, %v768_v57  ;;  %v1012_v34 = vadd.f32 %v948_v61, %v769_v40  ;;  %v1369_v4 = vmul.f32 %v3985_v9, %v3896_v22  ;;  %v1370_v49 = vmul.f32 %v3985_v9, %v3902_v27 }
 0x157   : > { %v1253_v28 = vrot.slane %v1127_v7, 1  ;;  %v1254_v55 = vrot.slane %v1128_v43, 1  ;;  %v1256_v56 = vrot.slane %v1129_v59, 1  ;;  %v1371_v2 = vmul.f32 %v3985_v9, %v3906_v5  ;;  %v2367_v40 = vpop.f32.mrf.mxu0 }
 0x158   : > { %v1078_v11 = vadd.f32 %v1046_v33, %v1011_v8  ;;  %v1079_v23 = vadd.f32 %v1047_v42, %v1012_v34  ;;  %v1495_v60 = vrot.slane %v1369_v4, 2  ;;  %v1496_v24 = vrot.slane %v1370_v49, 2  ;;  %v2387_v20 = vpop.f32.mrf.mxu1  ;;  %v2407_v43 = vpop.f32.mrf.mxu2 }
 0x159   : > { %v1255_v51 = vsel %vm625_vm2, %v1253_v28, %v1254_v55  ;;  %v1257_v22 = vsel %vm625_vm2, %v1254_v55, %v1256_v56  ;;  %v1498_v21 = vrot.slane %v1371_v2, 2  ;;  %v1597_v27 = vmul.f32 %v3998_v12, %v458_v6 }
 0x15a   : > { %v1320_v32 = vadd.f32 %v1255_v51, %v1078_v11  ;;  %v1321_v31 = vadd.f32 %v1257_v22, %v1079_v23  ;;  %v1497_v5 = vsel %vm868_vm3, %v1495_v60, %v1496_v24  ;;  %v1598_v9 = vmul.f32 %v3998_v12, %v459_v17 }
 0x15b   : > { %v1499_v53 = vsel %vm868_vm3, %v1496_v24, %v1498_v21  ;;  %v1678_v37 = vmul.f32 %v4007_v29, %v458_v6  ;;  %v1679_v3 = vmul.f32 %v4007_v29, %v459_v17  ;;  %v1680_v16 = vmul.f32 %v4007_v29, %v460_v10 }
 0x15c   : > { %v2695_v62 = vld [vmem:[#allocation3 + $0x58] sm:$0xff]  ;;  %v1562_v58 = vadd.f32 %v1497_v5, %v1320_v32  ;;  %v1563_v38 = vadd.f32 %v1499_v53, %v1321_v31  ;;  %v1920_v13 = vmul.f32 %v4015_v19, %v458_v6  ;;  %v1921_v12 = vmul.f32 %v4015_v19, %v459_v17 }
 0x15d   : > { %v1804_v48 = vrot.slane %v1678_v37, 1  ;;  %v1805_v15 = vrot.slane %v1679_v3, 1  ;;  %v1807_v14 = vrot.slane %v1680_v16, 1  ;;  %v1922_v35 = vmul.f32 %v4015_v19, %v460_v10  ;;  %2675 = vmatmul.msk.bf16.gmra.mxu2 %vm318_vm0, %v2695_v62 }
 0x15e   : > { %v1629_v29 = vadd.f32 %v1597_v27, %v1562_v58  ;;  %v1630_v36 = vadd.f32 %v1598_v9, %v1563_v38  ;;  %v2046_v39 = vrot.slane %v1920_v13, 2  ;;  %v2047_v41 = vrot.slane %v1921_v12, 2 }
 0x15f   : > { %v1806_v45 = vsel %vm625_vm2, %v1804_v48, %v1805_v15  ;;  %v1808_v63 = vsel %vm625_vm2, %v1805_v15, %v1807_v14  ;;  %v2049_v30 = vrot.slane %v1922_v35, 2  ;;  %v2363_v19 = vadd.f32 %v4169_v44, %v4126_v26  ;;  %v2369_v28 = vpop.f32.mrf.mxu0 }
 0x160   : > { %v1871_v1 = vadd.f32 %v1806_v45, %v1629_v29  ;;  %v1872_v18 = vadd.f32 %v1808_v63, %v1630_v36  ;;  %v2048_v33 = vsel %vm868_vm3, %v2046_v39, %v2047_v41  ;;  %v2383_v57 = vadd.f32 %v4169_v44, %v4128_v25  ;;  %v2389_v56 = vpop.f32.mrf.mxu1  ;;  %v2409_v10 = vpop.f32.mrf.mxu2 }
 0x161   : > { %v2050_v42 = vsel %vm868_vm3, %v2047_v41, %v2049_v30  ;;  %2442 = vst.msk [vmem:[%s4180_s19] sm:$0xff] %vm318_vm0, %v2363_v19  ;;  %v2365_v61 = vadd.f32 %v4169_v44, %v2364_v46  ;;  %v2403_v26 = vadd.f32 %v4169_v44, %v4131_v50  ;;  %v2423_v7 = vadd.f32 %v4169_v44, %v4133_v0 }
 0x162   : > { %v2113_v59 = vadd.f32 %v2048_v33, %v1871_v1  ;;  %v2114_v25 = vadd.f32 %v2050_v42, %v1872_v18  ;;  %2450 = vst.msk [vmem:[%s4180_s19 + $0x40] sm:$0xff] %vm318_vm0, %v2383_v57  ;;  %v2427_v6 = vpop.f32.mrf.mxu3  ;;  %v2385_v50 = vadd.f32 %v4169_v44, %v2384_v54  ;;  %v2368_v0 = vadd.f32 %v4169_v44, %v2367_v40 }
 0x163   : > { %2443 = vst.msk [vmem:[%s4180_s19 + $0x8] sm:$0xff] %vm318_vm0, %v2365_v61  ;;  %v2405_v4 = vadd.f32 %v4169_v44, %v2404_v52  ;;  %v2425_v49 = vadd.f32 %v4169_v44, %v2424_v47  ;;  %v2388_v17 = vadd.f32 %v4169_v44, %v2387_v20  ;;  %v2370_v55 = vadd.f32 %v4169_v44, %v2369_v28 }
 0x164   : > { %v2145_v8 = vpack.c.bf16 %v2113_v59, %v2113_v59  ;;  %v2146_v34 = vpack.c.bf16 %v2114_v25, %v2114_v25  ;;  %2458 = vst.msk [vmem:[%s4180_s19 + $0x80] sm:$0xff] %vm318_vm0, %v2403_v26  ;;  %v2408_v2 = vadd.f32 %v4169_v44, %v2407_v43  ;;  %v2428_v11 = vadd.f32 %v4169_v44, %v2427_v6 }
 0x165   : > { %2466 = vst.msk [vmem:[%s4180_s19 + $0xc0] sm:$0xff] %vm318_vm0, %v2423_v7  ;;  %v2390_v60 = vadd.f32 %v4169_v44, %v2389_v56  ;;  %v2410_v24 = vadd.f32 %v4169_v44, %v2409_v10 }
 0x166   : > { %2178 = vst.msk [vmem:[#allocation3 + $0x78] sm:$0xf] %vm2147_vm4, %v2145_v8 }
 0x167   : > { %2179 = vst.msk [vmem:[#allocation3 + $0x7c] sm:$0xf] %vm2147_vm4, %v2146_v34 }
 0x168   : > { %2451 = vst.msk [vmem:[%s4180_s19 + $0x48] sm:$0xff] %vm318_vm0, %v2385_v50 }
 0x169   : > { %2444 = vst.msk [vmem:[%s4180_s19 + $0x10] sm:$0xff] %vm318_vm0, %v2368_v0 }
 0x16a   : > { %2459 = vst.msk [vmem:[%s4180_s19 + $0x88] sm:$0xff] %vm318_vm0, %v2405_v4  ;;  %v2429_v23 = vpop.f32.mrf.mxu3 }
 0x16b   : > { %2467 = vst.msk [vmem:[%s4180_s19 + $0xc8] sm:$0xff] %vm318_vm0, %v2425_v49  ;;  %v2430_v54 = vadd.f32 %v4169_v44, %v2429_v23 }
 0x16c   : > { %2452 = vst.msk [vmem:[%s4180_s19 + $0x50] sm:$0xff] %vm318_vm0, %v2388_v17 }
 0x16d   : > { %2445 = vst.msk [vmem:[%s4180_s19 + $0x18] sm:$0xff] %vm318_vm0, %v2370_v55 }
 0x16e   : > { %v2699_v46 = vld [vmem:[#allocation3 + $0x78] sm:$0xff]  ;;  %2460 = vst.msk [vmem:[%s4180_s19 + $0x90] sm:$0xff] %vm318_vm0, %v2408_v2  ;;  %v2372_v51 = vpop.f32.mrf.mxu0 }
 0x16f   : > { %2468 = vst.msk [vmem:[%s4180_s19 + $0xd0] sm:$0xff] %vm318_vm0, %v2428_v11  ;;  %2679 = vmatmul.msk.bf16.gmra.mxu3 %vm318_vm0, %v2699_v46  ;;  %v2373_v22 = vadd.f32 %v4169_v44, %v2372_v51 }
 0x170   : > { %2453 = vst.msk [vmem:[%s4180_s19 + $0x58] sm:$0xff] %vm318_vm0, %v2390_v60 }
 0x171   : > { %2461 = vst.msk [vmem:[%s4180_s19 + $0x98] sm:$0xff] %vm318_vm0, %v2410_v24 }
 0x172   : > { %2469 = vst.msk [vmem:[%s4180_s19 + $0xd8] sm:$0xff] %vm318_vm0, %v2430_v54 }
 0x173   : > { %2446 = vst.msk [vmem:[%s4180_s19 + $0x20] sm:$0xff] %vm318_vm0, %v2373_v22 }
 0x176   : > { %v2374_v21 = vpop.f32.mrf.mxu0 }
 0x177   : > { %v2375_v27 = vadd.f32 %v4169_v44, %v2374_v21 }
 0x179   : > { %2447 = vst.msk [vmem:[%s4180_s19 + $0x28] sm:$0xff] %vm318_vm0, %v2375_v27 }
 0x180   : > { %v2392_v52 = vpop.f32.mrf.mxu1 }
 0x181   : > { %v2393_v47 = vadd.f32 %v4169_v44, %v2392_v52 }
 0x183   : > { %2454 = vst.msk [vmem:[%s4180_s19 + $0x60] sm:$0xff] %vm318_vm0, %v2393_v47 }
 0x188   : > { %v2394_v32 = vpop.f32.mrf.mxu1 }
 0x189   : > { %v2395_v31 = vadd.f32 %v4169_v44, %v2394_v32 }
 0x18b   : > { %2455 = vst.msk [vmem:[%s4180_s19 + $0x68] sm:$0xff] %vm318_vm0, %v2395_v31 }
 0x198   : > { %v2412_v5 = vpop.f32.mrf.mxu2 }
 0x199   : > { %v2413_v9 = vadd.f32 %v4169_v44, %v2412_v5 }
 0x19b   : > { %2462 = vst.msk [vmem:[%s4180_s19 + $0xa0] sm:$0xff] %vm318_vm0, %v2413_v9 }
 0x1a0   : > { %v2414_v53 = vpop.f32.mrf.mxu2 }
 0x1a1   : > { %v2415_v37 = vadd.f32 %v4169_v44, %v2414_v53 }
 0x1a3   : > { %2463 = vst.msk [vmem:[%s4180_s19 + $0xa8] sm:$0xff] %vm318_vm0, %v2415_v37 }
 0x1aa   : > { %v2432_v3 = vpop.f32.mrf.mxu3 }
 0x1ab   : > { %v2433_v16 = vadd.f32 %v4169_v44, %v2432_v3 }
 0x1ad   : > { %2470 = vst.msk [vmem:[%s4180_s19 + $0xe0] sm:$0xff] %vm318_vm0, %v2433_v16 }
 0x1b2   : > { %v2434_v62 = vpop.f32.mrf.mxu3 }
 0x1b3   : > { %v2435_v58 = vadd.f32 %v4169_v44, %v2434_v62 }
 0x1b5   : > { %2471 = vst.msk [vmem:[%s4180_s19 + $0xe8] sm:$0xff] %vm318_vm0, %v2435_v58 }
 0x1b6   : > { %v2377_v38 = vpop.f32.mrf.mxu0 }
 0x1b7   : > { %v2378_v13 = vadd.f32 %v4169_v44, %v2377_v38 }
 0x1b9   : > { %2448 = vst.msk [vmem:[%s4180_s19 + $0x30] sm:$0xff] %vm318_vm0, %v2378_v13 }
 0x1be   : > { %v2379_v12 = vpop.f32.mrf.mxu0 }
 0x1bf   : > { %v2380_v48 = vadd.f32 %v4169_v44, %v2379_v12 }
 0x1c1   : > { %2449 = vst.msk [vmem:[%s4180_s19 + $0x38] sm:$0xff] %vm318_vm0, %v2380_v48 }
 0x1c8   : > { %v2397_v15 = vpop.f32.mrf.mxu1 }
 0x1c9   : > { %v2398_v14 = vadd.f32 %v4169_v44, %v2397_v15 }
 0x1cb   : > { %2456 = vst.msk [vmem:[%s4180_s19 + $0x70] sm:$0xff] %vm318_vm0, %v2398_v14 }
 0x1d0   : > { %v2399_v35 = vpop.f32.mrf.mxu1 }
 0x1d1   : > { %v2400_v29 = vadd.f32 %v4169_v44, %v2399_v35 }
 0x1d3   : > { %2457 = vst.msk [vmem:[%s4180_s19 + $0x78] sm:$0xff] %vm318_vm0, %v2400_v29 }
 0x1e0   : > { %v2417_v36 = vpop.f32.mrf.mxu2 }
 0x1e1   : > { %v2418_v39 = vadd.f32 %v4169_v44, %v2417_v36 }
 0x1e3   : > { %2464 = vst.msk [vmem:[%s4180_s19 + $0xb0] sm:$0xff] %vm318_vm0, %v2418_v39 }
 0x1e8   : > { %v2419_v41 = vpop.f32.mrf.mxu2 }
 0x1e9   : > { %v2420_v45 = vadd.f32 %v4169_v44, %v2419_v41 }
 0x1eb   : > { %2465 = vst.msk [vmem:[%s4180_s19 + $0xb8] sm:$0xff] %vm318_vm0, %v2420_v45 }
 0x1f2   : > { %v2437_v63 = vpop.f32.mrf.mxu3 }
 0x1f3   : > { %v2438_v30 = vadd.f32 %v4169_v44, %v2437_v63 }
 0x1f5   : > { %2472 = vst.msk [vmem:[%s4180_s19 + $0xf0] sm:$0xff] %vm318_vm0, %v2438_v30 }
 0x1fa   : > { %v2439_v19 = vpop.f32.mrf.mxu3 }
 0x1fb   : > { %v2440_v1 = vadd.f32 %v4169_v44, %v2439_v19 }
 0x1fd   : > { %2473 = vst.msk [vmem:[%s4180_s19 + $0xf8] sm:$0xff] %vm318_vm0, %v2440_v1 }
 0x1fe PF: > { %s14_s17 = sadd.s32 1, %s2821_s17   ;;  %s4303_s15 = smov %s2817_s16 }
 0x1ff   : > { %p11_p5 = scmp.ge.s32.totalorder %s14_s17, 4   ;;  %s4304_s16 = smov %s4306_s18 }
 0x201   :  { %13 = sbr.rel (!%p11_p5) target bundleno = 2 (0x2), region = 79 }

// kernel: exit_flow_forward.5
= control target key start
LH: loop header
LB: loop body
LE: loop exit
PB: predicated region body
PF: predicated region fallthrough
CT: control target
= control target key end

     0   :  { %s3497_s24 = smov 0   ;;  %s3499_s25 = smov 0   ;;  %s5137_s0 = inlined_call_operand.vmem [shape: f32[2,16,16,16], index: 0, kind: input, shape index: {}]   ;;  %s5138_s1 = inlined_call_operand.vmem [shape: f32[2,16,16,16], index: 1, kind: input, shape index: {}]   ;;  %s5139_s2 = inlined_call_operand.vmem [shape: f32[3,3,16], index: 2, kind: input, shape index: {}]   ;;  %s5140_s3 = inlined_call_operand.vmem [shape: bf16[16,32], index: 3, kind: input, shape index: {}]   ;;  %s5141_s4 = inlined_call_operand.vmem [shape: f32[1,32], index: 4, kind: input, shape index: {}]   ;;  %s5142_s5 = inlined_call_operand.vmem [shape: bf16[16,32], index: 5, kind: input, shape index: {}]   ;;  %s5143_s6 = inlined_call_operand.vmem [shape: f32[1,32], index: 6, kind: input, shape index: {}]   ;;  %s5144_s7 = inlined_call_operand.vmem [shape: f32[2,8,8,32], index: 7, kind: output, shape index: {}]  }
   0x1   :  { %s3501_s26 = smov 0  }
   0x2 LB: > { %s29_s27 = sadd.s32 1, %s3449_s25  ;;  %p3203_p0 = scmp.ge.s32.totalorder %s3453_s26, 1  ;;  %s3453_s26 = sphi %s3501_s26, %s17_s26   ;;  %s3449_s25 = sphi %s3499_s25, %s5146_s25   ;;  %s3445_s24 = sphi %s3497_s24, %s5145_s24  }
   0x3   : > { %p31_p1 = scmp.ge.s32.totalorder %s29_s27, 2  ;;  %p295_p2 = scmp.lt.s32.totalorder %s3453_s26, 3 }
   0x5   : > { %s5148_s27 = smov (%p31_p1, %s29_s27), 0  ;;  %p296_p3 = pnand %p3203_p0, %p295_p2 }
   0x6   : > { %p349_p4 = scmp.lt.s32.totalorder (!%p296_p3), %s3445_s24, 1 }
   0x7   : > { %299 = sbr.rel (%p296_p3) target bundleno = 530 (0x212), region = 48 }
   0xc   : > { %v3352_v0 = vld [vmem:[%s5140_s3] sm:$0xff]  ;;  %vm450_vm0 = vcmask 130048   ;;  %vm453_vm1 = vcmask 123904   ;;  %v3455_v1 = vmov 0.0   ;;  %s5150_s24 = smov (!%p349_p4, %s3445_s24), 1  ;;  %vm757_vm2 = vcmask 1046528  }
   0xd   : > { %451 = vst.msk [vmem:[#allocation2] sm:$0xff] %vm450_vm0, %v3455_v1  ;;  %2531 = vmatpush.bf16.msra.mxu0 %v3352_v0  ;;  %3358 = vmatpush.bf16.msra.mxu1 %v3352_v0  ;;  %s3333_s30 = sshll.u32 %s5150_s24, 8  ;;  %v3532_v2 = vld [vmem:[%s5139_s2] ss:$0 sm:$0xff]  ;;  %v3537_v3 = vld [vmem:[%s5139_s2 + $0x1] ss:$0 sm:$0xff] }
   0xe   : > { %452 = vst.msk [vmem:[#allocation2 + $0x8] sm:$0xff] %vm450_vm0, %v3455_v1  ;;  %3359 = vmatpush.bf16.msra.mxu2 %v3352_v0  ;;  %3360 = vmatpush.bf16.msra.mxu3 %v3352_v0  ;;  %s3544_s14 = scalar_lea.vmem %s5137_s0, %s3333_s30  ;;  %v3551_v4 = vld [vmem:[%s5139_s2 + $0x2] ss:$0 sm:$0xff]  ;;  %vm1000_vm3 = vcmask 1045504   ;;  %v3579_v28 = vld [vmem:[%s5139_s2 + $0x4] ss:$0 sm:$0xff]  ;;  %s4235_s17 = scalar_lea.vmem %s5138_s1, %s3333_s30 }
   0xf   : > { %454 = vst.msk [vmem:[#allocation2 + $0x10] sm:$0x3] %vm453_vm1, %v3455_v1  ;;  %v386_v5 = vld [vmem:[%s3544_s14] sm:$0xff]  ;;  %v387_v6 = vld [vmem:[%s3544_s14 + $0x8] sm:$0xff]  ;;  %v388_v7 = vld [vmem:[%s3544_s14 + $0x10] sm:$0xff]  ;;  %vm2279_vm4 = vcmask 125952  }
  0x10   : > { %455 = vst.msk [vmem:[#allocation2 + $0x18] sm:$0xff] %vm450_vm0, %v3455_v1  ;;  %v389_v8 = vld [vmem:[%s3544_s14 + $0x18] sm:$0xff]  ;;  %v418_v9 = vmax.f32 %v386_v5, 0.0  ;;  %v419_v10 = vmax.f32 %v387_v6, 0.0  ;;  %v420_v11 = vmax.f32 %v388_v7, 0.0  ;;  %vm2613_vm5 = vcmask 261120  }
  0x11   : > { %456 = vst.msk [vmem:[#allocation2 + $0x20] sm:$0xff] %vm450_vm0, %v3455_v1  ;;  %v421_v13 = vmax.f32 %v389_v8, 0.0  ;;  %v3585_v31 = vld [vmem:[%s5139_s2 + $0x5] ss:$0 sm:$0xff]  ;;  %v3592_v34 = vld [vmem:[%s5139_s2 + $0x6] ss:$0 sm:$0xff] }
  0x12   : > { %457 = vst.msk [vmem:[#allocation2 + $0x28] sm:$0x3] %vm453_vm1, %v3455_v1  ;;  %v3607_v41 = vld [vmem:[%s5139_s2 + $0x8] ss:$0 sm:$0xff]  ;;  %v3624_v48 = vld [vmem:[%s5139_s2 + $0x9] ss:$0 sm:$0xff] }
  0x13   : > { %458 = vst.msk [vmem:[#allocation2 + $0x30] sm:$0xff] %vm450_vm0, %v3455_v1  ;;  %v3647_v59 = vld [vmem:[%s5139_s2 + $0xa] ss:$0 sm:$0xff]  ;;  %vm2616_vm6 = vcmask 254976   ;;  %s3335_s20 = sshll.u32 %s5150_s24, 6 }
  0x14   : > { %459 = vst.msk [vmem:[#allocation2 + $0x38] sm:$0xff] %vm450_vm0, %v3455_v1  ;;  %v539_v12 = vld [vmem:[#allocation2] sm:$0xff]  ;;  %s5077_s23 = scalar_lea.vmem %s5144_s7, %s3335_s20 }
  0x15   : > { %460 = vst.msk [vmem:[#allocation2 + $0x40] sm:$0x3] %vm453_vm1, %v3455_v1  ;;  %v540_v14 = vld [vmem:[#allocation2 + $0x8] sm:$0xff]  ;;  %v661_v15 = vmul.f32 %v3537_v3, %v539_v12  ;;  %v904_v16 = vmul.f32 %v3551_v4, %v539_v12  ;;  %v595_v18 = vmul.f32 %v3532_v2, %v539_v12 }
  0x16   : > { %507 = vst.msk [vmem:[#allocation2 + $0x19] sm:$0xff] %vm450_vm0, %v418_v9  ;;  %v541_v17 = vld [vmem:[#allocation2 + $0x10] sm:$0x3]  ;;  %v662_v19 = vmul.f32 %v3537_v3, %v540_v14  ;;  %v905_v20 = vmul.f32 %v3551_v4, %v540_v14  ;;  %v596_v25 = vmul.f32 %v3532_v2, %v540_v14 }
  0x17   : > { %508 = vst.msk [vmem:[#allocation2 + $0x21] sm:$0xff] %vm450_vm0, %v419_v10  ;;  %v663_v21 = vmul.f32 %v3537_v3, %v541_v17  ;;  %v758_v22 = vrot.slane %v661_v15, 1  ;;  %v906_v23 = vmul.f32 %v3551_v4, %v541_v17  ;;  %v1001_v24 = vrot.slane %v904_v16, 2 }
  0x18   : > { %509 = vst.msk [vmem:[#allocation2 + $0x31] sm:$0xff] %vm450_vm0, %v420_v11  ;;  %v759_v26 = vrot.slane %v662_v19, 1  ;;  %v1002_v27 = vrot.slane %v905_v20, 2 }
  0x19   : > { %510 = vst.msk [vmem:[#allocation2 + $0x39] sm:$0xff] %vm450_vm0, %v421_v13  ;;  %v761_v29 = vrot.slane %v663_v21, 1  ;;  %v1004_v30 = vrot.slane %v906_v23, 2 }
  0x1a   : > { %v760_v32 = vsel %vm757_vm2, %v758_v22, %v759_v26  ;;  %v1003_v33 = vsel %vm1000_vm3, %v1001_v24, %v1002_v27  ;;  %461 = vst.msk [vmem:[#allocation2 + $0x48] sm:$0xff] %vm450_vm0, %v3455_v1 }
  0x1b   : > { %v762_v35 = vsel %vm757_vm2, %v759_v26, %v761_v29  ;;  %v870_v36 = vadd.f32 %v760_v32, %v595_v18  ;;  %v1005_v37 = vsel %vm1000_vm3, %v1002_v27, %v1004_v30  ;;  %462 = vst.msk [vmem:[#allocation2 + $0x50] sm:$0xff] %vm450_vm0, %v3455_v1 }
  0x1c   : > { %v871_v38 = vadd.f32 %v762_v35, %v596_v25  ;;  %463 = vst.msk [vmem:[#allocation2 + $0x58] sm:$0x3] %vm453_vm1, %v3455_v1 }
  0x1d   : > { %v3602_v39 = vld [vmem:[#allocation2 + $0x18] sm:$0xff]  ;;  %v1113_v40 = vadd.f32 %v1003_v33, %v870_v36  ;;  %464 = vst.msk [vmem:[#allocation2 + $0x60] sm:$0xff] %vm450_vm0, %v3455_v1 }
  0x1e   : > { %v3611_v42 = vld [vmem:[#allocation2 + $0x20] sm:$0xff]  ;;  %v3613_v43 = vld [vmem:[#allocation2 + $0x28] sm:$0x3]  ;;  %v1114_v44 = vadd.f32 %v1005_v37, %v871_v38  ;;  %v1148_v45 = vmul.f32 %v3579_v28, %v3602_v39  ;;  %v1214_v46 = vmul.f32 %v3585_v31, %v3602_v39  ;;  %v1456_v47 = vmul.f32 %v3592_v34, %v3602_v39  ;;  %465 = vst.msk [vmem:[#allocation2 + $0x68] sm:$0xff] %vm450_vm0, %v3455_v1 }
  0x1f   : > { %v3628_v49 = vld [vmem:[#allocation2 + $0x30] sm:$0xff]  ;;  %v1149_v50 = vmul.f32 %v3579_v28, %v3611_v42  ;;  %v1215_v51 = vmul.f32 %v3585_v31, %v3611_v42  ;;  %v1216_v52 = vmul.f32 %v3585_v31, %v3613_v43  ;;  %v1457_v53 = vmul.f32 %v3592_v34, %v3611_v42  ;;  %466 = vst.msk [vmem:[#allocation2 + $0x70] sm:$0x3] %vm453_vm1, %v3455_v1 }
  0x20   : > { %v3640_v54 = vld [vmem:[#allocation2 + $0x38] sm:$0xff]  ;;  %v1180_v55 = vadd.f32 %v1148_v45, %v1113_v40  ;;  %v1310_v56 = vrot.slane %v1214_v46, 1  ;;  %v1458_v57 = vmul.f32 %v3592_v34, %v3613_v43  ;;  %v1552_v58 = vrot.slane %v1456_v47, 2  ;;  %467 = vst.msk [vmem:[#allocation2 + $0x78] sm:$0xff] %vm450_vm0, %v3455_v1  ;;  %v3651_v60 = vld [vmem:[#allocation2 + $0x40] sm:$0x3] }
  0x21   : > { %v1181_v61 = vadd.f32 %v1149_v50, %v1114_v44  ;;  %v1311_v62 = vrot.slane %v1215_v51, 1  ;;  %v1313_v63 = vrot.slane %v1216_v52, 1  ;;  %v1553_v0 = vrot.slane %v1457_v53, 2  ;;  %468 = vst.msk [vmem:[#allocation2 + $0x80] sm:$0xff] %vm450_vm0, %v3455_v1  ;;  %v394_v50 = vld [vmem:[%s3544_s14 + $0x40] sm:$0xff]  ;;  %v395_v51 = vld [vmem:[%s3544_s14 + $0x48] sm:$0xff] }
  0x22   : > { %v1555_v5 = vrot.slane %v1458_v57, 2  ;;  %v1699_v6 = vmul.f32 %v3607_v41, %v3628_v49  ;;  %v1700_v7 = vmul.f32 %v3607_v41, %v3640_v54  ;;  %v1765_v8 = vmul.f32 %v3624_v48, %v3628_v49  ;;  %469 = vst.msk [vmem:[#allocation2 + $0x88] sm:$0x3] %vm453_vm1, %v3455_v1  ;;  %v396_v52 = vld [vmem:[%s3544_s14 + $0x50] sm:$0xff]  ;;  %v397_v53 = vld [vmem:[%s3544_s14 + $0x58] sm:$0xff] }
  0x23   : > { %v1312_v9 = vsel %vm757_vm2, %v1310_v56, %v1311_v62  ;;  %v1314_v10 = vsel %vm757_vm2, %v1311_v62, %v1313_v63  ;;  %v1554_v11 = vsel %vm1000_vm3, %v1552_v58, %v1553_v0  ;;  %v1766_v12 = vmul.f32 %v3624_v48, %v3640_v54  ;;  %470 = vst.msk [vmem:[#allocation2 + $0x90] sm:$0xff] %vm450_vm0, %v3455_v1  ;;  %v398_v56 = vld [vmem:[%s3544_s14 + $0x60] sm:$0xff]  ;;  %v399_v58 = vld [vmem:[%s3544_s14 + $0x68] sm:$0xff]  ;;  %v400_v63 = vld [vmem:[%s3544_s14 + $0x70] sm:$0xff] }
  0x24   : > { %v1422_v13 = vadd.f32 %v1312_v9, %v1180_v55  ;;  %v1423_v14 = vadd.f32 %v1314_v10, %v1181_v61  ;;  %v1556_v15 = vsel %vm1000_vm3, %v1553_v0, %v1555_v5  ;;  %v1767_v16 = vmul.f32 %v3624_v48, %v3651_v60  ;;  %471 = vst.msk [vmem:[#allocation2 + $0x98] sm:$0xff] %vm450_vm0, %v3455_v1  ;;  %v401_v5 = vld [vmem:[%s3544_s14 + $0x78] sm:$0xff]  ;;  %v407_v9 = vld [vmem:[%s3544_s14 + $0xa8] sm:$0xff]  ;;  %v408_v10 = vld [vmem:[%s3544_s14 + $0xb0] sm:$0xff] }
  0x25   : > { %v1861_v17 = vrot.slane %v1765_v8, 1  ;;  %v1862_v18 = vrot.slane %v1766_v12, 1  ;;  %v2007_v19 = vmul.f32 %v3647_v59, %v3628_v49  ;;  %v2008_v20 = vmul.f32 %v3647_v59, %v3640_v54  ;;  %472 = vst.msk [vmem:[#allocation2 + $0xa0] sm:$0x3] %vm453_vm1, %v3455_v1  ;;  %v410_v12 = vld [vmem:[%s3544_s14 + $0xc0] sm:$0xff] }
  0x26   : > { %v1664_v21 = vadd.f32 %v1554_v11, %v1422_v13  ;;  %v1665_v22 = vadd.f32 %v1556_v15, %v1423_v14  ;;  %v1864_v23 = vrot.slane %v1767_v16, 1  ;;  %v2009_v24 = vmul.f32 %v3647_v59, %v3651_v60  ;;  %473 = vst.msk [vmem:[#allocation2 + $0xa8] sm:$0xff] %vm450_vm0, %v3455_v1  ;;  %v409_v11 = vld [vmem:[%s3544_s14 + $0xb8] sm:$0xff]  ;;  %v411_v14 = vld [vmem:[%s3544_s14 + $0xc8] sm:$0xff] }
  0x27   : > { %v1863_v25 = vsel %vm757_vm2, %v1861_v17, %v1862_v18  ;;  %v2103_v26 = vrot.slane %v2007_v19, 2  ;;  %v2104_v27 = vrot.slane %v2008_v20, 2  ;;  %474 = vst.msk [vmem:[#allocation2 + $0xb0] sm:$0xff] %vm450_vm0, %v3455_v1  ;;  %v426_v55 = vmax.f32 %v394_v50, 0.0 }
  0x28   : > { %v1731_v29 = vadd.f32 %v1699_v6, %v1664_v21  ;;  %v1732_v30 = vadd.f32 %v1700_v7, %v1665_v22  ;;  %v1865_v32 = vsel %vm757_vm2, %v1862_v18, %v1864_v23  ;;  %v2106_v33 = vrot.slane %v2009_v24, 2  ;;  %475 = vst.msk [vmem:[#allocation2 + $0xb8] sm:$0x3] %vm453_vm1, %v3455_v1  ;;  %v406_v7 = vld [vmem:[%s3544_s14 + $0xa0] sm:$0xff] }
  0x29   : > { %v2105_v35 = vsel %vm1000_vm3, %v2103_v26, %v2104_v27  ;;  %476 = vst.msk [vmem:[#allocation2 + $0xc0] sm:$0xff] %vm450_vm0, %v3455_v1  ;;  %v427_v57 = vmax.f32 %v395_v51, 0.0  ;;  %v428_v61 = vmax.f32 %v396_v52, 0.0  ;;  %v429_v62 = vmax.f32 %v397_v53, 0.0 }
  0x2a   : > { %v1973_v36 = vadd.f32 %v1863_v25, %v1731_v29  ;;  %v1974_v37 = vadd.f32 %v1865_v32, %v1732_v30  ;;  %v2107_v38 = vsel %vm1000_vm3, %v2104_v27, %v2106_v33  ;;  %477 = vst.msk [vmem:[#allocation2 + $0xc8] sm:$0xff] %vm450_vm0, %v3455_v1  ;;  %v430_v0 = vmax.f32 %v398_v56, 0.0 }
  0x2b   : > { %478 = vst.msk [vmem:[#allocation2 + $0xd0] sm:$0x3] %vm453_vm1, %v3455_v1  ;;  %v431_v6 = vmax.f32 %v399_v58, 0.0  ;;  %v432_v8 = vmax.f32 %v400_v63, 0.0  ;;  %v438_v13 = vmax.f32 %v406_v7, 0.0  ;;  %v439_v15 = vmax.f32 %v407_v9, 0.0 }
  0x2c   : > { %v2215_v40 = vadd.f32 %v2105_v35, %v1973_v36  ;;  %v2216_v44 = vadd.f32 %v2107_v38, %v1974_v37  ;;  %479 = vst.msk [vmem:[#allocation2 + $0xd8] sm:$0xff] %vm450_vm0, %v3455_v1  ;;  %v440_v16 = vmax.f32 %v408_v10, 0.0  ;;  %v441_v18 = vmax.f32 %v409_v11, 0.0 }
  0x2d   : > { %480 = vst.msk [vmem:[#allocation2 + $0xe0] sm:$0xff] %vm450_vm0, %v3455_v1  ;;  %v442_v19 = vmax.f32 %v410_v12, 0.0  ;;  %v443_v25 = vmax.f32 %v411_v14, 0.0 }
  0x2e   : > { %v2247_v45 = vpack.c.bf16 %v2215_v40, %v2215_v40  ;;  %v2248_v46 = vpack.c.bf16 %v2216_v44, %v2216_v44  ;;  %481 = vst.msk [vmem:[#allocation2 + $0xe8] sm:$0x3] %vm453_vm1, %v3455_v1 }
  0x2f   : > { %482 = vst.msk [vmem:[#allocation2 + $0xf0] sm:$0xff] %vm450_vm0, %v3455_v1 }
  0x30   : > { %2280 = vst.msk [vmem:[#allocation3] sm:$0xf] %vm2279_vm4, %v2247_v45 }
  0x31   : > { %2281 = vst.msk [vmem:[#allocation3 + $0x4] sm:$0xf] %vm2279_vm4, %v2248_v46 }
  0x32   : > { %483 = vst.msk [vmem:[#allocation2 + $0xf8] sm:$0xff] %vm450_vm0, %v3455_v1 }
  0x33   : > { %484 = vst.msk [vmem:[#allocation2 + $0x100] sm:$0x3] %vm453_vm1, %v3455_v1 }
  0x34   : > { %485 = vst.msk [vmem:[#allocation2 + $0x108] sm:$0xff] %vm450_vm0, %v3455_v1 }
  0x35   : > { %486 = vst.msk [vmem:[#allocation2 + $0x110] sm:$0xff] %vm450_vm0, %v3455_v1 }
  0x36   : > { %487 = vst.msk [vmem:[#allocation2 + $0x118] sm:$0x3] %vm453_vm1, %v3455_v1 }
  0x37   : > { %488 = vst.msk [vmem:[#allocation2 + $0x120] sm:$0xff] %vm450_vm0, %v3455_v1 }
  0x38   : > { %v3336_v47 = vld [vmem:[#allocation3] sm:$0xff]  ;;  %489 = vst.msk [vmem:[#allocation2 + $0x128] sm:$0xff] %vm450_vm0, %v3455_v1 }
  0x39   : > { %490 = vst.msk [vmem:[#allocation2 + $0x130] sm:$0x3] %vm453_vm1, %v3455_v1  ;;  %3291 = vmatmul.msk.bf16.vlgmr.msra.gmra.mxu0 %vm450_vm0, %v3336_v47 }
  0x3a   : > { %491 = vst.msk [vmem:[#allocation2 + $0x138] sm:$0xff] %vm450_vm0, %v3455_v1 }
  0x3b   : > { %492 = vst.msk [vmem:[#allocation2 + $0x140] sm:$0xff] %vm450_vm0, %v3455_v1 }
  0x3c   : > { %493 = vst.msk [vmem:[#allocation2 + $0x148] sm:$0x3] %vm453_vm1, %v3455_v1 }
  0x3d   : > { %494 = vst.msk [vmem:[#allocation2 + $0x150] sm:$0xff] %vm450_vm0, %v3455_v1 }
  0x3e   : > { %495 = vst.msk [vmem:[#allocation2 + $0x158] sm:$0xff] %vm450_vm0, %v3455_v1 }
  0x3f   : > { %496 = vst.msk [vmem:[#allocation2 + $0x160] sm:$0x3] %vm453_vm1, %v3455_v1 }
  0x40   : > { %497 = vst.msk [vmem:[#allocation2 + $0x168] sm:$0xff] %vm450_vm0, %v3455_v1 }
  0x41   : > { %498 = vst.msk [vmem:[#allocation2 + $0x170] sm:$0xff] %vm450_vm0, %v3455_v1 }
  0x42   : > { %499 = vst.msk [vmem:[#allocation2 + $0x178] sm:$0x3] %vm453_vm1, %v3455_v1 }
  0x43   : > { %500 = vst.msk [vmem:[#allocation2 + $0x180] sm:$0xff] %vm450_vm0, %v3455_v1 }
  0x44   : > { %501 = vst.msk [vmem:[#allocation2 + $0x188] sm:$0xff] %vm450_vm0, %v3455_v1 }
  0x45   : > { %502 = vst.msk [vmem:[#allocation2 + $0x190] sm:$0x3] %vm453_vm1, %v3455_v1 }
  0x46   : > { %503 = vst.msk [vmem:[#allocation2 + $0x198] sm:$0xff] %vm450_vm0, %v3455_v1 }
  0x47   : > { %504 = vst.msk [vmem:[#allocation2 + $0x1a0] sm:$0xff] %vm450_vm0, %v3455_v1 }
  0x48   : > { %505 = vst.msk [vmem:[#allocation2 + $0x1a8] sm:$0x3] %vm453_vm1, %v3455_v1  ;;  %v433_v1 = vmax.f32 %v401_v5, 0.0 }
  0x49   : > { %515 = vst.msk [vmem:[#allocation2 + $0x79] sm:$0xff] %vm450_vm0, %v426_v55 }
  0x4a   : > { %516 = vst.msk [vmem:[#allocation2 + $0x81] sm:$0xff] %vm450_vm0, %v427_v57 }
  0x4b   : > { %517 = vst.msk [vmem:[#allocation2 + $0x91] sm:$0xff] %vm450_vm0, %v428_v61 }
  0x4c   : > { %518 = vst.msk [vmem:[#allocation2 + $0x99] sm:$0xff] %vm450_vm0, %v429_v62 }
  0x4d   : > { %519 = vst.msk [vmem:[#allocation2 + $0xa9] sm:$0xff] %vm450_vm0, %v430_v0 }
  0x4e   : > { %520 = vst.msk [vmem:[#allocation2 + $0xb1] sm:$0xff] %vm450_vm0, %v431_v6 }
  0x4f   : > { %521 = vst.msk [vmem:[#allocation2 + $0xc1] sm:$0xff] %vm450_vm0, %v432_v8 }
  0x50   : > { %v554_v17 = vld [vmem:[#allocation2 + $0x78] sm:$0xff]  ;;  %522 = vst.msk [vmem:[#allocation2 + $0xc9] sm:$0xff] %vm450_vm0, %v433_v1 }
  0x51   : > { %v555_v20 = vld [vmem:[#allocation2 + $0x80] sm:$0xff]  ;;  %v556_v21 = vld [vmem:[#allocation2 + $0x88] sm:$0x3]  ;;  %v605_v22 = vmul.f32 %v3532_v2, %v554_v17  ;;  %v676_v23 = vmul.f32 %v3537_v3, %v554_v17  ;;  %v919_v24 = vmul.f32 %v3551_v4, %v554_v17  ;;  %527 = vst.msk [vmem:[#allocation2 + $0x109] sm:$0xff] %vm450_vm0, %v438_v13 }
  0x52   : > { %v3782_v26 = vld [vmem:[#allocation2 + $0x90] sm:$0xff]  ;;  %v606_v27 = vmul.f32 %v3532_v2, %v555_v20  ;;  %v677_v29 = vmul.f32 %v3537_v3, %v555_v20  ;;  %v678_v30 = vmul.f32 %v3537_v3, %v556_v21  ;;  %v920_v32 = vmul.f32 %v3551_v4, %v555_v20  ;;  %528 = vst.msk [vmem:[#allocation2 + $0x111] sm:$0xff] %vm450_vm0, %v439_v15 }
  0x53   : > { %v3789_v33 = vld [vmem:[#allocation2 + $0x98] sm:$0xff]  ;;  %v783_v35 = vrot.slane %v676_v23, 1  ;;  %v921_v36 = vmul.f32 %v3551_v4, %v556_v21  ;;  %v1026_v37 = vrot.slane %v919_v24, 2  ;;  %v1158_v38 = vmul.f32 %v3579_v28, %v3782_v26  ;;  %529 = vst.msk [vmem:[#allocation2 + $0x121] sm:$0xff] %vm450_vm0, %v440_v16  ;;  %v3795_v40 = vld [vmem:[#allocation2 + $0xa0] sm:$0x3] }
  0x54   : > { %v784_v44 = vrot.slane %v677_v29, 1  ;;  %v786_v45 = vrot.slane %v678_v30, 1  ;;  %v1027_v46 = vrot.slane %v920_v32, 2  ;;  %v1159_v47 = vmul.f32 %v3579_v28, %v3789_v33  ;;  %530 = vst.msk [vmem:[#allocation2 + $0x129] sm:$0xff] %vm450_vm0, %v441_v18  ;;  %v3814_v5 = vld [vmem:[#allocation2 + $0xa8] sm:$0xff] }
  0x55   : > { %v1029_v50 = vrot.slane %v921_v36, 2  ;;  %v1229_v51 = vmul.f32 %v3585_v31, %v3782_v26  ;;  %v1230_v52 = vmul.f32 %v3585_v31, %v3789_v33  ;;  %v1231_v53 = vmul.f32 %v3585_v31, %v3795_v40  ;;  %531 = vst.msk [vmem:[#allocation2 + $0x139] sm:$0xff] %vm450_vm0, %v442_v19  ;;  %v3822_v13 = vld [vmem:[#allocation2 + $0xb0] sm:$0xff]  ;;  %v3826_v18 = vld [vmem:[#allocation2 + $0xb8] sm:$0x3] }
  0x56   : > { %v785_v55 = vsel %vm757_vm2, %v783_v35, %v784_v44  ;;  %v787_v56 = vsel %vm757_vm2, %v784_v44, %v786_v45  ;;  %v1028_v57 = vsel %vm1000_vm3, %v1026_v37, %v1027_v46  ;;  %v1471_v58 = vmul.f32 %v3592_v34, %v3782_v26  ;;  %532 = vst.msk [vmem:[#allocation2 + $0x141] sm:$0xff] %vm450_vm0, %v443_v25 }
  0x57   : > { %v880_v61 = vadd.f32 %v785_v55, %v605_v22  ;;  %v881_v62 = vadd.f32 %v787_v56, %v606_v27  ;;  %v1030_v63 = vsel %vm1000_vm3, %v1027_v46, %v1029_v50  ;;  %v1335_v0 = vrot.slane %v1229_v51, 1 }
  0x58   : > { %v1336_v6 = vrot.slane %v1230_v52, 1  ;;  %v1338_v7 = vrot.slane %v1231_v53, 1  ;;  %v1472_v8 = vmul.f32 %v3592_v34, %v3789_v33  ;;  %v1473_v9 = vmul.f32 %v3592_v34, %v3795_v40 }
  0x59   : > { %v1123_v1 = vadd.f32 %v1028_v57, %v880_v61  ;;  %v1124_v10 = vadd.f32 %v1030_v63, %v881_v62  ;;  %v1577_v11 = vrot.slane %v1471_v58, 2  ;;  %v1709_v12 = vmul.f32 %v3607_v41, %v3814_v5 }
  0x5a   : > { %v1337_v14 = vsel %vm757_vm2, %v1335_v0, %v1336_v6  ;;  %v1339_v15 = vsel %vm757_vm2, %v1336_v6, %v1338_v7  ;;  %v1578_v16 = vrot.slane %v1472_v8, 2  ;;  %v1580_v17 = vrot.slane %v1473_v9, 2 }
  0x5b   : > { %v1190_v19 = vadd.f32 %v1158_v38, %v1123_v1  ;;  %v1191_v20 = vadd.f32 %v1159_v47, %v1124_v10  ;;  %v1710_v21 = vmul.f32 %v3607_v41, %v3822_v13  ;;  %v1780_v22 = vmul.f32 %v3624_v48, %v3814_v5 }
  0x5c   : > { %v1579_v23 = vsel %vm1000_vm3, %v1577_v11, %v1578_v16  ;;  %v1581_v24 = vsel %vm1000_vm3, %v1578_v16, %v1580_v17  ;;  %v1781_v25 = vmul.f32 %v3624_v48, %v3822_v13  ;;  %v1782_v27 = vmul.f32 %v3624_v48, %v3826_v18 }
  0x5d   : > { %v1432_v29 = vadd.f32 %v1337_v14, %v1190_v19  ;;  %v1433_v30 = vadd.f32 %v1339_v15, %v1191_v20  ;;  %v1886_v32 = vrot.slane %v1780_v22, 1  ;;  %v2022_v35 = vmul.f32 %v3647_v59, %v3814_v5 }
  0x5e   : > { %v1887_v36 = vrot.slane %v1781_v25, 1  ;;  %v1889_v37 = vrot.slane %v1782_v27, 1  ;;  %v2023_v38 = vmul.f32 %v3647_v59, %v3822_v13  ;;  %v2024_v44 = vmul.f32 %v3647_v59, %v3826_v18 }
  0x5f   : > { %v1674_v45 = vadd.f32 %v1579_v23, %v1432_v29  ;;  %v1675_v46 = vadd.f32 %v1581_v24, %v1433_v30  ;;  %v2128_v47 = vrot.slane %v2022_v35, 2  ;;  %v607_v50 = vmul.f32 %v3532_v2, %v3782_v26 }
  0x60   : > { %v1888_v51 = vsel %vm757_vm2, %v1886_v32, %v1887_v36  ;;  %v1890_v52 = vsel %vm757_vm2, %v1887_v36, %v1889_v37  ;;  %v2129_v53 = vrot.slane %v2023_v38, 2  ;;  %v2131_v55 = vrot.slane %v2024_v44, 2  ;;  %v3875_v32 = vld [vmem:[#allocation2 + $0xc0] sm:$0xff]  ;;  %v3882_v44 = vld [vmem:[#allocation2 + $0xc8] sm:$0xff] }
  0x61   : > { %v1741_v56 = vadd.f32 %v1709_v12, %v1674_v45  ;;  %v1742_v57 = vadd.f32 %v1710_v21, %v1675_v46  ;;  %v608_v58 = vmul.f32 %v3532_v2, %v3789_v33  ;;  %v679_v61 = vmul.f32 %v3537_v3, %v3782_v26 }
  0x62   : > { %v2130_v62 = vsel %vm1000_vm3, %v2128_v47, %v2129_v53  ;;  %v2132_v63 = vsel %vm1000_vm3, %v2129_v53, %v2131_v55  ;;  %v680_v0 = vmul.f32 %v3537_v3, %v3789_v33  ;;  %v681_v6 = vmul.f32 %v3537_v3, %v3795_v40 }
  0x63   : > { %v1983_v7 = vadd.f32 %v1888_v51, %v1741_v56  ;;  %v1984_v8 = vadd.f32 %v1890_v52, %v1742_v57  ;;  %v788_v9 = vrot.slane %v679_v61, 1  ;;  %v922_v1 = vmul.f32 %v3551_v4, %v3782_v26  ;;  %v3890_v56 = vld [vmem:[#allocation2 + $0xd0] sm:$0x3] }
  0x64   : > { %v789_v10 = vrot.slane %v680_v0, 1  ;;  %v791_v11 = vrot.slane %v681_v6, 1  ;;  %v923_v12 = vmul.f32 %v3551_v4, %v3789_v33  ;;  %v924_v14 = vmul.f32 %v3551_v4, %v3795_v40 }
  0x65   : > { %v2225_v15 = vadd.f32 %v2130_v62, %v1983_v7  ;;  %v2226_v16 = vadd.f32 %v2132_v63, %v1984_v8  ;;  %v1031_v17 = vrot.slane %v922_v1, 2  ;;  %v1160_v19 = vmul.f32 %v3579_v28, %v3814_v5 }
  0x66   : > { %v790_v20 = vsel %vm757_vm2, %v788_v9, %v789_v10  ;;  %v792_v21 = vsel %vm757_vm2, %v789_v10, %v791_v11  ;;  %v1032_v22 = vrot.slane %v923_v12, 2  ;;  %v1034_v26 = vrot.slane %v924_v14, 2 }
  0x67   : > { %v2257_v23 = vpack.c.bf16 %v2225_v15, %v2225_v15  ;;  %v2258_v24 = vpack.c.bf16 %v2226_v16, %v2226_v16  ;;  %v882_v25 = vadd.f32 %v790_v20, %v607_v50  ;;  %v883_v27 = vadd.f32 %v792_v21, %v608_v58  ;;  %v572_v21 = vld [vmem:[#allocation2 + $0x108] sm:$0xff] }
  0x68   : > { %v1033_v33 = vsel %vm1000_vm3, %v1031_v17, %v1032_v22  ;;  %v1035_v40 = vsel %vm1000_vm3, %v1032_v22, %v1034_v26  ;;  %v1161_v29 = vmul.f32 %v3579_v28, %v3822_v13  ;;  %v1232_v30 = vmul.f32 %v3585_v31, %v3814_v5 }
  0x69   : > { %2290 = vst.msk [vmem:[#allocation3 + $0x28] sm:$0xf] %vm2279_vm4, %v2257_v23  ;;  %v1125_v35 = vadd.f32 %v1033_v33, %v882_v25  ;;  %v1126_v36 = vadd.f32 %v1035_v40, %v883_v27  ;;  %v1233_v37 = vmul.f32 %v3585_v31, %v3822_v13  ;;  %v1234_v38 = vmul.f32 %v3585_v31, %v3826_v18 }
  0x6a   : > { %2291 = vst.msk [vmem:[#allocation3 + $0x2c] sm:$0xf] %vm2279_vm4, %v2258_v24  ;;  %v1340_v45 = vrot.slane %v1232_v30, 1  ;;  %v1474_v46 = vmul.f32 %v3592_v34, %v3814_v5  ;;  %v1475_v47 = vmul.f32 %v3592_v34, %v3822_v13  ;;  %v1476_v50 = vmul.f32 %v3592_v34, %v3826_v18  ;;  %v573_v30 = vld [vmem:[#allocation2 + $0x110] sm:$0xff] }
  0x6b   : > { %v1192_v51 = vadd.f32 %v1160_v19, %v1125_v35  ;;  %v1193_v52 = vadd.f32 %v1161_v29, %v1126_v36  ;;  %v1341_v53 = vrot.slane %v1233_v37, 1  ;;  %v1343_v55 = vrot.slane %v1234_v38, 1  ;;  %v574_v35 = vld [vmem:[#allocation2 + $0x118] sm:$0x3] }
  0x6c   : > { %v1582_v57 = vrot.slane %v1474_v46, 2  ;;  %v1583_v58 = vrot.slane %v1475_v47, 2  ;;  %v1585_v61 = vrot.slane %v1476_v50, 2  ;;  %v1711_v62 = vmul.f32 %v3607_v41, %v3875_v32 }
  0x6d   : > { %v1342_v63 = vsel %vm757_vm2, %v1340_v45, %v1341_v53  ;;  %v1344_v0 = vsel %vm757_vm2, %v1341_v53, %v1343_v55  ;;  %v1712_v6 = vmul.f32 %v3607_v41, %v3882_v44  ;;  %v1783_v7 = vmul.f32 %v3624_v48, %v3875_v32 }
  0x6e   : > { %v1434_v8 = vadd.f32 %v1342_v63, %v1192_v51  ;;  %v1435_v9 = vadd.f32 %v1344_v0, %v1193_v52  ;;  %v1584_v1 = vsel %vm1000_vm3, %v1582_v57, %v1583_v58  ;;  %v1586_v10 = vsel %vm1000_vm3, %v1583_v58, %v1585_v61  ;;  %v3920_v52 = vld [vmem:[#allocation2 + $0x120] sm:$0xff]  ;;  %v3925_v63 = vld [vmem:[#allocation2 + $0x128] sm:$0xff] }
  0x6f   : > { %v1784_v11 = vmul.f32 %v3624_v48, %v3882_v44  ;;  %v1785_v12 = vmul.f32 %v3624_v48, %v3890_v56  ;;  %v1891_v14 = vrot.slane %v1783_v7, 1  ;;  %v2025_v15 = vmul.f32 %v3647_v59, %v3875_v32 }
  0x70   : > { %v1676_v16 = vadd.f32 %v1584_v1, %v1434_v8  ;;  %v1677_v17 = vadd.f32 %v1586_v10, %v1435_v9  ;;  %v2026_v19 = vmul.f32 %v3647_v59, %v3882_v44  ;;  %v2027_v20 = vmul.f32 %v3647_v59, %v3890_v56 }
  0x71   : > { %v3341_v22 = vld [vmem:[#allocation3 + $0x28] sm:$0xff]  ;;  %v1892_v26 = vrot.slane %v1784_v11, 1  ;;  %v1894_v23 = vrot.slane %v1785_v12, 1  ;;  %v2133_v24 = vrot.slane %v2025_v15, 2  ;;  %v617_v25 = vmul.f32 %v3532_v2, %v572_v21  ;;  %v3931_v12 = vld [vmem:[#allocation2 + $0x130] sm:$0x3] }
  0x72   : > { %v1743_v27 = vadd.f32 %v1711_v62, %v1676_v16  ;;  %v1744_v33 = vadd.f32 %v1712_v6, %v1677_v17  ;;  %v2134_v40 = vrot.slane %v2026_v19, 2  ;;  %v2136_v29 = vrot.slane %v2027_v20, 2  ;;  %3296 = vmatmul.msk.bf16.vlgmr.msra.gmra.mxu1 %vm450_vm0, %v3341_v22 }
  0x73   : > { %v1893_v36 = vsel %vm757_vm2, %v1891_v14, %v1892_v26  ;;  %v1895_v37 = vsel %vm757_vm2, %v1892_v26, %v1894_v23  ;;  %v618_v38 = vmul.f32 %v3532_v2, %v573_v30  ;;  %v694_v45 = vmul.f32 %v3537_v3, %v572_v21 }
  0x74   : > { %v1985_v46 = vadd.f32 %v1893_v36, %v1743_v27  ;;  %v1986_v47 = vadd.f32 %v1895_v37, %v1744_v33  ;;  %v2135_v50 = vsel %vm1000_vm3, %v2133_v24, %v2134_v40  ;;  %v2137_v51 = vsel %vm1000_vm3, %v2134_v40, %v2136_v29 }
  0x75   : > { %v695_v53 = vmul.f32 %v3537_v3, %v573_v30  ;;  %v696_v55 = vmul.f32 %v3537_v3, %v574_v35  ;;  %v813_v57 = vrot.slane %v694_v45, 1  ;;  %v937_v58 = vmul.f32 %v3551_v4, %v572_v21  ;;  %v3940_v21 = vld [vmem:[#allocation2 + $0x138] sm:$0xff] }
  0x76   : > { %v2227_v61 = vadd.f32 %v2135_v50, %v1985_v46  ;;  %v2228_v62 = vadd.f32 %v2137_v51, %v1986_v47  ;;  %v938_v0 = vmul.f32 %v3551_v4, %v573_v30  ;;  %v939_v6 = vmul.f32 %v3551_v4, %v574_v35  ;;  %v3951_v30 = vld [vmem:[#allocation2 + $0x140] sm:$0xff]  ;;  %v3959_v50 = vld [vmem:[#allocation2 + $0x148] sm:$0x3] }
  0x77   : > { %v814_v7 = vrot.slane %v695_v53, 1  ;;  %v816_v8 = vrot.slane %v696_v55, 1  ;;  %v1056_v9 = vrot.slane %v937_v58, 2  ;;  %v1170_v1 = vmul.f32 %v3579_v28, %v3920_v52 }
  0x78   : > { %v2259_v10 = vpack.c.bf16 %v2227_v61, %v2227_v61  ;;  %v2260_v11 = vpack.c.bf16 %v2228_v62, %v2228_v62  ;;  %v1057_v14 = vrot.slane %v938_v0, 2  ;;  %v1059_v15 = vrot.slane %v939_v6, 2 }
  0x79   : > { %v815_v16 = vsel %vm757_vm2, %v813_v57, %v814_v7  ;;  %v817_v17 = vsel %vm757_vm2, %v814_v7, %v816_v8  ;;  %v1171_v19 = vmul.f32 %v3579_v28, %v3925_v63  ;;  %v1247_v20 = vmul.f32 %v3585_v31, %v3920_v52 }
  0x7a   : > { %2292 = vst.msk [vmem:[#allocation3 + $0x30] sm:$0xf] %vm2279_vm4, %v2259_v10  ;;  %v892_v22 = vadd.f32 %v815_v16, %v617_v25  ;;  %v893_v26 = vadd.f32 %v817_v17, %v618_v38  ;;  %v1058_v23 = vsel %vm1000_vm3, %v1056_v9, %v1057_v14  ;;  %v1060_v24 = vsel %vm1000_vm3, %v1057_v14, %v1059_v15 }
  0x7b   : > { %2293 = vst.msk [vmem:[#allocation3 + $0x34] sm:$0xf] %vm2279_vm4, %v2260_v11  ;;  %v1248_v27 = vmul.f32 %v3585_v31, %v3925_v63  ;;  %v1249_v33 = vmul.f32 %v3585_v31, %v3931_v12  ;;  %v1365_v40 = vrot.slane %v1247_v20, 1  ;;  %v1489_v29 = vmul.f32 %v3592_v34, %v3920_v52 }
  0x7c   : > { %v1135_v25 = vadd.f32 %v1058_v23, %v892_v22  ;;  %v1136_v35 = vadd.f32 %v1060_v24, %v893_v26  ;;  %v1490_v36 = vmul.f32 %v3592_v34, %v3925_v63  ;;  %v1491_v37 = vmul.f32 %v3592_v34, %v3931_v12  ;;  %v391_v26 = vld [vmem:[%s3544_s14 + $0x28] sm:$0xff] }
  0x7d   : > { %v1366_v38 = vrot.slane %v1248_v27, 1  ;;  %v1368_v45 = vrot.slane %v1249_v33, 1  ;;  %v1607_v46 = vrot.slane %v1489_v29, 2  ;;  %v1721_v47 = vmul.f32 %v3607_v41, %v3940_v21 }
  0x7e   : > { %v1202_v51 = vadd.f32 %v1170_v1, %v1135_v25  ;;  %v1203_v53 = vadd.f32 %v1171_v19, %v1136_v35  ;;  %v1608_v55 = vrot.slane %v1490_v36, 2  ;;  %v1610_v57 = vrot.slane %v1491_v37, 2  ;;  %v390_v1 = vld [vmem:[%s3544_s14 + $0x20] sm:$0xff] }
  0x7f   : > { %v1367_v58 = vsel %vm757_vm2, %v1365_v40, %v1366_v38  ;;  %v1369_v61 = vsel %vm757_vm2, %v1366_v38, %v1368_v45  ;;  %v1722_v62 = vmul.f32 %v3607_v41, %v3951_v30  ;;  %v1798_v0 = vmul.f32 %v3624_v48, %v3940_v21 }
  0x80   : > { %v1444_v6 = vadd.f32 %v1367_v58, %v1202_v51  ;;  %v1445_v7 = vadd.f32 %v1369_v61, %v1203_v53  ;;  %v1609_v8 = vsel %vm1000_vm3, %v1607_v46, %v1608_v55  ;;  %v1611_v9 = vsel %vm1000_vm3, %v1608_v55, %v1610_v57 }
  0x81   : > { %v1799_v10 = vmul.f32 %v3624_v48, %v3951_v30  ;;  %v1800_v11 = vmul.f32 %v3624_v48, %v3959_v50  ;;  %v1916_v14 = vrot.slane %v1798_v0, 1  ;;  %v2040_v15 = vmul.f32 %v3647_v59, %v3940_v21 }
  0x82   : > { %v3342_v16 = vld [vmem:[#allocation3 + $0x30] sm:$0xff]  ;;  %v1686_v17 = vadd.f32 %v1609_v8, %v1444_v6  ;;  %v1687_v19 = vadd.f32 %v1611_v9, %v1445_v7  ;;  %v2041_v20 = vmul.f32 %v3647_v59, %v3951_v30  ;;  %v2042_v22 = vmul.f32 %v3647_v59, %v3959_v50 }
  0x83   : > { %v1917_v23 = vrot.slane %v1799_v10, 1  ;;  %v1919_v24 = vrot.slane %v1800_v11, 1  ;;  %v2158_v27 = vrot.slane %v2040_v15, 2  ;;  %v422_v33 = vmax.f32 %v390_v1, 0.0  ;;  %3297 = vmatmul.msk.bf16.vlgmr.msra.gmra.mxu2 %vm450_vm0, %v3342_v16 }
  0x84   : > { %v1753_v40 = vadd.f32 %v1721_v47, %v1686_v17  ;;  %v1754_v29 = vadd.f32 %v1722_v62, %v1687_v19  ;;  %v2159_v25 = vrot.slane %v2041_v20, 2  ;;  %v2161_v35 = vrot.slane %v2042_v22, 2 }
  0x85   : > { %v1918_v36 = vsel %vm757_vm2, %v1916_v14, %v1917_v23  ;;  %v1920_v37 = vsel %vm757_vm2, %v1917_v23, %v1919_v24  ;;  %v423_v38 = vmax.f32 %v391_v26, 0.0  ;;  %511 = vst.msk [vmem:[#allocation2 + $0x49] sm:$0xff] %vm450_vm0, %v422_v33  ;;  %v597_v45 = vmul.f32 %v3532_v2, %v3602_v39 }
  0x86   : > { %v1995_v46 = vadd.f32 %v1918_v36, %v1753_v40  ;;  %v1996_v51 = vadd.f32 %v1920_v37, %v1754_v29  ;;  %v2160_v53 = vsel %vm1000_vm3, %v2158_v27, %v2159_v25  ;;  %v2162_v55 = vsel %vm1000_vm3, %v2159_v25, %v2161_v35 }
  0x87   : > { %512 = vst.msk [vmem:[#allocation2 + $0x51] sm:$0xff] %vm450_vm0, %v423_v38  ;;  %v598_v47 = vmul.f32 %v3532_v2, %v3611_v42  ;;  %v664_v57 = vmul.f32 %v3537_v3, %v3602_v39  ;;  %v665_v58 = vmul.f32 %v3537_v3, %v3611_v42  ;;  %v666_v61 = vmul.f32 %v3537_v3, %v3613_v43  ;;  %v3357_v2 = vld [vmem:[%s5142_s5] sm:$0xff] }
  0x88   : > { %v2237_v62 = vadd.f32 %v2160_v53, %v1995_v46  ;;  %v2238_v0 = vadd.f32 %v2162_v55, %v1996_v51  ;;  %v907_v6 = vmul.f32 %v3551_v4, %v3602_v39  ;;  %v908_v7 = vmul.f32 %v3551_v4, %v3611_v42  ;;  %2967 = vmatpush.bf16.msrb.mxu1 %v3357_v2 }
  0x89   : > { %v763_v8 = vrot.slane %v664_v57, 1  ;;  %v764_v9 = vrot.slane %v665_v58, 1  ;;  %v766_v1 = vrot.slane %v666_v61, 1  ;;  %v909_v10 = vmul.f32 %v3551_v4, %v3613_v43 }
  0x8a   : > { %v2269_v11 = vpack.c.bf16 %v2237_v62, %v2237_v62  ;;  %v2270_v3 = vpack.c.bf16 %v2238_v0, %v2238_v0  ;;  %v1006_v14 = vrot.slane %v907_v6, 2  ;;  %v1007_v15 = vrot.slane %v908_v7, 2 }
  0x8b   : > { %v765_v39 = vsel %vm757_vm2, %v763_v8, %v764_v9  ;;  %v767_v16 = vsel %vm757_vm2, %v764_v9, %v766_v1  ;;  %v1009_v42 = vrot.slane %v909_v10, 2  ;;  %v1150_v17 = vmul.f32 %v3579_v28, %v3628_v49  ;;  %v402_v1 = vld [vmem:[%s3544_s14 + $0x80] sm:$0xff] }
  0x8c   : > { %2302 = vst.msk [vmem:[#allocation3 + $0x58] sm:$0xf] %vm2279_vm4, %v2269_v11  ;;  %v872_v19 = vadd.f32 %v765_v39, %v597_v45  ;;  %v873_v20 = vadd.f32 %v767_v16, %v598_v47  ;;  %v1008_v22 = vsel %vm1000_vm3, %v1006_v14, %v1007_v15  ;;  %v1151_v4 = vmul.f32 %v3579_v28, %v3640_v54  ;;  %v4023_v27 = vld [vmem:[#allocation2 + $0x48] sm:$0xff] }
  0x8d   : > { %2303 = vst.msk [vmem:[#allocation3 + $0x5c] sm:$0xf] %vm2279_vm4, %v2270_v3  ;;  %v1010_v43 = vsel %vm1000_vm3, %v1007_v15, %v1009_v42  ;;  %v1217_v26 = vmul.f32 %v3585_v31, %v3628_v49  ;;  %v1218_v23 = vmul.f32 %v3585_v31, %v3640_v54  ;;  %v1219_v24 = vmul.f32 %v3585_v31, %v3651_v60  ;;  %v403_v15 = vld [vmem:[%s3544_s14 + $0x88] sm:$0xff] }
  0x8e   : > { %v1115_v33 = vadd.f32 %v1008_v22, %v872_v19  ;;  %v1116_v40 = vadd.f32 %v1010_v43, %v873_v20  ;;  %v1459_v28 = vmul.f32 %v3592_v34, %v3628_v49  ;;  %v1460_v29 = vmul.f32 %v3592_v34, %v3640_v54  ;;  %v4029_v25 = vld [vmem:[#allocation2 + $0x50] sm:$0xff]  ;;  %v4033_v45 = vld [vmem:[#allocation2 + $0x58] sm:$0x3] }
  0x8f   : > { %v1315_v35 = vrot.slane %v1217_v26, 1  ;;  %v1316_v36 = vrot.slane %v1218_v23, 1  ;;  %v1318_v37 = vrot.slane %v1219_v24, 1  ;;  %v1461_v38 = vmul.f32 %v3592_v34, %v3651_v60  ;;  %v4066_v24 = vld [vmem:[%s5139_s2] ss:$0 sm:$0xff] }
  0x90   : > { %v1182_v31 = vadd.f32 %v1150_v17, %v1115_v33  ;;  %v1183_v46 = vadd.f32 %v1151_v4, %v1116_v40  ;;  %v1557_v51 = vrot.slane %v1459_v28, 2  ;;  %v1558_v53 = vrot.slane %v1460_v29, 2  ;;  %v4075_v28 = vld [vmem:[%s5139_s2 + $0x1] ss:$0 sm:$0xff] }
  0x91   : > { %v1317_v55 = vsel %vm757_vm2, %v1315_v35, %v1316_v36  ;;  %v1319_v49 = vsel %vm757_vm2, %v1316_v36, %v1318_v37  ;;  %v1560_v54 = vrot.slane %v1461_v38, 2  ;;  %v1701_v47 = vmul.f32 %v3607_v41, %v4023_v27 }
  0x92   : > { %v1424_v57 = vadd.f32 %v1317_v55, %v1182_v31  ;;  %v1425_v58 = vadd.f32 %v1319_v49, %v1183_v46  ;;  %v1559_v61 = vsel %vm1000_vm3, %v1557_v51, %v1558_v53  ;;  %v1702_v34 = vmul.f32 %v3607_v41, %v4029_v25  ;;  %v4087_v46 = vld [vmem:[%s5139_s2 + $0x2] ss:$0 sm:$0xff] }
  0x93   : > { %v1561_v60 = vsel %vm1000_vm3, %v1558_v53, %v1560_v54  ;;  %v1768_v62 = vmul.f32 %v3624_v48, %v4023_v27  ;;  %v1769_v0 = vmul.f32 %v3624_v48, %v4029_v25  ;;  %v1770_v6 = vmul.f32 %v3624_v48, %v4033_v45 }
  0x94   : > { %v3347_v7 = vld [vmem:[#allocation3 + $0x58] sm:$0xff]  ;;  %v1666_v2 = vadd.f32 %v1559_v61, %v1424_v57  ;;  %v1667_v8 = vadd.f32 %v1561_v60, %v1425_v58  ;;  %v2010_v9 = vmul.f32 %v3647_v59, %v4023_v27  ;;  %v2011_v41 = vmul.f32 %v3647_v59, %v4029_v25  ;;  %v4098_v60 = vld [vmem:[%s5139_s2 + $0x4] ss:$0 sm:$0xff] }
  0x95   : > { %v1866_v10 = vrot.slane %v1768_v62, 1  ;;  %v1867_v11 = vrot.slane %v1769_v0, 1  ;;  %v1869_v3 = vrot.slane %v1770_v6, 1  ;;  %v2012_v14 = vmul.f32 %v3647_v59, %v4033_v45  ;;  %3302 = vmatmul.msk.bf16.vlgmr.msra.gmra.mxu3 %vm450_vm0, %v3347_v7  ;;  %v4110_v0 = vld [vmem:[%s5139_s2 + $0x5] ss:$0 sm:$0xff] }
  0x96   : > { %v1733_v48 = vadd.f32 %v1701_v47, %v1666_v2  ;;  %v1734_v39 = vadd.f32 %v1702_v34, %v1667_v8  ;;  %v2108_v16 = vrot.slane %v2010_v9, 2  ;;  %v2109_v42 = vrot.slane %v2011_v41, 2 }
  0x97   : > { %v1868_v17 = vsel %vm757_vm2, %v1866_v10, %v1867_v11  ;;  %v1870_v19 = vsel %vm757_vm2, %v1867_v11, %v1869_v3  ;;  %v2111_v20 = vrot.slane %v2012_v14, 2  ;;  %v434_v22 = vmax.f32 %v402_v1, 0.0  ;;  %v4126_v3 = vld [vmem:[%s5139_s2 + $0x6] ss:$0 sm:$0xff] }
  0x98   : > { %v1975_v4 = vadd.f32 %v1868_v17, %v1733_v48  ;;  %v1976_v43 = vadd.f32 %v1870_v19, %v1734_v39  ;;  %v2110_v26 = vsel %vm1000_vm3, %v2108_v16, %v2109_v42  ;;  %v435_v23 = vmax.f32 %v403_v15, 0.0 }
  0x99   : > { %v2112_v59 = vsel %vm1000_vm3, %v2109_v42, %v2111_v20  ;;  %523 = vst.msk [vmem:[#allocation2 + $0xd9] sm:$0xff] %vm450_vm0, %v434_v22  ;;  %v609_v33 = vmul.f32 %v4066_v24, %v3814_v5  ;;  %v610_v40 = vmul.f32 %v4066_v24, %v3822_v13  ;;  %v682_v29 = vmul.f32 %v4075_v28, %v3814_v5  ;;  %v4139_v22 = vld [vmem:[%s5139_s2 + $0x8] ss:$0 sm:$0xff] }
  0x9a   : > { %v2217_v35 = vadd.f32 %v2110_v26, %v1975_v4  ;;  %v2218_v36 = vadd.f32 %v2112_v59, %v1976_v43  ;;  %524 = vst.msk [vmem:[#allocation2 + $0xe1] sm:$0xff] %vm450_vm0, %v435_v23  ;;  %v683_v37 = vmul.f32 %v4075_v28, %v3822_v13  ;;  %v684_v38 = vmul.f32 %v4075_v28, %v3826_v18 }
  0x9b   : > { %v793_v31 = vrot.slane %v682_v29, 1  ;;  %v925_v51 = vmul.f32 %v4087_v46, %v3814_v5  ;;  %v926_v53 = vmul.f32 %v4087_v46, %v3822_v13  ;;  %v927_v55 = vmul.f32 %v4087_v46, %v3826_v18 }
  0x9c   : > { %v2249_v49 = vpack.c.bf16 %v2217_v35, %v2217_v35  ;;  %v2250_v54 = vpack.c.bf16 %v2218_v36, %v2218_v36  ;;  %v794_v47 = vrot.slane %v683_v37, 1  ;;  %v796_v57 = vrot.slane %v684_v38, 1  ;;  %v4152_v36 = vld [vmem:[%s5139_s2 + $0x9] ss:$0 sm:$0xff] }
  0x9d   : > { %v1036_v58 = vrot.slane %v925_v51, 2  ;;  %v1037_v61 = vrot.slane %v926_v53, 2  ;;  %v1039_v34 = vrot.slane %v927_v55, 2  ;;  %v1162_v5 = vmul.f32 %v4098_v60, %v3875_v32  ;;  %v412_v55 = vld [vmem:[%s3544_s14 + $0xd0] sm:$0xff] }
  0x9e   : > { %2282 = vst.msk [vmem:[#allocation3 + $0x8] sm:$0xf] %vm2279_vm4, %v2249_v49  ;;  %v795_v13 = vsel %vm757_vm2, %v793_v31, %v794_v47  ;;  %v797_v18 = vsel %vm757_vm2, %v794_v47, %v796_v57  ;;  %v1163_v62 = vmul.f32 %v4098_v60, %v3882_v44  ;;  %v1235_v6 = vmul.f32 %v4110_v0, %v3875_v32 }
  0x9f   : > { %2283 = vst.msk [vmem:[#allocation3 + $0xc] sm:$0xf] %vm2279_vm4, %v2250_v54  ;;  %v884_v7 = vadd.f32 %v795_v13, %v609_v33  ;;  %v885_v2 = vadd.f32 %v797_v18, %v610_v40  ;;  %v1038_v8 = vsel %vm1000_vm3, %v1036_v58, %v1037_v61  ;;  %v1040_v9 = vsel %vm1000_vm3, %v1037_v61, %v1039_v34  ;;  %v4166_v58 = vld [vmem:[%s5139_s2 + $0xa] ss:$0 sm:$0xff] }
  0xa0   : > { %v4117_v41 = vld [vmem:[#allocation2 + $0xd8] sm:$0xff]  ;;  %v1236_v1 = vmul.f32 %v4110_v0, %v3882_v44  ;;  %v1237_v10 = vmul.f32 %v4110_v0, %v3890_v56  ;;  %v1345_v11 = vrot.slane %v1235_v6, 1  ;;  %v1477_v14 = vmul.f32 %v4126_v3, %v3875_v32 }
  0xa1   : > { %v4130_v15 = vld [vmem:[#allocation2 + $0xe0] sm:$0xff]  ;;  %v1127_v48 = vadd.f32 %v1038_v8, %v884_v7  ;;  %v1128_v39 = vadd.f32 %v1040_v9, %v885_v2  ;;  %v1478_v16 = vmul.f32 %v4126_v3, %v3882_v44  ;;  %v1479_v42 = vmul.f32 %v4126_v3, %v3890_v56  ;;  %v4143_v43 = vld [vmem:[#allocation2 + $0xe8] sm:$0x3] }
  0xa2   : > { %v1346_v17 = vrot.slane %v1236_v1, 1  ;;  %v1348_v19 = vrot.slane %v1237_v10, 1  ;;  %v1587_v20 = vrot.slane %v1477_v14, 2  ;;  %v1713_v4 = vmul.f32 %v4139_v22, %v4117_v41 }
  0xa3   : > { %v1194_v26 = vadd.f32 %v1162_v5, %v1127_v48  ;;  %v1195_v23 = vadd.f32 %v1163_v62, %v1128_v39  ;;  %v1588_v59 = vrot.slane %v1478_v16, 2  ;;  %v1590_v33 = vrot.slane %v1479_v42, 2  ;;  %v413_v62 = vld [vmem:[%s3544_s14 + $0xd8] sm:$0xff] }
  0xa4   : > { %v1347_v40 = vsel %vm757_vm2, %v1345_v11, %v1346_v17  ;;  %v1349_v29 = vsel %vm757_vm2, %v1346_v17, %v1348_v19  ;;  %v1714_v35 = vmul.f32 %v4139_v22, %v4130_v15  ;;  %v1786_v37 = vmul.f32 %v4152_v36, %v4117_v41 }
  0xa5   : > { %v1436_v38 = vadd.f32 %v1347_v40, %v1194_v26  ;;  %v1437_v31 = vadd.f32 %v1349_v29, %v1195_v23  ;;  %v1589_v51 = vsel %vm1000_vm3, %v1587_v20, %v1588_v59  ;;  %v1591_v53 = vsel %vm1000_vm3, %v1588_v59, %v1590_v33 }
  0xa6   : > { %v3337_v49 = vld [vmem:[#allocation3 + $0x8] sm:$0xff]  ;;  %v1787_v54 = vmul.f32 %v4152_v36, %v4130_v15  ;;  %v1788_v47 = vmul.f32 %v4152_v36, %v4143_v43  ;;  %v1896_v57 = vrot.slane %v1786_v37, 1  ;;  %v2028_v61 = vmul.f32 %v4166_v58, %v4117_v41 }
  0xa7   : > { %v1678_v34 = vadd.f32 %v1589_v51, %v1436_v38  ;;  %v1679_v5 = vadd.f32 %v1591_v53, %v1437_v31  ;;  %v2029_v13 = vmul.f32 %v4166_v58, %v4130_v15  ;;  %v2030_v18 = vmul.f32 %v4166_v58, %v4143_v43  ;;  %3292 = vmatmul.msk.bf16.gmra.mxu0 %vm450_vm0, %v3337_v49 }
  0xa8   : > { %v1897_v6 = vrot.slane %v1787_v54, 1  ;;  %v1899_v7 = vrot.slane %v1788_v47, 1  ;;  %v2138_v2 = vrot.slane %v2028_v61, 2  ;;  %v444_v8 = vmax.f32 %v412_v55, 0.0 }
  0xa9   : > { %v1745_v9 = vadd.f32 %v1713_v4, %v1678_v34  ;;  %v1746_v1 = vadd.f32 %v1714_v35, %v1679_v5  ;;  %v2139_v10 = vrot.slane %v2029_v13, 2  ;;  %v2141_v11 = vrot.slane %v2030_v18, 2 }
  0xaa   : > { %v1898_v14 = vsel %vm757_vm2, %v1896_v57, %v1897_v6  ;;  %v1900_v48 = vsel %vm757_vm2, %v1897_v6, %v1899_v7  ;;  %v445_v39 = vmax.f32 %v413_v62, 0.0  ;;  %533 = vst.msk [vmem:[#allocation2 + $0x151] sm:$0xff] %vm450_vm0, %v444_v8  ;;  %v619_v16 = vmul.f32 %v4066_v24, %v3920_v52 }
  0xab   : > { %v1987_v42 = vadd.f32 %v1898_v14, %v1745_v9  ;;  %v1988_v17 = vadd.f32 %v1900_v48, %v1746_v1  ;;  %v2140_v19 = vsel %vm1000_vm3, %v2138_v2, %v2139_v10  ;;  %v2142_v20 = vsel %vm1000_vm3, %v2139_v10, %v2141_v11 }
  0xac   : > { %534 = vst.msk [vmem:[#allocation2 + $0x159] sm:$0xff] %vm450_vm0, %v445_v39  ;;  %v620_v4 = vmul.f32 %v4066_v24, %v3925_v63  ;;  %v697_v26 = vmul.f32 %v4075_v28, %v3920_v52  ;;  %v698_v23 = vmul.f32 %v4075_v28, %v3925_v63  ;;  %v699_v59 = vmul.f32 %v4075_v28, %v3931_v12 }
  0xad   : > { %v2229_v33 = vadd.f32 %v2140_v19, %v1987_v42  ;;  %v2230_v40 = vadd.f32 %v2142_v20, %v1988_v17  ;;  %v940_v29 = vmul.f32 %v4087_v46, %v3920_v52  ;;  %v941_v35 = vmul.f32 %v4087_v46, %v3925_v63 }
  0xae   : > { %v818_v37 = vrot.slane %v697_v26, 1  ;;  %v819_v38 = vrot.slane %v698_v23, 1  ;;  %v821_v31 = vrot.slane %v699_v59, 1  ;;  %v942_v51 = vmul.f32 %v4087_v46, %v3931_v12 }
  0xaf   : > { %v2261_v53 = vpack.c.bf16 %v2229_v33, %v2229_v33  ;;  %v2262_v55 = vpack.c.bf16 %v2230_v40, %v2230_v40  ;;  %v1061_v49 = vrot.slane %v940_v29, 2  ;;  %v1062_v54 = vrot.slane %v941_v35, 2 }
  0xb0   : > { %v820_v47 = vsel %vm757_vm2, %v818_v37, %v819_v38  ;;  %v822_v57 = vsel %vm757_vm2, %v819_v38, %v821_v31  ;;  %v1064_v61 = vrot.slane %v942_v51, 2  ;;  %v1172_v52 = vmul.f32 %v4098_v60, %v3940_v21 }
  0xb1   : > { %2294 = vst.msk [vmem:[#allocation3 + $0x38] sm:$0xf] %vm2279_vm4, %v2261_v53  ;;  %v894_v63 = vadd.f32 %v820_v47, %v619_v16  ;;  %v895_v34 = vadd.f32 %v822_v57, %v620_v4  ;;  %v1063_v5 = vsel %vm1000_vm3, %v1061_v49, %v1062_v54  ;;  %v1173_v12 = vmul.f32 %v4098_v60, %v3951_v30  ;;  %v4214_v7 = vld [vmem:[#allocation2 + $0x150] sm:$0xff]  ;;  %v2312_v57 = vld [vmem:[%s4235_s17] ss:$2 sm:$0xff] }
  0xb2   : > { %2295 = vst.msk [vmem:[#allocation3 + $0x3c] sm:$0xf] %vm2279_vm4, %v2262_v55  ;;  %v1065_v13 = vsel %vm1000_vm3, %v1062_v54, %v1064_v61  ;;  %v1250_v18 = vmul.f32 %v4110_v0, %v3940_v21  ;;  %v1251_v62 = vmul.f32 %v4110_v0, %v3951_v30  ;;  %v1252_v6 = vmul.f32 %v4110_v0, %v3959_v50 }
  0xb3   : > { %v1137_v2 = vadd.f32 %v1063_v5, %v894_v63  ;;  %v1138_v8 = vadd.f32 %v1065_v13, %v895_v34  ;;  %v1492_v9 = vmul.f32 %v4126_v3, %v3940_v21  ;;  %v1493_v1 = vmul.f32 %v4126_v3, %v3951_v30  ;;  %v4220_v10 = vld [vmem:[#allocation2 + $0x158] sm:$0xff]  ;;  %v4224_v16 = vld [vmem:[#allocation2 + $0x160] sm:$0x3] }
  0xb4   : > { %v1370_v11 = vrot.slane %v1250_v18, 1  ;;  %v1371_v14 = vrot.slane %v1251_v62, 1  ;;  %v1373_v48 = vrot.slane %v1252_v6, 1  ;;  %v1494_v39 = vmul.f32 %v4126_v3, %v3959_v50  ;;  %v3216_v5 = vld [vmem:[%s4235_s17 + $0x20] ss:$2 sm:$0xff]  ;;  %v392_v6 = vld [vmem:[%s3544_s14 + $0x30] sm:$0xff] }
  0xb5   : > { %v1204_v42 = vadd.f32 %v1172_v52, %v1137_v2  ;;  %v1205_v17 = vadd.f32 %v1173_v12, %v1138_v8  ;;  %v1612_v19 = vrot.slane %v1492_v9, 2  ;;  %v1613_v20 = vrot.slane %v1493_v1, 2  ;;  %v393_v2 = vld [vmem:[%s3544_s14 + $0x38] sm:$0xff] }
  0xb6   : > { %v1372_v4 = vsel %vm757_vm2, %v1370_v11, %v1371_v14  ;;  %v1374_v26 = vsel %vm757_vm2, %v1371_v14, %v1373_v48  ;;  %v1615_v23 = vrot.slane %v1494_v39, 2  ;;  %v1723_v59 = vmul.f32 %v4139_v22, %v4214_v7 }
  0xb7   : > { %v1446_v33 = vadd.f32 %v1372_v4, %v1204_v42  ;;  %v1447_v40 = vadd.f32 %v1374_v26, %v1205_v17  ;;  %v1614_v29 = vsel %vm1000_vm3, %v1612_v19, %v1613_v20  ;;  %v1724_v35 = vmul.f32 %v4139_v22, %v4220_v10 }
  0xb8   : > { %v1616_v37 = vsel %vm1000_vm3, %v1613_v20, %v1615_v23  ;;  %v1801_v38 = vmul.f32 %v4152_v36, %v4214_v7  ;;  %v1802_v31 = vmul.f32 %v4152_v36, %v4220_v10  ;;  %v1803_v51 = vmul.f32 %v4152_v36, %v4224_v16 }
  0xb9   : > { %v3343_v53 = vld [vmem:[#allocation3 + $0x38] sm:$0xff]  ;;  %v1688_v55 = vadd.f32 %v1614_v29, %v1446_v33  ;;  %v1689_v49 = vadd.f32 %v1616_v37, %v1447_v40  ;;  %v2043_v54 = vmul.f32 %v4166_v58, %v4214_v7  ;;  %v2044_v47 = vmul.f32 %v4166_v58, %v4220_v10  ;;  %v3407_v33 = vld [vmem:[#allocation2 + $0x30] sm:$0xff]  ;;  %v3408_v29 = vld [vmem:[#allocation2 + $0x38] sm:$0xff] }
  0xba   : > { %v1921_v61 = vrot.slane %v1801_v38, 1  ;;  %v1922_v52 = vrot.slane %v1802_v31, 1  ;;  %v1924_v63 = vrot.slane %v1803_v51, 1  ;;  %v2045_v34 = vmul.f32 %v4166_v58, %v4224_v16  ;;  %3298 = vmatmul.msk.bf16.gmra.mxu2 %vm450_vm0, %v3343_v53  ;;  %v3409_v31 = vld [vmem:[#allocation2 + $0x40] sm:$0x3] }
  0xbb   : > { %v1755_v12 = vadd.f32 %v1723_v59, %v1688_v55  ;;  %v1756_v13 = vadd.f32 %v1724_v35, %v1689_v49  ;;  %v2163_v18 = vrot.slane %v2043_v54, 2  ;;  %v2164_v62 = vrot.slane %v2044_v47, 2 }
  0xbc   : > { %v1923_v8 = vsel %vm757_vm2, %v1921_v61, %v1922_v52  ;;  %v1925_v9 = vsel %vm757_vm2, %v1922_v52, %v1924_v63  ;;  %v2166_v1 = vrot.slane %v2045_v34, 2  ;;  %v2327_v11 = vmax.f32 %v2312_v57, 0.0 }
  0xbd   : > { %v1997_v14 = vadd.f32 %v1923_v8, %v1755_v12  ;;  %v1998_v48 = vadd.f32 %v1925_v9, %v1756_v13  ;;  %v2165_v39 = vsel %vm1000_vm3, %v2163_v18, %v2164_v62  ;;  %v2328_v42 = vmax.f32 %v3216_v5, 0.0 }
  0xbe   : > { %v2167_v17 = vsel %vm1000_vm3, %v2164_v62, %v2166_v1  ;;  %v2335_v19 = vpack.c.bf16 %v2327_v11, %v2327_v11  ;;  %v424_v20 = vmax.f32 %v392_v6, 0.0  ;;  %v425_v4 = vmax.f32 %v393_v2, 0.0  ;;  %v404_v11 = vld [vmem:[%s3544_s14 + $0x90] sm:$0xff] }
  0xbf   : > { %v2239_v26 = vadd.f32 %v2165_v39, %v1997_v14  ;;  %v2240_v23 = vadd.f32 %v2167_v17, %v1998_v48  ;;  %v2336_v59 = vpack.c.bf16 %v2328_v42, %v2328_v42  ;;  %v599_v40 = vmul.f32 %v3407_v33, %v4066_v24 }
  0xc0   : > { %2343 = vst.msk [vmem:[#allocation4] sm:$0xf] %vm2279_vm4, %v2335_v19  ;;  %v600_v35 = vmul.f32 %v3408_v29, %v4066_v24  ;;  %v667_v37 = vmul.f32 %v3407_v33, %v4075_v28  ;;  %v668_v38 = vmul.f32 %v3408_v29, %v4075_v28  ;;  %v669_v51 = vmul.f32 %v3409_v31, %v4075_v28 }
  0xc1   : > { %v2271_v53 = vpack.c.bf16 %v2239_v26, %v2239_v26  ;;  %v2272_v55 = vpack.c.bf16 %v2240_v23, %v2240_v23  ;;  %2344 = vst.msk [vmem:[#allocation4 + $0x4] sm:$0xf] %vm2279_vm4, %v2336_v59  ;;  %v910_v49 = vmul.f32 %v3407_v33, %v4087_v46  ;;  %v911_v54 = vmul.f32 %v3408_v29, %v4087_v46 }
  0xc2   : > { %513 = vst.msk [vmem:[#allocation2 + $0x61] sm:$0xff] %vm450_vm0, %v424_v20  ;;  %v768_v47 = vrot.slane %v667_v37, 1  ;;  %v769_v57 = vrot.slane %v668_v38, 1  ;;  %v771_v61 = vrot.slane %v669_v51, 1  ;;  %v912_v52 = vmul.f32 %v3409_v31, %v4087_v46  ;;  %v405_v51 = vld [vmem:[%s3544_s14 + $0x98] sm:$0xff] }
  0xc3   : > { %2304 = vst.msk [vmem:[#allocation3 + $0x60] sm:$0xf] %vm2279_vm4, %v2271_v53  ;;  %v1011_v63 = vrot.slane %v910_v49, 2  ;;  %v1012_v34 = vrot.slane %v911_v54, 2  ;;  %v1152_v5 = vmul.f32 %v4098_v60, %v4023_v27  ;;  %v1153_v12 = vmul.f32 %v4098_v60, %v4029_v25 }
  0xc4   : > { %2305 = vst.msk [vmem:[#allocation3 + $0x64] sm:$0xf] %vm2279_vm4, %v2272_v55  ;;  %v770_v13 = vsel %vm757_vm2, %v768_v47, %v769_v57  ;;  %v772_v18 = vsel %vm757_vm2, %v769_v57, %v771_v61  ;;  %v1014_v62 = vrot.slane %v912_v52, 2  ;;  %v1220_v6 = vmul.f32 %v4110_v0, %v4023_v27 }
  0xc5   : > { %514 = vst.msk [vmem:[#allocation2 + $0x69] sm:$0xff] %vm450_vm0, %v425_v4  ;;  %v874_v2 = vadd.f32 %v770_v13, %v599_v40  ;;  %v875_v8 = vadd.f32 %v772_v18, %v600_v35  ;;  %v1013_v9 = vsel %vm1000_vm3, %v1011_v63, %v1012_v34  ;;  %v1221_v1 = vmul.f32 %v4110_v0, %v4029_v25 }
  0xc6   : > { %v1015_v14 = vsel %vm1000_vm3, %v1012_v34, %v1014_v62  ;;  %v1222_v48 = vmul.f32 %v4110_v0, %v4033_v45  ;;  %v1320_v39 = vrot.slane %v1220_v6, 1  ;;  %v1462_v42 = vmul.f32 %v4126_v3, %v4023_v27 }
  0xc7   : > { %v1117_v17 = vadd.f32 %v1013_v9, %v874_v2  ;;  %v1118_v19 = vadd.f32 %v1015_v14, %v875_v8  ;;  %v1321_v20 = vrot.slane %v1221_v1, 1  ;;  %v1463_v4 = vmul.f32 %v4126_v3, %v4029_v25 }
  0xc8   : > { %v3353_v26 = vld [vmem:[#allocation4] sm:$0xff]  ;;  %v1323_v23 = vrot.slane %v1222_v48, 1  ;;  %v1464_v59 = vmul.f32 %v4126_v3, %v4033_v45  ;;  %v1562_v33 = vrot.slane %v1462_v42, 2  ;;  %v436_v40 = vmax.f32 %v404_v11, 0.0 }
  0xc9   : > { %v4297_v29 = vld [vmem:[#allocation2 + $0x60] sm:$0xff]  ;;  %v1184_v35 = vadd.f32 %v1152_v5, %v1117_v17  ;;  %v1185_v37 = vadd.f32 %v1153_v12, %v1118_v19  ;;  %v1322_v38 = vsel %vm757_vm2, %v1320_v39, %v1321_v20  ;;  %v1563_v31 = vrot.slane %v1463_v4, 2  ;;  %3327 = vmatmul.msk.bf16.vlgmr.msrb.gmra.mxu1 %vm450_vm0, %v3353_v26 }
  0xca   : > { %v1324_v53 = vsel %vm757_vm2, %v1321_v20, %v1323_v23  ;;  %v1565_v55 = vrot.slane %v1464_v59, 2  ;;  %v1703_v49 = vmul.f32 %v4139_v22, %v4297_v29  ;;  %v1771_v54 = vmul.f32 %v4152_v36, %v4297_v29  ;;  %525 = vst.msk [vmem:[#allocation2 + $0xf1] sm:$0xff] %vm450_vm0, %v436_v40 }
  0xcb   : > { %v3348_v47 = vld [vmem:[#allocation3 + $0x60] sm:$0xff]  ;;  %v1426_v57 = vadd.f32 %v1322_v38, %v1184_v35  ;;  %v1427_v61 = vadd.f32 %v1324_v53, %v1185_v37  ;;  %v1564_v52 = vsel %vm1000_vm3, %v1562_v33, %v1563_v31  ;;  %v2013_v63 = vmul.f32 %v4166_v58, %v4297_v29 }
  0xcc   : > { %v4311_v34 = vld [vmem:[#allocation2 + $0x68] sm:$0xff]  ;;  %v4313_v5 = vld [vmem:[#allocation2 + $0x70] sm:$0x3]  ;;  %v1566_v12 = vsel %vm1000_vm3, %v1563_v31, %v1565_v55  ;;  %v1871_v13 = vrot.slane %v1771_v54, 1  ;;  %v437_v18 = vmax.f32 %v405_v51, 0.0  ;;  %v611_v62 = vmul.f32 %v4066_v24, %v3875_v32  ;;  %3303 = vmatmul.msk.bf16.gmra.mxu3 %vm450_vm0, %v3348_v47 }
  0xcd   : > { %v1668_v6 = vadd.f32 %v1564_v52, %v1426_v57  ;;  %v1669_v2 = vadd.f32 %v1566_v12, %v1427_v61  ;;  %v1704_v8 = vmul.f32 %v4139_v22, %v4311_v34  ;;  %v1772_v9 = vmul.f32 %v4152_v36, %v4311_v34 }
  0xce   : > { %v1773_v1 = vmul.f32 %v4152_v36, %v4313_v5  ;;  %v2014_v11 = vmul.f32 %v4166_v58, %v4311_v34  ;;  %v2015_v14 = vmul.f32 %v4166_v58, %v4313_v5  ;;  %v2113_v48 = vrot.slane %v2013_v63, 2  ;;  %526 = vst.msk [vmem:[#allocation2 + $0xf9] sm:$0xff] %vm450_vm0, %v437_v18 }
  0xcf   : > { %v1735_v39 = vadd.f32 %v1703_v49, %v1668_v6  ;;  %v1736_v42 = vadd.f32 %v1704_v8, %v1669_v2  ;;  %v1872_v17 = vrot.slane %v1772_v9, 1  ;;  %v612_v19 = vmul.f32 %v4066_v24, %v3882_v44 }
  0xd0   : > { %v1874_v20 = vrot.slane %v1773_v1, 1  ;;  %v2114_v4 = vrot.slane %v2014_v11, 2  ;;  %v2116_v26 = vrot.slane %v2015_v14, 2  ;;  %v685_v23 = vmul.f32 %v4075_v28, %v3875_v32 }
  0xd1   : > { %v1873_v59 = vsel %vm757_vm2, %v1871_v13, %v1872_v17  ;;  %v686_v33 = vmul.f32 %v4075_v28, %v3882_v44  ;;  %v687_v40 = vmul.f32 %v4075_v28, %v3890_v56  ;;  %v928_v35 = vmul.f32 %v4087_v46, %v3875_v32  ;;  %v4357_v11 = vld [vmem:[#allocation2 + $0xf0] sm:$0xff] }
  0xd2   : > { %v1875_v37 = vsel %vm757_vm2, %v1872_v17, %v1874_v20  ;;  %v1977_v38 = vadd.f32 %v1873_v59, %v1735_v39  ;;  %v2115_v31 = vsel %vm1000_vm3, %v2113_v48, %v2114_v4  ;;  %v2117_v51 = vsel %vm1000_vm3, %v2114_v4, %v2116_v26 }
  0xd3   : > { %v1978_v53 = vadd.f32 %v1875_v37, %v1736_v42  ;;  %v798_v55 = vrot.slane %v685_v23, 1  ;;  %v799_v49 = vrot.slane %v686_v33, 1  ;;  %v801_v54 = vrot.slane %v687_v40, 1 }
  0xd4   : > { %v2219_v47 = vadd.f32 %v2115_v31, %v1977_v38  ;;  %v929_v57 = vmul.f32 %v4087_v46, %v3882_v44  ;;  %v930_v61 = vmul.f32 %v4087_v46, %v3890_v56  ;;  %v1041_v52 = vrot.slane %v928_v35, 2 }
  0xd5   : > { %v2220_v32 = vadd.f32 %v2117_v51, %v1978_v53  ;;  %v800_v63 = vsel %vm757_vm2, %v798_v55, %v799_v49  ;;  %v802_v12 = vsel %vm757_vm2, %v799_v49, %v801_v54  ;;  %v1164_v13 = vmul.f32 %v4098_v60, %v4117_v41  ;;  %v4370_v4 = vld [vmem:[#allocation2 + $0xf8] sm:$0xff]  ;;  %v4374_v40 = vld [vmem:[#allocation2 + $0x100] sm:$0x3] }
  0xd6   : > { %v2251_v18 = vpack.c.bf16 %v2219_v47, %v2219_v47  ;;  %v886_v6 = vadd.f32 %v800_v63, %v611_v62  ;;  %v887_v2 = vadd.f32 %v802_v12, %v612_v19  ;;  %v1042_v8 = vrot.slane %v929_v57, 2 }
  0xd7   : > { %v2252_v9 = vpack.c.bf16 %v2220_v32, %v2220_v32  ;;  %v1044_v1 = vrot.slane %v930_v61, 2  ;;  %v1165_v44 = vmul.f32 %v4098_v60, %v4130_v15  ;;  %v1238_v56 = vmul.f32 %v4110_v0, %v4117_v41 }
  0xd8   : > { %2284 = vst.msk [vmem:[#allocation3 + $0x10] sm:$0xf] %vm2279_vm4, %v2251_v18  ;;  %v1043_v14 = vsel %vm1000_vm3, %v1041_v52, %v1042_v8  ;;  %v1239_v48 = vmul.f32 %v4110_v0, %v4130_v15  ;;  %v1240_v62 = vmul.f32 %v4110_v0, %v4143_v43  ;;  %v1480_v39 = vmul.f32 %v4126_v3, %v4117_v41 }
  0xd9   : > { %2285 = vst.msk [vmem:[#allocation3 + $0x14] sm:$0xf] %vm2279_vm4, %v2252_v9  ;;  %v1045_v42 = vsel %vm1000_vm3, %v1042_v8, %v1044_v1  ;;  %v1129_v17 = vadd.f32 %v1043_v14, %v886_v6  ;;  %v1350_v19 = vrot.slane %v1238_v56, 1  ;;  %v1481_v20 = vmul.f32 %v4126_v3, %v4130_v15 }
  0xda   : > { %v1130_v26 = vadd.f32 %v1045_v42, %v887_v2  ;;  %v1351_v23 = vrot.slane %v1239_v48, 1  ;;  %v1353_v59 = vrot.slane %v1240_v62, 1  ;;  %v1482_v33 = vmul.f32 %v4126_v3, %v4143_v43  ;;  %v415_v48 = vld [vmem:[%s3544_s14 + $0xe8] sm:$0xff] }
  0xdb   : > { %v1196_v35 = vadd.f32 %v1164_v13, %v1129_v17  ;;  %v1592_v37 = vrot.slane %v1480_v39, 2  ;;  %v1593_v38 = vrot.slane %v1481_v20, 2  ;;  %v1715_v31 = vmul.f32 %v4139_v22, %v4357_v11  ;;  %v414_v13 = vld [vmem:[%s3544_s14 + $0xe0] sm:$0xff] }
  0xdc   : > { %v1197_v51 = vadd.f32 %v1165_v44, %v1130_v26  ;;  %v1352_v53 = vsel %vm757_vm2, %v1350_v19, %v1351_v23  ;;  %v1354_v55 = vsel %vm757_vm2, %v1351_v23, %v1353_v59  ;;  %v1595_v49 = vrot.slane %v1482_v33, 2 }
  0xdd   : > { %v1438_v54 = vadd.f32 %v1352_v53, %v1196_v35  ;;  %v1594_v47 = vsel %vm1000_vm3, %v1592_v37, %v1593_v38  ;;  %v1716_v57 = vmul.f32 %v4139_v22, %v4370_v4  ;;  %v1789_v61 = vmul.f32 %v4152_v36, %v4357_v11 }
  0xde   : > { %v1439_v52 = vadd.f32 %v1354_v55, %v1197_v51  ;;  %v1596_v32 = vsel %vm1000_vm3, %v1593_v38, %v1595_v49  ;;  %v1790_v63 = vmul.f32 %v4152_v36, %v4370_v4  ;;  %v1791_v12 = vmul.f32 %v4152_v36, %v4374_v40 }
  0xdf   : > { %v1680_v18 = vadd.f32 %v1594_v47, %v1438_v54  ;;  %v1901_v6 = vrot.slane %v1789_v61, 1  ;;  %v2031_v2 = vmul.f32 %v4166_v58, %v4357_v11  ;;  %v2032_v8 = vmul.f32 %v4166_v58, %v4370_v4 }
  0xe0   : > { %v3338_v9 = vld [vmem:[#allocation3 + $0x10] sm:$0xff]  ;;  %v1681_v1 = vadd.f32 %v1596_v32, %v1439_v52  ;;  %v1902_v44 = vrot.slane %v1790_v63, 1  ;;  %v1904_v56 = vrot.slane %v1791_v12, 1  ;;  %v2033_v14 = vmul.f32 %v4166_v58, %v4374_v40 }
  0xe1   : > { %v1747_v62 = vadd.f32 %v1715_v31, %v1680_v18  ;;  %v2143_v39 = vrot.slane %v2031_v2, 2  ;;  %v2144_v42 = vrot.slane %v2032_v8, 2  ;;  %v446_v17 = vmax.f32 %v414_v13, 0.0  ;;  %3293 = vmatmul.msk.bf16.gmra.mxu0 %vm450_vm0, %v3338_v9 }
  0xe2   : > { %v1748_v19 = vadd.f32 %v1716_v57, %v1681_v1  ;;  %v1903_v20 = vsel %vm757_vm2, %v1901_v6, %v1902_v44  ;;  %v1905_v26 = vsel %vm757_vm2, %v1902_v44, %v1904_v56  ;;  %v2146_v23 = vrot.slane %v2033_v14, 2 }
  0xe3   : > { %v1989_v59 = vadd.f32 %v1903_v20, %v1747_v62  ;;  %v2145_v33 = vsel %vm1000_vm3, %v2143_v39, %v2144_v42  ;;  %v447_v35 = vmax.f32 %v415_v48, 0.0  ;;  %535 = vst.msk [vmem:[#allocation2 + $0x169] sm:$0xff] %vm450_vm0, %v446_v17  ;;  %v621_v37 = vmul.f32 %v4066_v24, %v3940_v21 }
  0xe4   : > { %v1990_v38 = vadd.f32 %v1905_v26, %v1748_v19  ;;  %v2147_v31 = vsel %vm1000_vm3, %v2144_v42, %v2146_v23  ;;  %v622_v51 = vmul.f32 %v4066_v24, %v3951_v30  ;;  %v700_v53 = vmul.f32 %v4075_v28, %v3940_v21 }
  0xe5   : > { %v2231_v55 = vadd.f32 %v2145_v33, %v1989_v59  ;;  %536 = vst.msk [vmem:[#allocation2 + $0x171] sm:$0xff] %vm450_vm0, %v447_v35  ;;  %v701_v49 = vmul.f32 %v4075_v28, %v3951_v30  ;;  %v702_v54 = vmul.f32 %v4075_v28, %v3959_v50  ;;  %v943_v47 = vmul.f32 %v4087_v46, %v3940_v21 }
  0xe6   : > { %v2232_v57 = vadd.f32 %v2147_v31, %v1990_v38  ;;  %v823_v61 = vrot.slane %v700_v53, 1  ;;  %v944_v52 = vmul.f32 %v4087_v46, %v3951_v30  ;;  %v945_v32 = vmul.f32 %v4087_v46, %v3959_v50 }
  0xe7   : > { %v2263_v63 = vpack.c.bf16 %v2231_v55, %v2231_v55  ;;  %v824_v12 = vrot.slane %v701_v49, 1  ;;  %v826_v13 = vrot.slane %v702_v54, 1  ;;  %v1066_v18 = vrot.slane %v943_v47, 2 }
  0xe8   : > { %v2264_v6 = vpack.c.bf16 %v2232_v57, %v2232_v57  ;;  %v1067_v2 = vrot.slane %v944_v52, 2  ;;  %v1069_v8 = vrot.slane %v945_v32, 2  ;;  %v1174_v9 = vmul.f32 %v4098_v60, %v4214_v7 }
  0xe9   : > { %2296 = vst.msk [vmem:[#allocation3 + $0x40] sm:$0xf] %vm2279_vm4, %v2263_v63  ;;  %v825_v21 = vsel %vm757_vm2, %v823_v61, %v824_v12  ;;  %v827_v1 = vsel %vm757_vm2, %v824_v12, %v826_v13  ;;  %v1175_v30 = vmul.f32 %v4098_v60, %v4220_v10  ;;  %v1253_v50 = vmul.f32 %v4110_v0, %v4214_v7 }
  0xea   : > { %2297 = vst.msk [vmem:[#allocation3 + $0x44] sm:$0xf] %vm2279_vm4, %v2264_v6  ;;  %v4431_v44 = vld [vmem:[#allocation2 + $0x168] sm:$0xff]  ;;  %v896_v56 = vadd.f32 %v825_v21, %v621_v37  ;;  %v897_v14 = vadd.f32 %v827_v1, %v622_v51  ;;  %v1068_v48 = vsel %vm1000_vm3, %v1066_v18, %v1067_v2  ;;  %v1070_v62 = vsel %vm1000_vm3, %v1067_v2, %v1069_v8 }
  0xeb   : > { %v1254_v39 = vmul.f32 %v4110_v0, %v4220_v10  ;;  %v1255_v42 = vmul.f32 %v4110_v0, %v4224_v16  ;;  %v1375_v17 = vrot.slane %v1253_v50, 1  ;;  %v1495_v19 = vmul.f32 %v4126_v3, %v4214_v7  ;;  %v3217_v18 = vld [vmem:[%s4235_s17 + $0x40] ss:$2 sm:$0xff] }
  0xec   : > { %v4441_v20 = vld [vmem:[#allocation2 + $0x170] sm:$0xff]  ;;  %v1139_v26 = vadd.f32 %v1068_v48, %v896_v56  ;;  %v1140_v23 = vadd.f32 %v1070_v62, %v897_v14  ;;  %v1496_v59 = vmul.f32 %v4126_v3, %v4220_v10  ;;  %v1497_v33 = vmul.f32 %v4126_v3, %v4224_v16  ;;  %v4449_v51 = vld [vmem:[#allocation2 + $0x178] sm:$0x3]  ;;  %v3218_v14 = vld [vmem:[%s4235_s17 + $0x60] ss:$2 sm:$0xff] }
  0xed   : > { %v1376_v35 = vrot.slane %v1254_v39, 1  ;;  %v1378_v37 = vrot.slane %v1255_v42, 1  ;;  %v1617_v38 = vrot.slane %v1495_v19, 2  ;;  %v1725_v31 = vmul.f32 %v4139_v22, %v4431_v44 }
  0xee   : > { %v1206_v53 = vadd.f32 %v1174_v9, %v1139_v26  ;;  %v1207_v55 = vadd.f32 %v1175_v30, %v1140_v23  ;;  %v1618_v49 = vrot.slane %v1496_v59, 2  ;;  %v1620_v54 = vrot.slane %v1497_v33, 2 }
  0xef   : > { %v1377_v47 = vsel %vm757_vm2, %v1375_v17, %v1376_v35  ;;  %v1379_v57 = vsel %vm757_vm2, %v1376_v35, %v1378_v37  ;;  %v1726_v61 = vmul.f32 %v4139_v22, %v4441_v20  ;;  %v1804_v52 = vmul.f32 %v4152_v36, %v4431_v44 }
  0xf0   : > { %v1448_v32 = vadd.f32 %v1377_v47, %v1206_v53  ;;  %v1449_v63 = vadd.f32 %v1379_v57, %v1207_v55  ;;  %v1619_v12 = vsel %vm1000_vm3, %v1617_v38, %v1618_v49  ;;  %v1621_v13 = vsel %vm1000_vm3, %v1618_v49, %v1620_v54 }
  0xf1   : > { %v3344_v6 = vld [vmem:[#allocation3 + $0x40] sm:$0xff]  ;;  %v1805_v2 = vmul.f32 %v4152_v36, %v4441_v20  ;;  %v1806_v8 = vmul.f32 %v4152_v36, %v4449_v51  ;;  %v1926_v9 = vrot.slane %v1804_v52, 1  ;;  %v2046_v21 = vmul.f32 %v4166_v58, %v4431_v44 }
  0xf2   : > { %v1690_v1 = vadd.f32 %v1619_v12, %v1448_v32  ;;  %v1691_v30 = vadd.f32 %v1621_v13, %v1449_v63  ;;  %v2047_v50 = vmul.f32 %v4166_v58, %v4441_v20  ;;  %v2048_v56 = vmul.f32 %v4166_v58, %v4449_v51  ;;  %3299 = vmatmul.msk.bf16.gmra.mxu2 %vm450_vm0, %v3344_v6 }
  0xf3   : > { %v1927_v48 = vrot.slane %v1805_v2, 1  ;;  %v1929_v62 = vrot.slane %v1806_v8, 1  ;;  %v2168_v39 = vrot.slane %v2046_v21, 2  ;;  %v2329_v42 = vmax.f32 %v3217_v18, 0.0 }
  0xf4   : > { %v1757_v17 = vadd.f32 %v1725_v31, %v1690_v1  ;;  %v1758_v19 = vadd.f32 %v1726_v61, %v1691_v30  ;;  %v2169_v26 = vrot.slane %v2047_v50, 2  ;;  %v2171_v23 = vrot.slane %v2048_v56, 2 }
  0xf5   : > { %v1928_v59 = vsel %vm757_vm2, %v1926_v9, %v1927_v48  ;;  %v1930_v33 = vsel %vm757_vm2, %v1927_v48, %v1929_v62  ;;  %v2330_v35 = vmax.f32 %v3218_v14, 0.0  ;;  %v2337_v37 = vpack.c.bf16 %v2329_v42, %v2329_v42 }
  0xf6   : > { %v1999_v38 = vadd.f32 %v1928_v59, %v1757_v17  ;;  %v2000_v53 = vadd.f32 %v1930_v33, %v1758_v19  ;;  %v2170_v55 = vsel %vm1000_vm3, %v2168_v39, %v2169_v26  ;;  %v2172_v49 = vsel %vm1000_vm3, %v2169_v26, %v2171_v23 }
  0xf7   : > { %v2338_v54 = vpack.c.bf16 %v2330_v35, %v2330_v35  ;;  %2345 = vst.msk [vmem:[#allocation4 + $0x8] sm:$0xf] %vm2279_vm4, %v2337_v37  ;;  %v601_v31 = vmul.f32 %v4066_v24, %v4023_v27  ;;  %v602_v47 = vmul.f32 %v4066_v24, %v4029_v25  ;;  %v670_v57 = vmul.f32 %v4075_v28, %v4023_v27 }
  0xf8   : > { %v2241_v61 = vadd.f32 %v2170_v55, %v1999_v38  ;;  %v2242_v52 = vadd.f32 %v2172_v49, %v2000_v53  ;;  %v671_v32 = vmul.f32 %v4075_v28, %v4029_v25  ;;  %v672_v63 = vmul.f32 %v4075_v28, %v4033_v45  ;;  %v4516_v53 = vld [vmem:[#allocation2 + $0x78] sm:$0xff] }
  0xf9   : > { %2346 = vst.msk [vmem:[#allocation4 + $0xc] sm:$0xf] %vm2279_vm4, %v2338_v54  ;;  %v773_v12 = vrot.slane %v670_v57, 1  ;;  %v913_v13 = vmul.f32 %v4087_v46, %v4023_v27  ;;  %v914_v18 = vmul.f32 %v4087_v46, %v4029_v25  ;;  %v915_v6 = vmul.f32 %v4087_v46, %v4033_v45 }
  0xfa   : > { %v2273_v2 = vpack.c.bf16 %v2241_v61, %v2241_v61  ;;  %v2274_v8 = vpack.c.bf16 %v2242_v52, %v2242_v52  ;;  %v774_v9 = vrot.slane %v671_v32, 1  ;;  %v776_v21 = vrot.slane %v672_v63, 1 }
  0xfb   : > { %v1016_v1 = vrot.slane %v913_v13, 2  ;;  %v1017_v30 = vrot.slane %v914_v18, 2  ;;  %v1019_v50 = vrot.slane %v915_v6, 2  ;;  %v1154_v28 = vmul.f32 %v4098_v60, %v4297_v29 }
  0xfc   : > { %2306 = vst.msk [vmem:[#allocation3 + $0x68] sm:$0xf] %vm2279_vm4, %v2273_v2  ;;  %v775_v27 = vsel %vm757_vm2, %v773_v12, %v774_v9  ;;  %v777_v56 = vsel %vm757_vm2, %v774_v9, %v776_v21  ;;  %v1155_v25 = vmul.f32 %v4098_v60, %v4311_v34  ;;  %v1223_v45 = vmul.f32 %v4110_v0, %v4297_v29  ;;  %v4533_v2 = vld [vmem:[#allocation2 + $0x88] sm:$0x3] }
  0xfd   : > { %2307 = vst.msk [vmem:[#allocation3 + $0x6c] sm:$0xf] %vm2279_vm4, %v2274_v8  ;;  %v876_v46 = vadd.f32 %v775_v27, %v601_v31  ;;  %v877_v14 = vadd.f32 %v777_v56, %v602_v47  ;;  %v1018_v48 = vsel %vm1000_vm3, %v1016_v1, %v1017_v30  ;;  %v1020_v62 = vsel %vm1000_vm3, %v1017_v30, %v1019_v50 }
  0xfe   : > { %v1224_v39 = vmul.f32 %v4110_v0, %v4311_v34  ;;  %v1225_v42 = vmul.f32 %v4110_v0, %v4313_v5  ;;  %v1325_v17 = vrot.slane %v1223_v45, 1  ;;  %v1465_v60 = vmul.f32 %v4126_v3, %v4297_v29 }
  0xff   : > { %v1119_v19 = vadd.f32 %v1018_v48, %v876_v46  ;;  %v1120_v26 = vadd.f32 %v1020_v62, %v877_v14  ;;  %v1466_v23 = vmul.f32 %v4126_v3, %v4311_v34  ;;  %v1467_v59 = vmul.f32 %v4126_v3, %v4313_v5  ;;  %v4523_v3 = vld [vmem:[#allocation2 + $0x80] sm:$0xff] }
 0x100   : > { %v3354_v33 = vld [vmem:[#allocation4 + $0x8] sm:$0xff]  ;;  %v1326_v35 = vrot.slane %v1224_v39, 1  ;;  %v1328_v37 = vrot.slane %v1225_v42, 1  ;;  %v1567_v38 = vrot.slane %v1465_v60, 2  ;;  %v1705_v0 = vmul.f32 %v4516_v53, %v4139_v22 }
 0x101   : > { %v1186_v55 = vadd.f32 %v1154_v28, %v1119_v19  ;;  %v1187_v49 = vadd.f32 %v1155_v25, %v1120_v26  ;;  %v1568_v54 = vrot.slane %v1466_v23, 2  ;;  %v1570_v31 = vrot.slane %v1467_v59, 2  ;;  %3328 = vmatmul.msk.bf16.gmra.mxu1 %vm450_vm0, %v3354_v33 }
 0x102   : > { %v1327_v47 = vsel %vm757_vm2, %v1325_v17, %v1326_v35  ;;  %v1329_v57 = vsel %vm757_vm2, %v1326_v35, %v1328_v37  ;;  %v1706_v61 = vmul.f32 %v4523_v3, %v4139_v22  ;;  %v1774_v52 = vmul.f32 %v4516_v53, %v4152_v36  ;;  %v4571_v35 = vld [vmem:[%s5139_s2 + $0x2] ss:$0 sm:$0xff] }
 0x103   : > { %v1428_v32 = vadd.f32 %v1327_v47, %v1186_v55  ;;  %v1429_v63 = vadd.f32 %v1329_v57, %v1187_v49  ;;  %v1569_v12 = vsel %vm1000_vm3, %v1567_v38, %v1568_v54  ;;  %v1571_v13 = vsel %vm1000_vm3, %v1568_v54, %v1570_v31  ;;  %v4582_v57 = vld [vmem:[%s5139_s2 + $0x4] ss:$0 sm:$0xff] }
 0x104   : > { %v3349_v18 = vld [vmem:[#allocation3 + $0x68] sm:$0xff]  ;;  %v1775_v6 = vmul.f32 %v4523_v3, %v4152_v36  ;;  %v1776_v8 = vmul.f32 %v4533_v2, %v4152_v36  ;;  %v1876_v9 = vrot.slane %v1774_v52, 1  ;;  %v2016_v22 = vmul.f32 %v4516_v53, %v4166_v58 }
 0x105   : > { %v1670_v21 = vadd.f32 %v1569_v12, %v1428_v32  ;;  %v1671_v1 = vadd.f32 %v1571_v13, %v1429_v63  ;;  %v2017_v30 = vmul.f32 %v4523_v3, %v4166_v58  ;;  %v2018_v50 = vmul.f32 %v4533_v2, %v4166_v58  ;;  %3304 = vmatmul.msk.bf16.gmra.mxu3 %vm450_vm0, %v3349_v18  ;;  %v4551_v58 = vld [vmem:[%s5139_s2] ss:$0 sm:$0xff]  ;;  %v4593_v13 = vld [vmem:[%s5139_s2 + $0x5] ss:$0 sm:$0xff] }
 0x106   : > { %v1877_v28 = vrot.slane %v1775_v6, 1  ;;  %v1879_v27 = vrot.slane %v1776_v8, 1  ;;  %v2118_v56 = vrot.slane %v2016_v22, 2  ;;  %v613_v36 = vmul.f32 %v4066_v24, %v4117_v41  ;;  %v4558_v24 = vld [vmem:[%s5139_s2 + $0x1] ss:$0 sm:$0xff] }
 0x107   : > { %v1737_v25 = vadd.f32 %v1705_v0, %v1670_v21  ;;  %v1738_v45 = vadd.f32 %v1706_v61, %v1671_v1  ;;  %v2119_v46 = vrot.slane %v2017_v30, 2  ;;  %v2121_v14 = vrot.slane %v2018_v50, 2  ;;  %v4608_v50 = vld [vmem:[%s5139_s2 + $0x6] ss:$0 sm:$0xff] }
 0x108   : > { %v1878_v48 = vsel %vm757_vm2, %v1876_v9, %v1877_v28  ;;  %v1880_v62 = vsel %vm757_vm2, %v1877_v28, %v1879_v27  ;;  %v614_v39 = vmul.f32 %v4551_v58, %v4130_v15  ;;  %v688_v42 = vmul.f32 %v4558_v24, %v4117_v41 }
 0x109   : > { %v1979_v17 = vadd.f32 %v1878_v48, %v1737_v25  ;;  %v1980_v60 = vadd.f32 %v1880_v62, %v1738_v45  ;;  %v2120_v19 = vsel %vm1000_vm3, %v2118_v56, %v2119_v46  ;;  %v2122_v26 = vsel %vm1000_vm3, %v2119_v46, %v2121_v14  ;;  %v4619_v48 = vld [vmem:[%s5139_s2 + $0x8] ss:$0 sm:$0xff] }
 0x10a   : > { %v689_v23 = vmul.f32 %v4558_v24, %v4130_v15  ;;  %v690_v59 = vmul.f32 %v4558_v24, %v4143_v43  ;;  %v803_v33 = vrot.slane %v688_v42, 1  ;;  %v931_v37 = vmul.f32 %v4571_v35, %v4117_v41  ;;  %v4621_v62 = vld [vmem:[#allocation2 + $0x108] sm:$0xff] }
 0x10b   : > { %v2221_v38 = vadd.f32 %v2120_v19, %v1979_v17  ;;  %v2222_v0 = vadd.f32 %v2122_v26, %v1980_v60  ;;  %v932_v55 = vmul.f32 %v4571_v35, %v4130_v15  ;;  %v933_v49 = vmul.f32 %v4571_v35, %v4143_v43 }
 0x10c   : > { %v804_v54 = vrot.slane %v689_v23, 1  ;;  %v806_v31 = vrot.slane %v690_v59, 1  ;;  %v1046_v47 = vrot.slane %v931_v37, 2  ;;  %v1166_v61 = vmul.f32 %v4582_v57, %v4357_v11  ;;  %v4627_v59 = vld [vmem:[#allocation2 + $0x110] sm:$0xff]  ;;  %v4634_v37 = vld [vmem:[%s5139_s2 + $0x9] ss:$0 sm:$0xff] }
 0x10d   : > { %v2253_v41 = vpack.c.bf16 %v2221_v38, %v2221_v38  ;;  %v2254_v52 = vpack.c.bf16 %v2222_v0, %v2222_v0  ;;  %v1047_v32 = vrot.slane %v932_v55, 2  ;;  %v1049_v63 = vrot.slane %v933_v49, 2 }
 0x10e   : > { %v805_v15 = vsel %vm757_vm2, %v803_v33, %v804_v54  ;;  %v807_v12 = vsel %vm757_vm2, %v804_v54, %v806_v31  ;;  %v1167_v43 = vmul.f32 %v4582_v57, %v4370_v4  ;;  %v1241_v18 = vmul.f32 %v4593_v13, %v4357_v11  ;;  %v416_v31 = vld [vmem:[%s3544_s14 + $0xf0] sm:$0xff] }
 0x10f   : > { %2286 = vst.msk [vmem:[#allocation3 + $0x18] sm:$0xf] %vm2279_vm4, %v2253_v41  ;;  %v888_v6 = vadd.f32 %v805_v15, %v613_v36  ;;  %v889_v8 = vadd.f32 %v807_v12, %v614_v39  ;;  %v1048_v9 = vsel %vm1000_vm3, %v1046_v47, %v1047_v32  ;;  %v1050_v22 = vsel %vm1000_vm3, %v1047_v32, %v1049_v63  ;;  %v4650_v32 = vld [vmem:[%s5139_s2 + $0xa] ss:$0 sm:$0xff] }
 0x110   : > { %2287 = vst.msk [vmem:[#allocation3 + $0x1c] sm:$0xf] %vm2279_vm4, %v2254_v52  ;;  %v1242_v21 = vmul.f32 %v4593_v13, %v4370_v4  ;;  %v1243_v1 = vmul.f32 %v4593_v13, %v4374_v40  ;;  %v1355_v30 = vrot.slane %v1241_v18, 1  ;;  %v1483_v28 = vmul.f32 %v4608_v50, %v4357_v11 }
 0x111   : > { %v1131_v27 = vadd.f32 %v1048_v9, %v888_v6  ;;  %v1132_v56 = vadd.f32 %v1050_v22, %v889_v8  ;;  %v1484_v36 = vmul.f32 %v4608_v50, %v4370_v4  ;;  %v1485_v25 = vmul.f32 %v4608_v50, %v4374_v40  ;;  %v417_v8 = vld [vmem:[%s3544_s14 + $0xf8] sm:$0xff] }
 0x112   : > { %v1356_v45 = vrot.slane %v1242_v21, 1  ;;  %v1358_v46 = vrot.slane %v1243_v1, 1  ;;  %v1597_v14 = vrot.slane %v1483_v28, 2  ;;  %v1717_v39 = vmul.f32 %v4621_v62, %v4619_v48 }
 0x113   : > { %v1198_v42 = vadd.f32 %v1166_v61, %v1131_v27  ;;  %v1199_v17 = vadd.f32 %v1167_v43, %v1132_v56  ;;  %v1598_v60 = vrot.slane %v1484_v36, 2  ;;  %v1600_v19 = vrot.slane %v1485_v25, 2  ;;  %v4643_v61 = vld [vmem:[#allocation2 + $0x118] sm:$0x3] }
 0x114   : > { %v1357_v26 = vsel %vm757_vm2, %v1355_v30, %v1356_v45  ;;  %v1359_v23 = vsel %vm757_vm2, %v1356_v45, %v1358_v46  ;;  %v1718_v33 = vmul.f32 %v4627_v59, %v4619_v48  ;;  %v1792_v38 = vmul.f32 %v4634_v37, %v4621_v62 }
 0x115   : > { %v1440_v0 = vadd.f32 %v1357_v26, %v1198_v42  ;;  %v1441_v55 = vadd.f32 %v1359_v23, %v1199_v17  ;;  %v1599_v49 = vsel %vm1000_vm3, %v1597_v14, %v1598_v60  ;;  %v1601_v54 = vsel %vm1000_vm3, %v1598_v60, %v1600_v19 }
 0x116   : > { %v1793_v47 = vmul.f32 %v4634_v37, %v4627_v59  ;;  %v1794_v41 = vmul.f32 %v4643_v61, %v4634_v37  ;;  %v1906_v52 = vrot.slane %v1792_v38, 1  ;;  %v2034_v63 = vmul.f32 %v4650_v32, %v4621_v62 }
 0x117   : > { %v3339_v15 = vld [vmem:[#allocation3 + $0x18] sm:$0xff]  ;;  %v1682_v12 = vadd.f32 %v1599_v49, %v1440_v0  ;;  %v1683_v43 = vadd.f32 %v1601_v54, %v1441_v55  ;;  %v2035_v18 = vmul.f32 %v4650_v32, %v4627_v59  ;;  %v2036_v6 = vmul.f32 %v4650_v32, %v4643_v61 }
 0x118   : > { %v1907_v9 = vrot.slane %v1793_v47, 1  ;;  %v1909_v22 = vrot.slane %v1794_v41, 1  ;;  %v2148_v21 = vrot.slane %v2034_v63, 2  ;;  %v448_v1 = vmax.f32 %v416_v31, 0.0  ;;  %3294 = vmatmul.msk.bf16.gmra.mxu0 %vm450_vm0, %v3339_v15 }
 0x119   : > { %v1749_v30 = vadd.f32 %v1717_v39, %v1682_v12  ;;  %v1750_v28 = vadd.f32 %v1718_v33, %v1683_v43  ;;  %v2149_v27 = vrot.slane %v2035_v18, 2  ;;  %v2151_v56 = vrot.slane %v2036_v6, 2 }
 0x11a   : > { %v1908_v36 = vsel %vm757_vm2, %v1906_v52, %v1907_v9  ;;  %v1910_v25 = vsel %vm757_vm2, %v1907_v9, %v1909_v22  ;;  %v449_v45 = vmax.f32 %v417_v8, 0.0  ;;  %537 = vst.msk [vmem:[#allocation2 + $0x181] sm:$0xff] %vm450_vm0, %v448_v1  ;;  %v623_v46 = vmul.f32 %v4551_v58, %v4214_v7 }
 0x11b   : > { %v1991_v14 = vadd.f32 %v1908_v36, %v1749_v30  ;;  %v1992_v42 = vadd.f32 %v1910_v25, %v1750_v28  ;;  %v2150_v17 = vsel %vm1000_vm3, %v2148_v21, %v2149_v27  ;;  %v2152_v60 = vsel %vm1000_vm3, %v2149_v27, %v2151_v56 }
 0x11c   : > { %538 = vst.msk [vmem:[#allocation2 + $0x189] sm:$0xff] %vm450_vm0, %v449_v45  ;;  %v624_v39 = vmul.f32 %v4551_v58, %v4220_v10  ;;  %v703_v19 = vmul.f32 %v4558_v24, %v4214_v7  ;;  %v704_v26 = vmul.f32 %v4558_v24, %v4220_v10  ;;  %v705_v23 = vmul.f32 %v4558_v24, %v4224_v16 }
 0x11d   : > { %v2233_v33 = vadd.f32 %v2150_v17, %v1991_v14  ;;  %v2234_v38 = vadd.f32 %v2152_v60, %v1992_v42  ;;  %v946_v0 = vmul.f32 %v4571_v35, %v4214_v7  ;;  %v947_v55 = vmul.f32 %v4571_v35, %v4220_v10 }
 0x11e   : > { %v828_v49 = vrot.slane %v703_v19, 1  ;;  %v829_v54 = vrot.slane %v704_v26, 1  ;;  %v831_v31 = vrot.slane %v705_v23, 1  ;;  %v948_v47 = vmul.f32 %v4571_v35, %v4224_v16 }
 0x11f   : > { %v2265_v41 = vpack.c.bf16 %v2233_v33, %v2233_v33  ;;  %v2266_v52 = vpack.c.bf16 %v2234_v38, %v2234_v38  ;;  %v1071_v63 = vrot.slane %v946_v0, 2  ;;  %v1072_v15 = vrot.slane %v947_v55, 2 }
 0x120   : > { %v830_v12 = vsel %vm757_vm2, %v828_v49, %v829_v54  ;;  %v832_v43 = vsel %vm757_vm2, %v829_v54, %v831_v31  ;;  %v1074_v18 = vrot.slane %v948_v47, 2  ;;  %v1176_v7 = vmul.f32 %v4582_v57, %v4431_v44 }
 0x121   : > { %2298 = vst.msk [vmem:[#allocation3 + $0x48] sm:$0xf] %vm2279_vm4, %v2265_v41  ;;  %v898_v10 = vadd.f32 %v830_v12, %v623_v46  ;;  %v899_v6 = vadd.f32 %v832_v43, %v624_v39  ;;  %v1073_v8 = vsel %vm1000_vm3, %v1071_v63, %v1072_v15  ;;  %v1177_v16 = vmul.f32 %v4582_v57, %v4441_v20  ;;  %v4698_v30 = vld [vmem:[#allocation2 + $0x180] sm:$0xff] }
 0x122   : > { %2299 = vst.msk [vmem:[#allocation3 + $0x4c] sm:$0xf] %vm2279_vm4, %v2266_v52  ;;  %v1075_v9 = vsel %vm1000_vm3, %v1072_v15, %v1074_v18  ;;  %v1256_v22 = vmul.f32 %v4593_v13, %v4431_v44  ;;  %v1257_v21 = vmul.f32 %v4593_v13, %v4441_v20  ;;  %v1258_v1 = vmul.f32 %v4593_v13, %v4449_v51 }
 0x123   : > { %v1141_v28 = vadd.f32 %v1073_v8, %v898_v10  ;;  %v1142_v27 = vadd.f32 %v1075_v9, %v899_v6  ;;  %v1498_v56 = vmul.f32 %v4608_v50, %v4431_v44  ;;  %v1499_v36 = vmul.f32 %v4608_v50, %v4441_v20  ;;  %v4704_v25 = vld [vmem:[#allocation2 + $0x188] sm:$0xff]  ;;  %v4708_v17 = vld [vmem:[#allocation2 + $0x190] sm:$0x3] }
 0x124   : > { %v1380_v45 = vrot.slane %v1256_v22, 1  ;;  %v1381_v46 = vrot.slane %v1257_v21, 1  ;;  %v1383_v14 = vrot.slane %v1258_v1, 1  ;;  %v1500_v42 = vmul.f32 %v4608_v50, %v4449_v51  ;;  %v3219_v10 = vld [vmem:[%s4235_s17 + $0x80] ss:$2 sm:$0xff] }
 0x125   : > { %v1208_v60 = vadd.f32 %v1176_v7, %v1141_v28  ;;  %v1209_v39 = vadd.f32 %v1177_v16, %v1142_v27  ;;  %v1622_v19 = vrot.slane %v1498_v56, 2  ;;  %v1623_v26 = vrot.slane %v1499_v36, 2  ;;  %v3220_v22 = vld [vmem:[%s4235_s17 + $0xa0] ss:$2 sm:$0xff] }
 0x126   : > { %v1382_v23 = vsel %vm757_vm2, %v1380_v45, %v1381_v46  ;;  %v1384_v33 = vsel %vm757_vm2, %v1381_v46, %v1383_v14  ;;  %v1625_v38 = vrot.slane %v1500_v42, 2  ;;  %v1727_v0 = vmul.f32 %v4619_v48, %v4698_v30 }
 0x127   : > { %v1450_v55 = vadd.f32 %v1382_v23, %v1208_v60  ;;  %v1451_v49 = vadd.f32 %v1384_v33, %v1209_v39  ;;  %v1624_v54 = vsel %vm1000_vm3, %v1622_v19, %v1623_v26  ;;  %v1728_v31 = vmul.f32 %v4619_v48, %v4704_v25 }
 0x128   : > { %v1626_v47 = vsel %vm1000_vm3, %v1623_v26, %v1625_v38  ;;  %v1807_v41 = vmul.f32 %v4634_v37, %v4698_v30  ;;  %v1808_v52 = vmul.f32 %v4634_v37, %v4704_v25  ;;  %v1809_v63 = vmul.f32 %v4634_v37, %v4708_v17 }
 0x129   : > { %v3345_v15 = vld [vmem:[#allocation3 + $0x48] sm:$0xff]  ;;  %v1692_v12 = vadd.f32 %v1624_v54, %v1450_v55  ;;  %v1693_v43 = vadd.f32 %v1626_v47, %v1451_v49  ;;  %v2049_v18 = vmul.f32 %v4650_v32, %v4698_v30  ;;  %v2050_v7 = vmul.f32 %v4650_v32, %v4704_v25 }
 0x12a   : > { %v1931_v6 = vrot.slane %v1807_v41, 1  ;;  %v1932_v8 = vrot.slane %v1808_v52, 1  ;;  %v1934_v16 = vrot.slane %v1809_v63, 1  ;;  %v2051_v9 = vmul.f32 %v4650_v32, %v4708_v17  ;;  %3300 = vmatmul.msk.bf16.gmra.mxu2 %vm450_vm0, %v3345_v15 }
 0x12b   : > { %v1759_v21 = vadd.f32 %v1727_v0, %v1692_v12  ;;  %v1760_v1 = vadd.f32 %v1728_v31, %v1693_v43  ;;  %v2173_v28 = vrot.slane %v2049_v18, 2  ;;  %v2174_v27 = vrot.slane %v2050_v7, 2 }
 0x12c   : > { %v1933_v56 = vsel %vm757_vm2, %v1931_v6, %v1932_v8  ;;  %v1935_v36 = vsel %vm757_vm2, %v1932_v8, %v1934_v16  ;;  %v2176_v45 = vrot.slane %v2051_v9, 2  ;;  %v2331_v46 = vmax.f32 %v3219_v10, 0.0 }
 0x12d   : > { %v2001_v14 = vadd.f32 %v1933_v56, %v1759_v21  ;;  %v2002_v42 = vadd.f32 %v1935_v36, %v1760_v1  ;;  %v2175_v60 = vsel %vm1000_vm3, %v2173_v28, %v2174_v27  ;;  %v2332_v39 = vmax.f32 %v3220_v22, 0.0 }
 0x12e   : > { %v2177_v19 = vsel %vm1000_vm3, %v2174_v27, %v2176_v45  ;;  %v2339_v26 = vpack.c.bf16 %v2331_v46, %v2331_v46  ;;  %v603_v23 = vmul.f32 %v4551_v58, %v4297_v29  ;;  %v604_v33 = vmul.f32 %v4551_v58, %v4311_v34 }
 0x12f   : > { %v2243_v38 = vadd.f32 %v2175_v60, %v2001_v14  ;;  %v2244_v0 = vadd.f32 %v2177_v19, %v2002_v42  ;;  %v2340_v55 = vpack.c.bf16 %v2332_v39, %v2332_v39  ;;  %v673_v49 = vmul.f32 %v4558_v24, %v4297_v29 }
 0x130   : > { %2347 = vst.msk [vmem:[#allocation4 + $0x10] sm:$0xf] %vm2279_vm4, %v2339_v26  ;;  %v674_v54 = vmul.f32 %v4558_v24, %v4311_v34  ;;  %v675_v31 = vmul.f32 %v4558_v24, %v4313_v5  ;;  %v916_v47 = vmul.f32 %v4571_v35, %v4297_v29  ;;  %v917_v41 = vmul.f32 %v4571_v35, %v4311_v34 }
 0x131   : > { %v2275_v52 = vpack.c.bf16 %v2243_v38, %v2243_v38  ;;  %v2276_v63 = vpack.c.bf16 %v2244_v0, %v2244_v0  ;;  %2348 = vst.msk [vmem:[#allocation4 + $0x14] sm:$0xf] %vm2279_vm4, %v2340_v55  ;;  %v778_v15 = vrot.slane %v673_v49, 1  ;;  %v918_v12 = vmul.f32 %v4571_v35, %v4313_v5  ;;  %v3425_v38 = vld [vmem:[#allocation2 + $0x90] sm:$0xff] }
 0x132   : > { %v779_v43 = vrot.slane %v674_v54, 1  ;;  %v781_v18 = vrot.slane %v675_v31, 1  ;;  %v1021_v7 = vrot.slane %v916_v47, 2  ;;  %v1022_v10 = vrot.slane %v917_v41, 2  ;;  %v3426_v31 = vld [vmem:[#allocation2 + $0x98] sm:$0xff] }
 0x133   : > { %2308 = vst.msk [vmem:[#allocation3 + $0x70] sm:$0xf] %vm2279_vm4, %v2275_v52  ;;  %v1024_v6 = vrot.slane %v918_v12, 2  ;;  %v1156_v29 = vmul.f32 %v4582_v57, %v4516_v53  ;;  %v1157_v34 = vmul.f32 %v4582_v57, %v4523_v3  ;;  %v1226_v8 = vmul.f32 %v4593_v13, %v4516_v53 }
 0x134   : > { %2309 = vst.msk [vmem:[#allocation3 + $0x74] sm:$0xf] %vm2279_vm4, %v2276_v63  ;;  %v780_v5 = vsel %vm757_vm2, %v778_v15, %v779_v43  ;;  %v782_v16 = vsel %vm757_vm2, %v779_v43, %v781_v18  ;;  %v1023_v9 = vsel %vm1000_vm3, %v1021_v7, %v1022_v10  ;;  %v1227_v22 = vmul.f32 %v4593_v13, %v4523_v3  ;;  %v3427_v43 = vld [vmem:[#allocation2 + $0xa0] sm:$0x3] }
 0x135   : > { %v878_v21 = vadd.f32 %v780_v5, %v603_v23  ;;  %v879_v1 = vadd.f32 %v782_v16, %v604_v33  ;;  %v1025_v28 = vsel %vm1000_vm3, %v1022_v10, %v1024_v6  ;;  %v1228_v27 = vmul.f32 %v4593_v13, %v4533_v2 }
 0x136   : > { %v1330_v56 = vrot.slane %v1226_v8, 1  ;;  %v1331_v36 = vrot.slane %v1227_v22, 1  ;;  %v1468_v45 = vmul.f32 %v4608_v50, %v4516_v53  ;;  %v1469_v46 = vmul.f32 %v4608_v50, %v4523_v3 }
 0x137   : > { %v1121_v14 = vadd.f32 %v1023_v9, %v878_v21  ;;  %v1122_v42 = vadd.f32 %v1025_v28, %v879_v1  ;;  %v1333_v60 = vrot.slane %v1228_v27, 1  ;;  %v1470_v39 = vmul.f32 %v4608_v50, %v4533_v2 }
 0x138   : > { %v3355_v19 = vld [vmem:[#allocation4 + $0x10] sm:$0xff]  ;;  %v1332_v26 = vsel %vm757_vm2, %v1330_v56, %v1331_v36  ;;  %v1572_v23 = vrot.slane %v1468_v45, 2  ;;  %v1573_v33 = vrot.slane %v1469_v46, 2  ;;  %v1707_v0 = vmul.f32 %v3425_v38, %v4619_v48 }
 0x139   : > { %v1188_v55 = vadd.f32 %v1156_v29, %v1121_v14  ;;  %v1189_v49 = vadd.f32 %v1157_v34, %v1122_v42  ;;  %v1334_v53 = vsel %vm757_vm2, %v1331_v36, %v1333_v60  ;;  %v1575_v54 = vrot.slane %v1470_v39, 2  ;;  %3329 = vmatmul.msk.bf16.gmra.mxu1 %vm450_vm0, %v3355_v19 }
 0x13a   : > { %v1574_v3 = vsel %vm1000_vm3, %v1572_v23, %v1573_v33  ;;  %v1708_v2 = vmul.f32 %v3426_v31, %v4619_v48  ;;  %v1777_v47 = vmul.f32 %v3425_v38, %v4634_v37  ;;  %v1778_v41 = vmul.f32 %v3426_v31, %v4634_v37 }
 0x13b   : > { %v3350_v52 = vld [vmem:[#allocation3 + $0x70] sm:$0xff]  ;;  %v1430_v63 = vadd.f32 %v1332_v26, %v1188_v55  ;;  %v1431_v15 = vadd.f32 %v1334_v53, %v1189_v49  ;;  %v1576_v12 = vsel %vm1000_vm3, %v1573_v33, %v1575_v54  ;;  %v1779_v18 = vmul.f32 %v3427_v43, %v4634_v37 }
 0x13c   : > { %v1881_v7 = vrot.slane %v1777_v47, 1  ;;  %v1882_v10 = vrot.slane %v1778_v41, 1  ;;  %v2019_v6 = vmul.f32 %v3425_v38, %v4650_v32  ;;  %v2020_v29 = vmul.f32 %v3426_v31, %v4650_v32  ;;  %3305 = vmatmul.msk.bf16.gmra.mxu3 %vm450_vm0, %v3350_v52 }
 0x13d   : > { %v1672_v34 = vadd.f32 %v1574_v3, %v1430_v63  ;;  %v1673_v8 = vadd.f32 %v1576_v12, %v1431_v15  ;;  %v1884_v5 = vrot.slane %v1779_v18, 1  ;;  %v2021_v16 = vmul.f32 %v3427_v43, %v4650_v32 }
 0x13e   : > { %v1883_v9 = vsel %vm757_vm2, %v1881_v7, %v1882_v10  ;;  %v2123_v22 = vrot.slane %v2019_v6, 2  ;;  %v2124_v21 = vrot.slane %v2020_v29, 2  ;;  %v615_v1 = vmul.f32 %v4551_v58, %v4357_v11 }
 0x13f   : > { %v1739_v28 = vadd.f32 %v1707_v0, %v1672_v34  ;;  %v1740_v27 = vadd.f32 %v1708_v2, %v1673_v8  ;;  %v1885_v56 = vsel %vm757_vm2, %v1882_v10, %v1884_v5  ;;  %v2126_v36 = vrot.slane %v2021_v16, 2 }
 0x140   : > { %v2125_v45 = vsel %vm1000_vm3, %v2123_v22, %v2124_v21  ;;  %v616_v46 = vmul.f32 %v4551_v58, %v4370_v4  ;;  %v691_v14 = vmul.f32 %v4558_v24, %v4357_v11  ;;  %v692_v42 = vmul.f32 %v4558_v24, %v4370_v4 }
 0x141   : > { %v1981_v60 = vadd.f32 %v1883_v9, %v1739_v28  ;;  %v1982_v39 = vadd.f32 %v1885_v56, %v1740_v27  ;;  %v2127_v19 = vsel %vm1000_vm3, %v2124_v21, %v2126_v36  ;;  %v693_v26 = vmul.f32 %v4558_v24, %v4374_v40 }
 0x142   : > { %v808_v23 = vrot.slane %v691_v14, 1  ;;  %v809_v33 = vrot.slane %v692_v42, 1  ;;  %v934_v38 = vmul.f32 %v4571_v35, %v4357_v11  ;;  %v935_v0 = vmul.f32 %v4571_v35, %v4370_v4 }
 0x143   : > { %v2223_v55 = vadd.f32 %v2125_v45, %v1981_v60  ;;  %v2224_v49 = vadd.f32 %v2127_v19, %v1982_v39  ;;  %v811_v53 = vrot.slane %v693_v26, 1  ;;  %v936_v54 = vmul.f32 %v4571_v35, %v4374_v40  ;;  %v3428_v45 = vld [vmem:[#allocation2 + $0x120] sm:$0xff] }
 0x144   : > { %v810_v3 = vsel %vm757_vm2, %v808_v23, %v809_v33  ;;  %v1051_v31 = vrot.slane %v934_v38, 2  ;;  %v1052_v2 = vrot.slane %v935_v0, 2  ;;  %v1168_v47 = vmul.f32 %v4621_v62, %v4582_v57  ;;  %v3430_v23 = vld [vmem:[#allocation2 + $0x130] sm:$0x3] }
 0x145   : > { %v2255_v41 = vpack.c.bf16 %v2223_v55, %v2223_v55  ;;  %v2256_v52 = vpack.c.bf16 %v2224_v49, %v2224_v49  ;;  %v812_v11 = vsel %vm757_vm2, %v809_v33, %v811_v53  ;;  %v890_v63 = vadd.f32 %v810_v3, %v615_v1 }
 0x146   : > { %v891_v15 = vadd.f32 %v812_v11, %v616_v46  ;;  %v1053_v4 = vsel %vm1000_vm3, %v1051_v31, %v1052_v2  ;;  %v1054_v12 = vrot.slane %v936_v54, 2  ;;  %v1169_v43 = vmul.f32 %v4627_v59, %v4582_v57  ;;  %v3429_v46 = vld [vmem:[#allocation2 + $0x128] sm:$0xff] }
 0x147   : > { %2288 = vst.msk [vmem:[#allocation3 + $0x20] sm:$0xf] %vm2279_vm4, %v2255_v41  ;;  %v1133_v40 = vadd.f32 %v1053_v4, %v890_v63  ;;  %v1244_v18 = vmul.f32 %v4621_v62, %v4593_v13  ;;  %v1245_v7 = vmul.f32 %v4627_v59, %v4593_v13  ;;  %v1246_v10 = vmul.f32 %v4643_v61, %v4593_v13 }
 0x148   : > { %2289 = vst.msk [vmem:[#allocation3 + $0x24] sm:$0xf] %vm2279_vm4, %v2256_v52  ;;  %v1055_v6 = vsel %vm1000_vm3, %v1052_v2, %v1054_v12  ;;  %v1486_v29 = vmul.f32 %v4621_v62, %v4608_v50  ;;  %v1487_v34 = vmul.f32 %v4627_v59, %v4608_v50  ;;  %v1488_v8 = vmul.f32 %v4643_v61, %v4608_v50 }
 0x149   : > { %v1134_v5 = vadd.f32 %v1055_v6, %v891_v15  ;;  %v1200_v16 = vadd.f32 %v1168_v47, %v1133_v40  ;;  %v1360_v9 = vrot.slane %v1244_v18, 1  ;;  %v1361_v22 = vrot.slane %v1245_v7, 1 }
 0x14a   : > { %v1363_v21 = vrot.slane %v1246_v10, 1  ;;  %v1602_v1 = vrot.slane %v1486_v29, 2  ;;  %v1603_v28 = vrot.slane %v1487_v34, 2  ;;  %v1605_v27 = vrot.slane %v1488_v8, 2 }
 0x14b   : > { %v1201_v56 = vadd.f32 %v1169_v43, %v1134_v5  ;;  %v1362_v36 = vsel %vm757_vm2, %v1360_v9, %v1361_v22  ;;  %v1719_v62 = vmul.f32 %v3428_v45, %v4619_v48  ;;  %v1720_v59 = vmul.f32 %v3429_v46, %v4619_v48 }
 0x14c   : > { %v1364_v14 = vsel %vm757_vm2, %v1361_v22, %v1363_v21  ;;  %v1442_v61 = vadd.f32 %v1362_v36, %v1200_v16  ;;  %v1604_v42 = vsel %vm1000_vm3, %v1602_v1, %v1603_v28  ;;  %v1606_v60 = vsel %vm1000_vm3, %v1603_v28, %v1605_v27 }
 0x14d   : > { %v1443_v39 = vadd.f32 %v1364_v14, %v1201_v56  ;;  %v1795_v19 = vmul.f32 %v3428_v45, %v4634_v37  ;;  %v1796_v26 = vmul.f32 %v3429_v46, %v4634_v37  ;;  %v1797_v33 = vmul.f32 %v3430_v23, %v4634_v37 }
 0x14e   : > { %v1684_v38 = vadd.f32 %v1604_v42, %v1442_v61  ;;  %v2037_v0 = vmul.f32 %v3428_v45, %v4650_v32  ;;  %v2038_v55 = vmul.f32 %v3429_v46, %v4650_v32  ;;  %v2039_v49 = vmul.f32 %v3430_v23, %v4650_v32 }
 0x14f   : > { %v3340_v53 = vld [vmem:[#allocation3 + $0x20] sm:$0xff]  ;;  %v1685_v54 = vadd.f32 %v1606_v60, %v1443_v39  ;;  %v1911_v3 = vrot.slane %v1795_v19, 1  ;;  %v1912_v31 = vrot.slane %v1796_v26, 1  ;;  %v1914_v2 = vrot.slane %v1797_v33, 1  ;;  %v590_v60 = vld [vmem:[#allocation2 + $0x198] sm:$0xff]  ;;  %v591_v33 = vld [vmem:[#allocation2 + $0x1a0] sm:$0xff] }
 0x150   : > { %v1751_v47 = vadd.f32 %v1719_v62, %v1684_v38  ;;  %v2153_v41 = vrot.slane %v2037_v0, 2  ;;  %v2154_v52 = vrot.slane %v2038_v55, 2  ;;  %v2156_v11 = vrot.slane %v2039_v49, 2  ;;  %3295 = vmatmul.msk.bf16.gmra.mxu0 %vm450_vm0, %v3340_v53  ;;  %v592_v49 = vld [vmem:[#allocation2 + $0x1a8] sm:$0x3] }
 0x151   : > { %v1752_v63 = vadd.f32 %v1720_v59, %v1685_v54  ;;  %v1913_v15 = vsel %vm757_vm2, %v1911_v3, %v1912_v31  ;;  %v1915_v4 = vsel %vm757_vm2, %v1912_v31, %v1914_v2  ;;  %v625_v12 = vmul.f32 %v4551_v58, %v4431_v44 }
 0x152   : > { %v1993_v43 = vadd.f32 %v1913_v15, %v1751_v47  ;;  %v2155_v40 = vsel %vm1000_vm3, %v2153_v41, %v2154_v52  ;;  %v2157_v18 = vsel %vm1000_vm3, %v2154_v52, %v2156_v11  ;;  %v626_v7 = vmul.f32 %v4551_v58, %v4441_v20 }
 0x153   : > { %v1994_v10 = vadd.f32 %v1915_v4, %v1752_v63  ;;  %v706_v6 = vmul.f32 %v4558_v24, %v4431_v44  ;;  %v707_v29 = vmul.f32 %v4558_v24, %v4441_v20  ;;  %v708_v34 = vmul.f32 %v4558_v24, %v4449_v51 }
 0x154   : > { %v2235_v8 = vadd.f32 %v2155_v40, %v1993_v43  ;;  %v949_v5 = vmul.f32 %v4571_v35, %v4431_v44  ;;  %v950_v16 = vmul.f32 %v4571_v35, %v4441_v20  ;;  %v951_v58 = vmul.f32 %v4571_v35, %v4449_v51 }
 0x155   : > { %v2236_v9 = vadd.f32 %v2157_v18, %v1994_v10  ;;  %v833_v22 = vrot.slane %v706_v6, 1  ;;  %v834_v21 = vrot.slane %v707_v29, 1  ;;  %v836_v1 = vrot.slane %v708_v34, 1  ;;  %v3222_v34 = vld [vmem:[%s4235_s17 + $0xe0] ss:$2 sm:$0xff] }
 0x156   : > { %v2267_v28 = vpack.c.bf16 %v2235_v8, %v2235_v8  ;;  %v1076_v27 = vrot.slane %v949_v5, 2  ;;  %v1077_v56 = vrot.slane %v950_v16, 2  ;;  %v1079_v36 = vrot.slane %v951_v58, 2 }
 0x157   : > { %v2268_v45 = vpack.c.bf16 %v2236_v9, %v2236_v9  ;;  %v835_v24 = vsel %vm757_vm2, %v833_v22, %v834_v21  ;;  %v837_v62 = vsel %vm757_vm2, %v834_v21, %v836_v1  ;;  %v1178_v44 = vmul.f32 %v4582_v57, %v4698_v30 }
 0x158   : > { %2300 = vst.msk [vmem:[#allocation3 + $0x50] sm:$0xf] %vm2279_vm4, %v2267_v28  ;;  %v900_v20 = vadd.f32 %v835_v24, %v625_v12  ;;  %v901_v51 = vadd.f32 %v837_v62, %v626_v7  ;;  %v1078_v35 = vsel %vm1000_vm3, %v1076_v27, %v1077_v56  ;;  %v1080_v46 = vsel %vm1000_vm3, %v1077_v56, %v1079_v36  ;;  %v3221_v7 = vld [vmem:[%s4235_s17 + $0xc0] ss:$2 sm:$0xff] }
 0x159   : > { %2301 = vst.msk [vmem:[#allocation3 + $0x54] sm:$0xf] %vm2279_vm4, %v2268_v45  ;;  %v1179_v59 = vmul.f32 %v4582_v57, %v4704_v25  ;;  %v1259_v14 = vmul.f32 %v4593_v13, %v4698_v30  ;;  %v1260_v61 = vmul.f32 %v4593_v13, %v4704_v25  ;;  %v1261_v42 = vmul.f32 %v4593_v13, %v4708_v17  ;;  %v4910_v45 = vld [vmem:[%s5141_s4] ss:$0 sm:$0xff] }
 0x15a   : > { %v1143_v39 = vadd.f32 %v1078_v35, %v900_v20  ;;  %v1144_v19 = vadd.f32 %v1080_v46, %v901_v51  ;;  %v1501_v26 = vmul.f32 %v4608_v50, %v4698_v30  ;;  %v1502_v23 = vmul.f32 %v4608_v50, %v4704_v25  ;;  %v2533_v35 = vpop.f32.mrf.mxu0 }
 0x15b   : > { %v1385_v57 = vrot.slane %v1259_v14, 1  ;;  %v1386_v38 = vrot.slane %v1260_v61, 1  ;;  %v1388_v0 = vrot.slane %v1261_v42, 1  ;;  %v1503_v55 = vmul.f32 %v4608_v50, %v4708_v17 }
 0x15c   : > { %v1210_v53 = vadd.f32 %v1178_v44, %v1143_v39  ;;  %v1211_v54 = vadd.f32 %v1179_v59, %v1144_v19  ;;  %v1627_v13 = vrot.slane %v1501_v26, 2  ;;  %v1628_v3 = vrot.slane %v1502_v23, 2  ;;  %v2588_v39 = vpop.f32.mrf.mxu3  ;;  %v2558_v19 = vpop.f32.mrf.mxu1 }
 0x15d   : > { %v1387_v31 = vsel %vm757_vm2, %v1385_v57, %v1386_v38  ;;  %v1389_v2 = vsel %vm757_vm2, %v1386_v38, %v1388_v0  ;;  %v1630_v30 = vrot.slane %v1503_v55, 2  ;;  %v1729_v25 = vmul.f32 %v4619_v48, %v590_v60 }
 0x15e   : > { %v1452_v47 = vadd.f32 %v1387_v31, %v1210_v53  ;;  %v1453_v41 = vadd.f32 %v1389_v2, %v1211_v54  ;;  %v1629_v52 = vsel %vm1000_vm3, %v1627_v13, %v1628_v3  ;;  %v1730_v50 = vmul.f32 %v4619_v48, %v591_v33 }
 0x15f   : > { %v1631_v17 = vsel %vm1000_vm3, %v1628_v3, %v1630_v30  ;;  %v1810_v11 = vmul.f32 %v4634_v37, %v590_v60  ;;  %v1811_v63 = vmul.f32 %v4634_v37, %v591_v33  ;;  %v1812_v15 = vmul.f32 %v4634_v37, %v592_v49 }
 0x160   : > { %v3346_v4 = vld [vmem:[#allocation3 + $0x50] sm:$0xff]  ;;  %v1694_v12 = vadd.f32 %v1629_v52, %v1452_v47  ;;  %v1695_v43 = vadd.f32 %v1631_v17, %v1453_v41  ;;  %v2052_v40 = vmul.f32 %v4650_v32, %v590_v60  ;;  %v2053_v18 = vmul.f32 %v4650_v32, %v591_v33  ;;  %v2563_v60 = vpop.f32.mrf.mxu2 }
 0x161   : > { %v1936_v10 = vrot.slane %v1810_v11, 1  ;;  %v1937_v6 = vrot.slane %v1811_v63, 1  ;;  %v1939_v29 = vrot.slane %v1812_v15, 1  ;;  %v2054_v48 = vmul.f32 %v4650_v32, %v592_v49  ;;  %3301 = vmatmul.msk.bf16.gmra.mxu2 %vm450_vm0, %v3346_v4 }
 0x162   : > { %v1761_v8 = vadd.f32 %v1729_v25, %v1694_v12  ;;  %v1762_v5 = vadd.f32 %v1730_v50, %v1695_v43  ;;  %v2178_v16 = vrot.slane %v2052_v40, 2  ;;  %v2179_v37 = vrot.slane %v2053_v18, 2  ;;  %v2535_v42 = vpop.f32.mrf.mxu0 }
 0x163   : > { %v1938_v58 = vsel %vm757_vm2, %v1936_v10, %v1937_v6  ;;  %v1940_v9 = vsel %vm757_vm2, %v1937_v6, %v1939_v29  ;;  %v2181_v22 = vrot.slane %v2054_v48, 2  ;;  %v2333_v21 = vmax.f32 %v3221_v7, 0.0 }
 0x164   : > { %v2003_v1 = vadd.f32 %v1938_v58, %v1761_v8  ;;  %v2004_v28 = vadd.f32 %v1940_v9, %v1762_v5  ;;  %v2180_v27 = vsel %vm1000_vm3, %v2178_v16, %v2179_v37  ;;  %v2334_v56 = vmax.f32 %v3222_v34, 0.0  ;;  %v2590_v38 = vpop.f32.mrf.mxu3  ;;  %v2560_v0 = vpop.f32.mrf.mxu1 }
 0x165   : > { %v2182_v32 = vsel %vm1000_vm3, %v2179_v37, %v2181_v22  ;;  %v2341_v36 = vpack.c.bf16 %v2333_v21, %v2333_v21  ;;  %v2534_v46 = vadd.f32 %v4910_v45, %v2533_v35  ;;  %v3456_v59 = vmov -3.4028235e+38  }
 0x166   : > { %v2245_v24 = vadd.f32 %v2180_v27, %v2003_v1  ;;  %v2246_v62 = vadd.f32 %v2182_v32, %v2004_v28  ;;  %v2342_v44 = vpack.c.bf16 %v2334_v56, %v2334_v56  ;;  %2618 = vst.msk [vmem:[#allocation5 + $0x18] sm:$0xff] %vm2613_vm5, %v3456_v59  ;;  %v2559_v26 = vadd.f32 %v4910_v45, %v2558_v19 }
 0x167   : > { %2349 = vst.msk [vmem:[#allocation4 + $0x18] sm:$0xf] %vm2279_vm4, %v2341_v36  ;;  %v2536_v57 = vadd.f32 %v4910_v45, %v2535_v42  ;;  %v2564_v25 = vadd.f32 %v4910_v45, %v2563_v60  ;;  %v2589_v41 = vadd.f32 %v4910_v45, %v2588_v39  ;;  %v2561_v50 = vadd.f32 %v4910_v45, %v2560_v0 }
 0x168   : > { %v2277_v20 = vpack.c.bf16 %v2245_v24, %v2245_v24  ;;  %v2278_v51 = vpack.c.bf16 %v2246_v62, %v2246_v62  ;;  %2350 = vst.msk [vmem:[#allocation4 + $0x1c] sm:$0xf] %vm2279_vm4, %v2342_v44  ;;  %v2565_v33 = vpop.f32.mrf.mxu2  ;;  %v2591_v15 = vadd.f32 %v4910_v45, %v2590_v38  ;;  %v5059_v24 = vld [vmem:[%s5143_s6] ss:$0 sm:$0xff] }
 0x169   : > { %2619 = vst.msk [vmem:[#allocation5 + $0x20] sm:$0xff] %vm2613_vm5, %v3456_v59  ;;  %v2566_v11 = vadd.f32 %v4910_v45, %v2565_v33 }
 0x16a   : > { %2310 = vst.msk [vmem:[#allocation3 + $0x78] sm:$0xf] %vm2279_vm4, %v2277_v20  ;;  %v2538_v23 = vpop.f32.mrf.mxu0 }
 0x16b   : > { %2311 = vst.msk [vmem:[#allocation3 + $0x7c] sm:$0xf] %vm2279_vm4, %v2278_v51  ;;  %v2539_v17 = vadd.f32 %v4910_v45, %v2538_v23 }
 0x16c   : > { %2670 = vst.msk [vmem:[#allocation5 + $0x19] sm:$0xff] %vm2613_vm5, %v2534_v46  ;;  %v2593_v53 = vpop.f32.mrf.mxu3  ;;  %v5014_v54 = vpop.f32.mrf.mxu1 }
 0x16d   : > { %2614 = vst.msk [vmem:[#allocation5] sm:$0xff] %vm2613_vm5, %v3456_v59  ;;  %v2594_v10 = vadd.f32 %v4910_v45, %v2593_v53 }
 0x16e   : > { %2615 = vst.msk [vmem:[#allocation5 + $0x8] sm:$0xff] %vm2613_vm5, %v3456_v59 }
 0x16f   : > { %v3356_v14 = vld [vmem:[#allocation4 + $0x18] sm:$0xff]  ;;  %2621 = vst.msk [vmem:[#allocation5 + $0x30] sm:$0xff] %vm2613_vm5, %v3456_v59 }
 0x170   : > { %3330 = vmatmul.msk.bf16.gmra.mxu1 %vm450_vm0, %v3356_v14  ;;  %2622 = vst.msk [vmem:[#allocation5 + $0x38] sm:$0xff] %vm2613_vm5, %v3456_v59  ;;  %v2568_v49 = vpop.f32.mrf.mxu2 }
 0x171   : > { %2624 = vst.msk [vmem:[#allocation5 + $0x48] sm:$0xff] %vm2613_vm5, %v3456_v59  ;;  %v2569_v18 = vadd.f32 %v4910_v45, %v2568_v49 }
 0x172   : > { %v3351_v61 = vld [vmem:[#allocation3 + $0x78] sm:$0xff]  ;;  %2625 = vst.msk [vmem:[#allocation5 + $0x50] sm:$0xff] %vm2613_vm5, %v3456_v59  ;;  %v2540_v55 = vpop.f32.mrf.mxu0 }
 0x173   : > { %3306 = vmatmul.msk.bf16.gmra.mxu3 %vm450_vm0, %v3351_v61  ;;  %2627 = vst.msk [vmem:[#allocation5 + $0x60] sm:$0xff] %vm2613_vm5, %v3456_v59  ;;  %v2541_v43 = vadd.f32 %v4910_v45, %v2540_v55 }
 0x174   : > { %2628 = vst.msk [vmem:[#allocation5 + $0x68] sm:$0xff] %vm2613_vm5, %v3456_v59  ;;  %v2595_v30 = vpop.f32.mrf.mxu3  ;;  %v5038_v40 = vpop.f32.mrf.mxu1 }
 0x175   : > { %2630 = vst.msk [vmem:[#allocation5 + $0x78] sm:$0xff] %vm2613_vm5, %v3456_v59  ;;  %v2702_v3 = vld [vmem:[#allocation5] ss:$2 sm:$0xff]  ;;  %v2718_v31 = vld [vmem:[#allocation5 + $0x1] ss:$2 sm:$0xff]  ;;  %v2596_v22 = vadd.f32 %v4910_v45, %v2595_v30 }
 0x176   : > { %2631 = vst.msk [vmem:[#allocation5 + $0x80] sm:$0xff] %vm2613_vm5, %v3456_v59  ;;  %v2733_v47 = vmax.f32 %v2702_v3, %v2718_v31 }
 0x177   : > { %2633 = vst.msk [vmem:[#allocation5 + $0x90] sm:$0xff] %vm2613_vm5, %v3456_v59 }
 0x178   : > { %2634 = vst.msk [vmem:[#allocation5 + $0x98] sm:$0xff] %vm2613_vm5, %v3456_v59  ;;  %v2570_v2 = vpop.f32.mrf.mxu2 }
 0x179   : > { %2636 = vst.msk [vmem:[#allocation5 + $0xa8] sm:$0xff] %vm2613_vm5, %v3456_v59  ;;  %v2571_v8 = vadd.f32 %v4910_v45, %v2570_v2 }
 0x17a   : > { %2637 = vst.msk [vmem:[#allocation5 + $0xb0] sm:$0xff] %vm2613_vm5, %v3456_v59  ;;  %v2543_v13 = vpop.f32.mrf.mxu0 }
 0x17b   : > { %2639 = vst.msk [vmem:[#allocation5 + $0xc0] sm:$0xff] %vm2613_vm5, %v3456_v59  ;;  %v2544_v34 = vadd.f32 %v4910_v45, %v2543_v13 }
 0x17c   : > { %2640 = vst.msk [vmem:[#allocation5 + $0xc8] sm:$0xff] %vm2613_vm5, %v3456_v59 }
 0x17d   : > { %2642 = vst.msk [vmem:[#allocation5 + $0xd8] sm:$0xff] %vm2613_vm5, %v3456_v59 }
 0x17e   : > { %2643 = vst.msk [vmem:[#allocation5 + $0xe0] sm:$0xff] %vm2613_vm5, %v3456_v59  ;;  %v5053_v27 = vpop.f32.mrf.mxu1 }
 0x17f   : > { %2645 = vst.msk [vmem:[#allocation5 + $0xf0] sm:$0xff] %vm2613_vm5, %v3456_v59 }
 0x180   : > { %2646 = vst.msk [vmem:[#allocation5 + $0xf8] sm:$0xff] %vm2613_vm5, %v3456_v59  ;;  %v2573_v7 = vpop.f32.mrf.mxu2 }
 0x181   : > { %2648 = vst.msk [vmem:[#allocation5 + $0x108] sm:$0xff] %vm2613_vm5, %v3456_v59  ;;  %v2574_v62 = vadd.f32 %v4910_v45, %v2573_v7 }
 0x182   : > { %2649 = vst.msk [vmem:[#allocation5 + $0x110] sm:$0xff] %vm2613_vm5, %v3456_v59  ;;  %v2545_v4 = vpop.f32.mrf.mxu0 }
 0x183   : > { %2651 = vst.msk [vmem:[#allocation5 + $0x120] sm:$0xff] %vm2613_vm5, %v3456_v59  ;;  %v2546_v56 = vadd.f32 %v4910_v45, %v2545_v4 }
 0x184   : > { %2652 = vst.msk [vmem:[#allocation5 + $0x128] sm:$0xff] %vm2613_vm5, %v3456_v59 }
 0x185   : > { %2654 = vst.msk [vmem:[#allocation5 + $0x138] sm:$0xff] %vm2613_vm5, %v3456_v59 }
 0x186   : > { %2655 = vst.msk [vmem:[#allocation5 + $0x140] sm:$0xff] %vm2613_vm5, %v3456_v59 }
 0x187   : > { %2657 = vst.msk [vmem:[#allocation5 + $0x150] sm:$0xff] %vm2613_vm5, %v3456_v59 }
 0x188   : > { %2658 = vst.msk [vmem:[#allocation5 + $0x158] sm:$0xff] %vm2613_vm5, %v3456_v59  ;;  %v2598_v29 = vpop.f32.mrf.mxu3  ;;  %v2575_v28 = vpop.f32.mrf.mxu2 }
 0x189   : > { %2660 = vst.msk [vmem:[#allocation5 + $0x168] sm:$0xff] %vm2613_vm5, %v3456_v59  ;;  %v2599_v14 = vadd.f32 %v4910_v45, %v2598_v29 }
 0x18a   : > { %2661 = vst.msk [vmem:[#allocation5 + $0x170] sm:$0xff] %vm2613_vm5, %v3456_v59 }
 0x18b   : > { %2663 = vst.msk [vmem:[#allocation5 + $0x180] sm:$0xff] %vm2613_vm5, %v3456_v59 }
 0x18c   : > { %2664 = vst.msk [vmem:[#allocation5 + $0x188] sm:$0xff] %vm2613_vm5, %v3456_v59 }
 0x18d   : > { %2680 = vst.msk [vmem:[#allocation5 + $0x91] sm:$0xff] %vm2613_vm5, %v2559_v26  ;;  %v2970_v26 = vadd.f32 %v5059_v24, %v5014_v54 }
 0x18e   : > { %2617 = vst.msk [vmem:[#allocation5 + $0x10] sm:$0x3] %vm2616_vm6, %v3456_v59 }
 0x18f   : > { %2620 = vst.msk [vmem:[#allocation5 + $0x28] sm:$0x3] %vm2616_vm6, %v3456_v59 }
 0x190   : > { %2671 = vst.msk [vmem:[#allocation5 + $0x21] sm:$0xff] %vm2613_vm5, %v2536_v57  ;;  %v2600_v42 = vpop.f32.mrf.mxu3  ;;  %v2576_v57 = vadd.f32 %v4910_v45, %v2575_v28 }
 0x191   : > { %2623 = vst.msk [vmem:[#allocation5 + $0x40] sm:$0x3] %vm2616_vm6, %v3456_v59  ;;  %v2601_v55 = vadd.f32 %v4910_v45, %v2600_v42 }
 0x192   : > { %2626 = vst.msk [vmem:[#allocation5 + $0x58] sm:$0x3] %vm2616_vm6, %v3456_v59 }
 0x193   : > { %2629 = vst.msk [vmem:[#allocation5 + $0x70] sm:$0x3] %vm2616_vm6, %v3456_v59 }
 0x194   : > { %2632 = vst.msk [vmem:[#allocation5 + $0x88] sm:$0x3] %vm2616_vm6, %v3456_v59 }
 0x195   : > { %2635 = vst.msk [vmem:[#allocation5 + $0xa0] sm:$0x3] %vm2616_vm6, %v3456_v59  ;;  %v2742_v52 = vld [vmem:[#allocation5 + $0x2] ss:$2 sm:$0xff]  ;;  %v2548_v37 = vpop.f32.mrf.mxu0 }
 0x196   : > { %2638 = vst.msk [vmem:[#allocation5 + $0xb8] sm:$0x3] %vm2616_vm6, %v3456_v59  ;;  %v2757_v63 = vmax.f32 %v2733_v47, %v2742_v52  ;;  %v2549_v19 = vadd.f32 %v4910_v45, %v2548_v37 }
 0x197   : > { %2641 = vst.msk [vmem:[#allocation5 + $0xd0] sm:$0x3] %vm2616_vm6, %v3456_v59  ;;  %v2765_v12 = vld [vmem:[#allocation5 + $0x18] ss:$2 sm:$0xff]  ;;  %v2789_v48 = vld [vmem:[#allocation5 + $0x19] ss:$2 sm:$0xff] }
 0x198   : > { %2644 = vst.msk [vmem:[#allocation5 + $0xe8] sm:$0x3] %vm2616_vm6, %v3456_v59  ;;  %v2780_v6 = vmax.f32 %v2757_v63, %v2765_v12  ;;  %v2813_v16 = vld [vmem:[#allocation5 + $0x1a] ss:$2 sm:$0xff] }
 0x199   : > { %2647 = vst.msk [vmem:[#allocation5 + $0x100] sm:$0x3] %vm2616_vm6, %v3456_v59 }
 0x19a   : > { %2650 = vst.msk [vmem:[#allocation5 + $0x118] sm:$0x3] %vm2616_vm6, %v3456_v59  ;;  %v2804_v5 = vmax.f32 %v2780_v6, %v2789_v48 }
 0x19b   : > { %2653 = vst.msk [vmem:[#allocation5 + $0x130] sm:$0x3] %vm2616_vm6, %v3456_v59 }
 0x19c   : > { %2656 = vst.msk [vmem:[#allocation5 + $0x148] sm:$0x3] %vm2616_vm6, %v3456_v59  ;;  %v2828_v36 = vmax.f32 %v2804_v5, %v2813_v16 }
 0x19d   : > { %2659 = vst.msk [vmem:[#allocation5 + $0x160] sm:$0x3] %vm2616_vm6, %v3456_v59  ;;  %v2550_v49 = vpop.f32.mrf.mxu0 }
 0x19e   : > { %2662 = vst.msk [vmem:[#allocation5 + $0x178] sm:$0x3] %vm2616_vm6, %v3456_v59 }
 0x19f   : > { %2665 = vst.msk [vmem:[#allocation5 + $0x190] sm:$0x3] %vm2616_vm6, %v3456_v59 }
 0x1a0   : > { %2682 = vst.msk [vmem:[#allocation5 + $0xa9] sm:$0xff] %vm2613_vm5, %v2564_v25 }
 0x1a1   : > { %2692 = vst.msk [vmem:[#allocation5 + $0x121] sm:$0xff] %vm2613_vm5, %v2589_v41  ;;  %v2551_v41 = vadd.f32 %v4910_v45, %v2550_v49 }
 0x1a2   : > { %2681 = vst.msk [vmem:[#allocation5 + $0x99] sm:$0xff] %vm2613_vm5, %v2561_v50 }
 0x1a3   : > { %2672 = vst.msk [vmem:[#allocation5 + $0x31] sm:$0xff] %vm2613_vm5, %v2539_v17  ;;  %v2976_v17 = vpop.f32.mrf.mxu1 }
 0x1a4   : > { %2683 = vst.msk [vmem:[#allocation5 + $0xb1] sm:$0xff] %vm2613_vm5, %v2566_v11  ;;  %v2977_v4 = vadd.f32 %v5059_v24, %v2976_v17 }
 0x1a5   : > { %2693 = vst.msk [vmem:[#allocation5 + $0x129] sm:$0xff] %vm2613_vm5, %v2591_v15 }
 0x1a6   : > { %2673 = vst.msk [vmem:[#allocation5 + $0x39] sm:$0xff] %vm2613_vm5, %v2541_v43 }
 0x1a7   : > { %2684 = vst.msk [vmem:[#allocation5 + $0xc1] sm:$0xff] %vm2613_vm5, %v2569_v18 }
 0x1a8   : > { %2694 = vst.msk [vmem:[#allocation5 + $0x139] sm:$0xff] %vm2613_vm5, %v2594_v10 }
 0x1a9   : > { %2674 = vst.msk [vmem:[#allocation5 + $0x49] sm:$0xff] %vm2613_vm5, %v2544_v34  ;;  %v2708_v58 = vld [vmem:[#allocation5 + $0x90] ss:$2 sm:$0xff]  ;;  %v2724_v9 = vld [vmem:[#allocation5 + $0x91] ss:$2 sm:$0xff] }
 0x1aa   : > { %2685 = vst.msk [vmem:[#allocation5 + $0xc9] sm:$0xff] %vm2613_vm5, %v2571_v8  ;;  %v2736_v21 = vmax.f32 %v2708_v58, %v2724_v9  ;;  %v2748_v1 = vld [vmem:[#allocation5 + $0x92] ss:$2 sm:$0xff] }
 0x1ab   : > { %v2771_v32 = vld [vmem:[#allocation5 + $0xa8] ss:$2 sm:$0xff]  ;;  %2695 = vst.msk [vmem:[#allocation5 + $0x141] sm:$0xff] %vm2613_vm5, %v2596_v22  ;;  %v2795_v39 = vld [vmem:[#allocation5 + $0xa9] ss:$2 sm:$0xff] }
 0x1ac   : > { %v2760_v44 = vmax.f32 %v2736_v21, %v2748_v1  ;;  %2675 = vst.msk [vmem:[#allocation5 + $0x51] sm:$0xff] %vm2613_vm5, %v2546_v56  ;;  %v2819_v0 = vld [vmem:[#allocation5 + $0xaa] ss:$2 sm:$0xff]  ;;  %v2730_v49 = vld [vmem:[#allocation5 + $0x121] ss:$2 sm:$0xff] }
 0x1ad   : > { %v2837_v20 = vld [vmem:[#allocation5 + $0x30] ss:$2 sm:$0xff]  ;;  %v2861_v51 = vld [vmem:[#allocation5 + $0x31] ss:$2 sm:$0xff]  ;;  %2686 = vst.msk [vmem:[#allocation5 + $0xd9] sm:$0xff] %vm2613_vm5, %v2574_v62  ;;  %v2578_v2 = vpop.f32.mrf.mxu2 }
 0x1ae   : > { %v2704_v35 = vld [vmem:[#allocation5 + $0x30] ss:$2 sm:$0xff]  ;;  %v2720_v46 = vld [vmem:[#allocation5 + $0x31] ss:$2 sm:$0xff]  ;;  %v2852_v59 = vmax.f32 %v2828_v36, %v2837_v20  ;;  %v2783_v61 = vmax.f32 %v2760_v44, %v2771_v32  ;;  %2696 = vst.msk [vmem:[#allocation5 + $0x151] sm:$0xff] %vm2613_vm5, %v2599_v14  ;;  %v2579_v11 = vadd.f32 %v4910_v45, %v2578_v2 }
 0x1af   : > { %v2885_v60 = vld [vmem:[#allocation5 + $0x32] ss:$2 sm:$0xff]  ;;  %v2734_v38 = vmax.f32 %v2704_v35, %v2720_v46  ;;  %2676 = vst.msk [vmem:[#allocation5 + $0x61] sm:$0xff] %vm2613_vm5, %v2549_v19  ;;  %v2972_v46 = vadd.f32 %v5059_v24, %v5038_v40 }
 0x1b0   : > { %v2876_v23 = vmax.f32 %v2852_v59, %v2861_v51  ;;  %v2807_v33 = vmax.f32 %v2783_v61, %v2795_v39  ;;  %v2744_v53 = vld [vmem:[#allocation5 + $0x32] ss:$2 sm:$0xff]  ;;  %2687 = vst.msk [vmem:[#allocation5 + $0xe1] sm:$0xff] %vm2613_vm5, %v2576_v57 }
 0x1b1   : > { %v2843_v31 = vld [vmem:[#allocation5 + $0xc0] ss:$2 sm:$0xff]  ;;  %v2726_v30 = vld [vmem:[#allocation5 + $0xc1] ss:$2 sm:$0xff]  ;;  %v2758_v52 = vmax.f32 %v2734_v38, %v2744_v53  ;;  %2697 = vst.msk [vmem:[#allocation5 + $0x159] sm:$0xff] %vm2613_vm5, %v2601_v55 }
 0x1b2   : > { %v2900_v13 = vmax.f32 %v2876_v23, %v2885_v60  ;;  %v2831_v3 = vmax.f32 %v2807_v33, %v2819_v0  ;;  %v2710_v54 = vld [vmem:[#allocation5 + $0xc0] ss:$2 sm:$0xff]  ;;  %v2867_v50 = vld [vmem:[#allocation5 + $0xc1] ss:$2 sm:$0xff]  ;;  %2677 = vst.msk [vmem:[#allocation5 + $0x69] sm:$0xff] %vm2613_vm5, %v2551_v41 }
 0x1b3   : > { %v2767_v63 = vld [vmem:[#allocation5 + $0x48] ss:$2 sm:$0xff]  ;;  %v2737_v12 = vmax.f32 %v2710_v54, %v2726_v30  ;;  %v2791_v7 = vld [vmem:[#allocation5 + $0x49] ss:$2 sm:$0xff]  ;;  %2688 = vst.msk [vmem:[#allocation5 + $0xf1] sm:$0xff] %vm2613_vm5, %v2579_v11 }
 0x1b4   : > { %v2855_v25 = vmax.f32 %v2831_v3, %v2843_v31  ;;  %v2989_v47 = vadd.f32 %v2970_v26, %v2900_v13  ;;  %v2781_v43 = vmax.f32 %v2758_v52, %v2767_v63  ;;  %v2891_v18 = vld [vmem:[#allocation5 + $0xc2] ss:$2 sm:$0xff]  ;;  %v2801_v17 = vld [vmem:[#allocation5 + $0x139] ss:$2 sm:$0xff] }
 0x1b5   : > { %v2750_v6 = vld [vmem:[#allocation5 + $0xc2] ss:$2 sm:$0xff]  ;;  %v2580_v34 = vpop.f32.mrf.mxu2 }
 0x1b6   : > { %v2879_v15 = vmax.f32 %v2855_v25, %v2867_v50  ;;  %2997 = vst.msk [vmem:[%s5077_s23] sm:$0xff] %vm2613_vm5, %v2989_v47  ;;  %v2761_v8 = vmax.f32 %v2737_v12, %v2750_v6  ;;  %v2805_v5 = vmax.f32 %v2781_v43, %v2791_v7  ;;  %v2581_v58 = vadd.f32 %v4910_v45, %v2580_v34  ;;  %v2815_v9 = vld [vmem:[#allocation5 + $0x4a] ss:$2 sm:$0xff]  ;;  %v2979_v33 = vpop.f32.mrf.mxu1  ;;  %v2825_v7 = vld [vmem:[#allocation5 + $0x13a] ss:$2 sm:$0xff] }
 0x1b7   : > { %v2773_v16 = vld [vmem:[#allocation5 + $0xd8] ss:$2 sm:$0xff]  ;;  %v2797_v1 = vld [vmem:[#allocation5 + $0xd9] ss:$2 sm:$0xff]  ;;  %v2980_v38 = vadd.f32 %v5059_v24, %v2979_v33 }
 0x1b8   : > { %v2903_v10 = vmax.f32 %v2879_v15, %v2891_v18  ;;  %v2784_v22 = vmax.f32 %v2761_v8, %v2773_v16  ;;  %2689 = vst.msk [vmem:[#allocation5 + $0xf9] sm:$0xff] %vm2613_vm5, %v2581_v58  ;;  %v2829_v21 = vmax.f32 %v2805_v5, %v2815_v9  ;;  %v2821_v35 = vld [vmem:[#allocation5 + $0xda] ss:$2 sm:$0xff] }
 0x1b9   : > { %v2839_v28 = vld [vmem:[#allocation5 + $0x60] ss:$2 sm:$0xff]  ;;  %v2863_v56 = vld [vmem:[#allocation5 + $0x61] ss:$2 sm:$0xff]  ;;  %v2841_v34 = vld [vmem:[#allocation5 + $0x90] ss:$2 sm:$0xff] }
 0x1ba   : > { %v2992_v29 = vadd.f32 %v2977_v4, %v2903_v10  ;;  %v2808_v32 = vmax.f32 %v2784_v22, %v2797_v1  ;;  %v2853_v36 = vmax.f32 %v2829_v21, %v2839_v28  ;;  %v2887_v62 = vld [vmem:[#allocation5 + $0x62] ss:$2 sm:$0xff]  ;;  %v2722_v2 = vld [vmem:[#allocation5 + $0x61] ss:$2 sm:$0xff]  ;;  %v2889_v9 = vld [vmem:[#allocation5 + $0x92] ss:$2 sm:$0xff]  ;;  %v2975_v21 = vadd.f32 %v5059_v24, %v5053_v27 }
 0x1bb   : > { %v2714_v55 = vld [vmem:[#allocation5 + $0x120] ss:$2 sm:$0xff]  ;;  %v2849_v10 = vld [vmem:[#allocation5 + $0x150] ss:$2 sm:$0xff]  ;;  %v2873_v22 = vld [vmem:[#allocation5 + $0x151] ss:$2 sm:$0xff] }
 0x1bc   : > { %3000 = vst.msk [vmem:[%s5077_s23 + $0x18] sm:$0xff] %vm2613_vm5, %v2992_v29  ;;  %v2877_v20 = vmax.f32 %v2853_v36, %v2863_v56  ;;  %v2832_v59 = vmax.f32 %v2808_v32, %v2821_v35  ;;  %v2739_v13 = vmax.f32 %v2714_v55, %v2730_v49  ;;  %v2706_v31 = vld [vmem:[#allocation5 + $0x60] ss:$2 sm:$0xff] }
 0x1bd   : > { %v2754_v54 = vld [vmem:[#allocation5 + $0x122] ss:$2 sm:$0xff]  ;;  %v2735_v25 = vmax.f32 %v2706_v31, %v2722_v2  ;;  %v2897_v36 = vld [vmem:[#allocation5 + $0x152] ss:$2 sm:$0xff]  ;;  %v2871_v31 = vld [vmem:[#allocation5 + $0x121] ss:$2 sm:$0xff] }
 0x1be   : > { %v2901_v14 = vmax.f32 %v2877_v20, %v2887_v62  ;;  %v2777_v30 = vld [vmem:[#allocation5 + $0x138] ss:$2 sm:$0xff]  ;;  %v2763_v47 = vmax.f32 %v2739_v13, %v2754_v54  ;;  %v2981_v18 = vpop.f32.mrf.mxu1 }
 0x1bf   : > { %v2603_v48 = vpop.f32.mrf.mxu3  ;;  %v2845_v61 = vld [vmem:[#allocation5 + $0xf0] ss:$2 sm:$0xff]  ;;  %v2869_v19 = vld [vmem:[#allocation5 + $0xf1] ss:$2 sm:$0xff]  ;;  %v2847_v55 = vld [vmem:[#allocation5 + $0x120] ss:$2 sm:$0xff] }
 0x1c0   : > { %v2604_v37 = vadd.f32 %v4910_v45, %v2603_v48  ;;  %v2990_v42 = vadd.f32 %v2972_v46, %v2901_v14  ;;  %v2856_v60 = vmax.f32 %v2832_v59, %v2845_v61  ;;  %v2893_v57 = vld [vmem:[#allocation5 + $0xf2] ss:$2 sm:$0xff]  ;;  %v2746_v41 = vld [vmem:[#allocation5 + $0x62] ss:$2 sm:$0xff]  ;;  %v2786_v52 = vmax.f32 %v2763_v47, %v2777_v30 }
 0x1c1   : > { %v2759_v50 = vmax.f32 %v2735_v25, %v2746_v41  ;;  %v2712_v20 = vld [vmem:[#allocation5 + $0xf0] ss:$2 sm:$0xff]  ;;  %v2982_v41 = vadd.f32 %v5059_v24, %v2981_v18 }
 0x1c2   : > { %2698 = vst.msk [vmem:[#allocation5 + $0x169] sm:$0xff] %vm2613_vm5, %v2604_v37  ;;  %v2880_v23 = vmax.f32 %v2856_v60, %v2869_v19  ;;  %v2810_v15 = vmax.f32 %v2786_v52, %v2801_v17  ;;  %v2865_v37 = vld [vmem:[#allocation5 + $0x91] ss:$2 sm:$0xff]  ;;  %v2752_v14 = vld [vmem:[#allocation5 + $0xf2] ss:$2 sm:$0xff] }
 0x1c3   : > { %2998 = vst.msk [vmem:[%s5077_s23 + $0x8] sm:$0xff] %vm2613_vm5, %v2990_v42  ;;  %v2732_v19 = vld [vmem:[#allocation5 + $0x151] ss:$2 sm:$0xff]  ;;  %v2756_v49 = vld [vmem:[#allocation5 + $0x152] ss:$2 sm:$0xff] }
 0x1c4   : > { %v2904_v40 = vmax.f32 %v2880_v23, %v2893_v57  ;;  %v2834_v6 = vmax.f32 %v2810_v15, %v2825_v7  ;;  %v2895_v47 = vld [vmem:[#allocation5 + $0x122] ss:$2 sm:$0xff] }
 0x1c6   : > { %v2993_v0 = vadd.f32 %v2980_v38, %v2904_v40  ;;  %v2858_v5 = vmax.f32 %v2834_v6, %v2849_v10 }
 0x1c7   : > { %v2605_v44 = vpop.f32.mrf.mxu3 }
 0x1c8   : > { %v2606_v51 = vadd.f32 %v4910_v45, %v2605_v44  ;;  %3001 = vst.msk [vmem:[%s5077_s23 + $0x20] sm:$0xff] %vm2613_vm5, %v2993_v0  ;;  %v2882_v1 = vmax.f32 %v2858_v5, %v2873_v22 }
 0x1ca   : > { %2699 = vst.msk [vmem:[#allocation5 + $0x171] sm:$0xff] %vm2613_vm5, %v2606_v51  ;;  %v2728_v51 = vld [vmem:[#allocation5 + $0xf1] ss:$2 sm:$0xff]  ;;  %v2906_v35 = vmax.f32 %v2882_v1, %v2897_v36 }
 0x1cb   : > { %v2738_v27 = vmax.f32 %v2712_v20, %v2728_v51 }
 0x1cd   : > { %v2553_v39 = vpop.f32.mrf.mxu0  ;;  %v2762_v61 = vmax.f32 %v2738_v27, %v2752_v14 }
 0x1ce   : > { %v2554_v26 = vadd.f32 %v4910_v45, %v2553_v39  ;;  %v2716_v39 = vld [vmem:[#allocation5 + $0x150] ss:$2 sm:$0xff] }
 0x1cf   : > { %v2740_v38 = vmax.f32 %v2716_v39, %v2732_v19 }
 0x1d0   : > { %2678 = vst.msk [vmem:[#allocation5 + $0x79] sm:$0xff] %vm2613_vm5, %v2554_v26 }
 0x1d5   : > { %v2555_v53 = vpop.f32.mrf.mxu0 }
 0x1d6   : > { %v2556_v3 = vadd.f32 %v4910_v45, %v2555_v53  ;;  %v2779_v53 = vld [vmem:[#allocation5 + $0x168] ss:$2 sm:$0xff] }
 0x1d8   : > { %2679 = vst.msk [vmem:[#allocation5 + $0x81] sm:$0xff] %vm2613_vm5, %v2556_v3  ;;  %v2764_v3 = vmax.f32 %v2740_v38, %v2756_v49 }
 0x1da   : > { %v2787_v25 = vmax.f32 %v2764_v3, %v2779_v53 }
 0x1df   : > { %v2769_v11 = vld [vmem:[#allocation5 + $0x78] ss:$2 sm:$0xff]  ;;  %v2793_v63 = vld [vmem:[#allocation5 + $0x79] ss:$2 sm:$0xff] }
 0x1e0   : > { %v2782_v4 = vmax.f32 %v2759_v50, %v2769_v11  ;;  %v2817_v12 = vld [vmem:[#allocation5 + $0x7a] ss:$2 sm:$0xff]  ;;  %v2803_v50 = vld [vmem:[#allocation5 + $0x169] ss:$2 sm:$0xff] }
 0x1e1   : > { %v2811_v11 = vmax.f32 %v2787_v25, %v2803_v50 }
 0x1e2   : > { %v2806_v43 = vmax.f32 %v2782_v4, %v2793_v63  ;;  %v2827_v63 = vld [vmem:[#allocation5 + $0x16a] ss:$2 sm:$0xff] }
 0x1e3   : > { %v2835_v15 = vmax.f32 %v2811_v11, %v2827_v63 }
 0x1e4   : > { %v2830_v29 = vmax.f32 %v2806_v43, %v2817_v12  ;;  %v2583_v48 = vpop.f32.mrf.mxu2 }
 0x1e5   : > { %v2584_v8 = vadd.f32 %v4910_v45, %v2583_v48 }
 0x1e6   : > { %v2854_v16 = vmax.f32 %v2830_v29, %v2841_v34 }
 0x1e7   : > { %2690 = vst.msk [vmem:[#allocation5 + $0x109] sm:$0xff] %vm2613_vm5, %v2584_v8 }
 0x1e8   : > { %v2878_v58 = vmax.f32 %v2854_v16, %v2865_v37 }
 0x1ea   : > { %v2902_v28 = vmax.f32 %v2878_v58, %v2889_v9 }
 0x1ec   : > { %v2991_v56 = vadd.f32 %v2975_v21, %v2902_v28  ;;  %v2585_v32 = vpop.f32.mrf.mxu2 }
 0x1ed   : > { %v2984_v62 = vpop.f32.mrf.mxu1  ;;  %v2586_v44 = vadd.f32 %v4910_v45, %v2585_v32 }
 0x1ee   : > { %v2985_v46 = vadd.f32 %v5059_v24, %v2984_v62  ;;  %2999 = vst.msk [vmem:[%s5077_s23 + $0x10] sm:$0xff] %vm2613_vm5, %v2991_v56 }
 0x1ef   : > { %2691 = vst.msk [vmem:[#allocation5 + $0x111] sm:$0xff] %vm2613_vm5, %v2586_v44 }
 0x1f0   : > { %v2995_v59 = vadd.f32 %v2985_v46, %v2906_v35 }
 0x1f2   : > { %3003 = vst.msk [vmem:[%s5077_s23 + $0x30] sm:$0xff] %vm2613_vm5, %v2995_v59 }
 0x1f5   : > { %v2986_v7 = vpop.f32.mrf.mxu1 }
 0x1f6   : > { %v2608_v42 = vpop.f32.mrf.mxu3  ;;  %v2775_v60 = vld [vmem:[#allocation5 + $0x108] ss:$2 sm:$0xff]  ;;  %v2799_v33 = vld [vmem:[#allocation5 + $0x109] ss:$2 sm:$0xff]  ;;  %v2987_v18 = vadd.f32 %v5059_v24, %v2986_v7 }
 0x1f7   : > { %v2609_v26 = vadd.f32 %v4910_v45, %v2608_v42  ;;  %v2785_v23 = vmax.f32 %v2762_v61, %v2775_v60  ;;  %v2823_v40 = vld [vmem:[#allocation5 + $0x10a] ss:$2 sm:$0xff] }
 0x1f9   : > { %2700 = vst.msk [vmem:[#allocation5 + $0x181] sm:$0xff] %vm2613_vm5, %v2609_v26  ;;  %v2809_v57 = vmax.f32 %v2785_v23, %v2799_v33 }
 0x1fb   : > { %v2833_v0 = vmax.f32 %v2809_v57, %v2823_v40 }
 0x1fd   : > { %v2857_v13 = vmax.f32 %v2833_v0, %v2847_v55 }
 0x1fe   : > { %v2610_v2 = vpop.f32.mrf.mxu3 }
 0x1ff   : > { %v2881_v54 = vmax.f32 %v2857_v13, %v2871_v31  ;;  %v2611_v30 = vadd.f32 %v4910_v45, %v2610_v2 }
 0x201   : > { %v2905_v52 = vmax.f32 %v2881_v54, %v2895_v47  ;;  %2701 = vst.msk [vmem:[#allocation5 + $0x189] sm:$0xff] %vm2613_vm5, %v2611_v30 }
 0x203   : > { %v2994_v17 = vadd.f32 %v2982_v41, %v2905_v52 }
 0x205   : > { %3002 = vst.msk [vmem:[%s5077_s23 + $0x28] sm:$0xff] %vm2613_vm5, %v2994_v17 }
 0x208   : > { %v2851_v4 = vld [vmem:[#allocation5 + $0x180] ss:$2 sm:$0xff]  ;;  %v2875_v43 = vld [vmem:[#allocation5 + $0x181] ss:$2 sm:$0xff] }
 0x209   : > { %v2859_v12 = vmax.f32 %v2835_v15, %v2851_v4  ;;  %v2899_v10 = vld [vmem:[#allocation5 + $0x182] ss:$2 sm:$0xff] }
 0x20b   : > { %v2883_v45 = vmax.f32 %v2859_v12, %v2875_v43 }
 0x20d   : > { %v2907_v6 = vmax.f32 %v2883_v45, %v2899_v10 }
 0x20f   : > { %v2996_v29 = vadd.f32 %v2987_v18, %v2907_v6 }
 0x211   : > { %3004 = vst.msk [vmem:[%s5077_s23 + $0x38] sm:$0xff] %vm2613_vm5, %v2996_v29 }
 0x212 PF: > { %s17_s26 = sadd.s32 1, %s3453_s26   ;;  %s5145_s24 = smov %s3449_s25 }
 0x213   : > { %p14_p5 = scmp.ge.s32.totalorder %s17_s26, 4   ;;  %s5146_s25 = smov %s5148_s27 }
 0x215   :  { %16 = sbr.rel (!%p14_p5) target bundleno = 2 (0x2), region = 178 }

</bundles_post_ra>
